<compile_context>
chip_gen: v7x
topology: tpu7x:2x2x1
jax: 0.10.0
libtpu: 0.0.40
codegen_flags: <defaults>
</compile_context>

<pallas_src>
import functools
import math

import jax
import jax.numpy as jnp
from jax.experimental import pallas as pl
from jax.experimental.pallas import tpu as pltpu

# ----------------------------- hyperparameters ------------------------------
B = 2                 # batch
K = 8                 # number of nodes (hparams.K)
NATTR = 5             # attributes per node (fixed in the module)
N = K * NATTR         # sequence length = 40
IN_CH = 6             # hparams.in_ch
D = 32                # hparams.attn_dim
H = 4                 # hparams.n_head
DH = D // H           # head dim
HD = H * DH           # fused head width (= D)
N_LAYERS = 2          # hparams.n_layers
NUM_CLASSES = 6 * D   # num_embeds_ada_norm
FF_MULT = 4
FF = FF_MULT * D
EPS = 1e-5
NEG = -1e9
BF16 = jnp.bfloat16


# ------------------------------- kernel helpers ------------------------------
def _ln(x):
    """LayerNorm over last dim, no affine."""
    mu = jnp.mean(x, axis=-1, keepdims=True)
    xc = x - mu
    var = jnp.mean(xc * xc, axis=-1, keepdims=True)
    return xc * jax.lax.rsqrt(var + EPS)


# ------------------------------- fused Pallas kernel -------------------------
def fused_forward_kernel(x_ref, c_ref, masks_ref, pe_ref,
                         wemb_ref, bemb_ref,
                         adaw_ref, adab_ref,
                         wqkv_ref, wo_ref, bo_ref, ln4_ref,
                         w1_ref, b1_ref, w2_ref, b2_ref,
                         fadaw_ref, fadab_ref, wout_ref, bout_ref,
                         out_ref):
    # x_ref:     (1, N, IN_CH)            c_ref:   (1, 1, D) conditioning vector
    # masks_ref: (1, 3, N, N) additive    pe_ref:  (N, D)
    # per-layer stacks (leading axis = layer):
    #   adaw (L, D, 6D) bf16, adab (L, 1, 6D)
    #   wqkv (L, 3, D, 3*HD) bf16, wo (L, 3, HD, D) bf16, bo (L, 3, 1, D)
    #   ln4 (L, 2, D), w1 (L, D, 2*FF) bf16, b1 (L, 1, 2*FF), w2 (L, FF, D) bf16, b2 (L, 1, D)
    inv_sqrt_dh = 1.0 / math.sqrt(DH)

    # ---- x_embedding + positional embeddings ----
    x = x_ref[0]                                                    # (N, IN_CH)
    h = (jnp.dot(x.astype(BF16), wemb_ref[...],
                 preferred_element_type=jnp.float32)
         + bemb_ref[...] + pe_ref[...])                             # (N, D) f32

    c_bf = c_ref[0].astype(BF16)                                    # (1, D)

    # ---- AAB layers (static unroll) ----
    for l in range(N_LAYERS):
        # AdaLN modulation for all three attentions in one matmul -> (1, 6D)
        mod = (jnp.dot(c_bf, adaw_ref[l], preferred_element_type=jnp.float32)
               + adab_ref[l])

        for a in range(3):                                          # local -> global -> graph
            shift = mod[:, 2 * a * D:(2 * a + 1) * D]
            scale = mod[:, (2 * a + 1) * D:(2 * a + 2) * D]
            xn = _ln(h) * (1.0 + scale) + shift                     # (N, D)

            qkv = jnp.dot(xn.astype(BF16), wqkv_ref[l, a],
                          preferred_element_type=jnp.float32)       # (N, 3*HD)
            q_bf = (qkv[:, :HD] * inv_sqrt_dh).astype(BF16)
            k_bf = qkv[:, HD:2 * HD].astype(BF16)
            v_bf = qkv[:, 2 * HD:3 * HD].astype(BF16)
            mask = masks_ref[0, a]                                  # (N, N) additive

            heads = []
            for hh in range(H):
                sl = slice(hh * DH, (hh + 1) * DH)
                s = jax.lax.dot_general(q_bf[:, sl], k_bf[:, sl],
                                        (((1,), (1,)), ((), ())),
                                        preferred_element_type=jnp.float32)
                s = s + mask
                s = s - jnp.max(s, axis=-1, keepdims=True)
                p = jnp.exp(s)
                p = p * pl.reciprocal(jnp.sum(p, axis=-1, keepdims=True),
                                      approx=True)
                heads.append(jnp.dot(p.astype(BF16), v_bf[:, sl],
                                     preferred_element_type=jnp.float32))
            o_cat = jnp.concatenate(heads, axis=-1)                 # (N, HD)
            attn = (jnp.dot(o_cat.astype(BF16), wo_ref[l, a],
                            preferred_element_type=jnp.float32)
                    + bo_ref[l, a])
            h = h + attn

        # GEGLU feed-forward (value/gate fused into one wide matmul)
        ln4 = ln4_ref[l]
        xn = _ln(h) * ln4[0:1, :] + ln4[1:2, :]
        h12 = (jnp.dot(xn.astype(BF16), w1_ref[l],
                       preferred_element_type=jnp.float32) + b1_ref[l])
        # TODO(synk): diffusers GEGLU uses exact erf-GELU; tanh-approx used here.
        ff_h = h12[:, :FF] * jax.nn.gelu(h12[:, FF:])
        h = h + (jnp.dot(ff_h.astype(BF16), w2_ref[l],
                         preferred_element_type=jnp.float32) + b2_ref[l])

    # ---- final layer (modulated LN + projection to in_ch) ----
    msf = (jnp.dot(c_bf, fadaw_ref[...], preferred_element_type=jnp.float32)
           + fadab_ref[...])                                        # (1, 2D) [shift | scale]
    xn = _ln(h) * (1.0 + msf[:, D:]) + msf[:, :D]
    out_ref[0] = (jnp.dot(xn.astype(BF16), wout_ref[...],
                          preferred_element_type=jnp.float32) + bout_ref[...])


# ------------------------------ pallas wrapper --------------------------------
def _full_spec(shape):
    nd = len(shape)
    return pl.BlockSpec(shape, lambda i, nd=nd: (0,) * nd)


def fused_forward_call(x, c, masks, pe, p):
    in_specs = [
        pl.BlockSpec((1, N, IN_CH), lambda i: (i, 0, 0)),       # x
        pl.BlockSpec((1, 1, D), lambda i: (i, 0, 0)),           # conditioning c
        pl.BlockSpec((1, 3, N, N), lambda i: (i, 0, 0, 0)),     # additive masks
        _full_spec((N, D)),                                     # pe
        _full_spec((IN_CH, D)), _full_spec((1, D)),             # embed W, b
        _full_spec((N_LAYERS, D, 6 * D)),                       # ada_w
        _full_spec((N_LAYERS, 1, 6 * D)),                       # ada_b
        _full_spec((N_LAYERS, 3, D, 3 * HD)),                   # fused wqkv
        _full_spec((N_LAYERS, 3, HD, D)),                       # fused wo
        _full_spec((N_LAYERS, 3, 1, D)),                        # bo
        _full_spec((N_LAYERS, 2, D)),                           # ln4 gamma/beta
        _full_spec((N_LAYERS, D, 2 * FF)),                      # fused GEGLU w1
        _full_spec((N_LAYERS, 1, 2 * FF)),                      # fused GEGLU b1
        _full_spec((N_LAYERS, FF, D)),                          # w2
        _full_spec((N_LAYERS, 1, D)),                           # b2
        _full_spec((D, 2 * D)), _full_spec((1, 2 * D)),         # final ada W, b
        _full_spec((D, IN_CH)), _full_spec((1, IN_CH)),         # out proj W, b
    ]
    return pl.pallas_call(
        fused_forward_kernel,
        out_shape=jax.ShapeDtypeStruct((B, N, IN_CH), jnp.float32),
        grid=(B,),
        in_specs=in_specs,
        out_specs=pl.BlockSpec((1, N, IN_CH), lambda i: (i, 0, 0)),
        compiler_params=pltpu.CompilerParams(
            dimension_semantics=("parallel",)),   # v7x: batch rows across 2 TCs
    )(x, c, masks, pe,
      p['w_emb'], p['b_emb'],
      p['ada_w'], p['ada_b'],
      p['wqkv'], p['wo'], p['bo'], p['ln4'],
      p['w1'], p['b1'], p['w2'], p['b2'],
      p['final_ada_w'], p['final_ada_b'], p['w_out'], p['b_out'])


# -------------------------- params & host-side glue --------------------------
def init_params(key):
    def nrm(k, shape, s=0.02):
        return s * jax.random.normal(k, shape, jnp.float32)

    keys = iter(jax.random.split(key, 256))
    p = {}
    p['w_emb'] = nrm(next(keys), (IN_CH, D)).astype(BF16)
    p['b_emb'] = jnp.zeros((1, D), jnp.float32)
    p['pe_node'] = nrm(next(keys), (K, D))          # PEmbeder(K, attn_dim)
    p['pe_attr'] = nrm(next(keys), (NATTR, D))      # PEmbeder(5, attn_dim)
    # conditioning (timestep MLP + class embedding table) -- plain JAX glue
    p['wt1'] = nrm(next(keys), (D, D)); p['bt1'] = jnp.zeros((D,), jnp.float32)
    p['wt2'] = nrm(next(keys), (D, D)); p['bt2'] = jnp.zeros((D,), jnp.float32)
    p['class_emb'] = nrm(next(keys), (NUM_CLASSES, D))

    adaw_l, adab_l, wqkv_l, wo_l, bo_l = [], [], [], [], []
    ln4_l, w1_l, b1_l, w2_l, b2_l = [], [], [], [], []
    for _ in range(N_LAYERS):
        ada_w = nrm(next(keys), (3, D, 2 * D))                     # per-attn shift|scale
        ada_b = jnp.zeros((3, 2 * D), jnp.float32)
        adaw_l.append(jnp.transpose(ada_w, (1, 0, 2)).reshape(D, 6 * D))
        adab_l.append(ada_b.reshape(1, 6 * D))

        wq = nrm(next(keys), (3, H, D, DH))
        wk = nrm(next(keys), (3, H, D, DH))
        wv = nrm(next(keys), (3, H, D, DH))
        fuse_in = lambda w: jnp.transpose(w, (0, 2, 1, 3)).reshape(3, D, HD)
        wqkv_l.append(jnp.concatenate([fuse_in(wq), fuse_in(wk), fuse_in(wv)],
                                      axis=-1))                    # (3, D, 3*HD)
        wo = nrm(next(keys), (3, H, DH, D))
        wo_l.append(wo.reshape(3, HD, D))                          # heads stacked on rows
        bo_l.append(jnp.zeros((3, 1, D), jnp.float32))

        ln4_l.append(jnp.concatenate([jnp.ones((1, D), jnp.float32),
                                      jnp.zeros((1, D), jnp.float32)], axis=0))
        w1a = nrm(next(keys), (D, FF))                             # GEGLU value
        w1b = nrm(next(keys), (D, FF))                             # GEGLU gate
        w1_l.append(jnp.concatenate([w1a, w1b], axis=-1))          # (D, 2*FF)
        b1_l.append(jnp.zeros((1, 2 * FF), jnp.float32))
        w2_l.append(nrm(next(keys), (FF, D)))
        b2_l.append(jnp.zeros((1, D), jnp.float32))

    p['ada_w'] = jnp.stack(adaw_l).astype(BF16)
    p['ada_b'] = jnp.stack(adab_l)
    p['wqkv'] = jnp.stack(wqkv_l).astype(BF16)
    p['wo'] = jnp.stack(wo_l).astype(BF16)
    p['bo'] = jnp.stack(bo_l)
    p['ln4'] = jnp.stack(ln4_l)
    p['w1'] = jnp.stack(w1_l).astype(BF16)
    p['b1'] = jnp.stack(b1_l)
    p['w2'] = jnp.stack(w2_l).astype(BF16)
    p['b2'] = jnp.stack(b2_l)

    p['final_ada_w'] = nrm(next(keys), (D, 2 * D)).astype(BF16)
    p['final_ada_b'] = jnp.zeros((1, 2 * D), jnp.float32)
    p['w_out'] = nrm(next(keys), (D, IN_CH)).astype(BF16)
    p['b_out'] = jnp.zeros((1, IN_CH), jnp.float32)
    return p


def timestep_embedding(t, dim, max_period=10000.0):
    half = dim // 2
    freqs = jnp.exp(-math.log(max_period) * jnp.arange(half, dtype=jnp.float32) / half)
    args = t.astype(jnp.float32)[:, None] * freqs[None, :]
    return jnp.concatenate([jnp.cos(args), jnp.sin(args)], axis=-1)


def build_masks(pad_valid, graph_adj):
    """Additive masks (0 keep / -1e9 drop), shape (B, 3, N, N): local, global, graph."""
    idx_node = jnp.repeat(jnp.arange(K), NATTR)                  # (N,)
    same_node = idx_node[:, None] == idx_node[None, :]           # (N, N)
    local = jnp.broadcast_to(same_node[None], (B, N, N))
    glob = jnp.broadcast_to(pad_valid[:, None, :], (B, N, N))
    graph_tok = graph_adj[:, idx_node][:, :, idx_node]           # (B, N, N)
    allowed = jnp.stack([local, glob, graph_tok.astype(bool)], axis=1)
    return jnp.where(allowed, 0.0, NEG).astype(jnp.float32)


def aab_model_forward(params, x, cat, timesteps, pad_valid, graph_adj):
    # positional embeddings (static index pattern from the reference forward)
    idx_attr = jnp.tile(jnp.arange(NATTR), K)
    idx_node = jnp.repeat(jnp.arange(K), NATTR)
    pe = params['pe_node'][idx_node] + params['pe_attr'][idx_attr]    # (N, D)

    # conditioning embedding (tiny; plain JAX glue, runs once before the kernel)
    t_freq = timestep_embedding(timesteps, D)
    t_emb = jax.nn.silu(t_freq @ params['wt1'] + params['bt1']) @ params['wt2'] + params['bt2']
    c = jax.nn.silu(t_emb + params['class_emb'][cat])                 # (B, D)

    masks = build_masks(pad_valid, graph_adj)                         # (B, 3, N, N)

    # single fused Pallas kernel: embed + N_LAYERS x AAB + final projection
    return fused_forward_call(x, c[:, None, :], masks, pe, params)    # (B, N, IN_CH)


# ------------------------------------ main -----------------------------------
if __name__ == "__main__":
    key = jax.random.PRNGKey(0)
    kx, kt, kc, kg = jax.random.split(key, 4)

    x = jax.random.normal(kx, (B, N, IN_CH), jnp.float32)
    timesteps = jax.random.randint(kt, (B,), 0, 1000)
    cat = jax.random.randint(kc, (B,), 0, NUM_CLASSES)
    # padding mask: True = valid token; mark the last node of sample 1 as padded
    pad_valid = jnp.ones((B, N), dtype=bool).at[1, -NATTR:].set(False)
    # node-level graph adjacency (symmetric, with self-loops)
    adj = jax.random.bernoulli(kg, 0.4, (B, K, K))
    adj = adj | adj.transpose(0, 2, 1) | jnp.eye(K, dtype=bool)[None]

    params = init_params(jax.random.PRNGKey(1))

    fwd = jax.jit(functools.partial(aab_model_forward, params))
    out = fwd(x, cat, timesteps, pad_valid, adj)
    jax.block_until_ready(out)
    assert out.shape == (B, N, IN_CH) and out.dtype == jnp.float32
    print("KERNEL_OK")
</pallas_src>

<mosaic_0001>
module attributes {stable_mosaic.version = 11 : i64} {
  func.func @fused_forward_kernel(%arg0: i32, %arg1: memref<1x40x6xf32, #tpu.memory_space<vmem>>, %arg2: memref<1x1x32xf32, #tpu.memory_space<vmem>>, %arg3: memref<1x3x40x40xf32, #tpu.memory_space<vmem>>, %arg4: memref<40x32xf32, #tpu.memory_space<vmem>>, %arg5: memref<6x32xbf16, #tpu.memory_space<vmem>>, %arg6: memref<1x32xf32, #tpu.memory_space<vmem>>, %arg7: memref<2x32x192xbf16, #tpu.memory_space<vmem>>, %arg8: memref<2x1x192xf32, #tpu.memory_space<vmem>>, %arg9: memref<2x3x32x96xbf16, #tpu.memory_space<vmem>>, %arg10: memref<2x3x32x32xbf16, #tpu.memory_space<vmem>>, %arg11: memref<2x3x1x32xf32, #tpu.memory_space<vmem>>, %arg12: memref<2x2x32xf32, #tpu.memory_space<vmem>>, %arg13: memref<2x32x256xbf16, #tpu.memory_space<vmem>>, %arg14: memref<2x1x256xf32, #tpu.memory_space<vmem>>, %arg15: memref<2x128x32xbf16, #tpu.memory_space<vmem>>, %arg16: memref<2x1x32xf32, #tpu.memory_space<vmem>>, %arg17: memref<32x64xbf16, #tpu.memory_space<vmem>>, %arg18: memref<1x64xf32, #tpu.memory_space<vmem>>, %arg19: memref<32x6xbf16, #tpu.memory_space<vmem>>, %arg20: memref<1x6xf32, #tpu.memory_space<vmem>>, %arg21: memref<1x40x6xf32, #tpu.memory_space<vmem>>) attributes {dimension_semantics = [#tpu.dimension_semantics<parallel>], iteration_bounds = array<i64: 2>, scalar_prefetch = 0 : i64, scratch_operands = 0 : i64, tpu.core_type = #tpu.core_type<tc>, window_params = [{transform_indices = @transform_0, window_bounds = array<i64: 1, 40, 6>}, {transform_indices = @transform_1, window_bounds = array<i64: 1, 1, 32>}, {transform_indices = @transform_2, window_bounds = array<i64: 1, 3, 40, 40>}, {pipeline_mode = #tpu.pipeline_mode<synchronous>, transform_indices = @transform_3, window_bounds = array<i64: 40, 32>}, {pipeline_mode = #tpu.pipeline_mode<synchronous>, transform_indices = @transform_4, window_bounds = array<i64: 6, 32>}, {pipeline_mode = #tpu.pipeline_mode<synchronous>, transform_indices = @transform_5, window_bounds = array<i64: 1, 32>}, {pipeline_mode = #tpu.pipeline_mode<synchronous>, transform_indices = @transform_6, window_bounds = array<i64: 2, 32, 192>}, {pipeline_mode = #tpu.pipeline_mode<synchronous>, transform_indices = @transform_7, window_bounds = array<i64: 2, 1, 192>}, {pipeline_mode = #tpu.pipeline_mode<synchronous>, transform_indices = @transform_8, window_bounds = array<i64: 2, 3, 32, 96>}, {pipeline_mode = #tpu.pipeline_mode<synchronous>, transform_indices = @transform_9, window_bounds = array<i64: 2, 3, 32, 32>}, {pipeline_mode = #tpu.pipeline_mode<synchronous>, transform_indices = @transform_10, window_bounds = array<i64: 2, 3, 1, 32>}, {pipeline_mode = #tpu.pipeline_mode<synchronous>, transform_indices = @transform_11, window_bounds = array<i64: 2, 2, 32>}, {pipeline_mode = #tpu.pipeline_mode<synchronous>, transform_indices = @transform_12, window_bounds = array<i64: 2, 32, 256>}, {pipeline_mode = #tpu.pipeline_mode<synchronous>, transform_indices = @transform_13, window_bounds = array<i64: 2, 1, 256>}, {pipeline_mode = #tpu.pipeline_mode<synchronous>, transform_indices = @transform_14, window_bounds = array<i64: 2, 128, 32>}, {pipeline_mode = #tpu.pipeline_mode<synchronous>, transform_indices = @transform_15, window_bounds = array<i64: 2, 1, 32>}, {pipeline_mode = #tpu.pipeline_mode<synchronous>, transform_indices = @transform_16, window_bounds = array<i64: 32, 64>}, {pipeline_mode = #tpu.pipeline_mode<synchronous>, transform_indices = @transform_17, window_bounds = array<i64: 1, 64>}, {pipeline_mode = #tpu.pipeline_mode<synchronous>, transform_indices = @transform_18, window_bounds = array<i64: 32, 6>}, {pipeline_mode = #tpu.pipeline_mode<synchronous>, transform_indices = @transform_19, window_bounds = array<i64: 1, 6>}, {transform_indices = @transform_20, window_bounds = array<i64: 1, 40, 6>}]} {
    %c0 = arith.constant 0 : index
    %c0_0 = arith.constant 0 : index
    %c0_1 = arith.constant 0 : index
    %0 = vector.load %arg1[%c0, %c0_0, %c0_1] : memref<1x40x6xf32, #tpu.memory_space<vmem>>, vector<1x40x6xf32>
    %1 = vector.shape_cast %0 : vector<1x40x6xf32> to vector<40x6xf32>
    %2 = arith.truncf %1 : vector<40x6xf32> to vector<40x6xbf16>
    %c0_2 = arith.constant 0 : index
    %c0_3 = arith.constant 0 : index
    %3 = vector.load %arg5[%c0_2, %c0_3] : memref<6x32xbf16, #tpu.memory_space<vmem>>, vector<6x32xbf16>
    %cst = arith.constant dense<0.000000e+00> : vector<40x32xf32>
    %4 = tpu.matmul %2, %3, %cst {dimension_numbers = #tpu.dot_dimension_numbers<[1], [0], [0], [1], [0, 0, 1, 1], [], []>} : vector<40x6xbf16>, vector<6x32xbf16>, vector<40x32xf32> -> vector<40x32xf32>
    %c0_4 = arith.constant 0 : index
    %c0_5 = arith.constant 0 : index
    %5 = vector.load %arg6[%c0_4, %c0_5] : memref<1x32xf32, #tpu.memory_space<vmem>>, vector<1x32xf32>
    %6 = vector.broadcast %5 : vector<1x32xf32> to vector<40x32xf32>
    %7 = arith.addf %4, %6 : vector<40x32xf32>
    %c0_6 = arith.constant 0 : index
    %c0_7 = arith.constant 0 : index
    %8 = vector.load %arg4[%c0_6, %c0_7] : memref<40x32xf32, #tpu.memory_space<vmem>>, vector<40x32xf32>
    %9 = arith.addf %7, %8 : vector<40x32xf32>
    %c0_8 = arith.constant 0 : index
    %c0_9 = arith.constant 0 : index
    %c0_10 = arith.constant 0 : index
    %10 = vector.load %arg2[%c0_8, %c0_9, %c0_10] : memref<1x1x32xf32, #tpu.memory_space<vmem>>, vector<1x1x32xf32>
    %11 = vector.shape_cast %10 : vector<1x1x32xf32> to vector<1x32xf32>
    %12 = arith.truncf %11 : vector<1x32xf32> to vector<1x32xbf16>
    %c0_11 = arith.constant 0 : index
    %c0_12 = arith.constant 0 : index
    %c0_13 = arith.constant 0 : index
    %13 = vector.load %arg7[%c0_11, %c0_12, %c0_13] : memref<2x32x192xbf16, #tpu.memory_space<vmem>>, vector<1x32x192xbf16>
    %14 = vector.shape_cast %13 : vector<1x32x192xbf16> to vector<32x192xbf16>
    %cst_14 = arith.constant dense<0.000000e+00> : vector<1x192xf32>
    %15 = tpu.matmul %12, %14, %cst_14 {dimension_numbers = #tpu.dot_dimension_numbers<[1], [0], [0], [1], [0, 0, 1, 1], [], []>} : vector<1x32xbf16>, vector<32x192xbf16>, vector<1x192xf32> -> vector<1x192xf32>
    %c0_15 = arith.constant 0 : index
    %c0_16 = arith.constant 0 : index
    %c0_17 = arith.constant 0 : index
    %16 = vector.load %arg8[%c0_15, %c0_16, %c0_17] : memref<2x1x192xf32, #tpu.memory_space<vmem>>, vector<1x1x192xf32>
    %17 = vector.shape_cast %16 : vector<1x1x192xf32> to vector<1x192xf32>
    %18 = arith.addf %15, %17 : vector<1x192xf32>
    %19 = vector.extract_strided_slice %18 {offsets = [0, 0], sizes = [1, 32], strides = [1, 1]} : vector<1x192xf32> to vector<1x32xf32>
    %20 = vector.extract_strided_slice %18 {offsets = [0, 32], sizes = [1, 32], strides = [1, 1]} : vector<1x192xf32> to vector<1x32xf32>
    %cst_18 = arith.constant dense<0.000000e+00> : vector<40xf32>
    %21 = vector.multi_reduction <add>, %9, %cst_18 [1] : vector<40x32xf32> to vector<40xf32>
    %22 = vector.shape_cast %21 : vector<40xf32> to vector<40x1xf32>
    %cst_19 = arith.constant 3.200000e+01 : f32
    %23 = vector.broadcast %cst_19 : f32 to vector<40x1xf32>
    %24 = arith.divf %22, %23 : vector<40x1xf32>
    %25 = vector.broadcast %24 : vector<40x1xf32> to vector<40x32xf32>
    %26 = arith.subf %9, %25 : vector<40x32xf32>
    %27 = arith.mulf %26, %26 : vector<40x32xf32>
    %cst_20 = arith.constant dense<0.000000e+00> : vector<40xf32>
    %28 = vector.multi_reduction <add>, %27, %cst_20 [1] : vector<40x32xf32> to vector<40xf32>
    %29 = vector.shape_cast %28 : vector<40xf32> to vector<40x1xf32>
    %cst_21 = arith.constant 3.200000e+01 : f32
    %30 = vector.broadcast %cst_21 : f32 to vector<40x1xf32>
    %31 = arith.divf %29, %30 : vector<40x1xf32>
    %cst_22 = arith.constant 9.99999974E-6 : f32
    %32 = vector.broadcast %cst_22 : f32 to vector<40x1xf32>
    %33 = arith.addf %31, %32 : vector<40x1xf32>
    %34 = math.rsqrt %33 : vector<40x1xf32>
    %35 = vector.broadcast %34 : vector<40x1xf32> to vector<40x32xf32>
    %36 = arith.mulf %26, %35 : vector<40x32xf32>
    %cst_23 = arith.constant 1.000000e+00 : f32
    %37 = vector.broadcast %cst_23 : f32 to vector<1x32xf32>
    %38 = arith.addf %37, %20 : vector<1x32xf32>
    %39 = vector.broadcast %38 : vector<1x32xf32> to vector<40x32xf32>
    %40 = arith.mulf %36, %39 : vector<40x32xf32>
    %41 = vector.broadcast %19 : vector<1x32xf32> to vector<40x32xf32>
    %42 = arith.addf %40, %41 : vector<40x32xf32>
    %43 = arith.truncf %42 : vector<40x32xf32> to vector<40x32xbf16>
    %c0_24 = arith.constant 0 : index
    %c0_25 = arith.constant 0 : index
    %c0_26 = arith.constant 0 : index
    %c0_27 = arith.constant 0 : index
    %44 = vector.load %arg9[%c0_24, %c0_25, %c0_26, %c0_27] : memref<2x3x32x96xbf16, #tpu.memory_space<vmem>>, vector<1x1x32x96xbf16>
    %45 = vector.shape_cast %44 : vector<1x1x32x96xbf16> to vector<32x96xbf16>
    %cst_28 = arith.constant dense<0.000000e+00> : vector<40x96xf32>
    %46 = tpu.matmul %43, %45, %cst_28 {dimension_numbers = #tpu.dot_dimension_numbers<[1], [0], [0], [1], [0, 0, 1, 1], [], []>} : vector<40x32xbf16>, vector<32x96xbf16>, vector<40x96xf32> -> vector<40x96xf32>
    %47 = vector.extract_strided_slice %46 {offsets = [0, 0], sizes = [40, 32], strides = [1, 1]} : vector<40x96xf32> to vector<40x32xf32>
    %cst_29 = arith.constant 0.353553385 : f32
    %48 = vector.broadcast %cst_29 : f32 to vector<40x32xf32>
    %49 = arith.mulf %47, %48 : vector<40x32xf32>
    %50 = arith.truncf %49 : vector<40x32xf32> to vector<40x32xbf16>
    %51 = vector.extract_strided_slice %46 {offsets = [0, 32], sizes = [40, 32], strides = [1, 1]} : vector<40x96xf32> to vector<40x32xf32>
    %52 = arith.truncf %51 : vector<40x32xf32> to vector<40x32xbf16>
    %53 = vector.extract_strided_slice %46 {offsets = [0, 64], sizes = [40, 32], strides = [1, 1]} : vector<40x96xf32> to vector<40x32xf32>
    %54 = arith.truncf %53 : vector<40x32xf32> to vector<40x32xbf16>
    %c0_30 = arith.constant 0 : index
    %c0_31 = arith.constant 0 : index
    %c0_32 = arith.constant 0 : index
    %c0_33 = arith.constant 0 : index
    %55 = vector.load %arg3[%c0_30, %c0_31, %c0_32, %c0_33] : memref<1x3x40x40xf32, #tpu.memory_space<vmem>>, vector<1x1x40x40xf32>
    %56 = vector.shape_cast %55 : vector<1x1x40x40xf32> to vector<40x40xf32>
    %57 = vector.extract_strided_slice %50 {offsets = [0, 0], sizes = [40, 8], strides = [1, 1]} : vector<40x32xbf16> to vector<40x8xbf16>
    %58 = vector.extract_strided_slice %52 {offsets = [0, 0], sizes = [40, 8], strides = [1, 1]} : vector<40x32xbf16> to vector<40x8xbf16>
    %cst_34 = arith.constant dense<0.000000e+00> : vector<40x40xf32>
    %59 = tpu.matmul %57, %58, %cst_34 {dimension_numbers = #tpu.dot_dimension_numbers<[1], [1], [0], [0], [0, 0, 1, 0], [], []>} : vector<40x8xbf16>, vector<40x8xbf16>, vector<40x40xf32> -> vector<40x40xf32>
    %60 = arith.addf %59, %56 : vector<40x40xf32>
    %cst_35 = arith.constant dense<0xFF800000> : vector<40xf32>
    %61 = vector.multi_reduction <maximumf>, %60, %cst_35 [1] : vector<40x40xf32> to vector<40xf32>
    %62 = vector.shape_cast %61 : vector<40xf32> to vector<40x1xf32>
    %63 = vector.broadcast %62 : vector<40x1xf32> to vector<40x40xf32>
    %64 = arith.subf %60, %63 : vector<40x40xf32>
    %65 = math.exp %64 : vector<40x40xf32>
    %cst_36 = arith.constant dense<0.000000e+00> : vector<40xf32>
    %66 = vector.multi_reduction <add>, %65, %cst_36 [1] : vector<40x40xf32> to vector<40xf32>
    %67 = vector.shape_cast %66 : vector<40xf32> to vector<40x1xf32>
    %68 = tpu.reciprocal %67 {approx = true} : vector<40x1xf32> -> vector<40x1xf32>
    %69 = vector.broadcast %68 : vector<40x1xf32> to vector<40x40xf32>
    %70 = arith.mulf %65, %69 : vector<40x40xf32>
    %71 = arith.truncf %70 : vector<40x40xf32> to vector<40x40xbf16>
    %72 = vector.extract_strided_slice %54 {offsets = [0, 0], sizes = [40, 8], strides = [1, 1]} : vector<40x32xbf16> to vector<40x8xbf16>
    %cst_37 = arith.constant dense<0.000000e+00> : vector<40x8xf32>
    %73 = tpu.matmul %71, %72, %cst_37 {dimension_numbers = #tpu.dot_dimension_numbers<[1], [0], [0], [1], [0, 0, 1, 1], [], []>} : vector<40x40xbf16>, vector<40x8xbf16>, vector<40x8xf32> -> vector<40x8xf32>
    %74 = vector.extract_strided_slice %50 {offsets = [0, 8], sizes = [40, 8], strides = [1, 1]} : vector<40x32xbf16> to vector<40x8xbf16>
    %75 = vector.extract_strided_slice %52 {offsets = [0, 8], sizes = [40, 8], strides = [1, 1]} : vector<40x32xbf16> to vector<40x8xbf16>
    %cst_38 = arith.constant dense<0.000000e+00> : vector<40x40xf32>
    %76 = tpu.matmul %74, %75, %cst_38 {dimension_numbers = #tpu.dot_dimension_numbers<[1], [1], [0], [0], [0, 0, 1, 0], [], []>} : vector<40x8xbf16>, vector<40x8xbf16>, vector<40x40xf32> -> vector<40x40xf32>
    %77 = arith.addf %76, %56 : vector<40x40xf32>
    %cst_39 = arith.constant dense<0xFF800000> : vector<40xf32>
    %78 = vector.multi_reduction <maximumf>, %77, %cst_39 [1] : vector<40x40xf32> to vector<40xf32>
    %79 = vector.shape_cast %78 : vector<40xf32> to vector<40x1xf32>
    %80 = vector.broadcast %79 : vector<40x1xf32> to vector<40x40xf32>
    %81 = arith.subf %77, %80 : vector<40x40xf32>
    %82 = math.exp %81 : vector<40x40xf32>
    %cst_40 = arith.constant dense<0.000000e+00> : vector<40xf32>
    %83 = vector.multi_reduction <add>, %82, %cst_40 [1] : vector<40x40xf32> to vector<40xf32>
    %84 = vector.shape_cast %83 : vector<40xf32> to vector<40x1xf32>
    %85 = tpu.reciprocal %84 {approx = true} : vector<40x1xf32> -> vector<40x1xf32>
    %86 = vector.broadcast %85 : vector<40x1xf32> to vector<40x40xf32>
    %87 = arith.mulf %82, %86 : vector<40x40xf32>
    %88 = arith.truncf %87 : vector<40x40xf32> to vector<40x40xbf16>
    %89 = vector.extract_strided_slice %54 {offsets = [0, 8], sizes = [40, 8], strides = [1, 1]} : vector<40x32xbf16> to vector<40x8xbf16>
    %cst_41 = arith.constant dense<0.000000e+00> : vector<40x8xf32>
    %90 = tpu.matmul %88, %89, %cst_41 {dimension_numbers = #tpu.dot_dimension_numbers<[1], [0], [0], [1], [0, 0, 1, 1], [], []>} : vector<40x40xbf16>, vector<40x8xbf16>, vector<40x8xf32> -> vector<40x8xf32>
    %91 = vector.extract_strided_slice %50 {offsets = [0, 16], sizes = [40, 8], strides = [1, 1]} : vector<40x32xbf16> to vector<40x8xbf16>
    %92 = vector.extract_strided_slice %52 {offsets = [0, 16], sizes = [40, 8], strides = [1, 1]} : vector<40x32xbf16> to vector<40x8xbf16>
    %cst_42 = arith.constant dense<0.000000e+00> : vector<40x40xf32>
    %93 = tpu.matmul %91, %92, %cst_42 {dimension_numbers = #tpu.dot_dimension_numbers<[1], [1], [0], [0], [0, 0, 1, 0], [], []>} : vector<40x8xbf16>, vector<40x8xbf16>, vector<40x40xf32> -> vector<40x40xf32>
    %94 = arith.addf %93, %56 : vector<40x40xf32>
    %cst_43 = arith.constant dense<0xFF800000> : vector<40xf32>
    %95 = vector.multi_reduction <maximumf>, %94, %cst_43 [1] : vector<40x40xf32> to vector<40xf32>
    %96 = vector.shape_cast %95 : vector<40xf32> to vector<40x1xf32>
    %97 = vector.broadcast %96 : vector<40x1xf32> to vector<40x40xf32>
    %98 = arith.subf %94, %97 : vector<40x40xf32>
    %99 = math.exp %98 : vector<40x40xf32>
    %cst_44 = arith.constant dense<0.000000e+00> : vector<40xf32>
    %100 = vector.multi_reduction <add>, %99, %cst_44 [1] : vector<40x40xf32> to vector<40xf32>
    %101 = vector.shape_cast %100 : vector<40xf32> to vector<40x1xf32>
    %102 = tpu.reciprocal %101 {approx = true} : vector<40x1xf32> -> vector<40x1xf32>
    %103 = vector.broadcast %102 : vector<40x1xf32> to vector<40x40xf32>
    %104 = arith.mulf %99, %103 : vector<40x40xf32>
    %105 = arith.truncf %104 : vector<40x40xf32> to vector<40x40xbf16>
    %106 = vector.extract_strided_slice %54 {offsets = [0, 16], sizes = [40, 8], strides = [1, 1]} : vector<40x32xbf16> to vector<40x8xbf16>
    %cst_45 = arith.constant dense<0.000000e+00> : vector<40x8xf32>
    %107 = tpu.matmul %105, %106, %cst_45 {dimension_numbers = #tpu.dot_dimension_numbers<[1], [0], [0], [1], [0, 0, 1, 1], [], []>} : vector<40x40xbf16>, vector<40x8xbf16>, vector<40x8xf32> -> vector<40x8xf32>
    %108 = vector.extract_strided_slice %50 {offsets = [0, 24], sizes = [40, 8], strides = [1, 1]} : vector<40x32xbf16> to vector<40x8xbf16>
    %109 = vector.extract_strided_slice %52 {offsets = [0, 24], sizes = [40, 8], strides = [1, 1]} : vector<40x32xbf16> to vector<40x8xbf16>
    %cst_46 = arith.constant dense<0.000000e+00> : vector<40x40xf32>
    %110 = tpu.matmul %108, %109, %cst_46 {dimension_numbers = #tpu.dot_dimension_numbers<[1], [1], [0], [0], [0, 0, 1, 0], [], []>} : vector<40x8xbf16>, vector<40x8xbf16>, vector<40x40xf32> -> vector<40x40xf32>
    %111 = arith.addf %110, %56 : vector<40x40xf32>
    %cst_47 = arith.constant dense<0xFF800000> : vector<40xf32>
    %112 = vector.multi_reduction <maximumf>, %111, %cst_47 [1] : vector<40x40xf32> to vector<40xf32>
    %113 = vector.shape_cast %112 : vector<40xf32> to vector<40x1xf32>
    %114 = vector.broadcast %113 : vector<40x1xf32> to vector<40x40xf32>
    %115 = arith.subf %111, %114 : vector<40x40xf32>
    %116 = math.exp %115 : vector<40x40xf32>
    %cst_48 = arith.constant dense<0.000000e+00> : vector<40xf32>
    %117 = vector.multi_reduction <add>, %116, %cst_48 [1] : vector<40x40xf32> to vector<40xf32>
    %118 = vector.shape_cast %117 : vector<40xf32> to vector<40x1xf32>
    %119 = tpu.reciprocal %118 {approx = true} : vector<40x1xf32> -> vector<40x1xf32>
    %120 = vector.broadcast %119 : vector<40x1xf32> to vector<40x40xf32>
    %121 = arith.mulf %116, %120 : vector<40x40xf32>
    %122 = arith.truncf %121 : vector<40x40xf32> to vector<40x40xbf16>
    %123 = vector.extract_strided_slice %54 {offsets = [0, 24], sizes = [40, 8], strides = [1, 1]} : vector<40x32xbf16> to vector<40x8xbf16>
    %cst_49 = arith.constant dense<0.000000e+00> : vector<40x8xf32>
    %124 = tpu.matmul %122, %123, %cst_49 {dimension_numbers = #tpu.dot_dimension_numbers<[1], [0], [0], [1], [0, 0, 1, 1], [], []>} : vector<40x40xbf16>, vector<40x8xbf16>, vector<40x8xf32> -> vector<40x8xf32>
    %125 = tpu.concatenate %73, %90, %107, %124 in 1 : vector<40x8xf32>, vector<40x8xf32>, vector<40x8xf32>, vector<40x8xf32> -> vector<40x32xf32>
    %126 = arith.truncf %125 : vector<40x32xf32> to vector<40x32xbf16>
    %c0_50 = arith.constant 0 : index
    %c0_51 = arith.constant 0 : index
    %c0_52 = arith.constant 0 : index
    %c0_53 = arith.constant 0 : index
    %127 = vector.load %arg10[%c0_50, %c0_51, %c0_52, %c0_53] : memref<2x3x32x32xbf16, #tpu.memory_space<vmem>>, vector<1x1x32x32xbf16>
    %128 = vector.shape_cast %127 : vector<1x1x32x32xbf16> to vector<32x32xbf16>
    %cst_54 = arith.constant dense<0.000000e+00> : vector<40x32xf32>
    %129 = tpu.matmul %126, %128, %cst_54 {dimension_numbers = #tpu.dot_dimension_numbers<[1], [0], [0], [1], [0, 0, 1, 1], [], []>} : vector<40x32xbf16>, vector<32x32xbf16>, vector<40x32xf32> -> vector<40x32xf32>
    %c0_55 = arith.constant 0 : index
    %c0_56 = arith.constant 0 : index
    %c0_57 = arith.constant 0 : index
    %c0_58 = arith.constant 0 : index
    %130 = vector.load %arg11[%c0_55, %c0_56, %c0_57, %c0_58] : memref<2x3x1x32xf32, #tpu.memory_space<vmem>>, vector<1x1x1x32xf32>
    %131 = vector.shape_cast %130 : vector<1x1x1x32xf32> to vector<1x32xf32>
    %132 = vector.broadcast %131 : vector<1x32xf32> to vector<40x32xf32>
    %133 = arith.addf %129, %132 : vector<40x32xf32>
    %134 = arith.addf %9, %133 : vector<40x32xf32>
    %135 = vector.extract_strided_slice %18 {offsets = [0, 64], sizes = [1, 32], strides = [1, 1]} : vector<1x192xf32> to vector<1x32xf32>
    %136 = vector.extract_strided_slice %18 {offsets = [0, 96], sizes = [1, 32], strides = [1, 1]} : vector<1x192xf32> to vector<1x32xf32>
    %cst_59 = arith.constant dense<0.000000e+00> : vector<40xf32>
    %137 = vector.multi_reduction <add>, %134, %cst_59 [1] : vector<40x32xf32> to vector<40xf32>
    %138 = vector.shape_cast %137 : vector<40xf32> to vector<40x1xf32>
    %cst_60 = arith.constant 3.200000e+01 : f32
    %139 = vector.broadcast %cst_60 : f32 to vector<40x1xf32>
    %140 = arith.divf %138, %139 : vector<40x1xf32>
    %141 = vector.broadcast %140 : vector<40x1xf32> to vector<40x32xf32>
    %142 = arith.subf %134, %141 : vector<40x32xf32>
    %143 = arith.mulf %142, %142 : vector<40x32xf32>
    %cst_61 = arith.constant dense<0.000000e+00> : vector<40xf32>
    %144 = vector.multi_reduction <add>, %143, %cst_61 [1] : vector<40x32xf32> to vector<40xf32>
    %145 = vector.shape_cast %144 : vector<40xf32> to vector<40x1xf32>
    %cst_62 = arith.constant 3.200000e+01 : f32
    %146 = vector.broadcast %cst_62 : f32 to vector<40x1xf32>
    %147 = arith.divf %145, %146 : vector<40x1xf32>
    %cst_63 = arith.constant 9.99999974E-6 : f32
    %148 = vector.broadcast %cst_63 : f32 to vector<40x1xf32>
    %149 = arith.addf %147, %148 : vector<40x1xf32>
    %150 = math.rsqrt %149 : vector<40x1xf32>
    %151 = vector.broadcast %150 : vector<40x1xf32> to vector<40x32xf32>
    %152 = arith.mulf %142, %151 : vector<40x32xf32>
    %cst_64 = arith.constant 1.000000e+00 : f32
    %153 = vector.broadcast %cst_64 : f32 to vector<1x32xf32>
    %154 = arith.addf %153, %136 : vector<1x32xf32>
    %155 = vector.broadcast %154 : vector<1x32xf32> to vector<40x32xf32>
    %156 = arith.mulf %152, %155 : vector<40x32xf32>
    %157 = vector.broadcast %135 : vector<1x32xf32> to vector<40x32xf32>
    %158 = arith.addf %156, %157 : vector<40x32xf32>
    %159 = arith.truncf %158 : vector<40x32xf32> to vector<40x32xbf16>
    %c0_65 = arith.constant 0 : index
    %c1 = arith.constant 1 : index
    %c0_66 = arith.constant 0 : index
    %c0_67 = arith.constant 0 : index
    %160 = vector.load %arg9[%c0_65, %c1, %c0_66, %c0_67] : memref<2x3x32x96xbf16, #tpu.memory_space<vmem>>, vector<1x1x32x96xbf16>
    %161 = vector.shape_cast %160 : vector<1x1x32x96xbf16> to vector<32x96xbf16>
    %cst_68 = arith.constant dense<0.000000e+00> : vector<40x96xf32>
    %162 = tpu.matmul %159, %161, %cst_68 {dimension_numbers = #tpu.dot_dimension_numbers<[1], [0], [0], [1], [0, 0, 1, 1], [], []>} : vector<40x32xbf16>, vector<32x96xbf16>, vector<40x96xf32> -> vector<40x96xf32>
    %163 = vector.extract_strided_slice %162 {offsets = [0, 0], sizes = [40, 32], strides = [1, 1]} : vector<40x96xf32> to vector<40x32xf32>
    %cst_69 = arith.constant 0.353553385 : f32
    %164 = vector.broadcast %cst_69 : f32 to vector<40x32xf32>
    %165 = arith.mulf %163, %164 : vector<40x32xf32>
    %166 = arith.truncf %165 : vector<40x32xf32> to vector<40x32xbf16>
    %167 = vector.extract_strided_slice %162 {offsets = [0, 32], sizes = [40, 32], strides = [1, 1]} : vector<40x96xf32> to vector<40x32xf32>
    %168 = arith.truncf %167 : vector<40x32xf32> to vector<40x32xbf16>
    %169 = vector.extract_strided_slice %162 {offsets = [0, 64], sizes = [40, 32], strides = [1, 1]} : vector<40x96xf32> to vector<40x32xf32>
    %170 = arith.truncf %169 : vector<40x32xf32> to vector<40x32xbf16>
    %c0_70 = arith.constant 0 : index
    %c1_71 = arith.constant 1 : index
    %c0_72 = arith.constant 0 : index
    %c0_73 = arith.constant 0 : index
    %171 = vector.load %arg3[%c0_70, %c1_71, %c0_72, %c0_73] : memref<1x3x40x40xf32, #tpu.memory_space<vmem>>, vector<1x1x40x40xf32>
    %172 = vector.shape_cast %171 : vector<1x1x40x40xf32> to vector<40x40xf32>
    %173 = vector.extract_strided_slice %166 {offsets = [0, 0], sizes = [40, 8], strides = [1, 1]} : vector<40x32xbf16> to vector<40x8xbf16>
    %174 = vector.extract_strided_slice %168 {offsets = [0, 0], sizes = [40, 8], strides = [1, 1]} : vector<40x32xbf16> to vector<40x8xbf16>
    %cst_74 = arith.constant dense<0.000000e+00> : vector<40x40xf32>
    %175 = tpu.matmul %173, %174, %cst_74 {dimension_numbers = #tpu.dot_dimension_numbers<[1], [1], [0], [0], [0, 0, 1, 0], [], []>} : vector<40x8xbf16>, vector<40x8xbf16>, vector<40x40xf32> -> vector<40x40xf32>
    %176 = arith.addf %175, %172 : vector<40x40xf32>
    %cst_75 = arith.constant dense<0xFF800000> : vector<40xf32>
    %177 = vector.multi_reduction <maximumf>, %176, %cst_75 [1] : vector<40x40xf32> to vector<40xf32>
    %178 = vector.shape_cast %177 : vector<40xf32> to vector<40x1xf32>
    %179 = vector.broadcast %178 : vector<40x1xf32> to vector<40x40xf32>
    %180 = arith.subf %176, %179 : vector<40x40xf32>
    %181 = math.exp %180 : vector<40x40xf32>
    %cst_76 = arith.constant dense<0.000000e+00> : vector<40xf32>
    %182 = vector.multi_reduction <add>, %181, %cst_76 [1] : vector<40x40xf32> to vector<40xf32>
    %183 = vector.shape_cast %182 : vector<40xf32> to vector<40x1xf32>
    %184 = tpu.reciprocal %183 {approx = true} : vector<40x1xf32> -> vector<40x1xf32>
    %185 = vector.broadcast %184 : vector<40x1xf32> to vector<40x40xf32>
    %186 = arith.mulf %181, %185 : vector<40x40xf32>
    %187 = arith.truncf %186 : vector<40x40xf32> to vector<40x40xbf16>
    %188 = vector.extract_strided_slice %170 {offsets = [0, 0], sizes = [40, 8], strides = [1, 1]} : vector<40x32xbf16> to vector<40x8xbf16>
    %cst_77 = arith.constant dense<0.000000e+00> : vector<40x8xf32>
    %189 = tpu.matmul %187, %188, %cst_77 {dimension_numbers = #tpu.dot_dimension_numbers<[1], [0], [0], [1], [0, 0, 1, 1], [], []>} : vector<40x40xbf16>, vector<40x8xbf16>, vector<40x8xf32> -> vector<40x8xf32>
    %190 = vector.extract_strided_slice %166 {offsets = [0, 8], sizes = [40, 8], strides = [1, 1]} : vector<40x32xbf16> to vector<40x8xbf16>
    %191 = vector.extract_strided_slice %168 {offsets = [0, 8], sizes = [40, 8], strides = [1, 1]} : vector<40x32xbf16> to vector<40x8xbf16>
    %cst_78 = arith.constant dense<0.000000e+00> : vector<40x40xf32>
    %192 = tpu.matmul %190, %191, %cst_78 {dimension_numbers = #tpu.dot_dimension_numbers<[1], [1], [0], [0], [0, 0, 1, 0], [], []>} : vector<40x8xbf16>, vector<40x8xbf16>, vector<40x40xf32> -> vector<40x40xf32>
    %193 = arith.addf %192, %172 : vector<40x40xf32>
    %cst_79 = arith.constant dense<0xFF800000> : vector<40xf32>
    %194 = vector.multi_reduction <maximumf>, %193, %cst_79 [1] : vector<40x40xf32> to vector<40xf32>
    %195 = vector.shape_cast %194 : vector<40xf32> to vector<40x1xf32>
    %196 = vector.broadcast %195 : vector<40x1xf32> to vector<40x40xf32>
    %197 = arith.subf %193, %196 : vector<40x40xf32>
    %198 = math.exp %197 : vector<40x40xf32>
    %cst_80 = arith.constant dense<0.000000e+00> : vector<40xf32>
    %199 = vector.multi_reduction <add>, %198, %cst_80 [1] : vector<40x40xf32> to vector<40xf32>
    %200 = vector.shape_cast %199 : vector<40xf32> to vector<40x1xf32>
    %201 = tpu.reciprocal %200 {approx = true} : vector<40x1xf32> -> vector<40x1xf32>
    %202 = vector.broadcast %201 : vector<40x1xf32> to vector<40x40xf32>
    %203 = arith.mulf %198, %202 : vector<40x40xf32>
    %204 = arith.truncf %203 : vector<40x40xf32> to vector<40x40xbf16>
    %205 = vector.extract_strided_slice %170 {offsets = [0, 8], sizes = [40, 8], strides = [1, 1]} : vector<40x32xbf16> to vector<40x8xbf16>
    %cst_81 = arith.constant dense<0.000000e+00> : vector<40x8xf32>
    %206 = tpu.matmul %204, %205, %cst_81 {dimension_numbers = #tpu.dot_dimension_numbers<[1], [0], [0], [1], [0, 0, 1, 1], [], []>} : vector<40x40xbf16>, vector<40x8xbf16>, vector<40x8xf32> -> vector<40x8xf32>
    %207 = vector.extract_strided_slice %166 {offsets = [0, 16], sizes = [40, 8], strides = [1, 1]} : vector<40x32xbf16> to vector<40x8xbf16>
    %208 = vector.extract_strided_slice %168 {offsets = [0, 16], sizes = [40, 8], strides = [1, 1]} : vector<40x32xbf16> to vector<40x8xbf16>
    %cst_82 = arith.constant dense<0.000000e+00> : vector<40x40xf32>
    %209 = tpu.matmul %207, %208, %cst_82 {dimension_numbers = #tpu.dot_dimension_numbers<[1], [1], [0], [0], [0, 0, 1, 0], [], []>} : vector<40x8xbf16>, vector<40x8xbf16>, vector<40x40xf32> -> vector<40x40xf32>
    %210 = arith.addf %209, %172 : vector<40x40xf32>
    %cst_83 = arith.constant dense<0xFF800000> : vector<40xf32>
    %211 = vector.multi_reduction <maximumf>, %210, %cst_83 [1] : vector<40x40xf32> to vector<40xf32>
    %212 = vector.shape_cast %211 : vector<40xf32> to vector<40x1xf32>
    %213 = vector.broadcast %212 : vector<40x1xf32> to vector<40x40xf32>
    %214 = arith.subf %210, %213 : vector<40x40xf32>
    %215 = math.exp %214 : vector<40x40xf32>
    %cst_84 = arith.constant dense<0.000000e+00> : vector<40xf32>
    %216 = vector.multi_reduction <add>, %215, %cst_84 [1] : vector<40x40xf32> to vector<40xf32>
    %217 = vector.shape_cast %216 : vector<40xf32> to vector<40x1xf32>
    %218 = tpu.reciprocal %217 {approx = true} : vector<40x1xf32> -> vector<40x1xf32>
    %219 = vector.broadcast %218 : vector<40x1xf32> to vector<40x40xf32>
    %220 = arith.mulf %215, %219 : vector<40x40xf32>
    %221 = arith.truncf %220 : vector<40x40xf32> to vector<40x40xbf16>
    %222 = vector.extract_strided_slice %170 {offsets = [0, 16], sizes = [40, 8], strides = [1, 1]} : vector<40x32xbf16> to vector<40x8xbf16>
    %cst_85 = arith.constant dense<0.000000e+00> : vector<40x8xf32>
    %223 = tpu.matmul %221, %222, %cst_85 {dimension_numbers = #tpu.dot_dimension_numbers<[1], [0], [0], [1], [0, 0, 1, 1], [], []>} : vector<40x40xbf16>, vector<40x8xbf16>, vector<40x8xf32> -> vector<40x8xf32>
    %224 = vector.extract_strided_slice %166 {offsets = [0, 24], sizes = [40, 8], strides = [1, 1]} : vector<40x32xbf16> to vector<40x8xbf16>
    %225 = vector.extract_strided_slice %168 {offsets = [0, 24], sizes = [40, 8], strides = [1, 1]} : vector<40x32xbf16> to vector<40x8xbf16>
    %cst_86 = arith.constant dense<0.000000e+00> : vector<40x40xf32>
    %226 = tpu.matmul %224, %225, %cst_86 {dimension_numbers = #tpu.dot_dimension_numbers<[1], [1], [0], [0], [0, 0, 1, 0], [], []>} : vector<40x8xbf16>, vector<40x8xbf16>, vector<40x40xf32> -> vector<40x40xf32>
    %227 = arith.addf %226, %172 : vector<40x40xf32>
    %cst_87 = arith.constant dense<0xFF800000> : vector<40xf32>
    %228 = vector.multi_reduction <maximumf>, %227, %cst_87 [1] : vector<40x40xf32> to vector<40xf32>
    %229 = vector.shape_cast %228 : vector<40xf32> to vector<40x1xf32>
    %230 = vector.broadcast %229 : vector<40x1xf32> to vector<40x40xf32>
    %231 = arith.subf %227, %230 : vector<40x40xf32>
    %232 = math.exp %231 : vector<40x40xf32>
    %cst_88 = arith.constant dense<0.000000e+00> : vector<40xf32>
    %233 = vector.multi_reduction <add>, %232, %cst_88 [1] : vector<40x40xf32> to vector<40xf32>
    %234 = vector.shape_cast %233 : vector<40xf32> to vector<40x1xf32>
    %235 = tpu.reciprocal %234 {approx = true} : vector<40x1xf32> -> vector<40x1xf32>
    %236 = vector.broadcast %235 : vector<40x1xf32> to vector<40x40xf32>
    %237 = arith.mulf %232, %236 : vector<40x40xf32>
    %238 = arith.truncf %237 : vector<40x40xf32> to vector<40x40xbf16>
    %239 = vector.extract_strided_slice %170 {offsets = [0, 24], sizes = [40, 8], strides = [1, 1]} : vector<40x32xbf16> to vector<40x8xbf16>
    %cst_89 = arith.constant dense<0.000000e+00> : vector<40x8xf32>
    %240 = tpu.matmul %238, %239, %cst_89 {dimension_numbers = #tpu.dot_dimension_numbers<[1], [0], [0], [1], [0, 0, 1, 1], [], []>} : vector<40x40xbf16>, vector<40x8xbf16>, vector<40x8xf32> -> vector<40x8xf32>
    %241 = tpu.concatenate %189, %206, %223, %240 in 1 : vector<40x8xf32>, vector<40x8xf32>, vector<40x8xf32>, vector<40x8xf32> -> vector<40x32xf32>
    %242 = arith.truncf %241 : vector<40x32xf32> to vector<40x32xbf16>
    %c0_90 = arith.constant 0 : index
    %c1_91 = arith.constant 1 : index
    %c0_92 = arith.constant 0 : index
    %c0_93 = arith.constant 0 : index
    %243 = vector.load %arg10[%c0_90, %c1_91, %c0_92, %c0_93] : memref<2x3x32x32xbf16, #tpu.memory_space<vmem>>, vector<1x1x32x32xbf16>
    %244 = vector.shape_cast %243 : vector<1x1x32x32xbf16> to vector<32x32xbf16>
    %cst_94 = arith.constant dense<0.000000e+00> : vector<40x32xf32>
    %245 = tpu.matmul %242, %244, %cst_94 {dimension_numbers = #tpu.dot_dimension_numbers<[1], [0], [0], [1], [0, 0, 1, 1], [], []>} : vector<40x32xbf16>, vector<32x32xbf16>, vector<40x32xf32> -> vector<40x32xf32>
    %c0_95 = arith.constant 0 : index
    %c1_96 = arith.constant 1 : index
    %c0_97 = arith.constant 0 : index
    %c0_98 = arith.constant 0 : index
    %246 = vector.load %arg11[%c0_95, %c1_96, %c0_97, %c0_98] : memref<2x3x1x32xf32, #tpu.memory_space<vmem>>, vector<1x1x1x32xf32>
    %247 = vector.shape_cast %246 : vector<1x1x1x32xf32> to vector<1x32xf32>
    %248 = vector.broadcast %247 : vector<1x32xf32> to vector<40x32xf32>
    %249 = arith.addf %245, %248 : vector<40x32xf32>
    %250 = arith.addf %134, %249 : vector<40x32xf32>
    %251 = vector.extract_strided_slice %18 {offsets = [0, 128], sizes = [1, 32], strides = [1, 1]} : vector<1x192xf32> to vector<1x32xf32>
    %252 = vector.extract_strided_slice %18 {offsets = [0, 160], sizes = [1, 32], strides = [1, 1]} : vector<1x192xf32> to vector<1x32xf32>
    %cst_99 = arith.constant dense<0.000000e+00> : vector<40xf32>
    %253 = vector.multi_reduction <add>, %250, %cst_99 [1] : vector<40x32xf32> to vector<40xf32>
    %254 = vector.shape_cast %253 : vector<40xf32> to vector<40x1xf32>
    %cst_100 = arith.constant 3.200000e+01 : f32
    %255 = vector.broadcast %cst_100 : f32 to vector<40x1xf32>
    %256 = arith.divf %254, %255 : vector<40x1xf32>
    %257 = vector.broadcast %256 : vector<40x1xf32> to vector<40x32xf32>
    %258 = arith.subf %250, %257 : vector<40x32xf32>
    %259 = arith.mulf %258, %258 : vector<40x32xf32>
    %cst_101 = arith.constant dense<0.000000e+00> : vector<40xf32>
    %260 = vector.multi_reduction <add>, %259, %cst_101 [1] : vector<40x32xf32> to vector<40xf32>
    %261 = vector.shape_cast %260 : vector<40xf32> to vector<40x1xf32>
    %cst_102 = arith.constant 3.200000e+01 : f32
    %262 = vector.broadcast %cst_102 : f32 to vector<40x1xf32>
    %263 = arith.divf %261, %262 : vector<40x1xf32>
    %cst_103 = arith.constant 9.99999974E-6 : f32
    %264 = vector.broadcast %cst_103 : f32 to vector<40x1xf32>
    %265 = arith.addf %263, %264 : vector<40x1xf32>
    %266 = math.rsqrt %265 : vector<40x1xf32>
    %267 = vector.broadcast %266 : vector<40x1xf32> to vector<40x32xf32>
    %268 = arith.mulf %258, %267 : vector<40x32xf32>
    %cst_104 = arith.constant 1.000000e+00 : f32
    %269 = vector.broadcast %cst_104 : f32 to vector<1x32xf32>
    %270 = arith.addf %269, %252 : vector<1x32xf32>
    %271 = vector.broadcast %270 : vector<1x32xf32> to vector<40x32xf32>
    %272 = arith.mulf %268, %271 : vector<40x32xf32>
    %273 = vector.broadcast %251 : vector<1x32xf32> to vector<40x32xf32>
    %274 = arith.addf %272, %273 : vector<40x32xf32>
    %275 = arith.truncf %274 : vector<40x32xf32> to vector<40x32xbf16>
    %c0_105 = arith.constant 0 : index
    %c2 = arith.constant 2 : index
    %c0_106 = arith.constant 0 : index
    %c0_107 = arith.constant 0 : index
    %276 = vector.load %arg9[%c0_105, %c2, %c0_106, %c0_107] : memref<2x3x32x96xbf16, #tpu.memory_space<vmem>>, vector<1x1x32x96xbf16>
    %277 = vector.shape_cast %276 : vector<1x1x32x96xbf16> to vector<32x96xbf16>
    %cst_108 = arith.constant dense<0.000000e+00> : vector<40x96xf32>
    %278 = tpu.matmul %275, %277, %cst_108 {dimension_numbers = #tpu.dot_dimension_numbers<[1], [0], [0], [1], [0, 0, 1, 1], [], []>} : vector<40x32xbf16>, vector<32x96xbf16>, vector<40x96xf32> -> vector<40x96xf32>
    %279 = vector.extract_strided_slice %278 {offsets = [0, 0], sizes = [40, 32], strides = [1, 1]} : vector<40x96xf32> to vector<40x32xf32>
    %cst_109 = arith.constant 0.353553385 : f32
    %280 = vector.broadcast %cst_109 : f32 to vector<40x32xf32>
    %281 = arith.mulf %279, %280 : vector<40x32xf32>
    %282 = arith.truncf %281 : vector<40x32xf32> to vector<40x32xbf16>
    %283 = vector.extract_strided_slice %278 {offsets = [0, 32], sizes = [40, 32], strides = [1, 1]} : vector<40x96xf32> to vector<40x32xf32>
    %284 = arith.truncf %283 : vector<40x32xf32> to vector<40x32xbf16>
    %285 = vector.extract_strided_slice %278 {offsets = [0, 64], sizes = [40, 32], strides = [1, 1]} : vector<40x96xf32> to vector<40x32xf32>
    %286 = arith.truncf %285 : vector<40x32xf32> to vector<40x32xbf16>
    %c0_110 = arith.constant 0 : index
    %c2_111 = arith.constant 2 : index
    %c0_112 = arith.constant 0 : index
    %c0_113 = arith.constant 0 : index
    %287 = vector.load %arg3[%c0_110, %c2_111, %c0_112, %c0_113] : memref<1x3x40x40xf32, #tpu.memory_space<vmem>>, vector<1x1x40x40xf32>
    %288 = vector.shape_cast %287 : vector<1x1x40x40xf32> to vector<40x40xf32>
    %289 = vector.extract_strided_slice %282 {offsets = [0, 0], sizes = [40, 8], strides = [1, 1]} : vector<40x32xbf16> to vector<40x8xbf16>
    %290 = vector.extract_strided_slice %284 {offsets = [0, 0], sizes = [40, 8], strides = [1, 1]} : vector<40x32xbf16> to vector<40x8xbf16>
    %cst_114 = arith.constant dense<0.000000e+00> : vector<40x40xf32>
    %291 = tpu.matmul %289, %290, %cst_114 {dimension_numbers = #tpu.dot_dimension_numbers<[1], [1], [0], [0], [0, 0, 1, 0], [], []>} : vector<40x8xbf16>, vector<40x8xbf16>, vector<40x40xf32> -> vector<40x40xf32>
    %292 = arith.addf %291, %288 : vector<40x40xf32>
    %cst_115 = arith.constant dense<0xFF800000> : vector<40xf32>
    %293 = vector.multi_reduction <maximumf>, %292, %cst_115 [1] : vector<40x40xf32> to vector<40xf32>
    %294 = vector.shape_cast %293 : vector<40xf32> to vector<40x1xf32>
    %295 = vector.broadcast %294 : vector<40x1xf32> to vector<40x40xf32>
    %296 = arith.subf %292, %295 : vector<40x40xf32>
    %297 = math.exp %296 : vector<40x40xf32>
    %cst_116 = arith.constant dense<0.000000e+00> : vector<40xf32>
    %298 = vector.multi_reduction <add>, %297, %cst_116 [1] : vector<40x40xf32> to vector<40xf32>
    %299 = vector.shape_cast %298 : vector<40xf32> to vector<40x1xf32>
    %300 = tpu.reciprocal %299 {approx = true} : vector<40x1xf32> -> vector<40x1xf32>
    %301 = vector.broadcast %300 : vector<40x1xf32> to vector<40x40xf32>
    %302 = arith.mulf %297, %301 : vector<40x40xf32>
    %303 = arith.truncf %302 : vector<40x40xf32> to vector<40x40xbf16>
    %304 = vector.extract_strided_slice %286 {offsets = [0, 0], sizes = [40, 8], strides = [1, 1]} : vector<40x32xbf16> to vector<40x8xbf16>
    %cst_117 = arith.constant dense<0.000000e+00> : vector<40x8xf32>
    %305 = tpu.matmul %303, %304, %cst_117 {dimension_numbers = #tpu.dot_dimension_numbers<[1], [0], [0], [1], [0, 0, 1, 1], [], []>} : vector<40x40xbf16>, vector<40x8xbf16>, vector<40x8xf32> -> vector<40x8xf32>
    %306 = vector.extract_strided_slice %282 {offsets = [0, 8], sizes = [40, 8], strides = [1, 1]} : vector<40x32xbf16> to vector<40x8xbf16>
    %307 = vector.extract_strided_slice %284 {offsets = [0, 8], sizes = [40, 8], strides = [1, 1]} : vector<40x32xbf16> to vector<40x8xbf16>
    %cst_118 = arith.constant dense<0.000000e+00> : vector<40x40xf32>
    %308 = tpu.matmul %306, %307, %cst_118 {dimension_numbers = #tpu.dot_dimension_numbers<[1], [1], [0], [0], [0, 0, 1, 0], [], []>} : vector<40x8xbf16>, vector<40x8xbf16>, vector<40x40xf32> -> vector<40x40xf32>
    %309 = arith.addf %308, %288 : vector<40x40xf32>
    %cst_119 = arith.constant dense<0xFF800000> : vector<40xf32>
    %310 = vector.multi_reduction <maximumf>, %309, %cst_119 [1] : vector<40x40xf32> to vector<40xf32>
    %311 = vector.shape_cast %310 : vector<40xf32> to vector<40x1xf32>
    %312 = vector.broadcast %311 : vector<40x1xf32> to vector<40x40xf32>
    %313 = arith.subf %309, %312 : vector<40x40xf32>
    %314 = math.exp %313 : vector<40x40xf32>
    %cst_120 = arith.constant dense<0.000000e+00> : vector<40xf32>
    %315 = vector.multi_reduction <add>, %314, %cst_120 [1] : vector<40x40xf32> to vector<40xf32>
    %316 = vector.shape_cast %315 : vector<40xf32> to vector<40x1xf32>
    %317 = tpu.reciprocal %316 {approx = true} : vector<40x1xf32> -> vector<40x1xf32>
    %318 = vector.broadcast %317 : vector<40x1xf32> to vector<40x40xf32>
    %319 = arith.mulf %314, %318 : vector<40x40xf32>
    %320 = arith.truncf %319 : vector<40x40xf32> to vector<40x40xbf16>
    %321 = vector.extract_strided_slice %286 {offsets = [0, 8], sizes = [40, 8], strides = [1, 1]} : vector<40x32xbf16> to vector<40x8xbf16>
    %cst_121 = arith.constant dense<0.000000e+00> : vector<40x8xf32>
    %322 = tpu.matmul %320, %321, %cst_121 {dimension_numbers = #tpu.dot_dimension_numbers<[1], [0], [0], [1], [0, 0, 1, 1], [], []>} : vector<40x40xbf16>, vector<40x8xbf16>, vector<40x8xf32> -> vector<40x8xf32>
    %323 = vector.extract_strided_slice %282 {offsets = [0, 16], sizes = [40, 8], strides = [1, 1]} : vector<40x32xbf16> to vector<40x8xbf16>
    %324 = vector.extract_strided_slice %284 {offsets = [0, 16], sizes = [40, 8], strides = [1, 1]} : vector<40x32xbf16> to vector<40x8xbf16>
    %cst_122 = arith.constant dense<0.000000e+00> : vector<40x40xf32>
    %325 = tpu.matmul %323, %324, %cst_122 {dimension_numbers = #tpu.dot_dimension_numbers<[1], [1], [0], [0], [0, 0, 1, 0], [], []>} : vector<40x8xbf16>, vector<40x8xbf16>, vector<40x40xf32> -> vector<40x40xf32>
    %326 = arith.addf %325, %288 : vector<40x40xf32>
    %cst_123 = arith.constant dense<0xFF800000> : vector<40xf32>
    %327 = vector.multi_reduction <maximumf>, %326, %cst_123 [1] : vector<40x40xf32> to vector<40xf32>
    %328 = vector.shape_cast %327 : vector<40xf32> to vector<40x1xf32>
    %329 = vector.broadcast %328 : vector<40x1xf32> to vector<40x40xf32>
    %330 = arith.subf %326, %329 : vector<40x40xf32>
    %331 = math.exp %330 : vector<40x40xf32>
    %cst_124 = arith.constant dense<0.000000e+00> : vector<40xf32>
    %332 = vector.multi_reduction <add>, %331, %cst_124 [1] : vector<40x40xf32> to vector<40xf32>
    %333 = vector.shape_cast %332 : vector<40xf32> to vector<40x1xf32>
    %334 = tpu.reciprocal %333 {approx = true} : vector<40x1xf32> -> vector<40x1xf32>
    %335 = vector.broadcast %334 : vector<40x1xf32> to vector<40x40xf32>
    %336 = arith.mulf %331, %335 : vector<40x40xf32>
    %337 = arith.truncf %336 : vector<40x40xf32> to vector<40x40xbf16>
    %338 = vector.extract_strided_slice %286 {offsets = [0, 16], sizes = [40, 8], strides = [1, 1]} : vector<40x32xbf16> to vector<40x8xbf16>
    %cst_125 = arith.constant dense<0.000000e+00> : vector<40x8xf32>
    %339 = tpu.matmul %337, %338, %cst_125 {dimension_numbers = #tpu.dot_dimension_numbers<[1], [0], [0], [1], [0, 0, 1, 1], [], []>} : vector<40x40xbf16>, vector<40x8xbf16>, vector<40x8xf32> -> vector<40x8xf32>
    %340 = vector.extract_strided_slice %282 {offsets = [0, 24], sizes = [40, 8], strides = [1, 1]} : vector<40x32xbf16> to vector<40x8xbf16>
    %341 = vector.extract_strided_slice %284 {offsets = [0, 24], sizes = [40, 8], strides = [1, 1]} : vector<40x32xbf16> to vector<40x8xbf16>
    %cst_126 = arith.constant dense<0.000000e+00> : vector<40x40xf32>
    %342 = tpu.matmul %340, %341, %cst_126 {dimension_numbers = #tpu.dot_dimension_numbers<[1], [1], [0], [0], [0, 0, 1, 0], [], []>} : vector<40x8xbf16>, vector<40x8xbf16>, vector<40x40xf32> -> vector<40x40xf32>
    %343 = arith.addf %342, %288 : vector<40x40xf32>
    %cst_127 = arith.constant dense<0xFF800000> : vector<40xf32>
    %344 = vector.multi_reduction <maximumf>, %343, %cst_127 [1] : vector<40x40xf32> to vector<40xf32>
    %345 = vector.shape_cast %344 : vector<40xf32> to vector<40x1xf32>
    %346 = vector.broadcast %345 : vector<40x1xf32> to vector<40x40xf32>
    %347 = arith.subf %343, %346 : vector<40x40xf32>
    %348 = math.exp %347 : vector<40x40xf32>
    %cst_128 = arith.constant dense<0.000000e+00> : vector<40xf32>
    %349 = vector.multi_reduction <add>, %348, %cst_128 [1] : vector<40x40xf32> to vector<40xf32>
    %350 = vector.shape_cast %349 : vector<40xf32> to vector<40x1xf32>
    %351 = tpu.reciprocal %350 {approx = true} : vector<40x1xf32> -> vector<40x1xf32>
    %352 = vector.broadcast %351 : vector<40x1xf32> to vector<40x40xf32>
    %353 = arith.mulf %348, %352 : vector<40x40xf32>
    %354 = arith.truncf %353 : vector<40x40xf32> to vector<40x40xbf16>
    %355 = vector.extract_strided_slice %286 {offsets = [0, 24], sizes = [40, 8], strides = [1, 1]} : vector<40x32xbf16> to vector<40x8xbf16>
    %cst_129 = arith.constant dense<0.000000e+00> : vector<40x8xf32>
    %356 = tpu.matmul %354, %355, %cst_129 {dimension_numbers = #tpu.dot_dimension_numbers<[1], [0], [0], [1], [0, 0, 1, 1], [], []>} : vector<40x40xbf16>, vector<40x8xbf16>, vector<40x8xf32> -> vector<40x8xf32>
    %357 = tpu.concatenate %305, %322, %339, %356 in 1 : vector<40x8xf32>, vector<40x8xf32>, vector<40x8xf32>, vector<40x8xf32> -> vector<40x32xf32>
    %358 = arith.truncf %357 : vector<40x32xf32> to vector<40x32xbf16>
    %c0_130 = arith.constant 0 : index
    %c2_131 = arith.constant 2 : index
    %c0_132 = arith.constant 0 : index
    %c0_133 = arith.constant 0 : index
    %359 = vector.load %arg10[%c0_130, %c2_131, %c0_132, %c0_133] : memref<2x3x32x32xbf16, #tpu.memory_space<vmem>>, vector<1x1x32x32xbf16>
    %360 = vector.shape_cast %359 : vector<1x1x32x32xbf16> to vector<32x32xbf16>
    %cst_134 = arith.constant dense<0.000000e+00> : vector<40x32xf32>
    %361 = tpu.matmul %358, %360, %cst_134 {dimension_numbers = #tpu.dot_dimension_numbers<[1], [0], [0], [1], [0, 0, 1, 1], [], []>} : vector<40x32xbf16>, vector<32x32xbf16>, vector<40x32xf32> -> vector<40x32xf32>
    %c0_135 = arith.constant 0 : index
    %c2_136 = arith.constant 2 : index
    %c0_137 = arith.constant 0 : index
    %c0_138 = arith.constant 0 : index
    %362 = vector.load %arg11[%c0_135, %c2_136, %c0_137, %c0_138] : memref<2x3x1x32xf32, #tpu.memory_space<vmem>>, vector<1x1x1x32xf32>
    %363 = vector.shape_cast %362 : vector<1x1x1x32xf32> to vector<1x32xf32>
    %364 = vector.broadcast %363 : vector<1x32xf32> to vector<40x32xf32>
    %365 = arith.addf %361, %364 : vector<40x32xf32>
    %366 = arith.addf %250, %365 : vector<40x32xf32>
    %c0_139 = arith.constant 0 : index
    %c0_140 = arith.constant 0 : index
    %c0_141 = arith.constant 0 : index
    %367 = vector.load %arg12[%c0_139, %c0_140, %c0_141] : memref<2x2x32xf32, #tpu.memory_space<vmem>>, vector<1x2x32xf32>
    %368 = vector.shape_cast %367 : vector<1x2x32xf32> to vector<2x32xf32>
    %cst_142 = arith.constant dense<0.000000e+00> : vector<40xf32>
    %369 = vector.multi_reduction <add>, %366, %cst_142 [1] : vector<40x32xf32> to vector<40xf32>
    %370 = vector.shape_cast %369 : vector<40xf32> to vector<40x1xf32>
    %cst_143 = arith.constant 3.200000e+01 : f32
    %371 = vector.broadcast %cst_143 : f32 to vector<40x1xf32>
    %372 = arith.divf %370, %371 : vector<40x1xf32>
    %373 = vector.broadcast %372 : vector<40x1xf32> to vector<40x32xf32>
    %374 = arith.subf %366, %373 : vector<40x32xf32>
    %375 = arith.mulf %374, %374 : vector<40x32xf32>
    %cst_144 = arith.constant dense<0.000000e+00> : vector<40xf32>
    %376 = vector.multi_reduction <add>, %375, %cst_144 [1] : vector<40x32xf32> to vector<40xf32>
    %377 = vector.shape_cast %376 : vector<40xf32> to vector<40x1xf32>
    %cst_145 = arith.constant 3.200000e+01 : f32
    %378 = vector.broadcast %cst_145 : f32 to vector<40x1xf32>
    %379 = arith.divf %377, %378 : vector<40x1xf32>
    %cst_146 = arith.constant 9.99999974E-6 : f32
    %380 = vector.broadcast %cst_146 : f32 to vector<40x1xf32>
    %381 = arith.addf %379, %380 : vector<40x1xf32>
    %382 = math.rsqrt %381 : vector<40x1xf32>
    %383 = vector.broadcast %382 : vector<40x1xf32> to vector<40x32xf32>
    %384 = arith.mulf %374, %383 : vector<40x32xf32>
    %385 = vector.extract_strided_slice %368 {offsets = [0, 0], sizes = [1, 32], strides = [1, 1]} : vector<2x32xf32> to vector<1x32xf32>
    %386 = vector.broadcast %385 : vector<1x32xf32> to vector<40x32xf32>
    %387 = arith.mulf %384, %386 : vector<40x32xf32>
    %388 = vector.extract_strided_slice %368 {offsets = [1, 0], sizes = [1, 32], strides = [1, 1]} : vector<2x32xf32> to vector<1x32xf32>
    %389 = vector.broadcast %388 : vector<1x32xf32> to vector<40x32xf32>
    %390 = arith.addf %387, %389 : vector<40x32xf32>
    %391 = arith.truncf %390 : vector<40x32xf32> to vector<40x32xbf16>
    %c0_147 = arith.constant 0 : index
    %c0_148 = arith.constant 0 : index
    %c0_149 = arith.constant 0 : index
    %392 = vector.load %arg13[%c0_147, %c0_148, %c0_149] : memref<2x32x256xbf16, #tpu.memory_space<vmem>>, vector<1x32x256xbf16>
    %393 = vector.shape_cast %392 : vector<1x32x256xbf16> to vector<32x256xbf16>
    %cst_150 = arith.constant dense<0.000000e+00> : vector<40x256xf32>
    %394 = tpu.matmul %391, %393, %cst_150 {dimension_numbers = #tpu.dot_dimension_numbers<[1], [0], [0], [1], [0, 0, 1, 1], [], []>} : vector<40x32xbf16>, vector<32x256xbf16>, vector<40x256xf32> -> vector<40x256xf32>
    %c0_151 = arith.constant 0 : index
    %c0_152 = arith.constant 0 : index
    %c0_153 = arith.constant 0 : index
    %395 = vector.load %arg14[%c0_151, %c0_152, %c0_153] : memref<2x1x256xf32, #tpu.memory_space<vmem>>, vector<1x1x256xf32>
    %396 = vector.shape_cast %395 : vector<1x1x256xf32> to vector<1x256xf32>
    %397 = vector.broadcast %396 : vector<1x256xf32> to vector<40x256xf32>
    %398 = arith.addf %394, %397 : vector<40x256xf32>
    %399 = vector.extract_strided_slice %398 {offsets = [0, 0], sizes = [40, 128], strides = [1, 1]} : vector<40x256xf32> to vector<40x128xf32>
    %400 = vector.extract_strided_slice %398 {offsets = [0, 128], sizes = [40, 128], strides = [1, 1]} : vector<40x256xf32> to vector<40x128xf32>
    %401 = arith.mulf %400, %400 : vector<40x128xf32>
    %402 = arith.mulf %400, %401 : vector<40x128xf32>
    %cst_154 = arith.constant 4.471500e-02 : f32
    %403 = vector.broadcast %cst_154 : f32 to vector<40x128xf32>
    %404 = arith.mulf %403, %402 : vector<40x128xf32>
    %405 = arith.addf %400, %404 : vector<40x128xf32>
    %cst_155 = arith.constant 0.797884583 : f32
    %406 = vector.broadcast %cst_155 : f32 to vector<40x128xf32>
    %407 = arith.mulf %406, %405 : vector<40x128xf32>
    %408 = math.tanh %407 : vector<40x128xf32>
    %cst_156 = arith.constant 1.000000e+00 : f32
    %409 = vector.broadcast %cst_156 : f32 to vector<40x128xf32>
    %410 = arith.addf %409, %408 : vector<40x128xf32>
    %cst_157 = arith.constant 5.000000e-01 : f32
    %411 = vector.broadcast %cst_157 : f32 to vector<40x128xf32>
    %412 = arith.mulf %411, %410 : vector<40x128xf32>
    %413 = arith.mulf %400, %412 : vector<40x128xf32>
    %414 = arith.mulf %399, %413 : vector<40x128xf32>
    %415 = arith.truncf %414 : vector<40x128xf32> to vector<40x128xbf16>
    %c0_158 = arith.constant 0 : index
    %c0_159 = arith.constant 0 : index
    %c0_160 = arith.constant 0 : index
    %416 = vector.load %arg15[%c0_158, %c0_159, %c0_160] : memref<2x128x32xbf16, #tpu.memory_space<vmem>>, vector<1x128x32xbf16>
    %417 = vector.shape_cast %416 : vector<1x128x32xbf16> to vector<128x32xbf16>
    %cst_161 = arith.constant dense<0.000000e+00> : vector<40x32xf32>
    %418 = tpu.matmul %415, %417, %cst_161 {dimension_numbers = #tpu.dot_dimension_numbers<[1], [0], [0], [1], [0, 0, 1, 1], [], []>} : vector<40x128xbf16>, vector<128x32xbf16>, vector<40x32xf32> -> vector<40x32xf32>
    %c0_162 = arith.constant 0 : index
    %c0_163 = arith.constant 0 : index
    %c0_164 = arith.constant 0 : index
    %419 = vector.load %arg16[%c0_162, %c0_163, %c0_164] : memref<2x1x32xf32, #tpu.memory_space<vmem>>, vector<1x1x32xf32>
    %420 = vector.shape_cast %419 : vector<1x1x32xf32> to vector<1x32xf32>
    %421 = vector.broadcast %420 : vector<1x32xf32> to vector<40x32xf32>
    %422 = arith.addf %418, %421 : vector<40x32xf32>
    %423 = arith.addf %366, %422 : vector<40x32xf32>
    %c1_165 = arith.constant 1 : index
    %c0_166 = arith.constant 0 : index
    %c0_167 = arith.constant 0 : index
    %424 = vector.load %arg7[%c1_165, %c0_166, %c0_167] : memref<2x32x192xbf16, #tpu.memory_space<vmem>>, vector<1x32x192xbf16>
    %425 = vector.shape_cast %424 : vector<1x32x192xbf16> to vector<32x192xbf16>
    %cst_168 = arith.constant dense<0.000000e+00> : vector<1x192xf32>
    %426 = tpu.matmul %12, %425, %cst_168 {dimension_numbers = #tpu.dot_dimension_numbers<[1], [0], [0], [1], [0, 0, 1, 1], [], []>} : vector<1x32xbf16>, vector<32x192xbf16>, vector<1x192xf32> -> vector<1x192xf32>
    %c1_169 = arith.constant 1 : index
    %c0_170 = arith.constant 0 : index
    %c0_171 = arith.constant 0 : index
    %427 = vector.load %arg8[%c1_169, %c0_170, %c0_171] : memref<2x1x192xf32, #tpu.memory_space<vmem>>, vector<1x1x192xf32>
    %428 = vector.shape_cast %427 : vector<1x1x192xf32> to vector<1x192xf32>
    %429 = arith.addf %426, %428 : vector<1x192xf32>
    %430 = vector.extract_strided_slice %429 {offsets = [0, 0], sizes = [1, 32], strides = [1, 1]} : vector<1x192xf32> to vector<1x32xf32>
    %431 = vector.extract_strided_slice %429 {offsets = [0, 32], sizes = [1, 32], strides = [1, 1]} : vector<1x192xf32> to vector<1x32xf32>
    %cst_172 = arith.constant dense<0.000000e+00> : vector<40xf32>
    %432 = vector.multi_reduction <add>, %423, %cst_172 [1] : vector<40x32xf32> to vector<40xf32>
    %433 = vector.shape_cast %432 : vector<40xf32> to vector<40x1xf32>
    %cst_173 = arith.constant 3.200000e+01 : f32
    %434 = vector.broadcast %cst_173 : f32 to vector<40x1xf32>
    %435 = arith.divf %433, %434 : vector<40x1xf32>
    %436 = vector.broadcast %435 : vector<40x1xf32> to vector<40x32xf32>
    %437 = arith.subf %423, %436 : vector<40x32xf32>
    %438 = arith.mulf %437, %437 : vector<40x32xf32>
    %cst_174 = arith.constant dense<0.000000e+00> : vector<40xf32>
    %439 = vector.multi_reduction <add>, %438, %cst_174 [1] : vector<40x32xf32> to vector<40xf32>
    %440 = vector.shape_cast %439 : vector<40xf32> to vector<40x1xf32>
    %cst_175 = arith.constant 3.200000e+01 : f32
    %441 = vector.broadcast %cst_175 : f32 to vector<40x1xf32>
    %442 = arith.divf %440, %441 : vector<40x1xf32>
    %cst_176 = arith.constant 9.99999974E-6 : f32
    %443 = vector.broadcast %cst_176 : f32 to vector<40x1xf32>
    %444 = arith.addf %442, %443 : vector<40x1xf32>
    %445 = math.rsqrt %444 : vector<40x1xf32>
    %446 = vector.broadcast %445 : vector<40x1xf32> to vector<40x32xf32>
    %447 = arith.mulf %437, %446 : vector<40x32xf32>
    %cst_177 = arith.constant 1.000000e+00 : f32
    %448 = vector.broadcast %cst_177 : f32 to vector<1x32xf32>
    %449 = arith.addf %448, %431 : vector<1x32xf32>
    %450 = vector.broadcast %449 : vector<1x32xf32> to vector<40x32xf32>
    %451 = arith.mulf %447, %450 : vector<40x32xf32>
    %452 = vector.broadcast %430 : vector<1x32xf32> to vector<40x32xf32>
    %453 = arith.addf %451, %452 : vector<40x32xf32>
    %454 = arith.truncf %453 : vector<40x32xf32> to vector<40x32xbf16>
    %c1_178 = arith.constant 1 : index
    %c0_179 = arith.constant 0 : index
    %c0_180 = arith.constant 0 : index
    %c0_181 = arith.constant 0 : index
    %455 = vector.load %arg9[%c1_178, %c0_179, %c0_180, %c0_181] : memref<2x3x32x96xbf16, #tpu.memory_space<vmem>>, vector<1x1x32x96xbf16>
    %456 = vector.shape_cast %455 : vector<1x1x32x96xbf16> to vector<32x96xbf16>
    %cst_182 = arith.constant dense<0.000000e+00> : vector<40x96xf32>
    %457 = tpu.matmul %454, %456, %cst_182 {dimension_numbers = #tpu.dot_dimension_numbers<[1], [0], [0], [1], [0, 0, 1, 1], [], []>} : vector<40x32xbf16>, vector<32x96xbf16>, vector<40x96xf32> -> vector<40x96xf32>
    %458 = vector.extract_strided_slice %457 {offsets = [0, 0], sizes = [40, 32], strides = [1, 1]} : vector<40x96xf32> to vector<40x32xf32>
    %cst_183 = arith.constant 0.353553385 : f32
    %459 = vector.broadcast %cst_183 : f32 to vector<40x32xf32>
    %460 = arith.mulf %458, %459 : vector<40x32xf32>
    %461 = arith.truncf %460 : vector<40x32xf32> to vector<40x32xbf16>
    %462 = vector.extract_strided_slice %457 {offsets = [0, 32], sizes = [40, 32], strides = [1, 1]} : vector<40x96xf32> to vector<40x32xf32>
    %463 = arith.truncf %462 : vector<40x32xf32> to vector<40x32xbf16>
    %464 = vector.extract_strided_slice %457 {offsets = [0, 64], sizes = [40, 32], strides = [1, 1]} : vector<40x96xf32> to vector<40x32xf32>
    %465 = arith.truncf %464 : vector<40x32xf32> to vector<40x32xbf16>
    %c0_184 = arith.constant 0 : index
    %c0_185 = arith.constant 0 : index
    %c0_186 = arith.constant 0 : index
    %c0_187 = arith.constant 0 : index
    %466 = vector.load %arg3[%c0_184, %c0_185, %c0_186, %c0_187] : memref<1x3x40x40xf32, #tpu.memory_space<vmem>>, vector<1x1x40x40xf32>
    %467 = vector.shape_cast %466 : vector<1x1x40x40xf32> to vector<40x40xf32>
    %468 = vector.extract_strided_slice %461 {offsets = [0, 0], sizes = [40, 8], strides = [1, 1]} : vector<40x32xbf16> to vector<40x8xbf16>
    %469 = vector.extract_strided_slice %463 {offsets = [0, 0], sizes = [40, 8], strides = [1, 1]} : vector<40x32xbf16> to vector<40x8xbf16>
    %cst_188 = arith.constant dense<0.000000e+00> : vector<40x40xf32>
    %470 = tpu.matmul %468, %469, %cst_188 {dimension_numbers = #tpu.dot_dimension_numbers<[1], [1], [0], [0], [0, 0, 1, 0], [], []>} : vector<40x8xbf16>, vector<40x8xbf16>, vector<40x40xf32> -> vector<40x40xf32>
    %471 = arith.addf %470, %467 : vector<40x40xf32>
    %cst_189 = arith.constant dense<0xFF800000> : vector<40xf32>
    %472 = vector.multi_reduction <maximumf>, %471, %cst_189 [1] : vector<40x40xf32> to vector<40xf32>
    %473 = vector.shape_cast %472 : vector<40xf32> to vector<40x1xf32>
    %474 = vector.broadcast %473 : vector<40x1xf32> to vector<40x40xf32>
    %475 = arith.subf %471, %474 : vector<40x40xf32>
    %476 = math.exp %475 : vector<40x40xf32>
    %cst_190 = arith.constant dense<0.000000e+00> : vector<40xf32>
    %477 = vector.multi_reduction <add>, %476, %cst_190 [1] : vector<40x40xf32> to vector<40xf32>
    %478 = vector.shape_cast %477 : vector<40xf32> to vector<40x1xf32>
    %479 = tpu.reciprocal %478 {approx = true} : vector<40x1xf32> -> vector<40x1xf32>
    %480 = vector.broadcast %479 : vector<40x1xf32> to vector<40x40xf32>
    %481 = arith.mulf %476, %480 : vector<40x40xf32>
    %482 = arith.truncf %481 : vector<40x40xf32> to vector<40x40xbf16>
    %483 = vector.extract_strided_slice %465 {offsets = [0, 0], sizes = [40, 8], strides = [1, 1]} : vector<40x32xbf16> to vector<40x8xbf16>
    %cst_191 = arith.constant dense<0.000000e+00> : vector<40x8xf32>
    %484 = tpu.matmul %482, %483, %cst_191 {dimension_numbers = #tpu.dot_dimension_numbers<[1], [0], [0], [1], [0, 0, 1, 1], [], []>} : vector<40x40xbf16>, vector<40x8xbf16>, vector<40x8xf32> -> vector<40x8xf32>
    %485 = vector.extract_strided_slice %461 {offsets = [0, 8], sizes = [40, 8], strides = [1, 1]} : vector<40x32xbf16> to vector<40x8xbf16>
    %486 = vector.extract_strided_slice %463 {offsets = [0, 8], sizes = [40, 8], strides = [1, 1]} : vector<40x32xbf16> to vector<40x8xbf16>
    %cst_192 = arith.constant dense<0.000000e+00> : vector<40x40xf32>
    %487 = tpu.matmul %485, %486, %cst_192 {dimension_numbers = #tpu.dot_dimension_numbers<[1], [1], [0], [0], [0, 0, 1, 0], [], []>} : vector<40x8xbf16>, vector<40x8xbf16>, vector<40x40xf32> -> vector<40x40xf32>
    %488 = arith.addf %487, %467 : vector<40x40xf32>
    %cst_193 = arith.constant dense<0xFF800000> : vector<40xf32>
    %489 = vector.multi_reduction <maximumf>, %488, %cst_193 [1] : vector<40x40xf32> to vector<40xf32>
    %490 = vector.shape_cast %489 : vector<40xf32> to vector<40x1xf32>
    %491 = vector.broadcast %490 : vector<40x1xf32> to vector<40x40xf32>
    %492 = arith.subf %488, %491 : vector<40x40xf32>
    %493 = math.exp %492 : vector<40x40xf32>
    %cst_194 = arith.constant dense<0.000000e+00> : vector<40xf32>
    %494 = vector.multi_reduction <add>, %493, %cst_194 [1] : vector<40x40xf32> to vector<40xf32>
    %495 = vector.shape_cast %494 : vector<40xf32> to vector<40x1xf32>
    %496 = tpu.reciprocal %495 {approx = true} : vector<40x1xf32> -> vector<40x1xf32>
    %497 = vector.broadcast %496 : vector<40x1xf32> to vector<40x40xf32>
    %498 = arith.mulf %493, %497 : vector<40x40xf32>
    %499 = arith.truncf %498 : vector<40x40xf32> to vector<40x40xbf16>
    %500 = vector.extract_strided_slice %465 {offsets = [0, 8], sizes = [40, 8], strides = [1, 1]} : vector<40x32xbf16> to vector<40x8xbf16>
    %cst_195 = arith.constant dense<0.000000e+00> : vector<40x8xf32>
    %501 = tpu.matmul %499, %500, %cst_195 {dimension_numbers = #tpu.dot_dimension_numbers<[1], [0], [0], [1], [0, 0, 1, 1], [], []>} : vector<40x40xbf16>, vector<40x8xbf16>, vector<40x8xf32> -> vector<40x8xf32>
    %502 = vector.extract_strided_slice %461 {offsets = [0, 16], sizes = [40, 8], strides = [1, 1]} : vector<40x32xbf16> to vector<40x8xbf16>
    %503 = vector.extract_strided_slice %463 {offsets = [0, 16], sizes = [40, 8], strides = [1, 1]} : vector<40x32xbf16> to vector<40x8xbf16>
    %cst_196 = arith.constant dense<0.000000e+00> : vector<40x40xf32>
    %504 = tpu.matmul %502, %503, %cst_196 {dimension_numbers = #tpu.dot_dimension_numbers<[1], [1], [0], [0], [0, 0, 1, 0], [], []>} : vector<40x8xbf16>, vector<40x8xbf16>, vector<40x40xf32> -> vector<40x40xf32>
    %505 = arith.addf %504, %467 : vector<40x40xf32>
    %cst_197 = arith.constant dense<0xFF800000> : vector<40xf32>
    %506 = vector.multi_reduction <maximumf>, %505, %cst_197 [1] : vector<40x40xf32> to vector<40xf32>
    %507 = vector.shape_cast %506 : vector<40xf32> to vector<40x1xf32>
    %508 = vector.broadcast %507 : vector<40x1xf32> to vector<40x40xf32>
    %509 = arith.subf %505, %508 : vector<40x40xf32>
    %510 = math.exp %509 : vector<40x40xf32>
    %cst_198 = arith.constant dense<0.000000e+00> : vector<40xf32>
    %511 = vector.multi_reduction <add>, %510, %cst_198 [1] : vector<40x40xf32> to vector<40xf32>
    %512 = vector.shape_cast %511 : vector<40xf32> to vector<40x1xf32>
    %513 = tpu.reciprocal %512 {approx = true} : vector<40x1xf32> -> vector<40x1xf32>
    %514 = vector.broadcast %513 : vector<40x1xf32> to vector<40x40xf32>
    %515 = arith.mulf %510, %514 : vector<40x40xf32>
    %516 = arith.truncf %515 : vector<40x40xf32> to vector<40x40xbf16>
    %517 = vector.extract_strided_slice %465 {offsets = [0, 16], sizes = [40, 8], strides = [1, 1]} : vector<40x32xbf16> to vector<40x8xbf16>
    %cst_199 = arith.constant dense<0.000000e+00> : vector<40x8xf32>
    %518 = tpu.matmul %516, %517, %cst_199 {dimension_numbers = #tpu.dot_dimension_numbers<[1], [0], [0], [1], [0, 0, 1, 1], [], []>} : vector<40x40xbf16>, vector<40x8xbf16>, vector<40x8xf32> -> vector<40x8xf32>
    %519 = vector.extract_strided_slice %461 {offsets = [0, 24], sizes = [40, 8], strides = [1, 1]} : vector<40x32xbf16> to vector<40x8xbf16>
    %520 = vector.extract_strided_slice %463 {offsets = [0, 24], sizes = [40, 8], strides = [1, 1]} : vector<40x32xbf16> to vector<40x8xbf16>
    %cst_200 = arith.constant dense<0.000000e+00> : vector<40x40xf32>
    %521 = tpu.matmul %519, %520, %cst_200 {dimension_numbers = #tpu.dot_dimension_numbers<[1], [1], [0], [0], [0, 0, 1, 0], [], []>} : vector<40x8xbf16>, vector<40x8xbf16>, vector<40x40xf32> -> vector<40x40xf32>
    %522 = arith.addf %521, %467 : vector<40x40xf32>
    %cst_201 = arith.constant dense<0xFF800000> : vector<40xf32>
    %523 = vector.multi_reduction <maximumf>, %522, %cst_201 [1] : vector<40x40xf32> to vector<40xf32>
    %524 = vector.shape_cast %523 : vector<40xf32> to vector<40x1xf32>
    %525 = vector.broadcast %524 : vector<40x1xf32> to vector<40x40xf32>
    %526 = arith.subf %522, %525 : vector<40x40xf32>
    %527 = math.exp %526 : vector<40x40xf32>
    %cst_202 = arith.constant dense<0.000000e+00> : vector<40xf32>
    %528 = vector.multi_reduction <add>, %527, %cst_202 [1] : vector<40x40xf32> to vector<40xf32>
    %529 = vector.shape_cast %528 : vector<40xf32> to vector<40x1xf32>
    %530 = tpu.reciprocal %529 {approx = true} : vector<40x1xf32> -> vector<40x1xf32>
    %531 = vector.broadcast %530 : vector<40x1xf32> to vector<40x40xf32>
    %532 = arith.mulf %527, %531 : vector<40x40xf32>
    %533 = arith.truncf %532 : vector<40x40xf32> to vector<40x40xbf16>
    %534 = vector.extract_strided_slice %465 {offsets = [0, 24], sizes = [40, 8], strides = [1, 1]} : vector<40x32xbf16> to vector<40x8xbf16>
    %cst_203 = arith.constant dense<0.000000e+00> : vector<40x8xf32>
    %535 = tpu.matmul %533, %534, %cst_203 {dimension_numbers = #tpu.dot_dimension_numbers<[1], [0], [0], [1], [0, 0, 1, 1], [], []>} : vector<40x40xbf16>, vector<40x8xbf16>, vector<40x8xf32> -> vector<40x8xf32>
    %536 = tpu.concatenate %484, %501, %518, %535 in 1 : vector<40x8xf32>, vector<40x8xf32>, vector<40x8xf32>, vector<40x8xf32> -> vector<40x32xf32>
    %537 = arith.truncf %536 : vector<40x32xf32> to vector<40x32xbf16>
    %c1_204 = arith.constant 1 : index
    %c0_205 = arith.constant 0 : index
    %c0_206 = arith.constant 0 : index
    %c0_207 = arith.constant 0 : index
    %538 = vector.load %arg10[%c1_204, %c0_205, %c0_206, %c0_207] : memref<2x3x32x32xbf16, #tpu.memory_space<vmem>>, vector<1x1x32x32xbf16>
    %539 = vector.shape_cast %538 : vector<1x1x32x32xbf16> to vector<32x32xbf16>
    %cst_208 = arith.constant dense<0.000000e+00> : vector<40x32xf32>
    %540 = tpu.matmul %537, %539, %cst_208 {dimension_numbers = #tpu.dot_dimension_numbers<[1], [0], [0], [1], [0, 0, 1, 1], [], []>} : vector<40x32xbf16>, vector<32x32xbf16>, vector<40x32xf32> -> vector<40x32xf32>
    %c1_209 = arith.constant 1 : index
    %c0_210 = arith.constant 0 : index
    %c0_211 = arith.constant 0 : index
    %c0_212 = arith.constant 0 : index
    %541 = vector.load %arg11[%c1_209, %c0_210, %c0_211, %c0_212] : memref<2x3x1x32xf32, #tpu.memory_space<vmem>>, vector<1x1x1x32xf32>
    %542 = vector.shape_cast %541 : vector<1x1x1x32xf32> to vector<1x32xf32>
    %543 = vector.broadcast %542 : vector<1x32xf32> to vector<40x32xf32>
    %544 = arith.addf %540, %543 : vector<40x32xf32>
    %545 = arith.addf %423, %544 : vector<40x32xf32>
    %546 = vector.extract_strided_slice %429 {offsets = [0, 64], sizes = [1, 32], strides = [1, 1]} : vector<1x192xf32> to vector<1x32xf32>
    %547 = vector.extract_strided_slice %429 {offsets = [0, 96], sizes = [1, 32], strides = [1, 1]} : vector<1x192xf32> to vector<1x32xf32>
    %cst_213 = arith.constant dense<0.000000e+00> : vector<40xf32>
    %548 = vector.multi_reduction <add>, %545, %cst_213 [1] : vector<40x32xf32> to vector<40xf32>
    %549 = vector.shape_cast %548 : vector<40xf32> to vector<40x1xf32>
    %cst_214 = arith.constant 3.200000e+01 : f32
    %550 = vector.broadcast %cst_214 : f32 to vector<40x1xf32>
    %551 = arith.divf %549, %550 : vector<40x1xf32>
    %552 = vector.broadcast %551 : vector<40x1xf32> to vector<40x32xf32>
    %553 = arith.subf %545, %552 : vector<40x32xf32>
    %554 = arith.mulf %553, %553 : vector<40x32xf32>
    %cst_215 = arith.constant dense<0.000000e+00> : vector<40xf32>
    %555 = vector.multi_reduction <add>, %554, %cst_215 [1] : vector<40x32xf32> to vector<40xf32>
    %556 = vector.shape_cast %555 : vector<40xf32> to vector<40x1xf32>
    %cst_216 = arith.constant 3.200000e+01 : f32
    %557 = vector.broadcast %cst_216 : f32 to vector<40x1xf32>
    %558 = arith.divf %556, %557 : vector<40x1xf32>
    %cst_217 = arith.constant 9.99999974E-6 : f32
    %559 = vector.broadcast %cst_217 : f32 to vector<40x1xf32>
    %560 = arith.addf %558, %559 : vector<40x1xf32>
    %561 = math.rsqrt %560 : vector<40x1xf32>
    %562 = vector.broadcast %561 : vector<40x1xf32> to vector<40x32xf32>
    %563 = arith.mulf %553, %562 : vector<40x32xf32>
    %cst_218 = arith.constant 1.000000e+00 : f32
    %564 = vector.broadcast %cst_218 : f32 to vector<1x32xf32>
    %565 = arith.addf %564, %547 : vector<1x32xf32>
    %566 = vector.broadcast %565 : vector<1x32xf32> to vector<40x32xf32>
    %567 = arith.mulf %563, %566 : vector<40x32xf32>
    %568 = vector.broadcast %546 : vector<1x32xf32> to vector<40x32xf32>
    %569 = arith.addf %567, %568 : vector<40x32xf32>
    %570 = arith.truncf %569 : vector<40x32xf32> to vector<40x32xbf16>
    %c1_219 = arith.constant 1 : index
    %c1_220 = arith.constant 1 : index
    %c0_221 = arith.constant 0 : index
    %c0_222 = arith.constant 0 : index
    %571 = vector.load %arg9[%c1_219, %c1_220, %c0_221, %c0_222] : memref<2x3x32x96xbf16, #tpu.memory_space<vmem>>, vector<1x1x32x96xbf16>
    %572 = vector.shape_cast %571 : vector<1x1x32x96xbf16> to vector<32x96xbf16>
    %cst_223 = arith.constant dense<0.000000e+00> : vector<40x96xf32>
    %573 = tpu.matmul %570, %572, %cst_223 {dimension_numbers = #tpu.dot_dimension_numbers<[1], [0], [0], [1], [0, 0, 1, 1], [], []>} : vector<40x32xbf16>, vector<32x96xbf16>, vector<40x96xf32> -> vector<40x96xf32>
    %574 = vector.extract_strided_slice %573 {offsets = [0, 0], sizes = [40, 32], strides = [1, 1]} : vector<40x96xf32> to vector<40x32xf32>
    %cst_224 = arith.constant 0.353553385 : f32
    %575 = vector.broadcast %cst_224 : f32 to vector<40x32xf32>
    %576 = arith.mulf %574, %575 : vector<40x32xf32>
    %577 = arith.truncf %576 : vector<40x32xf32> to vector<40x32xbf16>
    %578 = vector.extract_strided_slice %573 {offsets = [0, 32], sizes = [40, 32], strides = [1, 1]} : vector<40x96xf32> to vector<40x32xf32>
    %579 = arith.truncf %578 : vector<40x32xf32> to vector<40x32xbf16>
    %580 = vector.extract_strided_slice %573 {offsets = [0, 64], sizes = [40, 32], strides = [1, 1]} : vector<40x96xf32> to vector<40x32xf32>
    %581 = arith.truncf %580 : vector<40x32xf32> to vector<40x32xbf16>
    %c0_225 = arith.constant 0 : index
    %c1_226 = arith.constant 1 : index
    %c0_227 = arith.constant 0 : index
    %c0_228 = arith.constant 0 : index
    %582 = vector.load %arg3[%c0_225, %c1_226, %c0_227, %c0_228] : memref<1x3x40x40xf32, #tpu.memory_space<vmem>>, vector<1x1x40x40xf32>
    %583 = vector.shape_cast %582 : vector<1x1x40x40xf32> to vector<40x40xf32>
    %584 = vector.extract_strided_slice %577 {offsets = [0, 0], sizes = [40, 8], strides = [1, 1]} : vector<40x32xbf16> to vector<40x8xbf16>
    %585 = vector.extract_strided_slice %579 {offsets = [0, 0], sizes = [40, 8], strides = [1, 1]} : vector<40x32xbf16> to vector<40x8xbf16>
    %cst_229 = arith.constant dense<0.000000e+00> : vector<40x40xf32>
    %586 = tpu.matmul %584, %585, %cst_229 {dimension_numbers = #tpu.dot_dimension_numbers<[1], [1], [0], [0], [0, 0, 1, 0], [], []>} : vector<40x8xbf16>, vector<40x8xbf16>, vector<40x40xf32> -> vector<40x40xf32>
    %587 = arith.addf %586, %583 : vector<40x40xf32>
    %cst_230 = arith.constant dense<0xFF800000> : vector<40xf32>
    %588 = vector.multi_reduction <maximumf>, %587, %cst_230 [1] : vector<40x40xf32> to vector<40xf32>
    %589 = vector.shape_cast %588 : vector<40xf32> to vector<40x1xf32>
    %590 = vector.broadcast %589 : vector<40x1xf32> to vector<40x40xf32>
    %591 = arith.subf %587, %590 : vector<40x40xf32>
    %592 = math.exp %591 : vector<40x40xf32>
    %cst_231 = arith.constant dense<0.000000e+00> : vector<40xf32>
    %593 = vector.multi_reduction <add>, %592, %cst_231 [1] : vector<40x40xf32> to vector<40xf32>
    %594 = vector.shape_cast %593 : vector<40xf32> to vector<40x1xf32>
    %595 = tpu.reciprocal %594 {approx = true} : vector<40x1xf32> -> vector<40x1xf32>
    %596 = vector.broadcast %595 : vector<40x1xf32> to vector<40x40xf32>
    %597 = arith.mulf %592, %596 : vector<40x40xf32>
    %598 = arith.truncf %597 : vector<40x40xf32> to vector<40x40xbf16>
    %599 = vector.extract_strided_slice %581 {offsets = [0, 0], sizes = [40, 8], strides = [1, 1]} : vector<40x32xbf16> to vector<40x8xbf16>
    %cst_232 = arith.constant dense<0.000000e+00> : vector<40x8xf32>
    %600 = tpu.matmul %598, %599, %cst_232 {dimension_numbers = #tpu.dot_dimension_numbers<[1], [0], [0], [1], [0, 0, 1, 1], [], []>} : vector<40x40xbf16>, vector<40x8xbf16>, vector<40x8xf32> -> vector<40x8xf32>
    %601 = vector.extract_strided_slice %577 {offsets = [0, 8], sizes = [40, 8], strides = [1, 1]} : vector<40x32xbf16> to vector<40x8xbf16>
    %602 = vector.extract_strided_slice %579 {offsets = [0, 8], sizes = [40, 8], strides = [1, 1]} : vector<40x32xbf16> to vector<40x8xbf16>
    %cst_233 = arith.constant dense<0.000000e+00> : vector<40x40xf32>
    %603 = tpu.matmul %601, %602, %cst_233 {dimension_numbers = #tpu.dot_dimension_numbers<[1], [1], [0], [0], [0, 0, 1, 0], [], []>} : vector<40x8xbf16>, vector<40x8xbf16>, vector<40x40xf32> -> vector<40x40xf32>
    %604 = arith.addf %603, %583 : vector<40x40xf32>
    %cst_234 = arith.constant dense<0xFF800000> : vector<40xf32>
    %605 = vector.multi_reduction <maximumf>, %604, %cst_234 [1] : vector<40x40xf32> to vector<40xf32>
    %606 = vector.shape_cast %605 : vector<40xf32> to vector<40x1xf32>
    %607 = vector.broadcast %606 : vector<40x1xf32> to vector<40x40xf32>
    %608 = arith.subf %604, %607 : vector<40x40xf32>
    %609 = math.exp %608 : vector<40x40xf32>
    %cst_235 = arith.constant dense<0.000000e+00> : vector<40xf32>
    %610 = vector.multi_reduction <add>, %609, %cst_235 [1] : vector<40x40xf32> to vector<40xf32>
    %611 = vector.shape_cast %610 : vector<40xf32> to vector<40x1xf32>
    %612 = tpu.reciprocal %611 {approx = true} : vector<40x1xf32> -> vector<40x1xf32>
    %613 = vector.broadcast %612 : vector<40x1xf32> to vector<40x40xf32>
    %614 = arith.mulf %609, %613 : vector<40x40xf32>
    %615 = arith.truncf %614 : vector<40x40xf32> to vector<40x40xbf16>
    %616 = vector.extract_strided_slice %581 {offsets = [0, 8], sizes = [40, 8], strides = [1, 1]} : vector<40x32xbf16> to vector<40x8xbf16>
    %cst_236 = arith.constant dense<0.000000e+00> : vector<40x8xf32>
    %617 = tpu.matmul %615, %616, %cst_236 {dimension_numbers = #tpu.dot_dimension_numbers<[1], [0], [0], [1], [0, 0, 1, 1], [], []>} : vector<40x40xbf16>, vector<40x8xbf16>, vector<40x8xf32> -> vector<40x8xf32>
    %618 = vector.extract_strided_slice %577 {offsets = [0, 16], sizes = [40, 8], strides = [1, 1]} : vector<40x32xbf16> to vector<40x8xbf16>
    %619 = vector.extract_strided_slice %579 {offsets = [0, 16], sizes = [40, 8], strides = [1, 1]} : vector<40x32xbf16> to vector<40x8xbf16>
    %cst_237 = arith.constant dense<0.000000e+00> : vector<40x40xf32>
    %620 = tpu.matmul %618, %619, %cst_237 {dimension_numbers = #tpu.dot_dimension_numbers<[1], [1], [0], [0], [0, 0, 1, 0], [], []>} : vector<40x8xbf16>, vector<40x8xbf16>, vector<40x40xf32> -> vector<40x40xf32>
    %621 = arith.addf %620, %583 : vector<40x40xf32>
    %cst_238 = arith.constant dense<0xFF800000> : vector<40xf32>
    %622 = vector.multi_reduction <maximumf>, %621, %cst_238 [1] : vector<40x40xf32> to vector<40xf32>
    %623 = vector.shape_cast %622 : vector<40xf32> to vector<40x1xf32>
    %624 = vector.broadcast %623 : vector<40x1xf32> to vector<40x40xf32>
    %625 = arith.subf %621, %624 : vector<40x40xf32>
    %626 = math.exp %625 : vector<40x40xf32>
    %cst_239 = arith.constant dense<0.000000e+00> : vector<40xf32>
    %627 = vector.multi_reduction <add>, %626, %cst_239 [1] : vector<40x40xf32> to vector<40xf32>
    %628 = vector.shape_cast %627 : vector<40xf32> to vector<40x1xf32>
    %629 = tpu.reciprocal %628 {approx = true} : vector<40x1xf32> -> vector<40x1xf32>
    %630 = vector.broadcast %629 : vector<40x1xf32> to vector<40x40xf32>
    %631 = arith.mulf %626, %630 : vector<40x40xf32>
    %632 = arith.truncf %631 : vector<40x40xf32> to vector<40x40xbf16>
    %633 = vector.extract_strided_slice %581 {offsets = [0, 16], sizes = [40, 8], strides = [1, 1]} : vector<40x32xbf16> to vector<40x8xbf16>
    %cst_240 = arith.constant dense<0.000000e+00> : vector<40x8xf32>
    %634 = tpu.matmul %632, %633, %cst_240 {dimension_numbers = #tpu.dot_dimension_numbers<[1], [0], [0], [1], [0, 0, 1, 1], [], []>} : vector<40x40xbf16>, vector<40x8xbf16>, vector<40x8xf32> -> vector<40x8xf32>
    %635 = vector.extract_strided_slice %577 {offsets = [0, 24], sizes = [40, 8], strides = [1, 1]} : vector<40x32xbf16> to vector<40x8xbf16>
    %636 = vector.extract_strided_slice %579 {offsets = [0, 24], sizes = [40, 8], strides = [1, 1]} : vector<40x32xbf16> to vector<40x8xbf16>
    %cst_241 = arith.constant dense<0.000000e+00> : vector<40x40xf32>
    %637 = tpu.matmul %635, %636, %cst_241 {dimension_numbers = #tpu.dot_dimension_numbers<[1], [1], [0], [0], [0, 0, 1, 0], [], []>} : vector<40x8xbf16>, vector<40x8xbf16>, vector<40x40xf32> -> vector<40x40xf32>
    %638 = arith.addf %637, %583 : vector<40x40xf32>
    %cst_242 = arith.constant dense<0xFF800000> : vector<40xf32>
    %639 = vector.multi_reduction <maximumf>, %638, %cst_242 [1] : vector<40x40xf32> to vector<40xf32>
    %640 = vector.shape_cast %639 : vector<40xf32> to vector<40x1xf32>
    %641 = vector.broadcast %640 : vector<40x1xf32> to vector<40x40xf32>
    %642 = arith.subf %638, %641 : vector<40x40xf32>
    %643 = math.exp %642 : vector<40x40xf32>
    %cst_243 = arith.constant dense<0.000000e+00> : vector<40xf32>
    %644 = vector.multi_reduction <add>, %643, %cst_243 [1] : vector<40x40xf32> to vector<40xf32>
    %645 = vector.shape_cast %644 : vector<40xf32> to vector<40x1xf32>
    %646 = tpu.reciprocal %645 {approx = true} : vector<40x1xf32> -> vector<40x1xf32>
    %647 = vector.broadcast %646 : vector<40x1xf32> to vector<40x40xf32>
    %648 = arith.mulf %643, %647 : vector<40x40xf32>
    %649 = arith.truncf %648 : vector<40x40xf32> to vector<40x40xbf16>
    %650 = vector.extract_strided_slice %581 {offsets = [0, 24], sizes = [40, 8], strides = [1, 1]} : vector<40x32xbf16> to vector<40x8xbf16>
    %cst_244 = arith.constant dense<0.000000e+00> : vector<40x8xf32>
    %651 = tpu.matmul %649, %650, %cst_244 {dimension_numbers = #tpu.dot_dimension_numbers<[1], [0], [0], [1], [0, 0, 1, 1], [], []>} : vector<40x40xbf16>, vector<40x8xbf16>, vector<40x8xf32> -> vector<40x8xf32>
    %652 = tpu.concatenate %600, %617, %634, %651 in 1 : vector<40x8xf32>, vector<40x8xf32>, vector<40x8xf32>, vector<40x8xf32> -> vector<40x32xf32>
    %653 = arith.truncf %652 : vector<40x32xf32> to vector<40x32xbf16>
    %c1_245 = arith.constant 1 : index
    %c1_246 = arith.constant 1 : index
    %c0_247 = arith.constant 0 : index
    %c0_248 = arith.constant 0 : index
    %654 = vector.load %arg10[%c1_245, %c1_246, %c0_247, %c0_248] : memref<2x3x32x32xbf16, #tpu.memory_space<vmem>>, vector<1x1x32x32xbf16>
    %655 = vector.shape_cast %654 : vector<1x1x32x32xbf16> to vector<32x32xbf16>
    %cst_249 = arith.constant dense<0.000000e+00> : vector<40x32xf32>
    %656 = tpu.matmul %653, %655, %cst_249 {dimension_numbers = #tpu.dot_dimension_numbers<[1], [0], [0], [1], [0, 0, 1, 1], [], []>} : vector<40x32xbf16>, vector<32x32xbf16>, vector<40x32xf32> -> vector<40x32xf32>
    %c1_250 = arith.constant 1 : index
    %c1_251 = arith.constant 1 : index
    %c0_252 = arith.constant 0 : index
    %c0_253 = arith.constant 0 : index
    %657 = vector.load %arg11[%c1_250, %c1_251, %c0_252, %c0_253] : memref<2x3x1x32xf32, #tpu.memory_space<vmem>>, vector<1x1x1x32xf32>
    %658 = vector.shape_cast %657 : vector<1x1x1x32xf32> to vector<1x32xf32>
    %659 = vector.broadcast %658 : vector<1x32xf32> to vector<40x32xf32>
    %660 = arith.addf %656, %659 : vector<40x32xf32>
    %661 = arith.addf %545, %660 : vector<40x32xf32>
    %662 = vector.extract_strided_slice %429 {offsets = [0, 128], sizes = [1, 32], strides = [1, 1]} : vector<1x192xf32> to vector<1x32xf32>
    %663 = vector.extract_strided_slice %429 {offsets = [0, 160], sizes = [1, 32], strides = [1, 1]} : vector<1x192xf32> to vector<1x32xf32>
    %cst_254 = arith.constant dense<0.000000e+00> : vector<40xf32>
    %664 = vector.multi_reduction <add>, %661, %cst_254 [1] : vector<40x32xf32> to vector<40xf32>
    %665 = vector.shape_cast %664 : vector<40xf32> to vector<40x1xf32>
    %cst_255 = arith.constant 3.200000e+01 : f32
    %666 = vector.broadcast %cst_255 : f32 to vector<40x1xf32>
    %667 = arith.divf %665, %666 : vector<40x1xf32>
    %668 = vector.broadcast %667 : vector<40x1xf32> to vector<40x32xf32>
    %669 = arith.subf %661, %668 : vector<40x32xf32>
    %670 = arith.mulf %669, %669 : vector<40x32xf32>
    %cst_256 = arith.constant dense<0.000000e+00> : vector<40xf32>
    %671 = vector.multi_reduction <add>, %670, %cst_256 [1] : vector<40x32xf32> to vector<40xf32>
    %672 = vector.shape_cast %671 : vector<40xf32> to vector<40x1xf32>
    %cst_257 = arith.constant 3.200000e+01 : f32
    %673 = vector.broadcast %cst_257 : f32 to vector<40x1xf32>
    %674 = arith.divf %672, %673 : vector<40x1xf32>
    %cst_258 = arith.constant 9.99999974E-6 : f32
    %675 = vector.broadcast %cst_258 : f32 to vector<40x1xf32>
    %676 = arith.addf %674, %675 : vector<40x1xf32>
    %677 = math.rsqrt %676 : vector<40x1xf32>
    %678 = vector.broadcast %677 : vector<40x1xf32> to vector<40x32xf32>
    %679 = arith.mulf %669, %678 : vector<40x32xf32>
    %cst_259 = arith.constant 1.000000e+00 : f32
    %680 = vector.broadcast %cst_259 : f32 to vector<1x32xf32>
    %681 = arith.addf %680, %663 : vector<1x32xf32>
    %682 = vector.broadcast %681 : vector<1x32xf32> to vector<40x32xf32>
    %683 = arith.mulf %679, %682 : vector<40x32xf32>
    %684 = vector.broadcast %662 : vector<1x32xf32> to vector<40x32xf32>
    %685 = arith.addf %683, %684 : vector<40x32xf32>
    %686 = arith.truncf %685 : vector<40x32xf32> to vector<40x32xbf16>
    %c1_260 = arith.constant 1 : index
    %c2_261 = arith.constant 2 : index
    %c0_262 = arith.constant 0 : index
    %c0_263 = arith.constant 0 : index
    %687 = vector.load %arg9[%c1_260, %c2_261, %c0_262, %c0_263] : memref<2x3x32x96xbf16, #tpu.memory_space<vmem>>, vector<1x1x32x96xbf16>
    %688 = vector.shape_cast %687 : vector<1x1x32x96xbf16> to vector<32x96xbf16>
    %cst_264 = arith.constant dense<0.000000e+00> : vector<40x96xf32>
    %689 = tpu.matmul %686, %688, %cst_264 {dimension_numbers = #tpu.dot_dimension_numbers<[1], [0], [0], [1], [0, 0, 1, 1], [], []>} : vector<40x32xbf16>, vector<32x96xbf16>, vector<40x96xf32> -> vector<40x96xf32>
    %690 = vector.extract_strided_slice %689 {offsets = [0, 0], sizes = [40, 32], strides = [1, 1]} : vector<40x96xf32> to vector<40x32xf32>
    %cst_265 = arith.constant 0.353553385 : f32
    %691 = vector.broadcast %cst_265 : f32 to vector<40x32xf32>
    %692 = arith.mulf %690, %691 : vector<40x32xf32>
    %693 = arith.truncf %692 : vector<40x32xf32> to vector<40x32xbf16>
    %694 = vector.extract_strided_slice %689 {offsets = [0, 32], sizes = [40, 32], strides = [1, 1]} : vector<40x96xf32> to vector<40x32xf32>
    %695 = arith.truncf %694 : vector<40x32xf32> to vector<40x32xbf16>
    %696 = vector.extract_strided_slice %689 {offsets = [0, 64], sizes = [40, 32], strides = [1, 1]} : vector<40x96xf32> to vector<40x32xf32>
    %697 = arith.truncf %696 : vector<40x32xf32> to vector<40x32xbf16>
    %c0_266 = arith.constant 0 : index
    %c2_267 = arith.constant 2 : index
    %c0_268 = arith.constant 0 : index
    %c0_269 = arith.constant 0 : index
    %698 = vector.load %arg3[%c0_266, %c2_267, %c0_268, %c0_269] : memref<1x3x40x40xf32, #tpu.memory_space<vmem>>, vector<1x1x40x40xf32>
    %699 = vector.shape_cast %698 : vector<1x1x40x40xf32> to vector<40x40xf32>
    %700 = vector.extract_strided_slice %693 {offsets = [0, 0], sizes = [40, 8], strides = [1, 1]} : vector<40x32xbf16> to vector<40x8xbf16>
    %701 = vector.extract_strided_slice %695 {offsets = [0, 0], sizes = [40, 8], strides = [1, 1]} : vector<40x32xbf16> to vector<40x8xbf16>
    %cst_270 = arith.constant dense<0.000000e+00> : vector<40x40xf32>
    %702 = tpu.matmul %700, %701, %cst_270 {dimension_numbers = #tpu.dot_dimension_numbers<[1], [1], [0], [0], [0, 0, 1, 0], [], []>} : vector<40x8xbf16>, vector<40x8xbf16>, vector<40x40xf32> -> vector<40x40xf32>
    %703 = arith.addf %702, %699 : vector<40x40xf32>
    %cst_271 = arith.constant dense<0xFF800000> : vector<40xf32>
    %704 = vector.multi_reduction <maximumf>, %703, %cst_271 [1] : vector<40x40xf32> to vector<40xf32>
    %705 = vector.shape_cast %704 : vector<40xf32> to vector<40x1xf32>
    %706 = vector.broadcast %705 : vector<40x1xf32> to vector<40x40xf32>
    %707 = arith.subf %703, %706 : vector<40x40xf32>
    %708 = math.exp %707 : vector<40x40xf32>
    %cst_272 = arith.constant dense<0.000000e+00> : vector<40xf32>
    %709 = vector.multi_reduction <add>, %708, %cst_272 [1] : vector<40x40xf32> to vector<40xf32>
    %710 = vector.shape_cast %709 : vector<40xf32> to vector<40x1xf32>
    %711 = tpu.reciprocal %710 {approx = true} : vector<40x1xf32> -> vector<40x1xf32>
    %712 = vector.broadcast %711 : vector<40x1xf32> to vector<40x40xf32>
    %713 = arith.mulf %708, %712 : vector<40x40xf32>
    %714 = arith.truncf %713 : vector<40x40xf32> to vector<40x40xbf16>
    %715 = vector.extract_strided_slice %697 {offsets = [0, 0], sizes = [40, 8], strides = [1, 1]} : vector<40x32xbf16> to vector<40x8xbf16>
    %cst_273 = arith.constant dense<0.000000e+00> : vector<40x8xf32>
    %716 = tpu.matmul %714, %715, %cst_273 {dimension_numbers = #tpu.dot_dimension_numbers<[1], [0], [0], [1], [0, 0, 1, 1], [], []>} : vector<40x40xbf16>, vector<40x8xbf16>, vector<40x8xf32> -> vector<40x8xf32>
    %717 = vector.extract_strided_slice %693 {offsets = [0, 8], sizes = [40, 8], strides = [1, 1]} : vector<40x32xbf16> to vector<40x8xbf16>
    %718 = vector.extract_strided_slice %695 {offsets = [0, 8], sizes = [40, 8], strides = [1, 1]} : vector<40x32xbf16> to vector<40x8xbf16>
    %cst_274 = arith.constant dense<0.000000e+00> : vector<40x40xf32>
    %719 = tpu.matmul %717, %718, %cst_274 {dimension_numbers = #tpu.dot_dimension_numbers<[1], [1], [0], [0], [0, 0, 1, 0], [], []>} : vector<40x8xbf16>, vector<40x8xbf16>, vector<40x40xf32> -> vector<40x40xf32>
    %720 = arith.addf %719, %699 : vector<40x40xf32>
    %cst_275 = arith.constant dense<0xFF800000> : vector<40xf32>
    %721 = vector.multi_reduction <maximumf>, %720, %cst_275 [1] : vector<40x40xf32> to vector<40xf32>
    %722 = vector.shape_cast %721 : vector<40xf32> to vector<40x1xf32>
    %723 = vector.broadcast %722 : vector<40x1xf32> to vector<40x40xf32>
    %724 = arith.subf %720, %723 : vector<40x40xf32>
    %725 = math.exp %724 : vector<40x40xf32>
    %cst_276 = arith.constant dense<0.000000e+00> : vector<40xf32>
    %726 = vector.multi_reduction <add>, %725, %cst_276 [1] : vector<40x40xf32> to vector<40xf32>
    %727 = vector.shape_cast %726 : vector<40xf32> to vector<40x1xf32>
    %728 = tpu.reciprocal %727 {approx = true} : vector<40x1xf32> -> vector<40x1xf32>
    %729 = vector.broadcast %728 : vector<40x1xf32> to vector<40x40xf32>
    %730 = arith.mulf %725, %729 : vector<40x40xf32>
    %731 = arith.truncf %730 : vector<40x40xf32> to vector<40x40xbf16>
    %732 = vector.extract_strided_slice %697 {offsets = [0, 8], sizes = [40, 8], strides = [1, 1]} : vector<40x32xbf16> to vector<40x8xbf16>
    %cst_277 = arith.constant dense<0.000000e+00> : vector<40x8xf32>
    %733 = tpu.matmul %731, %732, %cst_277 {dimension_numbers = #tpu.dot_dimension_numbers<[1], [0], [0], [1], [0, 0, 1, 1], [], []>} : vector<40x40xbf16>, vector<40x8xbf16>, vector<40x8xf32> -> vector<40x8xf32>
    %734 = vector.extract_strided_slice %693 {offsets = [0, 16], sizes = [40, 8], strides = [1, 1]} : vector<40x32xbf16> to vector<40x8xbf16>
    %735 = vector.extract_strided_slice %695 {offsets = [0, 16], sizes = [40, 8], strides = [1, 1]} : vector<40x32xbf16> to vector<40x8xbf16>
    %cst_278 = arith.constant dense<0.000000e+00> : vector<40x40xf32>
    %736 = tpu.matmul %734, %735, %cst_278 {dimension_numbers = #tpu.dot_dimension_numbers<[1], [1], [0], [0], [0, 0, 1, 0], [], []>} : vector<40x8xbf16>, vector<40x8xbf16>, vector<40x40xf32> -> vector<40x40xf32>
    %737 = arith.addf %736, %699 : vector<40x40xf32>
    %cst_279 = arith.constant dense<0xFF800000> : vector<40xf32>
    %738 = vector.multi_reduction <maximumf>, %737, %cst_279 [1] : vector<40x40xf32> to vector<40xf32>
    %739 = vector.shape_cast %738 : vector<40xf32> to vector<40x1xf32>
    %740 = vector.broadcast %739 : vector<40x1xf32> to vector<40x40xf32>
    %741 = arith.subf %737, %740 : vector<40x40xf32>
    %742 = math.exp %741 : vector<40x40xf32>
    %cst_280 = arith.constant dense<0.000000e+00> : vector<40xf32>
    %743 = vector.multi_reduction <add>, %742, %cst_280 [1] : vector<40x40xf32> to vector<40xf32>
    %744 = vector.shape_cast %743 : vector<40xf32> to vector<40x1xf32>
    %745 = tpu.reciprocal %744 {approx = true} : vector<40x1xf32> -> vector<40x1xf32>
    %746 = vector.broadcast %745 : vector<40x1xf32> to vector<40x40xf32>
    %747 = arith.mulf %742, %746 : vector<40x40xf32>
    %748 = arith.truncf %747 : vector<40x40xf32> to vector<40x40xbf16>
    %749 = vector.extract_strided_slice %697 {offsets = [0, 16], sizes = [40, 8], strides = [1, 1]} : vector<40x32xbf16> to vector<40x8xbf16>
    %cst_281 = arith.constant dense<0.000000e+00> : vector<40x8xf32>
    %750 = tpu.matmul %748, %749, %cst_281 {dimension_numbers = #tpu.dot_dimension_numbers<[1], [0], [0], [1], [0, 0, 1, 1], [], []>} : vector<40x40xbf16>, vector<40x8xbf16>, vector<40x8xf32> -> vector<40x8xf32>
    %751 = vector.extract_strided_slice %693 {offsets = [0, 24], sizes = [40, 8], strides = [1, 1]} : vector<40x32xbf16> to vector<40x8xbf16>
    %752 = vector.extract_strided_slice %695 {offsets = [0, 24], sizes = [40, 8], strides = [1, 1]} : vector<40x32xbf16> to vector<40x8xbf16>
    %cst_282 = arith.constant dense<0.000000e+00> : vector<40x40xf32>
    %753 = tpu.matmul %751, %752, %cst_282 {dimension_numbers = #tpu.dot_dimension_numbers<[1], [1], [0], [0], [0, 0, 1, 0], [], []>} : vector<40x8xbf16>, vector<40x8xbf16>, vector<40x40xf32> -> vector<40x40xf32>
    %754 = arith.addf %753, %699 : vector<40x40xf32>
    %cst_283 = arith.constant dense<0xFF800000> : vector<40xf32>
    %755 = vector.multi_reduction <maximumf>, %754, %cst_283 [1] : vector<40x40xf32> to vector<40xf32>
    %756 = vector.shape_cast %755 : vector<40xf32> to vector<40x1xf32>
    %757 = vector.broadcast %756 : vector<40x1xf32> to vector<40x40xf32>
    %758 = arith.subf %754, %757 : vector<40x40xf32>
    %759 = math.exp %758 : vector<40x40xf32>
    %cst_284 = arith.constant dense<0.000000e+00> : vector<40xf32>
    %760 = vector.multi_reduction <add>, %759, %cst_284 [1] : vector<40x40xf32> to vector<40xf32>
    %761 = vector.shape_cast %760 : vector<40xf32> to vector<40x1xf32>
    %762 = tpu.reciprocal %761 {approx = true} : vector<40x1xf32> -> vector<40x1xf32>
    %763 = vector.broadcast %762 : vector<40x1xf32> to vector<40x40xf32>
    %764 = arith.mulf %759, %763 : vector<40x40xf32>
    %765 = arith.truncf %764 : vector<40x40xf32> to vector<40x40xbf16>
    %766 = vector.extract_strided_slice %697 {offsets = [0, 24], sizes = [40, 8], strides = [1, 1]} : vector<40x32xbf16> to vector<40x8xbf16>
    %cst_285 = arith.constant dense<0.000000e+00> : vector<40x8xf32>
    %767 = tpu.matmul %765, %766, %cst_285 {dimension_numbers = #tpu.dot_dimension_numbers<[1], [0], [0], [1], [0, 0, 1, 1], [], []>} : vector<40x40xbf16>, vector<40x8xbf16>, vector<40x8xf32> -> vector<40x8xf32>
    %768 = tpu.concatenate %716, %733, %750, %767 in 1 : vector<40x8xf32>, vector<40x8xf32>, vector<40x8xf32>, vector<40x8xf32> -> vector<40x32xf32>
    %769 = arith.truncf %768 : vector<40x32xf32> to vector<40x32xbf16>
    %c1_286 = arith.constant 1 : index
    %c2_287 = arith.constant 2 : index
    %c0_288 = arith.constant 0 : index
    %c0_289 = arith.constant 0 : index
    %770 = vector.load %arg10[%c1_286, %c2_287, %c0_288, %c0_289] : memref<2x3x32x32xbf16, #tpu.memory_space<vmem>>, vector<1x1x32x32xbf16>
    %771 = vector.shape_cast %770 : vector<1x1x32x32xbf16> to vector<32x32xbf16>
    %cst_290 = arith.constant dense<0.000000e+00> : vector<40x32xf32>
    %772 = tpu.matmul %769, %771, %cst_290 {dimension_numbers = #tpu.dot_dimension_numbers<[1], [0], [0], [1], [0, 0, 1, 1], [], []>} : vector<40x32xbf16>, vector<32x32xbf16>, vector<40x32xf32> -> vector<40x32xf32>
    %c1_291 = arith.constant 1 : index
    %c2_292 = arith.constant 2 : index
    %c0_293 = arith.constant 0 : index
    %c0_294 = arith.constant 0 : index
    %773 = vector.load %arg11[%c1_291, %c2_292, %c0_293, %c0_294] : memref<2x3x1x32xf32, #tpu.memory_space<vmem>>, vector<1x1x1x32xf32>
    %774 = vector.shape_cast %773 : vector<1x1x1x32xf32> to vector<1x32xf32>
    %775 = vector.broadcast %774 : vector<1x32xf32> to vector<40x32xf32>
    %776 = arith.addf %772, %775 : vector<40x32xf32>
    %777 = arith.addf %661, %776 : vector<40x32xf32>
    %c1_295 = arith.constant 1 : index
    %c0_296 = arith.constant 0 : index
    %c0_297 = arith.constant 0 : index
    %778 = vector.load %arg12[%c1_295, %c0_296, %c0_297] : memref<2x2x32xf32, #tpu.memory_space<vmem>>, vector<1x2x32xf32>
    %779 = vector.shape_cast %778 : vector<1x2x32xf32> to vector<2x32xf32>
    %cst_298 = arith.constant dense<0.000000e+00> : vector<40xf32>
    %780 = vector.multi_reduction <add>, %777, %cst_298 [1] : vector<40x32xf32> to vector<40xf32>
    %781 = vector.shape_cast %780 : vector<40xf32> to vector<40x1xf32>
    %cst_299 = arith.constant 3.200000e+01 : f32
    %782 = vector.broadcast %cst_299 : f32 to vector<40x1xf32>
    %783 = arith.divf %781, %782 : vector<40x1xf32>
    %784 = vector.broadcast %783 : vector<40x1xf32> to vector<40x32xf32>
    %785 = arith.subf %777, %784 : vector<40x32xf32>
    %786 = arith.mulf %785, %785 : vector<40x32xf32>
    %cst_300 = arith.constant dense<0.000000e+00> : vector<40xf32>
    %787 = vector.multi_reduction <add>, %786, %cst_300 [1] : vector<40x32xf32> to vector<40xf32>
    %788 = vector.shape_cast %787 : vector<40xf32> to vector<40x1xf32>
    %cst_301 = arith.constant 3.200000e+01 : f32
    %789 = vector.broadcast %cst_301 : f32 to vector<40x1xf32>
    %790 = arith.divf %788, %789 : vector<40x1xf32>
    %cst_302 = arith.constant 9.99999974E-6 : f32
    %791 = vector.broadcast %cst_302 : f32 to vector<40x1xf32>
    %792 = arith.addf %790, %791 : vector<40x1xf32>
    %793 = math.rsqrt %792 : vector<40x1xf32>
    %794 = vector.broadcast %793 : vector<40x1xf32> to vector<40x32xf32>
    %795 = arith.mulf %785, %794 : vector<40x32xf32>
    %796 = vector.extract_strided_slice %779 {offsets = [0, 0], sizes = [1, 32], strides = [1, 1]} : vector<2x32xf32> to vector<1x32xf32>
    %797 = vector.broadcast %796 : vector<1x32xf32> to vector<40x32xf32>
    %798 = arith.mulf %795, %797 : vector<40x32xf32>
    %799 = vector.extract_strided_slice %779 {offsets = [1, 0], sizes = [1, 32], strides = [1, 1]} : vector<2x32xf32> to vector<1x32xf32>
    %800 = vector.broadcast %799 : vector<1x32xf32> to vector<40x32xf32>
    %801 = arith.addf %798, %800 : vector<40x32xf32>
    %802 = arith.truncf %801 : vector<40x32xf32> to vector<40x32xbf16>
    %c1_303 = arith.constant 1 : index
    %c0_304 = arith.constant 0 : index
    %c0_305 = arith.constant 0 : index
    %803 = vector.load %arg13[%c1_303, %c0_304, %c0_305] : memref<2x32x256xbf16, #tpu.memory_space<vmem>>, vector<1x32x256xbf16>
    %804 = vector.shape_cast %803 : vector<1x32x256xbf16> to vector<32x256xbf16>
    %cst_306 = arith.constant dense<0.000000e+00> : vector<40x256xf32>
    %805 = tpu.matmul %802, %804, %cst_306 {dimension_numbers = #tpu.dot_dimension_numbers<[1], [0], [0], [1], [0, 0, 1, 1], [], []>} : vector<40x32xbf16>, vector<32x256xbf16>, vector<40x256xf32> -> vector<40x256xf32>
    %c1_307 = arith.constant 1 : index
    %c0_308 = arith.constant 0 : index
    %c0_309 = arith.constant 0 : index
    %806 = vector.load %arg14[%c1_307, %c0_308, %c0_309] : memref<2x1x256xf32, #tpu.memory_space<vmem>>, vector<1x1x256xf32>
    %807 = vector.shape_cast %806 : vector<1x1x256xf32> to vector<1x256xf32>
    %808 = vector.broadcast %807 : vector<1x256xf32> to vector<40x256xf32>
    %809 = arith.addf %805, %808 : vector<40x256xf32>
    %810 = vector.extract_strided_slice %809 {offsets = [0, 0], sizes = [40, 128], strides = [1, 1]} : vector<40x256xf32> to vector<40x128xf32>
    %811 = vector.extract_strided_slice %809 {offsets = [0, 128], sizes = [40, 128], strides = [1, 1]} : vector<40x256xf32> to vector<40x128xf32>
    %812 = arith.mulf %811, %811 : vector<40x128xf32>
    %813 = arith.mulf %811, %812 : vector<40x128xf32>
    %cst_310 = arith.constant 4.471500e-02 : f32
    %814 = vector.broadcast %cst_310 : f32 to vector<40x128xf32>
    %815 = arith.mulf %814, %813 : vector<40x128xf32>
    %816 = arith.addf %811, %815 : vector<40x128xf32>
    %cst_311 = arith.constant 0.797884583 : f32
    %817 = vector.broadcast %cst_311 : f32 to vector<40x128xf32>
    %818 = arith.mulf %817, %816 : vector<40x128xf32>
    %819 = math.tanh %818 : vector<40x128xf32>
    %cst_312 = arith.constant 1.000000e+00 : f32
    %820 = vector.broadcast %cst_312 : f32 to vector<40x128xf32>
    %821 = arith.addf %820, %819 : vector<40x128xf32>
    %cst_313 = arith.constant 5.000000e-01 : f32
    %822 = vector.broadcast %cst_313 : f32 to vector<40x128xf32>
    %823 = arith.mulf %822, %821 : vector<40x128xf32>
    %824 = arith.mulf %811, %823 : vector<40x128xf32>
    %825 = arith.mulf %810, %824 : vector<40x128xf32>
    %826 = arith.truncf %825 : vector<40x128xf32> to vector<40x128xbf16>
    %c1_314 = arith.constant 1 : index
    %c0_315 = arith.constant 0 : index
    %c0_316 = arith.constant 0 : index
    %827 = vector.load %arg15[%c1_314, %c0_315, %c0_316] : memref<2x128x32xbf16, #tpu.memory_space<vmem>>, vector<1x128x32xbf16>
    %828 = vector.shape_cast %827 : vector<1x128x32xbf16> to vector<128x32xbf16>
    %cst_317 = arith.constant dense<0.000000e+00> : vector<40x32xf32>
    %829 = tpu.matmul %826, %828, %cst_317 {dimension_numbers = #tpu.dot_dimension_numbers<[1], [0], [0], [1], [0, 0, 1, 1], [], []>} : vector<40x128xbf16>, vector<128x32xbf16>, vector<40x32xf32> -> vector<40x32xf32>
    %c1_318 = arith.constant 1 : index
    %c0_319 = arith.constant 0 : index
    %c0_320 = arith.constant 0 : index
    %830 = vector.load %arg16[%c1_318, %c0_319, %c0_320] : memref<2x1x32xf32, #tpu.memory_space<vmem>>, vector<1x1x32xf32>
    %831 = vector.shape_cast %830 : vector<1x1x32xf32> to vector<1x32xf32>
    %832 = vector.broadcast %831 : vector<1x32xf32> to vector<40x32xf32>
    %833 = arith.addf %829, %832 : vector<40x32xf32>
    %834 = arith.addf %777, %833 : vector<40x32xf32>
    %c0_321 = arith.constant 0 : index
    %c0_322 = arith.constant 0 : index
    %835 = vector.load %arg17[%c0_321, %c0_322] : memref<32x64xbf16, #tpu.memory_space<vmem>>, vector<32x64xbf16>
    %cst_323 = arith.constant dense<0.000000e+00> : vector<1x64xf32>
    %836 = tpu.matmul %12, %835, %cst_323 {dimension_numbers = #tpu.dot_dimension_numbers<[1], [0], [0], [1], [0, 0, 1, 1], [], []>} : vector<1x32xbf16>, vector<32x64xbf16>, vector<1x64xf32> -> vector<1x64xf32>
    %c0_324 = arith.constant 0 : index
    %c0_325 = arith.constant 0 : index
    %837 = vector.load %arg18[%c0_324, %c0_325] : memref<1x64xf32, #tpu.memory_space<vmem>>, vector<1x64xf32>
    %838 = arith.addf %836, %837 : vector<1x64xf32>
    %cst_326 = arith.constant dense<0.000000e+00> : vector<40xf32>
    %839 = vector.multi_reduction <add>, %834, %cst_326 [1] : vector<40x32xf32> to vector<40xf32>
    %840 = vector.shape_cast %839 : vector<40xf32> to vector<40x1xf32>
    %cst_327 = arith.constant 3.200000e+01 : f32
    %841 = vector.broadcast %cst_327 : f32 to vector<40x1xf32>
    %842 = arith.divf %840, %841 : vector<40x1xf32>
    %843 = vector.broadcast %842 : vector<40x1xf32> to vector<40x32xf32>
    %844 = arith.subf %834, %843 : vector<40x32xf32>
    %845 = arith.mulf %844, %844 : vector<40x32xf32>
    %cst_328 = arith.constant dense<0.000000e+00> : vector<40xf32>
    %846 = vector.multi_reduction <add>, %845, %cst_328 [1] : vector<40x32xf32> to vector<40xf32>
    %847 = vector.shape_cast %846 : vector<40xf32> to vector<40x1xf32>
    %cst_329 = arith.constant 3.200000e+01 : f32
    %848 = vector.broadcast %cst_329 : f32 to vector<40x1xf32>
    %849 = arith.divf %847, %848 : vector<40x1xf32>
    %cst_330 = arith.constant 9.99999974E-6 : f32
    %850 = vector.broadcast %cst_330 : f32 to vector<40x1xf32>
    %851 = arith.addf %849, %850 : vector<40x1xf32>
    %852 = math.rsqrt %851 : vector<40x1xf32>
    %853 = vector.broadcast %852 : vector<40x1xf32> to vector<40x32xf32>
    %854 = arith.mulf %844, %853 : vector<40x32xf32>
    %855 = vector.extract_strided_slice %838 {offsets = [0, 32], sizes = [1, 32], strides = [1, 1]} : vector<1x64xf32> to vector<1x32xf32>
    %cst_331 = arith.constant 1.000000e+00 : f32
    %856 = vector.broadcast %cst_331 : f32 to vector<1x32xf32>
    %857 = arith.addf %856, %855 : vector<1x32xf32>
    %858 = vector.broadcast %857 : vector<1x32xf32> to vector<40x32xf32>
    %859 = arith.mulf %854, %858 : vector<40x32xf32>
    %860 = vector.extract_strided_slice %838 {offsets = [0, 0], sizes = [1, 32], strides = [1, 1]} : vector<1x64xf32> to vector<1x32xf32>
    %861 = vector.broadcast %860 : vector<1x32xf32> to vector<40x32xf32>
    %862 = arith.addf %859, %861 : vector<40x32xf32>
    %863 = arith.truncf %862 : vector<40x32xf32> to vector<40x32xbf16>
    %c0_332 = arith.constant 0 : index
    %c0_333 = arith.constant 0 : index
    %864 = vector.load %arg19[%c0_332, %c0_333] : memref<32x6xbf16, #tpu.memory_space<vmem>>, vector<32x6xbf16>
    %cst_334 = arith.constant dense<0.000000e+00> : vector<40x6xf32>
    %865 = tpu.matmul %863, %864, %cst_334 {dimension_numbers = #tpu.dot_dimension_numbers<[1], [0], [0], [1], [0, 0, 1, 1], [], []>} : vector<40x32xbf16>, vector<32x6xbf16>, vector<40x6xf32> -> vector<40x6xf32>
    %c0_335 = arith.constant 0 : index
    %c0_336 = arith.constant 0 : index
    %866 = vector.load %arg20[%c0_335, %c0_336] : memref<1x6xf32, #tpu.memory_space<vmem>>, vector<1x6xf32>
    %867 = vector.broadcast %866 : vector<1x6xf32> to vector<40x6xf32>
    %868 = arith.addf %865, %867 : vector<40x6xf32>
    %c0_337 = arith.constant 0 : index
    %c0_338 = arith.constant 0 : index
    %c0_339 = arith.constant 0 : index
    %869 = vector.load %arg21[%c0_337, %c0_338, %c0_339] : memref<1x40x6xf32, #tpu.memory_space<vmem>>, vector<1x40x6xf32>
    %870 = vector.shape_cast %869 : vector<1x40x6xf32> to vector<40x6xf32>
    %871 = vector.shape_cast %868 : vector<40x6xf32> to vector<1x40x6xf32>
    tpu.vector_store %arg21[%c0_337, %c0_338, %c0_339], %871 {strides = array<i32>} : memref<1x40x6xf32, #tpu.memory_space<vmem>>, vector<1x40x6xf32>,
    return
  }
  func.func @transform_0(%arg0: i32) -> (i32, i32, i32) {
    %c0_i32 = arith.constant 0 : i32
    %c0_i32_0 = arith.constant 0 : i32
    %c0_i32_1 = arith.constant 0 : i32
    return %arg0, %c0_i32, %c0_i32_0 : i32, i32, i32
  }
  func.func @transform_1(%arg0: i32) -> (i32, i32, i32) {
    %c0_i32 = arith.constant 0 : i32
    %c0_i32_0 = arith.constant 0 : i32
    %c0_i32_1 = arith.constant 0 : i32
    return %arg0, %c0_i32, %c0_i32_0 : i32, i32, i32
  }
  func.func @transform_2(%arg0: i32) -> (i32, i32, i32, i32) {
    %c0_i32 = arith.constant 0 : i32
    %c0_i32_0 = arith.constant 0 : i32
    %c0_i32_1 = arith.constant 0 : i32
    %c0_i32_2 = arith.constant 0 : i32
    return %arg0, %c0_i32, %c0_i32_0, %c0_i32_1 : i32, i32, i32, i32
  }
  func.func @transform_3(%arg0: i32) -> (i32, i32) {
    %c0_i32 = arith.constant 0 : i32
    %c0_i32_0 = arith.constant 0 : i32
    %c0_i32_1 = arith.constant 0 : i32
    return %c0_i32, %c0_i32_0 : i32, i32
  }
  func.func @transform_4(%arg0: i32) -> (i32, i32) {
    %c0_i32 = arith.constant 0 : i32
    %c0_i32_0 = arith.constant 0 : i32
    %c0_i32_1 = arith.constant 0 : i32
    return %c0_i32, %c0_i32_0 : i32, i32
  }
  func.func @transform_5(%arg0: i32) -> (i32, i32) {
    %c0_i32 = arith.constant 0 : i32
    %c0_i32_0 = arith.constant 0 : i32
    %c0_i32_1 = arith.constant 0 : i32
    return %c0_i32, %c0_i32_0 : i32, i32
  }
  func.func @transform_6(%arg0: i32) -> (i32, i32, i32) {
    %c0_i32 = arith.constant 0 : i32
    %c0_i32_0 = arith.constant 0 : i32
    %c0_i32_1 = arith.constant 0 : i32
    %c0_i32_2 = arith.constant 0 : i32
    return %c0_i32, %c0_i32_0, %c0_i32_1 : i32, i32, i32
  }
  func.func @transform_7(%arg0: i32) -> (i32, i32, i32) {
    %c0_i32 = arith.constant 0 : i32
    %c0_i32_0 = arith.constant 0 : i32
    %c0_i32_1 = arith.constant 0 : i32
    %c0_i32_2 = arith.constant 0 : i32
    return %c0_i32, %c0_i32_0, %c0_i32_1 : i32, i32, i32
  }
  func.func @transform_8(%arg0: i32) -> (i32, i32, i32, i32) {
    %c0_i32 = arith.constant 0 : i32
    %c0_i32_0 = arith.constant 0 : i32
    %c0_i32_1 = arith.constant 0 : i32
    %c0_i32_2 = arith.constant 0 : i32
    %c0_i32_3 = arith.constant 0 : i32
    return %c0_i32, %c0_i32_0, %c0_i32_1, %c0_i32_2 : i32, i32, i32, i32
  }
  func.func @transform_9(%arg0: i32) -> (i32, i32, i32, i32) {
    %c0_i32 = arith.constant 0 : i32
    %c0_i32_0 = arith.constant 0 : i32
    %c0_i32_1 = arith.constant 0 : i32
    %c0_i32_2 = arith.constant 0 : i32
    %c0_i32_3 = arith.constant 0 : i32
    return %c0_i32, %c0_i32_0, %c0_i32_1, %c0_i32_2 : i32, i32, i32, i32
  }
  func.func @transform_10(%arg0: i32) -> (i32, i32, i32, i32) {
    %c0_i32 = arith.constant 0 : i32
    %c0_i32_0 = arith.constant 0 : i32
    %c0_i32_1 = arith.constant 0 : i32
    %c0_i32_2 = arith.constant 0 : i32
    %c0_i32_3 = arith.constant 0 : i32
    return %c0_i32, %c0_i32_0, %c0_i32_1, %c0_i32_2 : i32, i32, i32, i32
  }
  func.func @transform_11(%arg0: i32) -> (i32, i32, i32) {
    %c0_i32 = arith.constant 0 : i32
    %c0_i32_0 = arith.constant 0 : i32
    %c0_i32_1 = arith.constant 0 : i32
    %c0_i32_2 = arith.constant 0 : i32
    return %c0_i32, %c0_i32_0, %c0_i32_1 : i32, i32, i32
  }
  func.func @transform_12(%arg0: i32) -> (i32, i32, i32) {
    %c0_i32 = arith.constant 0 : i32
    %c0_i32_0 = arith.constant 0 : i32
    %c0_i32_1 = arith.constant 0 : i32
    %c0_i32_2 = arith.constant 0 : i32
    return %c0_i32, %c0_i32_0, %c0_i32_1 : i32, i32, i32
  }
  func.func @transform_13(%arg0: i32) -> (i32, i32, i32) {
    %c0_i32 = arith.constant 0 : i32
    %c0_i32_0 = arith.constant 0 : i32
    %c0_i32_1 = arith.constant 0 : i32
    %c0_i32_2 = arith.constant 0 : i32
    return %c0_i32, %c0_i32_0, %c0_i32_1 : i32, i32, i32
  }
  func.func @transform_14(%arg0: i32) -> (i32, i32, i32) {
    %c0_i32 = arith.constant 0 : i32
    %c0_i32_0 = arith.constant 0 : i32
    %c0_i32_1 = arith.constant 0 : i32
    %c0_i32_2 = arith.constant 0 : i32
    return %c0_i32, %c0_i32_0, %c0_i32_1 : i32, i32, i32
  }
  func.func @transform_15(%arg0: i32) -> (i32, i32, i32) {
    %c0_i32 = arith.constant 0 : i32
    %c0_i32_0 = arith.constant 0 : i32
    %c0_i32_1 = arith.constant 0 : i32
    %c0_i32_2 = arith.constant 0 : i32
    return %c0_i32, %c0_i32_0, %c0_i32_1 : i32, i32, i32
  }
  func.func @transform_16(%arg0: i32) -> (i32, i32) {
    %c0_i32 = arith.constant 0 : i32
    %c0_i32_0 = arith.constant 0 : i32
    %c0_i32_1 = arith.constant 0 : i32
    return %c0_i32, %c0_i32_0 : i32, i32
  }
  func.func @transform_17(%arg0: i32) -> (i32, i32) {
    %c0_i32 = arith.constant 0 : i32
    %c0_i32_0 = arith.constant 0 : i32
    %c0_i32_1 = arith.constant 0 : i32
    return %c0_i32, %c0_i32_0 : i32, i32
  }
  func.func @transform_18(%arg0: i32) -> (i32, i32) {
    %c0_i32 = arith.constant 0 : i32
    %c0_i32_0 = arith.constant 0 : i32
    %c0_i32_1 = arith.constant 0 : i32
    return %c0_i32, %c0_i32_0 : i32, i32
  }
  func.func @transform_19(%arg0: i32) -> (i32, i32) {
    %c0_i32 = arith.constant 0 : i32
    %c0_i32_0 = arith.constant 0 : i32
    %c0_i32_1 = arith.constant 0 : i32
    return %c0_i32, %c0_i32_0 : i32, i32
  }
  func.func @transform_20(%arg0: i32) -> (i32, i32, i32) {
    %c0_i32 = arith.constant 0 : i32
    %c0_i32_0 = arith.constant 0 : i32
    %c0_i32_1 = arith.constant 0 : i32
    return %arg0, %c0_i32, %c0_i32_0 : i32, i32, i32
  }
}

</mosaic_0001>

<bundles_post_ra>
// kernel: eq.8
= control target key start
LH: loop header
LB: loop body
LE: loop exit
PB: predicated region body
PF: predicated region fallthrough
CT: control target
= control target key end

     0   :  { %s67_s10 = smov 35   ;;  %s68_s11 = smov 25   ;;  %vm3_vm0 = vcmask 39936   ;;  %vm9_vm1 = vcmask 326936   ;;  %vm15_vm2 = vcmask 285936   ;;  %vm21_vm3 = vcmask 244936   ;;  %s111_s0 = inlined_call_operand.vmem [shape: s32[8,5], index: 0, kind: input, shape index: {}]   ;;  %s112_s1 = inlined_call_operand.vmem [shape: s32[40], index: 1, kind: output, shape index: {}]  }
   0x1   :  { %v53_v0 = vld [vmem:[%s111_s0 + $0x7] sm:$0x1]   ;;  %v55_v1 = vld [vmem:[%s111_s0 + $0x5] sm:$0x1]   ;;  %v54_v2 = vld [vmem:[%s111_s0 + $0x6] sm:$0x1]  }
   0x2   :  { %7 = vrot.lane.b32.xlu0 %v53_v0, %s67_s10  ;;  %19 = vrot.lane.b32.xlu1 %v55_v1, %s68_s11  ;;  %v56_v3 = vld [vmem:[%s111_s0 + $0x4] sm:$0x1]   ;;  %v2_v4 = vld [vmem:[%s111_s0] sm:$0x1]   ;;  %s69_s18 = smov 30   ;;  %s70_s19 = smov 20  }
   0x3   :  { %4 = vst.msk [vmem:[#allocation0] sm:$0x1] %vm3_vm0, %v2_v4   ;;  %v57_v5 = vld [vmem:[%s111_s0 + $0x3] sm:$0x1]   ;;  %v58_v6 = vld [vmem:[%s111_s0 + $0x2] sm:$0x1]  }
   0x4   :  { %s71_s24 = smov 15   ;;  %s72_s25 = smov 10   ;;  %v59_v7 = vld [vmem:[%s111_s0 + $0x1] sm:$0x1]   ;;  %vm27_vm4 = vcmask 203936   ;;  %vm33_vm5 = vcmask 162936  }
   0x5   :  { %s73_s0 = smov 5   ;;  %vm39_vm6 = vcmask 121936   ;;  %vm45_vm7 = vcmask 80936  }
   0x6   :  { %13 = vrot.lane.b32.xlu0 %v54_v2, %s69_s18  ;;  %25 = vrot.lane.b32.xlu1 %v56_v3, %s70_s19 }
   0xa   :  { %31 = vrot.lane.b32.xlu0 %v57_v5, %s71_s24  ;;  %37 = vrot.lane.b32.xlu1 %v58_v6, %s72_s25 }
   0xe   :  { %43 = vrot.lane.b32.xlu0 %v59_v7, %s73_s0 }
  0x74   :  { %v8_v8 = vpop.permute.xlu0 %7   ;;  %v20_v9 = vpop.permute.xlu1 %19  }
  0x75   :  { %10 = vst.msk [vmem:[#allocation0] sm:$0x1] %vm9_vm1, %v8_v8  }
  0x78   :  { %v14_v10 = vpop.permute.xlu0 %13   ;;  %v26_v11 = vpop.permute.xlu1 %25  }
  0x79   :  { %16 = vst.msk [vmem:[#allocation0] sm:$0x1] %vm15_vm2, %v14_v10  }
  0x7a   :  { %22 = vst.msk [vmem:[#allocation0] sm:$0x1] %vm21_vm3, %v20_v9  }
  0x7b   :  { %28 = vst.msk [vmem:[#allocation0] sm:$0x1] %vm27_vm4, %v26_v11  }
  0x7c   :  { %v32_v12 = vpop.permute.xlu0 %31   ;;  %v38_v13 = vpop.permute.xlu1 %37  }
  0x7d   :  { %34 = vst.msk [vmem:[#allocation0] sm:$0x1] %vm33_vm5, %v32_v12  }
  0x7e   :  { %40 = vst.msk [vmem:[#allocation0] sm:$0x1] %vm39_vm6, %v38_v13  }
  0x80   :  { %v44_v14 = vpop.permute.xlu0 %43  }
  0x81   :  { %46 = vst.msk [vmem:[#allocation0] sm:$0x1] %vm45_vm7, %v44_v14  }
  0x88   :  { %v50_v15 = vld [vmem:[#allocation0] sm:$0x1] }
  0x89   :  { %52 = vst [vmem:[%s112_s1] sm:$0x1] %v50_v15 }

// kernel: aab_model_forward.1
= control target key start
LH: loop header
LB: loop body
LE: loop exit
PB: predicated region body
PF: predicated region fallthrough
CT: control target
= control target key end

     0   :  { %s15985_s0 = inlined_call_operand.vmem [shape: f32[2,40,6], index: 0, kind: input, shape index: {}]   ;;  %s15986_s1 = inlined_call_operand.vmem [shape: f32[2,1,32], index: 1, kind: input, shape index: {}]   ;;  %s15987_s2 = inlined_call_operand.vmem [shape: f32[2,3,40,40], index: 2, kind: input, shape index: {}]   ;;  %s15988_s3 = inlined_call_operand.vmem [shape: f32[40,32], index: 3, kind: input, shape index: {}]   ;;  %s15989_s4 = inlined_call_operand.vmem [shape: bf16[6,32], index: 4, kind: input, shape index: {}]   ;;  %s15990_s5 = inlined_call_operand.vmem [shape: f32[1,32], index: 5, kind: input, shape index: {}]   ;;  %s15991_s6 = inlined_call_operand.vmem [shape: bf16[2,32,192], index: 6, kind: input, shape index: {}]   ;;  %s15992_s7 = inlined_call_operand.vmem [shape: f32[2,1,192], index: 7, kind: input, shape index: {}]   ;;  %s15993_s8 = inlined_call_operand.vmem [shape: bf16[2,3,32,96], index: 8, kind: input, shape index: {}]   ;;  %s15994_s9 = inlined_call_operand.vmem [shape: bf16[2,3,32,32], index: 9, kind: input, shape index: {}]   ;;  %s15995_s10 = inlined_call_operand.vmem [shape: f32[2,3,1,32], index: 10, kind: input, shape index: {}]   ;;  %s15996_s11 = inlined_call_operand.vmem [shape: f32[2,2,32], index: 11, kind: input, shape index: {}]   ;;  %s15997_s12 = inlined_call_operand.vmem [shape: bf16[2,32,256], index: 12, kind: input, shape index: {}]   ;;  %s15998_s13 = inlined_call_operand.vmem [shape: f32[2,1,256], index: 13, kind: input, shape index: {}]   ;;  %s15999_s14 = inlined_call_operand.vmem [shape: bf16[2,128,32], index: 14, kind: input, shape index: {}]   ;;  %s16000_s15 = inlined_call_operand.vmem [shape: f32[2,1,32], index: 15, kind: input, shape index: {}]   ;;  %s16001_s16 = inlined_call_operand.vmem [shape: bf16[32,64], index: 16, kind: input, shape index: {}]   ;;  %s16002_s17 = inlined_call_operand.vmem [shape: f32[1,64], index: 17, kind: input, shape index: {}]   ;;  %s16003_s18 = inlined_call_operand.vmem [shape: bf16[32,6], index: 18, kind: input, shape index: {}]   ;;  %s16004_s19 = inlined_call_operand.vmem [shape: f32[1,6], index: 19, kind: input, shape index: {}]   ;;  %s16005_s20 = inlined_call_operand.vmem [shape: f32[2,40,6], index: 20, kind: output, shape index: {}]  }
   0x1   :  { %16043 = sst [smem:[#allocation4_spill]] %s15985_s0 }
   0x2   :  { %16044 = sst [smem:[#allocation5_spill]] %s15986_s1  ;;  %s12333_s1 = smov 0  }
   0x3   :  { %16045 = sst [smem:[#allocation6_spill]] %s15987_s2 }
   0x4   :  { %16046 = sst [smem:[#allocation7_spill]] %s15988_s3 }
   0x5   :  { %16047 = sst [smem:[#allocation8_spill]] %s15989_s4 }
   0x6   :  { %16048 = sst [smem:[#allocation9_spill]] %s15990_s5 }
   0x7   :  { %16049 = sst [smem:[#allocation10_spill]] %s15995_s10 }
   0x8   :  { %16050 = sst [smem:[#allocation11_spill]] %s15996_s11 }
   0x9   :  { %16051 = sst [smem:[#allocation12_spill]] %s16001_s16 }
   0xa   :  { %16052 = sst [smem:[#allocation13_spill]] %s16002_s17 }
   0xb   :  { %16053 = sst [smem:[#allocation14_spill]] %s16003_s18 }
   0xc   :  { %16054 = sst [smem:[#allocation15_spill]] %s16004_s19 }
   0xd   :  { %16055 = sst [smem:[#allocation16_spill]] %s16005_s20 }
   0xe LB: > { %16056 = sst [smem:[#allocation2_spill]] %s12208_s1  ;;  %s9431_s22 = sadd.s32 4294967295, %s12208_s1   ;;  %s12208_s1 = sphi %s12333_s1, %s30_s1  }
   0xf   : > { %p9435_p0 = scmp.ge.s32.totalorder %s12208_s1, 1  ;;  %p580_p1 = scmp.lt.s32.totalorder %s12208_s1, 3 }
  0x11   : > { %p581_p2 = pnand %p9435_p0, %p580_p1 }
  0x13   : > { %584 = sbr.rel (%p581_p2) target bundleno = 13757 (0x35bd), region = 100 }
  0x1a   : > { %s16057_s2 = sld [smem:[#allocation8_spill]]  ;;  %vm691_vm0 = vcmask 1042432   ;;  %p646_p3 = scmp.lt.s32.totalorder %s9431_s22, 1  ;;  %v12210_v1 = vmov 0.0   ;;  %vm12211_vm1 = vmmov 0   ;;  %v12212_v6 = vmov 0  }
  0x1b   : > { %10171 = vmatprep.subr.bf16.mxu0 %v12210_v1  ;;  %10173 = vmatprep.mubr.msk.bf16.mxu0 %vm12211_vm1, %v12210_v1  ;;  %v11529_v3 = vld [vmem:[%s15991_s6 + $0x4] ss:$8 sps:$4 sm:$0xff]   ;;  %v11531_v4 = vld [vmem:[%s15991_s6] ss:$8 sps:$4 sm:$0xff]   ;;  %v11532_v5 = vld [vmem:[%s15991_s6 + $0x14] ss:$8 sps:$4 sm:$0xff]   ;;  %v789_v51 = vlaneseq }
  0x1c   : > { %s16092_s22 = smov (!%p646_p3, %s9431_s22), 1  ;;  %803 = vmatprep.subr.bf16.mxu1 %v11529_v3  ;;  %835 = vmatprep.mubr.bf16.mxu1 %v12212_v6  ;;  %v11534_v7 = vld [vmem:[%s15991_s6 + $0x10] ss:$8 sps:$4 sm:$0xff]   ;;  %s16059_s24 = sld [smem:[#allocation5_spill]]  ;;  %vm681_vm2 = vcmask 48128   ;;  %vm799_vm3 = vcmask 261120  }
  0x1d   : > { %16058 = sst [smem:[#allocation3_spill]] %s16092_s22  ;;  %s16007_s29 = smul.u32 40, %s16092_s22  ;;  %804 = vmatpush1.bf16.msra.mxu1 %v11531_v4  ;;  %v790_v54 = vshrl.u32 %v789_v51, 7  ;;  %v767_v58 = vld [vmem:[%s15992_s7] sm:$0x3]  ;;  %vm1042_vm4 = vcmask 64512  }
  0x1e   : > { %805 = vmatprep.subr.bf16.mxu1 %v11532_v5  ;;  %s16060_s26 = sld [smem:[#allocation4_spill]]  ;;  %s16061_s5 = sld [smem:[#allocation9_spill]]  ;;  %vm1193_vm5 = vcmask 1043456   ;;  %vm1117_vm6 = vcmask 326656   ;;  %vm1981_vm7 = vcmask 130048   ;;  %vm1987_vm8 = vcmask 195584  }
  0x1f   : > { %s16062_s21 = sld [smem:[#allocation7_spill]]  ;;  %v12427_v57 = vsub.s32 1, %v790_v54  ;;  %s16033_s3 = smov 88  }
  0x20   : > { %v673_v0 = vld [vmem:[%s16057_s2] sm:$0x7]  ;;  %s16027_s28 = smov 72   ;;  %s16010_s4 = smov 112  }
  0x21   : > { %v693_v2 = vsel %vm691_vm0, %v673_v0, 0  ;;  %806 = vmatpush1.bf16.msra.mxu1 %v11534_v7  ;;  %v796_v59 = vrot.slane %v767_v58, %v12427_v57  ;;  %s16008_s30 = smov 104   ;;  %s16025_s0 = smov 64  }
  0x22   : > { %10172 = vmatpush3.bf16.msra.mxu0 %v693_v2  ;;  %s653_s2 = scalar_lea.vmem %s16059_s24, %s16092_s22  ;;  %10185 = vmatprep.subr.bf16.mxu1 %v12210_v1  ;;  %s16036_s24 = smov 96  }
  0x23   : > { %10201 = vmatprep.subr.bf16.mxu0 %v12210_v1  ;;  %v761_v8 = vld [vmem:[%s653_s2] sm:$0x1]  ;;  %s16016_s23 = smov 56   ;;  %s11322_s2 = smul.u32 120, %s16092_s22 }
  0x24   : > { %s650_s27 = scalar_lea.vmem %s16060_s26, %s16007_s29  ;;  %v12373_v11 = vpack.c.bf16 %v761_v8, %v761_v8  ;;  %v9439_v18 = vld [vmem:[%s16061_s5] ss:$0 sm:$0xff]  ;;  %s16029_s26 = smov 80  }
  0x25   : > { %v665_v9 = vld [vmem:[%s650_s27] sm:$0xff]  ;;  %v666_v10 = vld [vmem:[%s650_s27 + $0x8] sm:$0xff]  ;;  %v667_v13 = vld [vmem:[%s650_s27 + $0x10] sm:$0xff]  ;;  %s16014_s29 = smov 48   ;;  %s16064_s10 = sld [smem:[#allocation10_spill]] }
  0x26   : > { %v670_v12 = vpack.c.bf16 %v666_v10, %v665_v9  ;;  %v668_v14 = vld [vmem:[%s650_s27 + $0x18] sm:$0xff]  ;;  %9447 = vmatmul.mubr.msk.bf16.vlgmr.msra.gmra.mrb[0].mxu1 %vm799_vm3, %v12373_v11  ;;  %v669_v16 = vld [vmem:[%s650_s27 + $0x20] sm:$0xff]  ;;  %v752_v24 = vld [vmem:[%s16062_s21 + $0x8] sm:$0xff]  ;;  %s16031_s27 = smov 120   ;;  %s16068_s25 = smov 48  }
  0x27   : > { %10189 = vmatprep.mubr.msk.bf16.mxu1 %vm12211_vm1, %v12210_v1  ;;  %v671_v15 = vpack.c.bf16 %v668_v14, %v667_v13  ;;  %v672_v17 = vpack.c.bf16 %v669_v16, %v669_v16  ;;  %v751_v20 = vld [vmem:[%s16062_s21] sm:$0xff]  ;;  %v753_v31 = vld [vmem:[%s16062_s21 + $0x10] sm:$0xff]  ;;  %v754_v36 = vld [vmem:[%s16062_s21 + $0x18] sm:$0xff]  ;;  %s16073_s5 = smov 88   ;;  %s16078_s11 = sld [smem:[#allocation11_spill]] }
  0x28   : > { %10174 = vmatmul.mubr.msk.bf16.vlgmr.msra.gmra.mrb[0].mxu0 %vm681_vm2, %v670_v12  ;;  %v755_v43 = vld [vmem:[%s16062_s21 + $0x20] sm:$0xff]  ;;  %s16074_s21 = smov 120   ;;  %s16079_s1 = smov 96  }
  0x29   : > { %10177 = vmatprep.mubr.msk.bf16.mxu0 %vm12211_vm1, %v12210_v1  ;;  %s16080_s22 = sld [smem:[#allocation10_spill]]  ;;  %s16082_s16 = sld [smem:[#allocation11_spill]] }
  0x30   : > { %10178 = vmatmul.mubr.msk.bf16.gmra.mrb[4].mxu0 %vm681_vm2, %v671_v15 }
  0x31   : > { %10181 = vmatprep.mubr.msk.bf16.mxu0 %vm12211_vm1, %v12210_v1 }
  0x38   : > { %10182 = vmatmul.mubr.msk.bf16.gmra.mrb[8].mxu0 %vm681_vm2, %v672_v17 }
  0x39   : > { %10207 = vmatprep.mubr.msk.bf16.mxu0 %vm12211_vm1, %v12210_v1 }
  0xf9   : > { %v837_v52 = vpop.f32.mrb[0].mxu1 }
  0xfa   : > { %v839_v53 = vpop.f32.mrb[1].mxu1 }
  0xfb   : > { %v729_v19 = vpop.f32.mrb[0].mxu0  ;;  %v841_v55 = vpop.f32.mrb[2].mxu1  ;;  %v12433_v60 = vadd.f32 %v839_v53, %v796_v59 }
  0xfc   : > { %v730_v21 = vadd.f32 %v9439_v18, %v729_v19  ;;  %v10175_v22 = vpop.f32.mrb[1].mxu0  ;;  %v842_v56 = vpop.f32.mrb[3].mxu1 }
  0xfd   : > { %v732_v23 = vpop.f32.mrb[2].mxu0 }
  0xfe   : > { %v733_v25 = vadd.f32 %v9439_v18, %v732_v23  ;;  %v10176_v26 = vpop.f32.mrb[3].mxu0  ;;  %v12398_v27 = vadd.f32 %v751_v20, %v730_v21 }
 0x100   : > { %v844_v28 = vsel %vm799_vm3, %v12398_v27, 0.0  ;;  %v12402_v29 = vadd.f32 %v752_v24, %v733_v25  ;;  %v12444_v24 = vsub.s32 0, %v790_v54 }
 0x101   : > { %845 = vadd.xlane.f32.xlu0 %v844_v28 }
 0x102   : > { %v847_v34 = vsel %vm799_vm3, %v12402_v29, 0.0  ;;  %v792_v26 = vrot.slane %v767_v58, %v12444_v24 }
 0x103   : > { %v737_v30 = vpop.f32.mrb[4].mxu0 }
 0x104   : > { %v738_v32 = vadd.f32 %v9439_v18, %v737_v30  ;;  %v10179_v33 = vpop.f32.mrb[5].mxu0  ;;  %v838_v28 = vadd.f32 %v837_v52, %v792_v26 }
 0x105   : > { %848 = vadd.xlane.f32.xlu0 %v847_v34  ;;  %v740_v35 = vpop.f32.mrb[6].mxu0  ;;  %v11536_v33 = vld [vmem:[%s15993_s8 + $0x8] sm:$0xff]  }
 0x106   : > { %v741_v37 = vadd.f32 %v9439_v18, %v740_v35  ;;  %v10180_v38 = vpop.f32.mrb[7].mxu0  ;;  %v12412_v39 = vadd.f32 %v753_v31, %v738_v32  ;;  %v910_v30 = vadd.f32 1.0, %v838_v28  ;;  %v11535_v32 = vld [vmem:[%s15993_s8] sm:$0xff]   ;;  %v12462_v59 = vrot.slane %v838_v28, %v12444_v24 }
 0x107   : > { %10186 = vmatpush3.bf16.msra.mxu1 %v11535_v32 }
 0x108   : > { %v850_v40 = vsel %vm799_vm3, %v12412_v39, 0.0  ;;  %v12416_v41 = vadd.f32 %v754_v36, %v741_v37  ;;  %v12449_v31 = vrot.slane %v910_v30, %v12444_v24  ;;  %10187 = vmatprep.subr.bf16.mxu1 %v12210_v1 }
 0x109   : > { %851 = vadd.xlane.f32.xlu1 %v850_v40 }
 0x10a   : > { %v853_v45 = vsel %vm799_vm3, %v12416_v41, 0.0 }
 0x10b   : > { %v745_v42 = vpop.f32.mrb[8].mxu0  ;;  %10188 = vmatpush3.bf16.msra.mxu1 %v11536_v33 }
 0x10c   : > { %v746_v44 = vadd.f32 %v9439_v18, %v745_v42  ;;  %v10183_v46 = vpop.f32.mrb[9].mxu0  ;;  %10219 = vmatprep.subr.bf16.mxu1 %v12210_v1 }
 0x10d   : > { %854 = vadd.xlane.f32.xlu1 %v853_v45  ;;  %v748_v47 = vpop.f32.mrb[10].mxu0 }
 0x10e   : > { %v12423_v48 = vadd.f32 %v755_v43, %v746_v44  ;;  %v10184_v49 = vpop.f32.mrb[11].mxu0 }
 0x110   : > { %v856_v50 = vsel %vm799_vm3, %v12423_v48, 0.0 }
 0x111   : > { %857 = vadd.xlane.f32.xlu0 %v856_v50 }
 0x18e   : > { %v846_v61 = vpop.xlane.xlu0 %845 }
 0x18f   : > { %v860_v62 = vmul.f32 0.03125, %v846_v61 }
 0x191   : > { %v865_v63 = vsub.f32 %v12398_v27, %v860_v62 }
 0x192   : > { %v849_v0 = vpop.xlane.xlu0 %848 }
 0x193   : > { %v861_v2 = vmul.f32 0.03125, %v849_v0  ;;  %v870_v3 = vmul.f32 %v865_v63, %v865_v63 }
 0x195   : > { %v866_v4 = vsub.f32 %v12402_v29, %v861_v2  ;;  %v875_v5 = vsel %vm799_vm3, %v870_v3, 0.0 }
 0x196   : > { %v852_v7 = vpop.xlane.xlu1 %851  ;;  %876 = vadd.xlane.f32.xlu1 %v875_v5 }
 0x197   : > { %v862_v8 = vmul.f32 0.03125, %v852_v7  ;;  %v871_v9 = vmul.f32 %v866_v4, %v866_v4 }
 0x199   : > { %v867_v10 = vsub.f32 %v12412_v39, %v862_v8  ;;  %v878_v12 = vsel %vm799_vm3, %v871_v9, 0.0 }
 0x19a   : > { %v855_v13 = vpop.xlane.xlu1 %854  ;;  %879 = vadd.xlane.f32.xlu0 %v878_v12 }
 0x19b   : > { %v863_v14 = vmul.f32 0.03125, %v855_v13  ;;  %v872_v15 = vmul.f32 %v867_v10, %v867_v10 }
 0x19d   : > { %v868_v16 = vsub.f32 %v12416_v41, %v863_v14  ;;  %v881_v17 = vsel %vm799_vm3, %v872_v15, 0.0 }
 0x19e   : > { %882 = vadd.xlane.f32.xlu1 %v881_v17  ;;  %v858_v18 = vpop.xlane.xlu0 %857 }
 0x19f   : > { %v864_v19 = vmul.f32 0.03125, %v858_v18  ;;  %v873_v20 = vmul.f32 %v868_v16, %v868_v16 }
 0x1a1   : > { %v869_v21 = vsub.f32 %v12423_v48, %v864_v19  ;;  %v884_v22 = vsel %vm799_vm3, %v873_v20, 0.0 }
 0x1a2   : > { %885 = vadd.xlane.f32.xlu0 %v884_v22 }
 0x1a3   : > { %v874_v23 = vmul.f32 %v869_v21, %v869_v21 }
 0x1a5   : > { %v887_v25 = vsel %vm799_vm3, %v874_v23, 0.0 }
 0x1a6   : > { %888 = vadd.xlane.f32.xlu1 %v887_v25 }
 0x1b8   : > { %916 = vrot.lane.b32.xlu0 %v12449_v31, %s16036_s24 }
 0x223   : > { %v877_v34 = vpop.xlane.xlu1 %876 }
 0x224   : > { %v890_v35 = vmul.f32 0.03125, %v877_v34 }
 0x226   : > { %v895_v36 = vadd.f32 1e-05, %v890_v35 }
 0x227   : > { %v880_v37 = vpop.xlane.xlu0 %879 }
 0x228   : > { %11597 = vrsqrt.f32 %v895_v36  ;;  %v891_v38 = vmul.f32 0.03125, %v880_v37 }
 0x22a   : > { %v896_v40 = vadd.f32 1e-05, %v891_v38 }
 0x22b   : > { %v883_v42 = vpop.xlane.xlu1 %882 }
 0x22c   : > { %11599 = vrsqrt.f32 %v896_v40  ;;  %v892_v43 = vmul.f32 0.03125, %v883_v42 }
 0x22e   : > { %v897_v44 = vadd.f32 1e-05, %v892_v43 }
 0x22f   : > { %v886_v45 = vpop.xlane.xlu0 %885 }
 0x230   : > { %11601 = vrsqrt.f32 %v897_v44  ;;  %v893_v46 = vmul.f32 0.03125, %v886_v45 }
 0x232   : > { %v11598_v47 = vpop.eup %11597  ;;  %v898_v49 = vadd.f32 1e-05, %v893_v46 }
 0x233   : > { %v889_v50 = vpop.xlane.xlu1 %888  ;;  %v905_v51 = vmul.f32 %v11598_v47, %v865_v63  ;;  %v917_v53 = vpop.permute.xlu0 %916 }
 0x234   : > { %11603 = vrsqrt.f32 %v898_v49  ;;  %v894_v52 = vmul.f32 0.03125, %v889_v50 }
 0x235   : > { %v919_v58 = vmul.f32 %v917_v53, %v905_v51 }
 0x236   : > { %v11600_v54 = vpop.eup %11599  ;;  %v899_v55 = vadd.f32 1e-05, %v894_v52 }
 0x237   : > { %v906_v56 = vmul.f32 %v11600_v54, %v866_v4  ;;  %v928_v0 = vadd.f32 %v12462_v59, %v919_v58 }
 0x238   : > { %11605 = vrsqrt.f32 %v899_v55 }
 0x239   : > { %v920_v61 = vmul.f32 %v917_v53, %v906_v56 }
 0x23a   : > { %v11602_v62 = vpop.eup %11601 }
 0x23b   : > { %v929_v2 = vadd.f32 %v12462_v59, %v920_v61  ;;  %v907_v3 = vmul.f32 %v11602_v62, %v867_v10 }
 0x23d   : > { %v933_v5 = vpack.c.bf16 %v929_v2, %v928_v0  ;;  %v921_v8 = vmul.f32 %v917_v53, %v907_v3 }
 0x23e   : > { %v11604_v63 = vpop.eup %11603 }
 0x23f   : > { %10190 = vmatmul.mubr.msk.bf16.vlgmr.msra.gmra.mrb[4].mxu1 %vm799_vm3, %v933_v5  ;;  %v908_v7 = vmul.f32 %v11604_v63, %v868_v16  ;;  %v930_v12 = vadd.f32 %v12462_v59, %v921_v8 }
 0x240   : > { %10193 = vmatprep.mubr.msk.bf16.mxu1 %vm12211_vm1, %v12210_v1 }
 0x241   : > { %v922_v4 = vmul.f32 %v917_v53, %v908_v7 }
 0x242   : > { %v11606_v9 = vpop.eup %11605 }
 0x243   : > { %v931_v13 = vadd.f32 %v12462_v59, %v922_v4  ;;  %v909_v14 = vmul.f32 %v11606_v9, %v869_v21 }
 0x245   : > { %v934_v15 = vpack.c.bf16 %v931_v13, %v930_v12  ;;  %v923_v17 = vmul.f32 %v917_v53, %v909_v14 }
 0x247   : > { %10194 = vmatmul.mubr.msk.bf16.gmra.mrb[8].mxu1 %vm799_vm3, %v934_v15  ;;  %v932_v10 = vadd.f32 %v12462_v59, %v923_v17 }
 0x248   : > { %10197 = vmatprep.mubr.msk.bf16.mxu1 %vm12211_vm1, %v12210_v1 }
 0x249   : > { %v935_v16 = vpack.c.bf16 %v932_v10, %v932_v10 }
 0x24f   : > { %10198 = vmatmul.mubr.msk.bf16.gmra.mrb[12].mxu1 %vm799_vm3, %v935_v16 }
 0x250   : > { %10225 = vmatprep.mubr.msk.bf16.mxu1 %vm12211_vm1, %v12210_v1 }
 0x312   : > { %v995_v18 = vpop.f32.mrb[4].mxu1 }
 0x313   : > { %v10191_v19 = vpop.f32.mrb[5].mxu1  ;;  %v1017_v22 = vmul.f32 0.35355338, %v995_v18 }
 0x314   : > { %v998_v20 = vpop.f32.mrb[6].mxu1 }
 0x315   : > { %v1018_v21 = vmul.f32 0.35355338, %v998_v20  ;;  %v12478_v23 = vpack.c.bf16 %v998_v20, %v995_v18  ;;  %v10192_v25 = vpop.f32.mrb[7].mxu1 }
 0x317   : > { %1262 = vrot.lane.b32.xlu0 %v12478_v23, %s16033_s3  ;;  %1036 = vrot.lane.b32.xlu1 %v12478_v23, %s16036_s24  ;;  %v12484_v26 = vpack.c.bf16 %v1018_v21, %v1017_v22 }
 0x31a   : > { %v1003_v28 = vpop.f32.mrb[8].mxu1 }
 0x31b   : > { %v10195_v30 = vpop.f32.mrb[9].mxu1  ;;  %v1019_v33 = vmul.f32 0.35355338, %v1003_v28 }
 0x31c   : > { %v1006_v32 = vpop.f32.mrb[10].mxu1 }
 0x31d   : > { %v1020_v34 = vmul.f32 0.35355338, %v1006_v32  ;;  %v12486_v35 = vpack.c.bf16 %v1006_v32, %v1003_v28  ;;  %v10196_v36 = vpop.f32.mrb[11].mxu1 }
 0x31f   : > { %1038 = vrot.lane.b32.xlu1 %v12486_v35, %s16036_s24  ;;  %v12490_v37 = vpack.c.bf16 %v1020_v34, %v1019_v33 }
 0x322   : > { %v1011_v38 = vpop.f32.mrb[12].mxu1 }
 0x323   : > { %v12492_v40 = vpack.c.bf16 %v1011_v38, %v1011_v38  ;;  %v10199_v42 = vpop.f32.mrb[13].mxu1  ;;  %v1021_v45 = vmul.f32 0.35355338, %v1011_v38 }
 0x324   : > { %v1014_v43 = vpop.f32.mrb[14].mxu1 }
 0x325   : > { %1266 = vrot.lane.b32.xlu0 %v12492_v40, %s16033_s3  ;;  %1040 = vrot.lane.b32.xlu1 %v12492_v40, %s16036_s24  ;;  %v10200_v44 = vpop.f32.mrb[15].mxu1  ;;  %v1024_v46 = vpack.c.bf16 %v1021_v45, %v1021_v45 }
 0x329   : > { %1482 = vrot.lane.b32.xlu0 %v12478_v23, %s16029_s26  ;;  %1264 = vrot.lane.b32.xlu1 %v12486_v35, %s16033_s3 }
 0x32d   : > { %1484 = vrot.lane.b32.xlu0 %v12486_v35, %s16029_s26  ;;  %1256 = vrot.lane.b32.xlu1 %v12484_v26, %s16031_s27 }
 0x331   : > { %1486 = vrot.lane.b32.xlu0 %v12492_v40, %s16029_s26  ;;  %1258 = vrot.lane.b32.xlu1 %v12490_v37, %s16031_s27 }
 0x335   : > { %1702 = vrot.lane.b32.xlu0 %v12478_v23, %s16027_s28  ;;  %1260 = vrot.lane.b32.xlu1 %v1024_v46, %s16031_s27 }
 0x339   : > { %1704 = vrot.lane.b32.xlu0 %v12486_v35, %s16027_s28  ;;  %1476 = vrot.lane.b32.xlu1 %v12484_v26, %s16010_s4 }
 0x33d   : > { %1706 = vrot.lane.b32.xlu0 %v12492_v40, %s16027_s28  ;;  %1478 = vrot.lane.b32.xlu1 %v12490_v37, %s16010_s4 }
 0x341   : > { %1698 = vrot.lane.b32.xlu0 %v12490_v37, %s16008_s30  ;;  %1480 = vrot.lane.b32.xlu1 %v1024_v46, %s16010_s4 }
 0x345   : > { %1178 = vrot.lane.b32.xlu0 %v12486_v35, %s16025_s0  ;;  %1696 = vrot.lane.b32.xlu1 %v12484_v26, %s16008_s30 }
 0x349   : > { %1400 = vrot.lane.b32.xlu0 %v12478_v23, %s16016_s23  ;;  %1700 = vrot.lane.b32.xlu1 %v1024_v46, %s16008_s30  ;;  %s16063_s30 = sld [smem:[#allocation6_spill]] }
 0x34d   : > { %1176 = vrot.lane.b32.xlu1 %v12478_v23, %s16025_s0 }
 0x34f   : > { %s12607_s4 = scalar_lea.vmem %s16063_s30, %s11322_s2  ;;  %s16012_s30 = smov 40  }
 0x350   : > { %v12610_v32 = vld [vmem:[%s12607_s4] sm:$0xff]  ;;  %v12613_v34 = vld [vmem:[%s12607_s4 + $0x8] sm:$0xff]  ;;  %s16022_s2 = smov 8  }
 0x351   : > { %1180 = vrot.lane.b32.xlu1 %v12492_v40, %s16025_s0 }
 0x355   : > { %1402 = vrot.lane.b32.xlu1 %v12486_v35, %s16016_s23 }
 0x389   : > { %v1037_v47 = vpop.permute.xlu1 %1036  ;;  %v1263_v52 = vpop.permute.xlu0 %1262 }
 0x38a   : > { %v1053_v49 = vsel %vm1042_vm4, %v1037_v47, 0  ;;  %v1278_v0 = vsel %vm1042_vm4, %v1263_v52, 0 }
 0x38b   : > { %10202 = vmatpush3.bf16.xpose.msra.mxu0 %v1053_v49  ;;  %v12629_v49 = vld [vmem:[%s12607_s4 + $0x18] sm:$0xff] }
 0x38c   : > { %10203 = vmatprep.subr.bf16.mxu0 %v12210_v1 }
 0x391   : > { %v1039_v50 = vpop.permute.xlu1 %1038 }
 0x392   : > { %v1056_v51 = vsel %vm1042_vm4, %v1039_v50, 0 }
 0x393   : > { %10204 = vmatpush3.bf16.xpose.msra.mxu0 %v1056_v51 }
 0x394   : > { %10205 = vmatprep.subr.bf16.mxu0 %v12210_v1 }
 0x397   : > { %v1267_v53 = vpop.permute.xlu0 %1266  ;;  %v1041_v54 = vpop.permute.xlu1 %1040 }
 0x398   : > { %v1059_v55 = vsel %vm1042_vm4, %v1041_v54, 0  ;;  %v1284_v12 = vsel %vm1042_vm4, %v1267_v53, 0 }
 0x39b   : > { %v1483_v56 = vpop.permute.xlu0 %1482  ;;  %10206 = vmatpush3.bf16.xpose.msra.mxu0 %v1059_v55  ;;  %v1265_v58 = vpop.permute.xlu1 %1264 }
 0x39c   : > { %10237 = vmatprep.subr.bf16.mxu0 %v12210_v1  ;;  %v1281_v63 = vsel %vm1042_vm4, %v1265_v58, 0  ;;  %v1498_v17 = vsel %vm1042_vm4, %v1483_v56, 0  ;;  %v12640_v56 = vld [vmem:[%s12607_s4 + $0x20] sm:$0xff] }
 0x39f   : > { %v1485_v61 = vpop.permute.xlu0 %1484  ;;  %v1257_v62 = vpop.permute.xlu1 %1256 }
 0x3a0   : > { %v1501_v19 = vsel %vm1042_vm4, %v1485_v61, 0 }
 0x3a2   : > { %10208 = vmatmul.mubr.msk.bf16.vlgmr.msra.gmra.mrb[12].mxu0 %vm1042_vm4, %v12484_v26 }
 0x3a3   : > { %10238 = vmatpush3.bf16.xpose.msra.mxu0 %v1278_v0  ;;  %v1259_v2 = vpop.permute.xlu1 %1258  ;;  %10211 = vmatprep.mubr.msk.bf16.mxu0 %vm12211_vm1, %v12210_v1  ;;  %v1487_v3 = vpop.permute.xlu0 %1486 }
 0x3a4   : > { %10239 = vmatprep.subr.bf16.mxu0 %v12210_v1  ;;  %v1504_v25 = vsel %vm1042_vm4, %v1487_v3, 0 }
 0x3a7   : > { %v1261_v5 = vpop.permute.xlu1 %1260  ;;  %v1703_v7 = vpop.permute.xlu0 %1702 }
 0x3a8   : > { %v1718_v26 = vsel %vm1042_vm4, %v1703_v7, 0 }
 0x3aa   : > { %10212 = vmatmul.mubr.msk.bf16.gmra.mrb[16].mxu0 %vm1042_vm4, %v12490_v37 }
 0x3ab   : > { %10240 = vmatpush3.bf16.xpose.msra.mxu0 %v1281_v63  ;;  %v1477_v8 = vpop.permute.xlu1 %1476  ;;  %10215 = vmatprep.mubr.msk.bf16.mxu0 %vm12211_vm1, %v12210_v1  ;;  %v1705_v9 = vpop.permute.xlu0 %1704 }
 0x3ac   : > { %10241 = vmatprep.subr.bf16.mxu0 %v12210_v1  ;;  %v1721_v28 = vsel %vm1042_vm4, %v1705_v9, 0 }
 0x3af   : > { %v1479_v4 = vpop.permute.xlu1 %1478  ;;  %v1707_v14 = vpop.permute.xlu0 %1706 }
 0x3b0   : > { %v1724_v30 = vsel %vm1042_vm4, %v1707_v14, 0 }
 0x3b2   : > { %10216 = vmatmul.mubr.msk.bf16.gmra.mrb[20].mxu0 %vm1042_vm4, %v1024_v46  ;;  %v12626_v46 = vld [vmem:[%s12607_s4 + $0x10] sm:$0xff] }
 0x3b3   : > { %10242 = vmatpush3.bf16.xpose.msra.mxu0 %v1284_v12  ;;  %v1481_v13 = vpop.permute.xlu1 %1480  ;;  %10243 = vmatprep.mubr.msk.bf16.mxu0 %vm12211_vm1, %v12210_v1  ;;  %v1699_v16 = vpop.permute.xlu0 %1698 }
 0x3b4   : > { %10273 = vmatprep.subr.bf16.mxu0 %v12210_v1 }
 0x3b7   : > { %v1697_v15 = vpop.permute.xlu1 %1696  ;;  %v1179_v20 = vpop.permute.xlu0 %1178 }
 0x3ba   : > { %10244 = vmatmul.mubr.msk.bf16.vlgmr.msra.gmra.mrb[24].mxu0 %vm1042_vm4, %v1257_v62 }
 0x3bb   : > { %v1701_v10 = vpop.permute.xlu1 %1700  ;;  %10274 = vmatpush3.bf16.xpose.msra.mxu0 %v1498_v17  ;;  %10247 = vmatprep.mubr.msk.bf16.mxu0 %vm12211_vm1, %v12210_v1 }
 0x3bc   : > { %10275 = vmatprep.subr.bf16.mxu0 %v12210_v1 }
 0x3bf   : > { %v1177_v18 = vpop.permute.xlu1 %1176 }
 0x3c0   : > { %10220 = vmatpush3.bf16.msra.mxu1 %v1177_v18 }
 0x3c1   : > { %10221 = vmatprep.subr.bf16.mxu1 %v12210_v1 }
 0x3c2   : > { %10248 = vmatmul.mubr.msk.bf16.gmra.mrb[28].mxu0 %vm1042_vm4, %v1259_v2 }
 0x3c3   : > { %10276 = vmatpush3.bf16.xpose.msra.mxu0 %v1501_v19  ;;  %10251 = vmatprep.mubr.msk.bf16.mxu0 %vm12211_vm1, %v12210_v1  ;;  %v1181_v22 = vpop.permute.xlu1 %1180 }
 0x3c4   : > { %10222 = vmatpush3.bf16.msra.mxu1 %v1179_v20  ;;  %10277 = vmatprep.subr.bf16.mxu0 %v12210_v1  ;;  %v1195_v21 = vsel %vm1193_vm5, %v1181_v22, 0 }
 0x3c5   : > { %10223 = vmatprep.subr.bf16.mxu1 %v12210_v1 }
 0x3c8   : > { %10224 = vmatpush3.bf16.msra.mxu1 %v1195_v21 }
 0x3c9   : > { %10255 = vmatprep.subr.bf16.mxu1 %v12210_v1 }
 0x3ca   : > { %10252 = vmatmul.mubr.msk.bf16.gmra.mrb[32].mxu0 %vm1042_vm4, %v1261_v5 }
 0x3cb   : > { %10278 = vmatpush3.bf16.xpose.msra.mxu0 %v1504_v25  ;;  %10279 = vmatprep.mubr.msk.bf16.mxu0 %vm12211_vm1, %v12210_v1 }
 0x3cc   : > { %10309 = vmatprep.subr.bf16.mxu0 %v12210_v1 }
 0x3d2   : > { %10280 = vmatmul.mubr.msk.bf16.vlgmr.msra.gmra.mrb[36].mxu0 %vm1042_vm4, %v1477_v8 }
 0x3d3   : > { %10310 = vmatpush3.bf16.xpose.msra.mxu0 %v1718_v26  ;;  %10283 = vmatprep.mubr.msk.bf16.mxu0 %vm12211_vm1, %v12210_v1 }
 0x3d4   : > { %10311 = vmatprep.subr.bf16.mxu0 %v12210_v1 }
 0x3da   : > { %10284 = vmatmul.mubr.msk.bf16.gmra.mrb[40].mxu0 %vm1042_vm4, %v1479_v4 }
 0x3db   : > { %10312 = vmatpush3.bf16.xpose.msra.mxu0 %v1721_v28  ;;  %10287 = vmatprep.mubr.msk.bf16.mxu0 %vm12211_vm1, %v12210_v1 }
 0x3dc   : > { %10313 = vmatprep.subr.bf16.mxu0 %v12210_v1 }
 0x3e2   : > { %10288 = vmatmul.mubr.msk.bf16.gmra.mrb[44].mxu0 %vm1042_vm4, %v1481_v13 }
 0x3e3   : > { %10314 = vmatpush3.bf16.xpose.msra.mxu0 %v1724_v30  ;;  %10315 = vmatprep.mubr.msk.bf16.mxu0 %vm12211_vm1, %v12210_v1 }
 0x3e4   : > { %10345 = vmatprep.subr.bf16.mxu0 %v12210_v1 }
 0x3ea   : > { %10316 = vmatmul.mubr.msk.bf16.vlgmr.msra.gmra.mrb[48].mxu0 %vm1042_vm4, %v1697_v15 }
 0x3eb   : > { %10319 = vmatprep.mubr.msk.bf16.mxu0 %vm12211_vm1, %v12210_v1 }
 0x3f2   : > { %10320 = vmatmul.mubr.msk.bf16.gmra.mrb[52].mxu0 %vm1042_vm4, %v1699_v16 }
 0x3f3   : > { %10323 = vmatprep.mubr.msk.bf16.mxu0 %vm12211_vm1, %v12210_v1 }
 0x3fa   : > { %10324 = vmatmul.mubr.msk.bf16.gmra.mrb[56].mxu0 %vm1042_vm4, %v1701_v10 }
 0x3fb   : > { %10349 = vmatprep.mubr.msk.bf16.mxu0 %vm12211_vm1, %v12210_v1 }
 0x475   : > { %v1095_v33 = vpop.f32.mrb[12].mxu0 }
 0x476   : > { %v10209_v36 = vpop.f32.mrb[13].mxu0  ;;  %v12616_v37 = vadd.f32 %v1095_v33, %v12610_v32 }
 0x477   : > { %v1098_v38 = vpop.f32.mrb[14].mxu0 }
 0x478   : > { %v10210_v42 = vpop.f32.mrb[15].mxu0  ;;  %v1118_v43 = vsel %vm1117_vm6, %v12616_v37, -inf  ;;  %v12621_v44 = vadd.f32 %v1098_v38, %v12613_v34 }
 0x479   : > { %1119 = vmax.xlane.f32.xlu0 %v1118_v43 }
 0x47a   : > { %v1121_v45 = vsel %vm1117_vm6, %v12621_v44, -inf }
 0x47b   : > { %1122 = vmax.xlane.f32.xlu1 %v1121_v45 }
 0x47d   : > { %v1103_v47 = vpop.f32.mrb[16].mxu0 }
 0x47e   : > { %v10213_v50 = vpop.f32.mrb[17].mxu0  ;;  %v12632_v51 = vadd.f32 %v1103_v47, %v12626_v46 }
 0x47f   : > { %v1106_v52 = vpop.f32.mrb[18].mxu0 }
 0x480   : > { %v10214_v53 = vpop.f32.mrb[19].mxu0  ;;  %v1124_v54 = vsel %vm1117_vm6, %v12632_v51, -inf  ;;  %v12637_v55 = vadd.f32 %v1106_v52, %v12629_v49 }
 0x481   : > { %1125 = vmax.xlane.f32.xlu0 %v1124_v54 }
 0x482   : > { %v1127_v58 = vsel %vm1117_vm6, %v12637_v55, -inf }
 0x485   : > { %1128 = vmax.xlane.f32.xlu0 %v1127_v58  ;;  %v1111_v61 = vpop.f32.mrb[20].mxu0 }
 0x486   : > { %v10217_v62 = vpop.f32.mrb[21].mxu0  ;;  %v12645_v0 = vadd.f32 %v1111_v61, %v12640_v56 }
 0x487   : > { %v1114_v2 = vpop.f32.mrb[22].mxu0 }
 0x488   : > { %v10218_v3 = vpop.f32.mrb[23].mxu0  ;;  %v1130_v5 = vsel %vm1117_vm6, %v12645_v0, -inf }
 0x489   : > { %1131 = vmax.xlane.f32.xlu0 %v1130_v5 }
 0x48d   : > { %v1320_v63 = vpop.f32.mrb[24].mxu0 }
 0x48e   : > { %v10245_v7 = vpop.f32.mrb[25].mxu0  ;;  %v12650_v8 = vadd.f32 %v1320_v63, %v12610_v32 }
 0x48f   : > { %v1323_v4 = vpop.f32.mrb[26].mxu0 }
 0x490   : > { %v10246_v9 = vpop.f32.mrb[27].mxu0  ;;  %v1342_v12 = vsel %vm1117_vm6, %v12650_v8, -inf  ;;  %v12655_v13 = vadd.f32 %v1323_v4, %v12613_v34 }
 0x491   : > { %1343 = vmax.xlane.f32.xlu1 %v1342_v12 }
 0x492   : > { %v1345_v14 = vsel %vm1117_vm6, %v12655_v13, -inf }
 0x493   : > { %1346 = vmax.xlane.f32.xlu0 %v1345_v14 }
 0x495   : > { %v1328_v15 = vpop.f32.mrb[28].mxu0 }
 0x496   : > { %v10249_v17 = vpop.f32.mrb[29].mxu0  ;;  %v12660_v10 = vadd.f32 %v1328_v15, %v12626_v46 }
 0x497   : > { %v1331_v16 = vpop.f32.mrb[30].mxu0 }
 0x498   : > { %v10250_v18 = vpop.f32.mrb[31].mxu0  ;;  %v1348_v19 = vsel %vm1117_vm6, %v12660_v10, -inf  ;;  %v12665_v20 = vadd.f32 %v1331_v16, %v12629_v49 }
 0x499   : > { %1349 = vmax.xlane.f32.xlu1 %v1348_v19 }
 0x49a   : > { %v1351_v22 = vsel %vm1117_vm6, %v12665_v20, -inf }
 0x49b   : > { %1352 = vmax.xlane.f32.xlu0 %v1351_v22 }
 0x49d   : > { %v1336_v21 = vpop.f32.mrb[32].mxu0 }
 0x49e   : > { %v10253_v25 = vpop.f32.mrb[33].mxu0  ;;  %v12670_v26 = vadd.f32 %v1336_v21, %v12640_v56 }
 0x49f   : > { %v1339_v28 = vpop.f32.mrb[34].mxu0 }
 0x4a0   : > { %v10254_v30 = vpop.f32.mrb[35].mxu0  ;;  %v1354_v33 = vsel %vm1117_vm6, %v12670_v26, -inf }
 0x4a1   : > { %1355 = vmax.xlane.f32.xlu1 %v1354_v33 }
 0x4a5   : > { %v1540_v36 = vpop.f32.mrb[36].mxu0 }
 0x4a6   : > { %v10281_v38 = vpop.f32.mrb[37].mxu0  ;;  %v12675_v42 = vadd.f32 %v1540_v36, %v12610_v32 }
 0x4a7   : > { %v1543_v43 = vpop.f32.mrb[38].mxu0 }
 0x4a8   : > { %v10282_v45 = vpop.f32.mrb[39].mxu0  ;;  %v1562_v47 = vsel %vm1117_vm6, %v12675_v42, -inf  ;;  %v12680_v50 = vadd.f32 %v1543_v43, %v12613_v34 }
 0x4a9   : > { %1563 = vmax.xlane.f32.xlu0 %v1562_v47 }
 0x4aa   : > { %v1565_v52 = vsel %vm1117_vm6, %v12680_v50, -inf }
 0x4ab   : > { %1566 = vmax.xlane.f32.xlu1 %v1565_v52 }
 0x4ad   : > { %v1548_v53 = vpop.f32.mrb[40].mxu0 }
 0x4ae   : > { %v10285_v54 = vpop.f32.mrb[41].mxu0  ;;  %v12689_v21 = vadd.f32 %v1548_v53, %v12626_v46 }
 0x4af   : > { %v1551_v58 = vpop.f32.mrb[42].mxu0 }
 0x4b0   : > { %v10286_v61 = vpop.f32.mrb[43].mxu0  ;;  %v12692_v25 = vadd.f32 %v1551_v58, %v12629_v49  ;;  %v1568_v28 = vsel %vm1117_vm6, %v12689_v21, -inf  ;;  %v12732_v58 = vpop.permute.xlu1 %1402 }
 0x4b2   : > { %v1571_v33 = vsel %vm1117_vm6, %v12692_v25, -inf }
 0x4b5   : > { %v1556_v62 = vpop.f32.mrb[44].mxu0 }
 0x4b6   : > { %v10289_v2 = vpop.f32.mrb[45].mxu0  ;;  %v12697_v30 = vadd.f32 %v1556_v62, %v12640_v56 }
 0x4b7   : > { %v1559_v3 = vpop.f32.mrb[46].mxu0 }
 0x4b8   : > { %v10290_v5 = vpop.f32.mrb[47].mxu0  ;;  %v1574_v38 = vsel %vm1117_vm6, %v12697_v30, -inf }
 0x4bc   : > { %1404 = vrot.lane.b32.xlu1 %v12492_v40, %s16016_s23  ;;  %s16018_s23 = smov 24  }
 0x4bd   : > { %v1760_v63 = vpop.f32.mrb[48].mxu0 }
 0x4be   : > { %v10317_v7 = vpop.f32.mrb[49].mxu0  ;;  %v12702_v36 = vadd.f32 %v1760_v63, %v12610_v32 }
 0x4bf   : > { %1620 = vrot.lane.b32.xlu0 %v12478_v23, %s16014_s29  ;;  %v1763_v4 = vpop.f32.mrb[50].mxu0 }
 0x4c0   : > { %v10318_v9 = vpop.f32.mrb[51].mxu0  ;;  %v12707_v43 = vadd.f32 %v1763_v4, %v12613_v34  ;;  %v1782_v45 = vsel %vm1117_vm6, %v12702_v36, -inf }
 0x4c2   : > { %v1785_v52 = vsel %vm1117_vm6, %v12707_v43, -inf }
 0x4c5   : > { %v1768_v12 = vpop.f32.mrb[52].mxu0 }
 0x4c6   : > { %v10321_v14 = vpop.f32.mrb[53].mxu0  ;;  %v12712_v47 = vadd.f32 %v1768_v12, %v12626_v46 }
 0x4c7   : > { %v1771_v15 = vpop.f32.mrb[54].mxu0 }
 0x4c8   : > { %v10322_v17 = vpop.f32.mrb[55].mxu0  ;;  %v12717_v32 = vadd.f32 %v1771_v15, %v12629_v49  ;;  %v1788_v53 = vsel %vm1117_vm6, %v12712_v47, -inf  ;;  %v12730_v49 = vpop.permute.xlu0 %1400 }
 0x4ca   : > { %v1791_v54 = vsel %vm1117_vm6, %v12717_v32, -inf }
 0x4cd   : > { %v1776_v16 = vpop.f32.mrb[56].mxu0 }
 0x4ce   : > { %v10325_v18 = vpop.f32.mrb[57].mxu0  ;;  %v12722_v34 = vadd.f32 %v1776_v16, %v12640_v56 }
 0x4cf   : > { %v1779_v19 = vpop.f32.mrb[58].mxu0 }
 0x4d0   : > { %v10326_v22 = vpop.f32.mrb[59].mxu0  ;;  %v1794_v46 = vsel %vm1117_vm6, %v12722_v34, -inf }
 0x4de   : > { %1569 = vmax.xlane.f32.xlu0 %v1568_v28 }
 0x4e0   : > { %1572 = vmax.xlane.f32.xlu1 %v1571_v33 }
 0x4e2   : > { %1575 = vmax.xlane.f32.xlu0 %v1574_v38 }
 0x4e4   : > { %1783 = vmax.xlane.f32.xlu1 %v1782_v45 }
 0x4e6   : > { %1786 = vmax.xlane.f32.xlu0 %v1785_v52 }
 0x4e8   : > { %1789 = vmax.xlane.f32.xlu1 %v1788_v53 }
 0x4ea   : > { %1792 = vmax.xlane.f32.xlu0 %v1791_v54 }
 0x4ec   : > { %1795 = vmax.xlane.f32.xlu1 %v1794_v46 }
 0x500   : > { %1622 = vrot.lane.b32.xlu0 %v12486_v35, %s16014_s29 }
 0x506   : > { %v1120_v61 = vpop.xlane.xlu0 %1119 }
 0x507   : > { %v1133_v56 = vsub.f32 %v12616_v37, %v1120_v61 }
 0x508   : > { %v1123_v62 = vpop.xlane.xlu1 %1122 }
 0x509   : > { %v1138_v2 = vmul.f32 1.442695, %v1133_v56  ;;  %v1134_v3 = vsub.f32 %v12621_v44, %v1123_v62 }
 0x50b   : > { %11607 = vpow2.f32 %v1138_v2  ;;  %v1140_v5 = vmul.f32 1.442695, %v1134_v3 }
 0x50d   : > { %11609 = vpow2.f32 %v1140_v5 }
 0x50e   : > { %v1126_v63 = vpop.xlane.xlu0 %1125 }
 0x50f   : > { %v1135_v7 = vsub.f32 %v12632_v51, %v1126_v63 }
 0x511   : > { %v1142_v4 = vmul.f32 1.442695, %v1135_v7 }
 0x512   : > { %v1129_v9 = vpop.xlane.xlu0 %1128 }
 0x513   : > { %v1136_v12 = vsub.f32 %v12637_v55, %v1129_v9  ;;  %11611 = vpow2.f32 %v1142_v4 }
 0x515   : > { %v12738_v14 = vpop.eup %11607  ;;  %v1144_v15 = vmul.f32 1.442695, %v1136_v12 }
 0x516   : > { %v1132_v17 = vpop.xlane.xlu0 %1131  ;;  %v1148_v37 = vsel %vm1117_vm6, %v12738_v14, 0.0 }
 0x517   : > { %11613 = vpow2.f32 %v1144_v15  ;;  %v1137_v44 = vsub.f32 %v12645_v0, %v1132_v17  ;;  %1149 = vadd.xlane.f32.xlu1 %v1148_v37  ;;  %v12743_v18 = vpop.eup %11609 }
 0x518   : > { %v1151_v55 = vsel %vm1117_vm6, %v12743_v18, 0.0 }
 0x519   : > { %v1146_v16 = vmul.f32 1.442695, %v1137_v44 }
 0x51b   : > { %11615 = vpow2.f32 %v1146_v16 }
 0x51d   : > { %v12747_v19 = vpop.eup %11611 }
 0x51e   : > { %v1344_v51 = vpop.xlane.xlu1 %1343  ;;  %v1154_v45 = vsel %vm1117_vm6, %v12747_v19, 0.0 }
 0x51f   : > { %v1357_v22 = vsub.f32 %v12650_v8, %v1344_v51  ;;  %1152 = vadd.xlane.f32.xlu0 %v1151_v55 }
 0x520   : > { %v1347_v28 = vpop.xlane.xlu0 %1346 }
 0x521   : > { %v12750_v33 = vpop.eup %11613  ;;  %v1362_v38 = vmul.f32 1.442695, %v1357_v22  ;;  %v1358_v0 = vsub.f32 %v12655_v13, %v1347_v28 }
 0x522   : > { %v1157_v52 = vsel %vm1117_vm6, %v12750_v33, 0.0 }
 0x523   : > { %11617 = vpow2.f32 %v1362_v38  ;;  %v1364_v53 = vmul.f32 1.442695, %v1358_v0  ;;  %1155 = vadd.xlane.f32.xlu0 %v1154_v45  ;;  %1158 = vadd.xlane.f32.xlu1 %v1157_v52 }
 0x525   : > { %v12757_v54 = vpop.eup %11615  ;;  %11619 = vpow2.f32 %v1364_v53 }
 0x526   : > { %v1350_v8 = vpop.xlane.xlu1 %1349  ;;  %v1160_v46 = vsel %vm1117_vm6, %v12757_v54, 0.0 }
 0x527   : > { %v1359_v61 = vsub.f32 %v12660_v10, %v1350_v8  ;;  %1161 = vadd.xlane.f32.xlu0 %v1160_v46 }
 0x528   : > { %v1353_v13 = vpop.xlane.xlu0 %1352 }
 0x529   : > { %v1366_v56 = vmul.f32 1.442695, %v1359_v61  ;;  %v1360_v62 = vsub.f32 %v12665_v20, %v1353_v13 }
 0x52b   : > { %11621 = vpow2.f32 %v1366_v56  ;;  %v1368_v2 = vmul.f32 1.442695, %v1360_v62 }
 0x52d   : > { %v12763_v3 = vpop.eup %11617  ;;  %11623 = vpow2.f32 %v1368_v2 }
 0x52e   : > { %v1356_v5 = vpop.xlane.xlu1 %1355  ;;  %v1372_v63 = vsel %vm1117_vm6, %v12763_v3, 0.0 }
 0x52f   : > { %v12767_v7 = vpop.eup %11619  ;;  %v1361_v4 = vsub.f32 %v12670_v26, %v1356_v5  ;;  %1373 = vadd.xlane.f32.xlu1 %v1372_v63 }
 0x530   : > { %v1375_v10 = vsel %vm1117_vm6, %v12767_v7, 0.0 }
 0x531   : > { %v1370_v9 = vmul.f32 1.442695, %v1361_v4  ;;  %1376 = vadd.xlane.f32.xlu0 %v1375_v10 }
 0x533   : > { %11625 = vpow2.f32 %v1370_v9 }
 0x535   : > { %v12772_v20 = vpop.eup %11621 }
 0x536   : > { %v1378_v12 = vsel %vm1117_vm6, %v12772_v20, 0.0  ;;  %v1564_v22 = vpop.xlane.xlu0 %1563 }
 0x537   : > { %v12776_v15 = vpop.eup %11623  ;;  %1379 = vadd.xlane.f32.xlu0 %v1378_v12  ;;  %v1577_v28 = vsub.f32 %v12675_v42, %v1564_v22 }
 0x538   : > { %v1567_v17 = vpop.xlane.xlu1 %1566  ;;  %v1381_v26 = vsel %vm1117_vm6, %v12776_v15, 0.0 }
 0x539   : > { %v1578_v37 = vsub.f32 %v12680_v50, %v1567_v17  ;;  %v1582_v38 = vmul.f32 1.442695, %v1577_v28 }
 0x53a   : > { %v12796_v52 = vpop.permute.xlu0 %1620 }
 0x53b   : > { %v1584_v44 = vmul.f32 1.442695, %v1578_v37  ;;  %1382 = vadd.xlane.f32.xlu0 %v1381_v26 }
 0x53c   : > { %v12798_v53 = vpop.permute.xlu1 %1404 }
 0x53d   : > { %v12781_v16 = vpop.eup %11625  ;;  %11627 = vpow2.f32 %v1584_v44 }
 0x53e   : > { %v1384_v51 = vsel %vm1117_vm6, %v12781_v16, 0.0  ;;  %11629 = vpow2.f32 %v1582_v38 }
 0x53f   : > { %1385 = vadd.xlane.f32.xlu0 %v1384_v51 }
 0x540   : > { %1624 = vrot.lane.b32.xlu1 %v12492_v40, %s16014_s29  ;;  %s16020_s29 = smov 16  }
 0x547   : > { %v12787_v55 = vpop.eup %11627 }
 0x548   : > { %v1595_v50 = vsel %vm1117_vm6, %v12787_v55, 0.0  ;;  %v12792_v0 = vpop.eup %11629 }
 0x549   : > { %1596 = vadd.xlane.f32.xlu0 %v1595_v50  ;;  %v1592_v45 = vsel %vm1117_vm6, %v12792_v0, 0.0 }
 0x564   : > { %1593 = vadd.xlane.f32.xlu1 %v1592_v45 }
 0x56b   : > { %v1570_v8 = vpop.xlane.xlu0 %1569 }
 0x56c   : > { %v1579_v46 = vsub.f32 %v12689_v21, %v1570_v8 }
 0x56d   : > { %v1573_v61 = vpop.xlane.xlu1 %1572 }
 0x56e   : > { %v1586_v13 = vmul.f32 1.442695, %v1579_v46  ;;  %v1580_v56 = vsub.f32 %v12692_v25, %v1573_v61 }
 0x56f   : > { %v1576_v42 = vpop.xlane.xlu0 %1575 }
 0x570   : > { %11631 = vpow2.f32 %v1586_v13  ;;  %v1588_v62 = vmul.f32 1.442695, %v1580_v56  ;;  %v1581_v2 = vsub.f32 %v12697_v30, %v1576_v42 }
 0x571   : > { %v1784_v5 = vpop.xlane.xlu1 %1783 }
 0x572   : > { %11633 = vpow2.f32 %v1588_v62  ;;  %v1590_v63 = vmul.f32 1.442695, %v1581_v2  ;;  %v1797_v4 = vsub.f32 %v12702_v36, %v1784_v5 }
 0x573   : > { %v1787_v10 = vpop.xlane.xlu0 %1786 }
 0x574   : > { %11635 = vpow2.f32 %v1590_v63  ;;  %v1802_v9 = vmul.f32 1.442695, %v1797_v4  ;;  %v1798_v12 = vsub.f32 %v12707_v43, %v1787_v10 }
 0x575   : > { %v1790_v21 = vpop.xlane.xlu1 %1789 }
 0x576   : > { %11637 = vpow2.f32 %v1802_v9  ;;  %v1804_v17 = vmul.f32 1.442695, %v1798_v12  ;;  %v1799_v25 = vsub.f32 %v12712_v47, %v1790_v21 }
 0x577   : > { %v1793_v37 = vpop.xlane.xlu0 %1792 }
 0x578   : > { %11639 = vpow2.f32 %v1804_v17  ;;  %v1806_v26 = vmul.f32 1.442695, %v1799_v25  ;;  %v1800_v30 = vsub.f32 %v12717_v32, %v1793_v37 }
 0x579   : > { %v1796_v56 = vpop.xlane.xlu1 %1795 }
 0x57a   : > { %v12807_v44 = vpop.eup %11631  ;;  %11641 = vpow2.f32 %v1806_v26  ;;  %v1808_v51 = vmul.f32 1.442695, %v1800_v30  ;;  %v1801_v42 = vsub.f32 %v12722_v34, %v1796_v56 }
 0x57b   : > { %v1598_v36 = vsel %vm1117_vm6, %v12807_v44, 0.0  ;;  %v12842_v62 = vpop.permute.xlu0 %1622 }
 0x57c   : > { %v12811_v50 = vpop.eup %11633  ;;  %11643 = vpow2.f32 %v1808_v51  ;;  %1599 = vadd.xlane.f32.xlu0 %v1598_v36  ;;  %v1810_v5 = vmul.f32 1.442695, %v1801_v42 }
 0x57d   : > { %v1601_v47 = vsel %vm1117_vm6, %v12811_v50, 0.0 }
 0x57e   : > { %v12813_v43 = vpop.eup %11635 }
 0x57f   : > { %v1604_v22 = vsel %vm1117_vm6, %v12813_v43, 0.0 }
 0x580   : > { %v12819_v32 = vpop.eup %11637  ;;  %1602 = vadd.xlane.f32.xlu0 %v1601_v47  ;;  %1605 = vadd.xlane.f32.xlu1 %v1604_v22 }
 0x581   : > { %v1812_v38 = vsel %vm1117_vm6, %v12819_v32, 0.0 }
 0x582   : > { %v12821_v28 = vpop.eup %11639 }
 0x583   : > { %v1815_v45 = vsel %vm1117_vm6, %v12821_v28, 0.0 }
 0x584   : > { %v12827_v8 = vpop.eup %11641  ;;  %1813 = vadd.xlane.f32.xlu0 %v1812_v38  ;;  %1816 = vadd.xlane.f32.xlu1 %v1815_v45 }
 0x585   : > { %v1818_v13 = vsel %vm1117_vm6, %v12827_v8, 0.0 }
 0x586   : > { %v12829_v46 = vpop.eup %11643 }
 0x587   : > { %v1821_v61 = vsel %vm1117_vm6, %v12829_v46, 0.0 }
 0x588   : > { %1822 = vadd.xlane.f32.xlu0 %v1821_v61  ;;  %1819 = vadd.xlane.f32.xlu1 %v1818_v13 }
 0x599   : > { %1842 = vrot.lane.b32.xlu1 %v12486_v35, %s16012_s30 }
 0x59d   : > { %1844 = vrot.lane.b32.xlu1 %v12492_v40, %s16012_s30 }
 0x59e   : > { %1840 = vrot.lane.b32.xlu0 %v12478_v23, %s16012_s30  ;;  %s16024_s30 = smov 32  }
 0x5a4   : > { %v1150_v2 = vpop.xlane.xlu1 %1149 }
 0x5a5   : > { %11645 = vrcp.f32 %v1150_v2 }
 0x5ac   : > { %v1153_v63 = vpop.xlane.xlu0 %1152 }
 0x5ad   : > { %11647 = vrcp.f32 %v1153_v63 }
 0x5ae   : > { %11649 = vpow2.f32 %v1810_v5 }
 0x5af   : > { %v11646_v35 = vpop.eup %11645 }
 0x5b0   : > { %v1156_v4 = vpop.xlane.xlu0 %1155  ;;  %v1159_v10 = vpop.xlane.xlu1 %1158  ;;  %v1168_v23 = vmul.f32 %v11646_v35, %v12738_v14 }
 0x5b1   : > { %11651 = vrcp.f32 %v1156_v4 }
 0x5b2   : > { %11653 = vrcp.f32 %v1159_v10 }
 0x5b4   : > { %v1162_v40 = vpop.xlane.xlu0 %1161 }
 0x5b5   : > { %11655 = vrcp.f32 %v1162_v40 }
 0x5b7   : > { %v11648_v9 = vpop.eup %11647 }
 0x5b8   : > { %v1169_v12 = vmul.f32 %v11648_v9, %v12743_v18  ;;  %v12846_v34 = vpop.eup %11649 }
 0x5b9   : > { %v1824_v37 = vsel %vm1117_vm6, %v12846_v34, 0.0 }
 0x5ba   : > { %v1173_v21 = vpack.c.bf16 %v1169_v12, %v1168_v23 }
 0x5bb   : > { %v11652_v17 = vpop.eup %11651 }
 0x5bc   : > { %v11654_v25 = vpop.eup %11653  ;;  %10226 = vmatmul.mubr.msk.bf16.vlgmr.msra.gmra.mrb[16].mxu1 %vm1117_vm6, %v1173_v21  ;;  %v1170_v14 = vmul.f32 %v11652_v17, %v12747_v19  ;;  %v1374_v30 = vpop.xlane.xlu1 %1373 }
 0x5bd   : > { %10256 = vmatpush3.bf16.msra.mxu1 %v12730_v49  ;;  %1825 = vadd.xlane.f32.xlu0 %v1824_v37  ;;  %v1171_v18 = vmul.f32 %v11654_v25, %v12750_v33  ;;  %v1418_v49 = vsel %vm1193_vm5, %v12798_v53, 0 }
 0x5be   : > { %v1377_v26 = vpop.xlane.xlu0 %1376  ;;  %10257 = vmatprep.subr.bf16.mxu1 %v12210_v1  ;;  %10229 = vmatprep.mubr.msk.bf16.mxu1 %vm12211_vm1, %v12210_v1 }
 0x5bf   : > { %11657 = vrcp.f32 %v1377_v26  ;;  %v1174_v51 = vpack.c.bf16 %v1171_v18, %v1170_v14  ;;  %v11656_v36 = vpop.eup %11655 }
 0x5c0   : > { %11659 = vrcp.f32 %v1374_v30  ;;  %v1172_v19 = vmul.f32 %v11656_v36, %v12757_v54  ;;  %v1625_v2 = vpop.permute.xlu1 %1624 }
 0x5c1   : > { %10258 = vmatpush3.bf16.msra.mxu1 %v12732_v58  ;;  %v1638_v63 = vsel %vm1193_vm5, %v1625_v2, 0 }
 0x5c2   : > { %10259 = vmatprep.subr.bf16.mxu1 %v12210_v1  ;;  %v1175_v33 = vpack.c.bf16 %v1172_v19, %v1172_v19 }
 0x5c4   : > { %v1380_v47 = vpop.xlane.xlu0 %1379  ;;  %10230 = vmatmul.mubr.msk.bf16.gmra.mrb[20].mxu1 %vm1117_vm6, %v1174_v51 }
 0x5c5   : > { %10260 = vmatpush3.bf16.msra.mxu1 %v1418_v49  ;;  %10233 = vmatprep.mubr.msk.bf16.mxu1 %vm12211_vm1, %v12210_v1 }
 0x5c6   : > { %10291 = vmatprep.subr.bf16.mxu1 %v12210_v1 }
 0x5c8   : > { %v1383_v58 = vpop.xlane.xlu0 %1382 }
 0x5c9   : > { %11661 = vrcp.f32 %v1383_v58  ;;  %v11658_v22 = vpop.eup %11657 }
 0x5ca   : > { %11663 = vrcp.f32 %v1380_v47  ;;  %v11660_v38 = vpop.eup %11659  ;;  %v1393_v53 = vmul.f32 %v11658_v22, %v12767_v7 }
 0x5cb   : > { %v1392_v61 = vmul.f32 %v11660_v38, %v12763_v3 }
 0x5cc   : > { %10234 = vmatmul.mubr.msk.bf16.gmra.mrb[24].mxu1 %vm1117_vm6, %v1175_v33  ;;  %v1386_v45 = vpop.xlane.xlu0 %1385 }
 0x5cd   : > { %10261 = vmatprep.mubr.msk.bf16.mxu1 %vm12211_vm1, %v12210_v1  ;;  %11665 = vrcp.f32 %v1386_v45  ;;  %v1397_v54 = vpack.c.bf16 %v1393_v53, %v1392_v61 }
 0x5d3   : > { %v11662_v13 = vpop.eup %11661 }
 0x5d4   : > { %10262 = vmatmul.mubr.msk.bf16.vlgmr.msra.gmra.mrb[28].mxu1 %vm1117_vm6, %v1397_v54  ;;  %v11664_v56 = vpop.eup %11663  ;;  %v1395_v42 = vmul.f32 %v11662_v13, %v12776_v15 }
 0x5d5   : > { %10292 = vmatpush3.bf16.msra.mxu1 %v12796_v52  ;;  %10265 = vmatprep.mubr.msk.bf16.mxu1 %vm12211_vm1, %v12210_v1  ;;  %v1394_v7 = vmul.f32 %v11664_v56, %v12772_v20 }
 0x5d6   : > { %10293 = vmatprep.subr.bf16.mxu1 %v12210_v1  ;;  %v1597_v15 = vpop.xlane.xlu0 %1596 }
 0x5d7   : > { %v1398_v3 = vpack.c.bf16 %v1395_v42, %v1394_v7  ;;  %v11666_v5 = vpop.eup %11665  ;;  %11667 = vrcp.f32 %v1597_v15 }
 0x5d8   : > { %v1396_v52 = vmul.f32 %v11666_v5, %v12781_v16 }
 0x5d9   : > { %10294 = vmatpush3.bf16.msra.mxu1 %v12842_v62 }
 0x5da   : > { %10295 = vmatprep.subr.bf16.mxu1 %v12210_v1  ;;  %v1399_v20 = vpack.c.bf16 %v1396_v52, %v1396_v52 }
 0x5dc   : > { %10266 = vmatmul.mubr.msk.bf16.gmra.mrb[32].mxu1 %vm1117_vm6, %v1398_v3 }
 0x5dd   : > { %10296 = vmatpush3.bf16.msra.mxu1 %v1638_v63  ;;  %10269 = vmatprep.mubr.msk.bf16.mxu1 %vm12211_vm1, %v12210_v1 }
 0x5de   : > { %10327 = vmatprep.subr.bf16.mxu1 %v12210_v1 }
 0x5e1   : > { %v11668_v4 = vpop.eup %11667 }
 0x5e2   : > { %v1613_v35 = vmul.f32 %v11668_v4, %v12787_v55 }
 0x5e4   : > { %10270 = vmatmul.mubr.msk.bf16.gmra.mrb[36].mxu1 %vm1117_vm6, %v1399_v20 }
 0x5e5   : > { %10297 = vmatprep.mubr.msk.bf16.mxu1 %vm12211_vm1, %v12210_v1 }
 0x5f1   : > { %v1594_v62 = vpop.xlane.xlu1 %1593 }
 0x5f2   : > { %11669 = vrcp.f32 %v1594_v62 }
 0x5fc   : > { %v11670_v10 = vpop.eup %11669 }
 0x5fd   : > { %v1612_v40 = vmul.f32 %v11670_v10, %v12792_v0 }
 0x5ff   : > { %v1617_v9 = vpack.c.bf16 %v1613_v35, %v1612_v40 }
 0x601   : > { %10298 = vmatmul.mubr.msk.bf16.vlgmr.msra.gmra.mrb[40].mxu1 %vm1117_vm6, %v1617_v9 }
 0x602   : > { %10301 = vmatprep.mubr.msk.bf16.mxu1 %vm12211_vm1, %v12210_v1 }
 0x609   : > { %v1600_v16 = vpop.xlane.xlu0 %1599 }
 0x60a   : > { %11671 = vrcp.f32 %v1600_v16 }
 0x60d   : > { %v1603_v23 = vpop.xlane.xlu0 %1602  ;;  %v1606_v12 = vpop.xlane.xlu1 %1605 }
 0x60e   : > { %11673 = vrcp.f32 %v1603_v23 }
 0x60f   : > { %11675 = vrcp.f32 %v1606_v12 }
 0x611   : > { %v1814_v21 = vpop.xlane.xlu0 %1813  ;;  %v1817_v17 = vpop.xlane.xlu1 %1816 }
 0x612   : > { %11677 = vrcp.f32 %v1814_v21 }
 0x613   : > { %11679 = vrcp.f32 %v1817_v17 }
 0x614   : > { %v11672_v26 = vpop.eup %11671 }
 0x615   : > { %v1823_v25 = vpop.xlane.xlu0 %1822  ;;  %v1820_v37 = vpop.xlane.xlu1 %1819  ;;  %v1614_v18 = vmul.f32 %v11672_v26, %v12807_v44 }
 0x616   : > { %11681 = vrcp.f32 %v1823_v25 }
 0x617   : > { %11683 = vrcp.f32 %v1820_v37 }
 0x618   : > { %v11674_v55 = vpop.eup %11673 }
 0x619   : > { %v1841_v0 = vpop.permute.xlu0 %1840  ;;  %v1843_v14 = vpop.permute.xlu1 %1842  ;;  %v1615_v30 = vmul.f32 %v11674_v55, %v12811_v50  ;;  %v11537_v55 = vld [vmem:[%s15994_s9] sm:$0xff]  }
 0x61a   : > { %10328 = vmatpush3.bf16.msra.mxu1 %v1841_v0  ;;  %v11676_v36 = vpop.eup %11675  ;;  %10346 = vmatpush3.bf16.msra.mxu0 %v11537_v55 }
 0x61b   : > { %v1618_v51 = vpack.c.bf16 %v1615_v30, %v1614_v18  ;;  %10329 = vmatprep.subr.bf16.mxu1 %v12210_v1  ;;  %v1616_v47 = vmul.f32 %v11676_v36, %v12813_v43  ;;  %10347 = vmatprep.subr.bf16.mxu0 %v12210_v1 }
 0x61c   : > { %v11678_v50 = vpop.eup %11677 }
 0x61d   : > { %10302 = vmatmul.mubr.msk.bf16.gmra.mrb[44].mxu1 %vm1117_vm6, %v1618_v51  ;;  %v1845_v49 = vpop.permute.xlu1 %1844  ;;  %v1619_v19 = vpack.c.bf16 %v1616_v47, %v1616_v47  ;;  %v11680_v58 = vpop.eup %11679  ;;  %v1832_v33 = vmul.f32 %v11678_v50, %v12819_v32 }
 0x61e   : > { %10330 = vmatpush3.bf16.msra.mxu1 %v1843_v14  ;;  %10305 = vmatprep.mubr.msk.bf16.mxu1 %vm12211_vm1, %v12210_v1  ;;  %v1858_v44 = vsel %vm1193_vm5, %v1845_v49, 0  ;;  %v1833_v22 = vmul.f32 %v11680_v58, %v12821_v28 }
 0x61f   : > { %10331 = vmatprep.subr.bf16.mxu1 %v12210_v1 }
 0x620   : > { %v11682_v43 = vpop.eup %11681  ;;  %v1837_v38 = vpack.c.bf16 %v1833_v22, %v1832_v33  ;;  %v11538_v33 = vld [vmem:[%s15994_s9 + $0x8] sm:$0xff]  }
 0x621   : > { %v11684_v53 = vpop.eup %11683  ;;  %v1835_v61 = vmul.f32 %v11682_v43, %v12829_v46  ;;  %10348 = vmatpush3.bf16.msra.mxu0 %v11538_v33 }
 0x622   : > { %10332 = vmatpush3.bf16.msra.mxu1 %v1858_v44  ;;  %v1834_v45 = vmul.f32 %v11684_v53, %v12827_v8  ;;  %10377 = vmatprep.subr.bf16.mxu0 %v12210_v1 }
 0x623   : > { %10361 = vmatprep.subr.bf16.mxu1 %v12210_v1 }
 0x624   : > { %v1838_v54 = vpack.c.bf16 %v1835_v61, %v1834_v45 }
 0x625   : > { %10306 = vmatmul.mubr.msk.bf16.gmra.mrb[48].mxu1 %vm1117_vm6, %v1619_v19 }
 0x626   : > { %10333 = vmatprep.mubr.msk.bf16.mxu1 %vm12211_vm1, %v12210_v1 }
 0x62d   : > { %10334 = vmatmul.mubr.msk.bf16.vlgmr.msra.gmra.mrb[52].mxu1 %vm1117_vm6, %v1837_v38 }
 0x62e   : > { %10337 = vmatprep.mubr.msk.bf16.mxu1 %vm12211_vm1, %v12210_v1 }
 0x635   : > { %10338 = vmatmul.mubr.msk.bf16.gmra.mrb[56].mxu1 %vm1117_vm6, %v1838_v54 }
 0x636   : > { %10341 = vmatprep.mubr.msk.bf16.mxu1 %vm12211_vm1, %v12210_v1 }
 0x64a   : > { %v1826_v32 = vpop.xlane.xlu0 %1825 }
 0x64b   : > { %11685 = vrcp.f32 %v1826_v32 }
 0x655   : > { %v11686_v28 = vpop.eup %11685 }
 0x656   : > { %v1836_v13 = vmul.f32 %v11686_v28, %v12846_v34 }
 0x658   : > { %v1839_v56 = vpack.c.bf16 %v1836_v13, %v1836_v13 }
 0x65a   : > { %10342 = vmatmul.mubr.msk.bf16.gmra.mrb[60].mxu1 %vm1117_vm6, %v1839_v56 }
 0x65b   : > { %10365 = vmatprep.mubr.msk.bf16.mxu1 %vm12211_vm1, %v12210_v1 }
 0x68f   : > { %v12921_v8 = vpop.f32.mrb[16].mxu1 }
 0x690   : > { %v10227_v46 = vpop.f32.mrb[17].mxu1 }
 0x691   : > { %v12923_v42 = vpop.f32.mrb[18].mxu1 }
 0x692   : > { %v10228_v7 = vpop.f32.mrb[19].mxu1 }
 0x697   : > { %v12925_v2 = vpop.f32.mrb[20].mxu1 }
 0x698   : > { %v10231_v3 = vpop.f32.mrb[21].mxu1 }
 0x699   : > { %v12927_v5 = vpop.f32.mrb[22].mxu1 }
 0x69a   : > { %v10232_v63 = vpop.f32.mrb[23].mxu1 }
 0x69f   : > { %v12929_v52 = vpop.f32.mrb[24].mxu1 }
 0x6a0   : > { %v10235_v34 = vpop.f32.mrb[25].mxu1 }
 0x6a1   : > { %v1250_v20 = vpop.f32.mrb[26].mxu1 }
 0x6a2   : > { %v10236_v15 = vpop.f32.mrb[27].mxu1 }
 0x6a7   : > { %v1454_v62 = vpop.f32.mrb[28].mxu1 }
 0x6a8   : > { %v10263_v4 = vpop.f32.mrb[29].mxu1 }
 0x6a9   : > { %v1457_v10 = vpop.f32.mrb[30].mxu1 }
 0x6aa   : > { %v11349_v35 = vpack.i.bf16 %v1457_v10, %v1454_v62  ;;  %v10264_v40 = vpop.f32.mrb[31].mxu1 }
 0x6ac   : > { %11350 = vrot.lane.b32.xlu1 %v11349_v35, %s16022_s2 }
 0x6af   : > { %v1462_v9 = vpop.f32.mrb[32].mxu1 }
 0x6b0   : > { %v10267_v16 = vpop.f32.mrb[33].mxu1 }
 0x6b1   : > { %v1465_v23 = vpop.f32.mrb[34].mxu1 }
 0x6b2   : > { %v11359_v12 = vpack.i.bf16 %v1465_v23, %v1462_v9  ;;  %v10268_v21 = vpop.f32.mrb[35].mxu1 }
 0x6b4   : > { %11360 = vrot.lane.b32.xlu1 %v11359_v12, %s16022_s2 }
 0x6b7   : > { %v1470_v17 = vpop.f32.mrb[36].mxu1 }
 0x6b8   : > { %v10271_v25 = vpop.f32.mrb[37].mxu1 }
 0x6b9   : > { %v1473_v37 = vpop.f32.mrb[38].mxu1 }
 0x6ba   : > { %v10272_v26 = vpop.f32.mrb[39].mxu1 }
 0x6d4   : > { %v1674_v0 = vpop.f32.mrb[40].mxu1 }
 0x6d5   : > { %v10299_v14 = vpop.f32.mrb[41].mxu1 }
 0x6d6   : > { %v1677_v18 = vpop.f32.mrb[42].mxu1 }
 0x6d7   : > { %v11354_v30 = vpack.i.bf16 %v1677_v18, %v1674_v0  ;;  %v10300_v51 = vpop.f32.mrb[43].mxu1 }
 0x6d9   : > { %11355 = vrot.lane.b32.xlu0 %v11354_v30, %s16020_s29 }
 0x6f0   : > { %v1682_v36 = vpop.f32.mrb[44].mxu1 }
 0x6f1   : > { %v10303_v49 = vpop.f32.mrb[45].mxu1 }
 0x6f2   : > { %v1685_v47 = vpop.f32.mrb[46].mxu1 }
 0x6f3   : > { %v11369_v44 = vpack.i.bf16 %v1685_v47, %v1682_v36  ;;  %v10304_v50 = vpop.f32.mrb[47].mxu1 }
 0x6f8   : > { %v1690_v19 = vpop.f32.mrb[48].mxu1 }
 0x6f9   : > { %v10307_v58 = vpop.f32.mrb[49].mxu1 }
 0x6fa   : > { %v1693_v22 = vpop.f32.mrb[50].mxu1 }
 0x6fb   : > { %v10308_v43 = vpop.f32.mrb[51].mxu1 }
 0x700   : > { %v1894_v38 = vpop.f32.mrb[52].mxu1 }
 0x701   : > { %v10335_v53 = vpop.f32.mrb[53].mxu1 }
 0x702   : > { %v1897_v45 = vpop.f32.mrb[54].mxu1 }
 0x703   : > { %v11364_v61 = vpack.i.bf16 %v1897_v45, %v1894_v38  ;;  %v10336_v54 = vpop.f32.mrb[55].mxu1 }
 0x705   : > { %11365 = vrot.lane.b32.xlu1 %v11364_v61, %s16018_s23  ;;  %v9477_v61 = vld [vmem:[%s16064_s10] ss:$0 sm:$0xff] }
 0x708   : > { %v1902_v32 = vpop.f32.mrb[56].mxu1 }
 0x709   : > { %11370 = vrot.lane.b32.xlu1 %v11369_v44, %s16020_s29  ;;  %v10339_v28 = vpop.f32.mrb[57].mxu1 }
 0x70a   : > { %v1905_v13 = vpop.f32.mrb[58].mxu1 }
 0x70b   : > { %v11374_v56 = vpack.i.bf16 %v1905_v13, %v1902_v32  ;;  %v10340_v46 = vpop.f32.mrb[59].mxu1 }
 0x70d   : > { %11375 = vrot.lane.b32.xlu1 %v11374_v56, %s16018_s23 }
 0x711   : > { %1929 = vrot.lane.b32.xlu1 %v1470_v17, %s16022_s2  ;;  %s16067_s2 = smov 56  }
 0x715   : > { %1949 = vrot.lane.b32.xlu1 %v1690_v19, %s16020_s29  ;;  %s16066_s29 = smov 104  }
 0x71e   : > { %v11351_v20 = vpop.permute.xlu1 %11350 }
 0x71f   : > { %v11353_v4 = vunpack.i.h.bf16 %v11351_v20  ;;  %v11352_v10 = vunpack.i.l.bf16 %v11351_v20 }
 0x721   : > { %v1977_v16 = vsel %vm1042_vm4, %v12923_v42, %v11353_v4  ;;  %v1976_v23 = vsel %vm1042_vm4, %v12921_v8, %v11352_v10 }
 0x726   : > { %v11361_v62 = vpop.permute.xlu1 %11360 }
 0x727   : > { %v11363_v14 = vunpack.i.h.bf16 %v11361_v62  ;;  %v11362_v18 = vunpack.i.l.bf16 %v11361_v62 }
 0x729   : > { %v1979_v42 = vsel %vm1042_vm4, %v12927_v5, %v11363_v14  ;;  %v1978_v36 = vsel %vm1042_vm4, %v12925_v2, %v11362_v18 }
 0x72d   : > { %v1910_v7 = vpop.f32.mrb[60].mxu1 }
 0x72e   : > { %1969 = vrot.lane.b32.xlu0 %v1910_v7, %s16018_s23  ;;  %v10343_v3 = vpop.f32.mrb[61].mxu1  ;;  %s16065_s23 = smov 112  }
 0x72f   : > { %v1913_v63 = vpop.f32.mrb[62].mxu1 }
 0x730   : > { %v10344_v34 = vpop.f32.mrb[63].mxu1 }
 0x74b   : > { %v11356_v15 = vpop.permute.xlu0 %11355 }
 0x74c   : > { %v11358_v35 = vunpack.i.h.bf16 %v11356_v15  ;;  %v11357_v40 = vunpack.i.l.bf16 %v11356_v15 }
 0x74e   : > { %v1982_v17 = vsel %vm1981_vm7, %v1976_v23, %v11357_v40  ;;  %v1983_v25 = vsel %vm1981_vm7, %v1977_v16, %v11358_v35 }
 0x777   : > { %v11366_v9 = vpop.permute.xlu1 %11365 }
 0x778   : > { %v11368_v12 = vunpack.i.h.bf16 %v11366_v9  ;;  %v11367_v21 = vunpack.i.l.bf16 %v11366_v9 }
 0x77a   : > { %v1988_v37 = vsel %vm1987_vm8, %v1982_v17, %v11367_v21  ;;  %v1989_v26 = vsel %vm1987_vm8, %v1983_v25, %v11368_v12 }
 0x77b   : > { %v1993_v55 = vpack.c.bf16 %v1989_v26, %v1988_v37  ;;  %v11371_v0 = vpop.permute.xlu1 %11370 }
 0x77c   : > { %v11373_v30 = vunpack.i.h.bf16 %v11371_v0  ;;  %v11372_v51 = vunpack.i.l.bf16 %v11371_v0 }
 0x77d   : > { %10350 = vmatmul.mubr.msk.bf16.vlgmr.msra.gmra.mrb[60].mxu0 %vm799_vm3, %v1993_v55 }
 0x77e   : > { %10353 = vmatprep.mubr.msk.bf16.mxu0 %vm12211_vm1, %v12210_v1  ;;  %v1984_v44 = vsel %vm1981_vm7, %v1978_v36, %v11372_v51  ;;  %v1985_v50 = vsel %vm1981_vm7, %v1979_v42, %v11373_v30 }
 0x77f   : > { %v11376_v8 = vpop.permute.xlu1 %11375 }
 0x780   : > { %v11378_v49 = vunpack.i.h.bf16 %v11376_v8  ;;  %v11377_v47 = vunpack.i.l.bf16 %v11376_v8 }
 0x782   : > { %v1990_v19 = vsel %vm1987_vm8, %v1984_v44, %v11377_v47  ;;  %v1991_v58 = vsel %vm1987_vm8, %v1985_v50, %v11378_v49 }
 0x783   : > { %v1994_v33 = vpack.c.bf16 %v1991_v58, %v1990_v19  ;;  %v1930_v5 = vpop.permute.xlu1 %1929 }
 0x784   : > { %v1980_v2 = vsel %vm1042_vm4, %v12929_v52, %v1930_v5 }
 0x785   : > { %10354 = vmatmul.mubr.msk.bf16.gmra.mrb[64].mxu0 %vm799_vm3, %v1994_v33 }
 0x786   : > { %10357 = vmatprep.mubr.msk.bf16.mxu0 %vm12211_vm1, %v12210_v1 }
 0x787   : > { %v1950_v22 = vpop.permute.xlu1 %1949 }
 0x788   : > { %v1986_v43 = vsel %vm1981_vm7, %v1980_v2, %v1950_v22  ;;  %v11539_v22 = vld [vmem:[%s15993_s8 + $0x10] sm:$0xff]  }
 0x789   : > { %10362 = vmatpush3.bf16.msra.mxu1 %v11539_v22 }
 0x78a   : > { %10363 = vmatprep.subr.bf16.mxu1 %v12210_v1 }
 0x7a0   : > { %v1970_v38 = vpop.permute.xlu0 %1969 }
 0x7a1   : > { %v1992_v53 = vsel %vm1987_vm8, %v1986_v43, %v1970_v38  ;;  %v11540_v43 = vld [vmem:[%s15993_s8 + $0x18] sm:$0xff]  }
 0x7a2   : > { %v1995_v45 = vpack.c.bf16 %v1992_v53, %v1992_v53  ;;  %10364 = vmatpush3.bf16.msra.mxu1 %v11540_v43 }
 0x7a3   : > { %10395 = vmatprep.subr.bf16.mxu1 %v12210_v1 }
 0x7a4   : > { %10358 = vmatmul.mubr.msk.bf16.gmra.mrb[68].mxu0 %vm799_vm3, %v1995_v45 }
 0x7a5   : > { %10383 = vmatprep.mubr.msk.bf16.mxu0 %vm12211_vm1, %v12210_v1 }
 0x850   : > { %v2062_v54 = vpop.f32.mrb[60].mxu0 }
 0x851   : > { %v2063_v32 = vadd.f32 %v9477_v61, %v2062_v54  ;;  %v10351_v28 = vpop.f32.mrb[61].mxu0 }
 0x852   : > { %v2065_v13 = vpop.f32.mrb[62].mxu0 }
 0x853   : > { %v2066_v52 = vadd.f32 %v9477_v61, %v2065_v13  ;;  %v10352_v56 = vpop.f32.mrb[63].mxu0  ;;  %v12981_v46 = vadd.f32 %v2063_v32, %v12398_v27 }
 0x855   : > { %v2089_v7 = vsel %vm799_vm3, %v12981_v46, 0.0  ;;  %v12986_v3 = vadd.f32 %v2066_v52, %v12402_v29 }
 0x856   : > { %2090 = vadd.xlane.f32.xlu1 %v2089_v7 }
 0x857   : > { %v2092_v63 = vsel %vm799_vm3, %v12986_v3, 0.0 }
 0x858   : > { %2093 = vadd.xlane.f32.xlu0 %v2092_v63  ;;  %v2070_v34 = vpop.f32.mrb[64].mxu0 }
 0x859   : > { %v2071_v20 = vadd.f32 %v9477_v61, %v2070_v34  ;;  %v10355_v15 = vpop.f32.mrb[65].mxu0 }
 0x85a   : > { %v2073_v62 = vpop.f32.mrb[66].mxu0 }
 0x85b   : > { %v2074_v4 = vadd.f32 %v9477_v61, %v2073_v62  ;;  %v10356_v10 = vpop.f32.mrb[67].mxu0  ;;  %v12991_v27 = vadd.f32 %v2071_v20, %v12412_v39 }
 0x85d   : > { %v2095_v35 = vsel %vm799_vm3, %v12991_v27, 0.0  ;;  %v12996_v29 = vadd.f32 %v2074_v4, %v12416_v41 }
 0x85e   : > { %2096 = vadd.xlane.f32.xlu0 %v2095_v35 }
 0x85f   : > { %v2098_v40 = vsel %vm799_vm3, %v12996_v29, 0.0 }
 0x862   : > { %2099 = vadd.xlane.f32.xlu0 %v2098_v40 }
 0x877   : > { %v2078_v9 = vpop.f32.mrb[68].mxu0 }
 0x878   : > { %v2079_v16 = vadd.f32 %v9477_v61, %v2078_v9  ;;  %v10359_v23 = vpop.f32.mrb[69].mxu0 }
 0x879   : > { %v2081_v12 = vpop.f32.mrb[70].mxu0 }
 0x87a   : > { %v10360_v21 = vpop.f32.mrb[71].mxu0  ;;  %v13001_v17 = vadd.f32 %v2079_v16, %v12423_v48 }
 0x87c   : > { %v2101_v39 = vsel %vm799_vm3, %v13001_v17, 0.0 }
 0x87d   : > { %2102 = vadd.xlane.f32.xlu1 %v2101_v39 }
 0x8e3   : > { %v2091_v25 = vpop.xlane.xlu1 %2090 }
 0x8e4   : > { %v2104_v41 = vmul.f32 0.03125, %v2091_v25 }
 0x8e5   : > { %v2094_v37 = vpop.xlane.xlu0 %2093 }
 0x8e6   : > { %v2109_v26 = vsub.f32 %v12981_v46, %v2104_v41  ;;  %v2105_v55 = vmul.f32 0.03125, %v2094_v37 }
 0x8e8   : > { %v2110_v0 = vsub.f32 %v12986_v3, %v2105_v55  ;;  %v2114_v14 = vmul.f32 %v2109_v26, %v2109_v26 }
 0x8ea   : > { %v2119_v18 = vsel %vm799_vm3, %v2114_v14, 0.0  ;;  %v2115_v30 = vmul.f32 %v2110_v0, %v2110_v0 }
 0x8eb   : > { %v2097_v51 = vpop.xlane.xlu0 %2096  ;;  %2120 = vadd.xlane.f32.xlu0 %v2119_v18 }
 0x8ec   : > { %v2106_v48 = vmul.f32 0.03125, %v2097_v51  ;;  %v2122_v8 = vsel %vm799_vm3, %v2115_v30, 0.0 }
 0x8ed   : > { %2123 = vadd.xlane.f32.xlu1 %v2122_v8 }
 0x8ee   : > { %v2111_v42 = vsub.f32 %v12991_v27, %v2106_v48 }
 0x8ef   : > { %v2100_v36 = vpop.xlane.xlu0 %2099 }
 0x8f0   : > { %v2107_v49 = vmul.f32 0.03125, %v2100_v36  ;;  %v2116_v47 = vmul.f32 %v2111_v42, %v2111_v42 }
 0x8f2   : > { %v2112_v44 = vsub.f32 %v12996_v29, %v2107_v49  ;;  %v2125_v50 = vsel %vm799_vm3, %v2116_v47, 0.0 }
 0x8f3   : > { %2126 = vadd.xlane.f32.xlu0 %v2125_v50 }
 0x8f4   : > { %v2117_v19 = vmul.f32 %v2112_v44, %v2112_v44 }
 0x8f6   : > { %v2128_v58 = vsel %vm799_vm3, %v2117_v19, 0.0 }
 0x8f7   : > { %2129 = vadd.xlane.f32.xlu1 %v2128_v58 }
 0x908   : > { %2154 = vrot.lane.b32.xlu1 %v12449_v31, %s16024_s30  ;;  %s16069_s30 = smov 40  }
 0x90a   : > { %v2103_v33 = vpop.xlane.xlu1 %2102 }
 0x90b   : > { %v2108_v5 = vmul.f32 0.03125, %v2103_v33 }
 0x90d   : > { %v2113_v2 = vsub.f32 %v13001_v17, %v2108_v5 }
 0x90f   : > { %v2118_v38 = vmul.f32 %v2113_v2, %v2113_v2 }
 0x911   : > { %v2131_v53 = vsel %vm799_vm3, %v2118_v38, 0.0 }
 0x912   : > { %2132 = vadd.xlane.f32.xlu0 %v2131_v53 }
 0x928   : > { %2163 = vrot.lane.b32.xlu0 %v12462_v59, %s16025_s0 }
 0x978   : > { %v2121_v31 = vpop.xlane.xlu0 %2120 }
 0x979   : > { %v2134_v61 = vmul.f32 0.03125, %v2121_v31 }
 0x97a   : > { %v2124_v45 = vpop.xlane.xlu1 %2123 }
 0x97b   : > { %v2135_v54 = vmul.f32 0.03125, %v2124_v45  ;;  %v2139_v28 = vadd.f32 1e-05, %v2134_v61 }
 0x97d   : > { %v2140_v52 = vadd.f32 1e-05, %v2135_v54  ;;  %11687 = vrsqrt.f32 %v2139_v28 }
 0x97f   : > { %11689 = vrsqrt.f32 %v2140_v52 }
 0x980   : > { %v2127_v32 = vpop.xlane.xlu0 %2126 }
 0x981   : > { %v2136_v56 = vmul.f32 0.03125, %v2127_v32 }
 0x983   : > { %v2141_v63 = vadd.f32 1e-05, %v2136_v56 }
 0x984   : > { %v2130_v13 = vpop.xlane.xlu1 %2129 }
 0x985   : > { %v2137_v7 = vmul.f32 0.03125, %v2130_v13  ;;  %11691 = vrsqrt.f32 %v2141_v63 }
 0x987   : > { %v2142_v34 = vadd.f32 1e-05, %v2137_v7  ;;  %v11688_v20 = vpop.eup %11687 }
 0x988   : > { %v2149_v62 = vmul.f32 %v11688_v20, %v2109_v26  ;;  %v2155_v4 = vpop.permute.xlu1 %2154 }
 0x989   : > { %11693 = vrsqrt.f32 %v2142_v34  ;;  %v11690_v15 = vpop.eup %11689 }
 0x98a   : > { %v2150_v59 = vmul.f32 %v11690_v15, %v2110_v0  ;;  %v2157_v16 = vmul.f32 %v2155_v4, %v2149_v62 }
 0x98c   : > { %v2158_v23 = vmul.f32 %v2155_v4, %v2150_v59 }
 0x98f   : > { %v11692_v35 = vpop.eup %11691 }
 0x990   : > { %v2151_v39 = vmul.f32 %v11692_v35, %v2111_v42 }
 0x992   : > { %v2159_v14 = vmul.f32 %v2155_v4, %v2151_v39 }
 0x993   : > { %v11694_v9 = vpop.eup %11693 }
 0x994   : > { %v2152_v37 = vmul.f32 %v11694_v9, %v2112_v44 }
 0x996   : > { %v2160_v26 = vmul.f32 %v2155_v4, %v2152_v37 }
 0x99f   : > { %v2133_v10 = vpop.xlane.xlu0 %2132 }
 0x9a0   : > { %v2138_v40 = vmul.f32 0.03125, %v2133_v10 }
 0x9a2   : > { %v2143_v12 = vadd.f32 1e-05, %v2138_v40 }
 0x9a3   : > { %v2164_v21 = vpop.permute.xlu0 %2163 }
 0x9a4   : > { %11695 = vrsqrt.f32 %v2143_v12  ;;  %v2166_v25 = vadd.f32 %v2164_v21, %v2157_v16  ;;  %v2167_v41 = vadd.f32 %v2164_v21, %v2158_v23  ;;  %v2168_v0 = vadd.f32 %v2164_v21, %v2159_v14 }
 0x9a5   : > { %v2169_v18 = vadd.f32 %v2164_v21, %v2160_v26 }
 0x9a6   : > { %v2171_v55 = vpack.c.bf16 %v2167_v41, %v2166_v25 }
 0x9a7   : > { %v2172_v51 = vpack.c.bf16 %v2169_v18, %v2168_v0 }
 0x9a8   : > { %10366 = vmatmul.mubr.msk.bf16.vlgmr.msra.gmra.mrb[64].mxu1 %vm799_vm3, %v2171_v55 }
 0x9a9   : > { %10369 = vmatprep.mubr.msk.bf16.mxu1 %vm12211_vm1, %v12210_v1 }
 0x9ae   : > { %v11696_v30 = vpop.eup %11695 }
 0x9af   : > { %v2153_v48 = vmul.f32 %v11696_v30, %v2113_v2 }
 0x9b0   : > { %10370 = vmatmul.mubr.msk.bf16.gmra.mrb[68].mxu1 %vm799_vm3, %v2172_v51 }
 0x9b1   : > { %10373 = vmatprep.mubr.msk.bf16.mxu1 %vm12211_vm1, %v12210_v1  ;;  %v2161_v8 = vmul.f32 %v2155_v4, %v2153_v48 }
 0x9b3   : > { %v2170_v42 = vadd.f32 %v2164_v21, %v2161_v8 }
 0x9b5   : > { %v2173_v36 = vpack.c.bf16 %v2170_v42, %v2170_v42 }
 0x9b8   : > { %10374 = vmatmul.mubr.msk.bf16.gmra.mrb[72].mxu1 %vm799_vm3, %v2173_v36 }
 0x9b9   : > { %10401 = vmatprep.mubr.msk.bf16.mxu1 %vm12211_vm1, %v12210_v1 }
 0xa7b   : > { %v2234_v49 = vpop.f32.mrb[64].mxu1 }
 0xa7c   : > { %v10367_v47 = vpop.f32.mrb[65].mxu1  ;;  %v2256_v50 = vmul.f32 0.35355338, %v2234_v49 }
 0xa7d   : > { %v2237_v44 = vpop.f32.mrb[66].mxu1 }
 0xa7e   : > { %v2257_v19 = vmul.f32 0.35355338, %v2237_v44  ;;  %v13036_v58 = vpack.c.bf16 %v2237_v44, %v2234_v49  ;;  %v10368_v33 = vpop.f32.mrb[67].mxu1 }
 0xa80   : > { %2499 = vrot.lane.b32.xlu0 %v13036_v58, %s16033_s3  ;;  %2276 = vrot.lane.b32.xlu1 %v13036_v58, %s16036_s24  ;;  %v2261_v5 = vpack.c.bf16 %v2257_v19, %v2256_v50 }
 0xa83   : > { %v2242_v22 = vpop.f32.mrb[68].mxu1 }
 0xa84   : > { %v10371_v2 = vpop.f32.mrb[69].mxu1  ;;  %v2258_v38 = vmul.f32 0.35355338, %v2242_v22 }
 0xa85   : > { %v2245_v43 = vpop.f32.mrb[70].mxu1 }
 0xa86   : > { %v2259_v53 = vmul.f32 0.35355338, %v2245_v43  ;;  %v13042_v31 = vpack.c.bf16 %v2245_v43, %v2242_v22  ;;  %v10372_v45 = vpop.f32.mrb[71].mxu1  ;;  %v13150_v22 = vld [vmem:[%s12607_s4 + $0x28] sm:$0xff]  ;;  %v13153_v43 = vld [vmem:[%s12607_s4 + $0x30] sm:$0xff] }
 0xa88   : > { %2278 = vrot.lane.b32.xlu1 %v13042_v31, %s16036_s24  ;;  %v2262_v61 = vpack.c.bf16 %v2259_v53, %v2258_v38 }
 0xa8b   : > { %v2250_v54 = vpop.f32.mrb[72].mxu1 }
 0xa8c   : > { %v13046_v32 = vpack.c.bf16 %v2250_v54, %v2250_v54  ;;  %v10375_v28 = vpop.f32.mrb[73].mxu1  ;;  %v2260_v56 = vmul.f32 0.35355338, %v2250_v54 }
 0xa8d   : > { %v2253_v13 = vpop.f32.mrb[74].mxu1 }
 0xa8e   : > { %2503 = vrot.lane.b32.xlu0 %v13046_v32, %s16033_s3  ;;  %2280 = vrot.lane.b32.xlu1 %v13046_v32, %s16036_s24  ;;  %v10376_v52 = vpop.f32.mrb[75].mxu1  ;;  %v2263_v7 = vpack.c.bf16 %v2260_v56, %v2260_v56 }
 0xa8f   : > { %v13166_v52 = vld [vmem:[%s12607_s4 + $0x38] sm:$0xff] }
 0xa92   : > { %2719 = vrot.lane.b32.xlu0 %v13036_v58, %s16029_s26  ;;  %2501 = vrot.lane.b32.xlu1 %v13042_v31, %s16033_s3  ;;  %s16075_s3 = smov 80  }
 0xa96   : > { %2721 = vrot.lane.b32.xlu0 %v13042_v31, %s16029_s26  ;;  %2493 = vrot.lane.b32.xlu1 %v2261_v5, %s16031_s27 }
 0xa9a   : > { %2723 = vrot.lane.b32.xlu0 %v13046_v32, %s16029_s26  ;;  %2495 = vrot.lane.b32.xlu1 %v2262_v61, %s16031_s27  ;;  %s16076_s26 = smov 72  }
 0xa9e   : > { %2939 = vrot.lane.b32.xlu0 %v13036_v58, %s16027_s28  ;;  %2497 = vrot.lane.b32.xlu1 %v2263_v7, %s16031_s27  ;;  %s16071_s27 = smov 16  }
 0xaa2   : > { %2941 = vrot.lane.b32.xlu0 %v13042_v31, %s16027_s28  ;;  %2713 = vrot.lane.b32.xlu1 %v2261_v5, %s16065_s23 }
 0xaa6   : > { %2943 = vrot.lane.b32.xlu0 %v13046_v32, %s16027_s28  ;;  %2715 = vrot.lane.b32.xlu1 %v2262_v61, %s16065_s23  ;;  %s16072_s28 = smov 24  }
 0xaaa   : > { %2935 = vrot.lane.b32.xlu0 %v2262_v61, %s16066_s29  ;;  %2717 = vrot.lane.b32.xlu1 %v2263_v7, %s16065_s23 }
 0xaae   : > { %2416 = vrot.lane.b32.xlu0 %v13042_v31, %s16025_s0  ;;  %2933 = vrot.lane.b32.xlu1 %v2261_v5, %s16066_s29 }
 0xab2   : > { %2637 = vrot.lane.b32.xlu0 %v13036_v58, %s16067_s2  ;;  %2937 = vrot.lane.b32.xlu1 %v2263_v7, %s16066_s29 }
 0xab6   : > { %2414 = vrot.lane.b32.xlu1 %v13036_v58, %s16025_s0 }
 0xaba   : > { %2418 = vrot.lane.b32.xlu1 %v13046_v32, %s16025_s0  ;;  %s16070_s0 = smov 8  }
 0xabe   : > { %2639 = vrot.lane.b32.xlu1 %v13042_v31, %s16067_s2 }
 0xaf2   : > { %v2277_v63 = vpop.permute.xlu1 %2276  ;;  %v2500_v62 = vpop.permute.xlu0 %2499 }
 0xaf3   : > { %v2292_v34 = vsel %vm1042_vm4, %v2277_v63, 0  ;;  %v2515_v23 = vsel %vm1042_vm4, %v2500_v62, 0 }
 0xaf4   : > { %10378 = vmatpush3.bf16.xpose.msra.mxu0 %v2292_v34 }
 0xaf5   : > { %10379 = vmatprep.subr.bf16.mxu0 %v12210_v1 }
 0xafa   : > { %v2279_v20 = vpop.permute.xlu1 %2278 }
 0xafb   : > { %v2295_v15 = vsel %vm1042_vm4, %v2279_v20, 0 }
 0xafc   : > { %10380 = vmatpush3.bf16.xpose.msra.mxu0 %v2295_v15 }
 0xafd   : > { %10381 = vmatprep.subr.bf16.mxu0 %v12210_v1 }
 0xb00   : > { %v2504_v59 = vpop.permute.xlu0 %2503  ;;  %v2281_v4 = vpop.permute.xlu1 %2280 }
 0xb01   : > { %v2298_v10 = vsel %vm1042_vm4, %v2281_v4, 0  ;;  %v2521_v26 = vsel %vm1042_vm4, %v2504_v59, 0  ;;  %v13180_v4 = vld [vmem:[%s12607_s4 + $0x48] sm:$0xff] }
 0xb04   : > { %v2720_v35 = vpop.permute.xlu0 %2719  ;;  %10382 = vmatpush3.bf16.xpose.msra.mxu0 %v2298_v10  ;;  %v2502_v40 = vpop.permute.xlu1 %2501 }
 0xb05   : > { %10413 = vmatprep.subr.bf16.mxu0 %v12210_v1  ;;  %v2518_v25 = vsel %vm1042_vm4, %v2502_v40, 0  ;;  %v2735_v51 = vsel %vm1042_vm4, %v2720_v35, 0 }
 0xb08   : > { %v2722_v9 = vpop.permute.xlu0 %2721  ;;  %v2494_v16 = vpop.permute.xlu1 %2493 }
 0xb09   : > { %v2738_v36 = vsel %vm1042_vm4, %v2722_v9, 0 }
 0xb0b   : > { %10384 = vmatmul.mubr.msk.bf16.vlgmr.msra.gmra.mrb[72].mxu0 %vm1042_vm4, %v2261_v5 }
 0xb0c   : > { %10414 = vmatpush3.bf16.xpose.msra.mxu0 %v2515_v23  ;;  %v2496_v12 = vpop.permute.xlu1 %2495  ;;  %10387 = vmatprep.mubr.msk.bf16.mxu0 %vm12211_vm1, %v12210_v1  ;;  %v2724_v21 = vpop.permute.xlu0 %2723 }
 0xb0d   : > { %10415 = vmatprep.subr.bf16.mxu0 %v12210_v1  ;;  %v2741_v50 = vsel %vm1042_vm4, %v2724_v21, 0 }
 0xb10   : > { %v2498_v39 = vpop.permute.xlu1 %2497  ;;  %v2940_v41 = vpop.permute.xlu0 %2939 }
 0xb11   : > { %v2955_v19 = vsel %vm1042_vm4, %v2940_v41, 0 }
 0xb13   : > { %10388 = vmatmul.mubr.msk.bf16.gmra.mrb[76].mxu0 %vm1042_vm4, %v2262_v61 }
 0xb14   : > { %10416 = vmatpush3.bf16.xpose.msra.mxu0 %v2518_v25  ;;  %v2714_v37 = vpop.permute.xlu1 %2713  ;;  %10391 = vmatprep.mubr.msk.bf16.mxu0 %vm12211_vm1, %v12210_v1  ;;  %v2942_v14 = vpop.permute.xlu0 %2941 }
 0xb15   : > { %10417 = vmatprep.subr.bf16.mxu0 %v12210_v1  ;;  %v2958_v33 = vsel %vm1042_vm4, %v2942_v14, 0 }
 0xb18   : > { %v2716_v55 = vpop.permute.xlu1 %2715  ;;  %v2944_v18 = vpop.permute.xlu0 %2943 }
 0xb19   : > { %v2961_v5 = vsel %vm1042_vm4, %v2944_v18, 0 }
 0xb1b   : > { %10392 = vmatmul.mubr.msk.bf16.gmra.mrb[80].mxu0 %vm1042_vm4, %v2263_v7  ;;  %v13169_v7 = vld [vmem:[%s12607_s4 + $0x40] sm:$0xff] }
 0xb1c   : > { %10418 = vmatpush3.bf16.xpose.msra.mxu0 %v2521_v26  ;;  %v2718_v0 = vpop.permute.xlu1 %2717  ;;  %10419 = vmatprep.mubr.msk.bf16.mxu0 %vm12211_vm1, %v12210_v1  ;;  %v2936_v8 = vpop.permute.xlu0 %2935 }
 0xb1d   : > { %10449 = vmatprep.subr.bf16.mxu0 %v12210_v1 }
 0xb20   : > { %v2934_v30 = vpop.permute.xlu1 %2933  ;;  %v2417_v49 = vpop.permute.xlu0 %2416 }
 0xb23   : > { %10420 = vmatmul.mubr.msk.bf16.vlgmr.msra.gmra.mrb[84].mxu0 %vm1042_vm4, %v2494_v16 }
 0xb24   : > { %v2938_v48 = vpop.permute.xlu1 %2937  ;;  %10450 = vmatpush3.bf16.xpose.msra.mxu0 %v2735_v51  ;;  %10423 = vmatprep.mubr.msk.bf16.mxu0 %vm12211_vm1, %v12210_v1 }
 0xb25   : > { %10451 = vmatprep.subr.bf16.mxu0 %v12210_v1 }
 0xb28   : > { %v2415_v42 = vpop.permute.xlu1 %2414 }
 0xb29   : > { %10396 = vmatpush3.bf16.msra.mxu1 %v2415_v42 }
 0xb2a   : > { %10397 = vmatprep.subr.bf16.mxu1 %v12210_v1 }
 0xb2b   : > { %10424 = vmatmul.mubr.msk.bf16.gmra.mrb[88].mxu0 %vm1042_vm4, %v2496_v12 }
 0xb2c   : > { %10452 = vmatpush3.bf16.xpose.msra.mxu0 %v2738_v36  ;;  %10427 = vmatprep.mubr.msk.bf16.mxu0 %vm12211_vm1, %v12210_v1  ;;  %v2419_v47 = vpop.permute.xlu1 %2418 }
 0xb2d   : > { %10398 = vmatpush3.bf16.msra.mxu1 %v2417_v49  ;;  %10453 = vmatprep.subr.bf16.mxu0 %v12210_v1  ;;  %v2432_v44 = vsel %vm1193_vm5, %v2419_v47, 0 }
 0xb2e   : > { %10399 = vmatprep.subr.bf16.mxu1 %v12210_v1 }
 0xb31   : > { %10400 = vmatpush3.bf16.msra.mxu1 %v2432_v44 }
 0xb32   : > { %10431 = vmatprep.subr.bf16.mxu1 %v12210_v1 }
 0xb33   : > { %10428 = vmatmul.mubr.msk.bf16.gmra.mrb[92].mxu0 %vm1042_vm4, %v2498_v39 }
 0xb34   : > { %10454 = vmatpush3.bf16.xpose.msra.mxu0 %v2741_v50  ;;  %10455 = vmatprep.mubr.msk.bf16.mxu0 %vm12211_vm1, %v12210_v1 }
 0xb35   : > { %10485 = vmatprep.subr.bf16.mxu0 %v12210_v1 }
 0xb3b   : > { %10456 = vmatmul.mubr.msk.bf16.vlgmr.msra.gmra.mrb[96].mxu0 %vm1042_vm4, %v2714_v37 }
 0xb3c   : > { %10486 = vmatpush3.bf16.xpose.msra.mxu0 %v2955_v19  ;;  %10459 = vmatprep.mubr.msk.bf16.mxu0 %vm12211_vm1, %v12210_v1 }
 0xb3d   : > { %10487 = vmatprep.subr.bf16.mxu0 %v12210_v1 }
 0xb43   : > { %10460 = vmatmul.mubr.msk.bf16.gmra.mrb[100].mxu0 %vm1042_vm4, %v2716_v55 }
 0xb44   : > { %10488 = vmatpush3.bf16.xpose.msra.mxu0 %v2958_v33  ;;  %10463 = vmatprep.mubr.msk.bf16.mxu0 %vm12211_vm1, %v12210_v1 }
 0xb45   : > { %10489 = vmatprep.subr.bf16.mxu0 %v12210_v1 }
 0xb4b   : > { %10464 = vmatmul.mubr.msk.bf16.gmra.mrb[104].mxu0 %vm1042_vm4, %v2718_v0 }
 0xb4c   : > { %10490 = vmatpush3.bf16.xpose.msra.mxu0 %v2961_v5  ;;  %10491 = vmatprep.mubr.msk.bf16.mxu0 %vm12211_vm1, %v12210_v1 }
 0xb4d   : > { %10521 = vmatprep.subr.bf16.mxu0 %v12210_v1 }
 0xb53   : > { %10492 = vmatmul.mubr.msk.bf16.vlgmr.msra.gmra.mrb[108].mxu0 %vm1042_vm4, %v2934_v30 }
 0xb54   : > { %10495 = vmatprep.mubr.msk.bf16.mxu0 %vm12211_vm1, %v12210_v1 }
 0xb5b   : > { %10496 = vmatmul.mubr.msk.bf16.gmra.mrb[112].mxu0 %vm1042_vm4, %v2936_v8 }
 0xb5c   : > { %10499 = vmatprep.mubr.msk.bf16.mxu0 %vm12211_vm1, %v12210_v1 }
 0xb63   : > { %10500 = vmatmul.mubr.msk.bf16.gmra.mrb[116].mxu0 %vm1042_vm4, %v2938_v48 }
 0xb64   : > { %10525 = vmatprep.mubr.msk.bf16.mxu0 %vm12211_vm1, %v12210_v1 }
 0xbde   : > { %v2334_v2 = vpop.f32.mrb[72].mxu0 }
 0xbdf   : > { %v13156_v38 = vadd.f32 %v13150_v22, %v2334_v2  ;;  %v10385_v53 = vpop.f32.mrb[73].mxu0 }
 0xbe0   : > { %v2337_v45 = vpop.f32.mrb[74].mxu0 }
 0xbe1   : > { %v13159_v61 = vadd.f32 %v13153_v43, %v2337_v45  ;;  %v10386_v54 = vpop.f32.mrb[75].mxu0  ;;  %v2356_v28 = vsel %vm1117_vm6, %v13156_v38, -inf }
 0xbe2   : > { %2357 = vmax.xlane.f32.xlu0 %v2356_v28 }
 0xbe3   : > { %v2359_v13 = vsel %vm1117_vm6, %v13159_v61, -inf }
 0xbe4   : > { %2360 = vmax.xlane.f32.xlu1 %v2359_v13 }
 0xbe6   : > { %v2342_v56 = vpop.f32.mrb[76].mxu0 }
 0xbe7   : > { %v13172_v63 = vadd.f32 %v13166_v52, %v2342_v56  ;;  %v10389_v34 = vpop.f32.mrb[77].mxu0 }
 0xbe8   : > { %v2345_v20 = vpop.f32.mrb[78].mxu0 }
 0xbe9   : > { %v13175_v15 = vadd.f32 %v13169_v7, %v2345_v20  ;;  %v10390_v62 = vpop.f32.mrb[79].mxu0  ;;  %v2362_v59 = vsel %vm1117_vm6, %v13172_v63, -inf }
 0xbea   : > { %2363 = vmax.xlane.f32.xlu0 %v2362_v59 }
 0xbeb   : > { %v2365_v10 = vsel %vm1117_vm6, %v13175_v15, -inf }
 0xbee   : > { %2366 = vmax.xlane.f32.xlu0 %v2365_v10  ;;  %v2350_v35 = vpop.f32.mrb[80].mxu0 }
 0xbef   : > { %v13185_v40 = vadd.f32 %v13180_v4, %v2350_v35  ;;  %v10393_v9 = vpop.f32.mrb[81].mxu0 }
 0xbf0   : > { %v2353_v16 = vpop.f32.mrb[82].mxu0 }
 0xbf1   : > { %v10394_v23 = vpop.f32.mrb[83].mxu0  ;;  %v2368_v12 = vsel %vm1117_vm6, %v13185_v40, -inf }
 0xbf2   : > { %2369 = vmax.xlane.f32.xlu0 %v2368_v12 }
 0xbf6   : > { %v2557_v21 = vpop.f32.mrb[84].mxu0 }
 0xbf7   : > { %v13190_v39 = vadd.f32 %v13150_v22, %v2557_v21  ;;  %v10421_v25 = vpop.f32.mrb[85].mxu0 }
 0xbf8   : > { %v2560_v41 = vpop.f32.mrb[86].mxu0 }
 0xbf9   : > { %v13193_v37 = vadd.f32 %v13153_v43, %v2560_v41  ;;  %v10422_v55 = vpop.f32.mrb[87].mxu0  ;;  %v2579_v14 = vsel %vm1117_vm6, %v13190_v39, -inf }
 0xbfa   : > { %2580 = vmax.xlane.f32.xlu1 %v2579_v14 }
 0xbfb   : > { %v2582_v26 = vsel %vm1117_vm6, %v13193_v37, -inf }
 0xbfc   : > { %2583 = vmax.xlane.f32.xlu0 %v2582_v26 }
 0xbfe   : > { %v2565_v0 = vpop.f32.mrb[88].mxu0 }
 0xbff   : > { %v13200_v18 = vadd.f32 %v13166_v52, %v2565_v0  ;;  %v10425_v30 = vpop.f32.mrb[89].mxu0 }
 0xc00   : > { %v2568_v51 = vpop.f32.mrb[90].mxu0 }
 0xc01   : > { %v13203_v48 = vadd.f32 %v13169_v7, %v2568_v51  ;;  %v10426_v8 = vpop.f32.mrb[91].mxu0  ;;  %v2585_v42 = vsel %vm1117_vm6, %v13200_v18, -inf }
 0xc02   : > { %2586 = vmax.xlane.f32.xlu1 %v2585_v42 }
 0xc03   : > { %v2588_v36 = vsel %vm1117_vm6, %v13203_v48, -inf }
 0xc04   : > { %2589 = vmax.xlane.f32.xlu0 %v2588_v36 }
 0xc06   : > { %v2573_v49 = vpop.f32.mrb[92].mxu0 }
 0xc07   : > { %v13210_v47 = vadd.f32 %v13180_v4, %v2573_v49  ;;  %v10429_v44 = vpop.f32.mrb[93].mxu0 }
 0xc08   : > { %v2576_v50 = vpop.f32.mrb[94].mxu0 }
 0xc09   : > { %v10430_v19 = vpop.f32.mrb[95].mxu0  ;;  %v2591_v33 = vsel %vm1117_vm6, %v13210_v47, -inf }
 0xc0a   : > { %2592 = vmax.xlane.f32.xlu1 %v2591_v33 }
 0xc0e   : > { %v2777_v5 = vpop.f32.mrb[96].mxu0 }
 0xc0f   : > { %v13215_v2 = vadd.f32 %v13150_v22, %v2777_v5  ;;  %v10457_v53 = vpop.f32.mrb[97].mxu0 }
 0xc10   : > { %v2780_v45 = vpop.f32.mrb[98].mxu0 }
 0xc11   : > { %v13218_v54 = vadd.f32 %v13153_v43, %v2780_v45  ;;  %v10458_v28 = vpop.f32.mrb[99].mxu0  ;;  %v2799_v13 = vsel %vm1117_vm6, %v13215_v2, -inf }
 0xc12   : > { %2800 = vmax.xlane.f32.xlu0 %v2799_v13 }
 0xc13   : > { %v2802_v56 = vsel %vm1117_vm6, %v13218_v54, -inf }
 0xc14   : > { %2803 = vmax.xlane.f32.xlu1 %v2802_v56 }
 0xc16   : > { %v2785_v34 = vpop.f32.mrb[100].mxu0 }
 0xc17   : > { %v10461_v20 = vpop.f32.mrb[101].mxu0  ;;  %v13229_v42 = vadd.f32 %v13166_v52, %v2785_v34  ;;  %v13272_v34 = vpop.permute.xlu1 %2639 }
 0xc18   : > { %v2788_v62 = vpop.f32.mrb[102].mxu0 }
 0xc19   : > { %v10462_v59 = vpop.f32.mrb[103].mxu0  ;;  %v13232_v36 = vadd.f32 %v13169_v7, %v2788_v62  ;;  %v2805_v44 = vsel %vm1117_vm6, %v13229_v42, -inf }
 0xc1b   : > { %v2808_v19 = vsel %vm1117_vm6, %v13232_v36, -inf }
 0xc1e   : > { %v2793_v10 = vpop.f32.mrb[104].mxu0 }
 0xc1f   : > { %v10465_v35 = vpop.f32.mrb[105].mxu0  ;;  %v13235_v49 = vadd.f32 %v13180_v4, %v2793_v10 }
 0xc20   : > { %v2796_v9 = vpop.f32.mrb[106].mxu0 }
 0xc21   : > { %v10466_v16 = vpop.f32.mrb[107].mxu0  ;;  %v2811_v5 = vsel %vm1117_vm6, %v13235_v49, -inf }
 0xc25   : > { %2641 = vrot.lane.b32.xlu1 %v13046_v32, %s16067_s2 }
 0xc26   : > { %v2997_v23 = vpop.f32.mrb[108].mxu0 }
 0xc27   : > { %v10493_v12 = vpop.f32.mrb[109].mxu0  ;;  %v13240_v50 = vadd.f32 %v13150_v22, %v2997_v23 }
 0xc28   : > { %2857 = vrot.lane.b32.xlu0 %v13036_v58, %s16068_s25  ;;  %v3000_v21 = vpop.f32.mrb[110].mxu0 }
 0xc29   : > { %v10494_v25 = vpop.f32.mrb[111].mxu0  ;;  %v13245_v33 = vadd.f32 %v13153_v43, %v3000_v21  ;;  %v3019_v45 = vsel %vm1117_vm6, %v13240_v50, -inf }
 0xc2b   : > { %v3022_v28 = vsel %vm1117_vm6, %v13245_v33, -inf }
 0xc2e   : > { %v3005_v41 = vpop.f32.mrb[112].mxu0 }
 0xc2f   : > { %v10497_v55 = vpop.f32.mrb[113].mxu0  ;;  %v13250_v53 = vadd.f32 %v13166_v52, %v3005_v41 }
 0xc30   : > { %v3008_v14 = vpop.f32.mrb[114].mxu0 }
 0xc31   : > { %v10498_v26 = vpop.f32.mrb[115].mxu0  ;;  %v13255_v22 = vadd.f32 %v13169_v7, %v3008_v14  ;;  %v3025_v13 = vsel %vm1117_vm6, %v13250_v53, -inf  ;;  %v13270_v7 = vpop.permute.xlu0 %2637 }
 0xc33   : > { %v3028_v52 = vsel %vm1117_vm6, %v13255_v22, -inf }
 0xc36   : > { %v3013_v0 = vpop.f32.mrb[116].mxu0 }
 0xc37   : > { %v10501_v30 = vpop.f32.mrb[117].mxu0  ;;  %v13260_v43 = vadd.f32 %v13180_v4, %v3013_v0 }
 0xc38   : > { %v3016_v51 = vpop.f32.mrb[118].mxu0 }
 0xc39   : > { %v10502_v8 = vpop.f32.mrb[119].mxu0  ;;  %v3031_v56 = vsel %vm1117_vm6, %v13260_v43, -inf }
 0xc47   : > { %2806 = vmax.xlane.f32.xlu0 %v2805_v44 }
 0xc49   : > { %2809 = vmax.xlane.f32.xlu1 %v2808_v19 }
 0xc4b   : > { %2812 = vmax.xlane.f32.xlu0 %v2811_v5 }
 0xc4d   : > { %3020 = vmax.xlane.f32.xlu1 %v3019_v45 }
 0xc4f   : > { %3023 = vmax.xlane.f32.xlu0 %v3022_v28 }
 0xc51   : > { %3026 = vmax.xlane.f32.xlu1 %v3025_v13 }
 0xc53   : > { %3029 = vmax.xlane.f32.xlu0 %v3028_v52 }
 0xc55   : > { %3032 = vmax.xlane.f32.xlu1 %v3031_v56 }
 0xc69   : > { %2859 = vrot.lane.b32.xlu0 %v13042_v31, %s16068_s25 }
 0xc6f   : > { %v2358_v4 = vpop.xlane.xlu0 %2357 }
 0xc70   : > { %v2371_v20 = vsub.f32 %v13156_v38, %v2358_v4 }
 0xc71   : > { %v2361_v62 = vpop.xlane.xlu1 %2360 }
 0xc72   : > { %v2376_v59 = vmul.f32 1.442695, %v2371_v20  ;;  %v2372_v10 = vsub.f32 %v13159_v61, %v2361_v62 }
 0xc74   : > { %11697 = vpow2.f32 %v2376_v59  ;;  %v2378_v35 = vmul.f32 1.442695, %v2372_v10 }
 0xc76   : > { %11699 = vpow2.f32 %v2378_v35 }
 0xc77   : > { %v2364_v9 = vpop.xlane.xlu0 %2363 }
 0xc78   : > { %v2373_v16 = vsub.f32 %v13172_v63, %v2364_v9 }
 0xc7a   : > { %v2380_v23 = vmul.f32 1.442695, %v2373_v16 }
 0xc7b   : > { %v2367_v12 = vpop.xlane.xlu0 %2366 }
 0xc7c   : > { %v2374_v21 = vsub.f32 %v13175_v15, %v2367_v12  ;;  %11701 = vpow2.f32 %v2380_v23 }
 0xc7e   : > { %v13278_v25 = vpop.eup %11697  ;;  %v2382_v41 = vmul.f32 1.442695, %v2374_v21 }
 0xc7f   : > { %v2370_v55 = vpop.xlane.xlu0 %2369  ;;  %v2386_v38 = vsel %vm1117_vm6, %v13278_v25, 0.0 }
 0xc80   : > { %11703 = vpow2.f32 %v2382_v41  ;;  %v2375_v61 = vsub.f32 %v13185_v40, %v2370_v55  ;;  %2387 = vadd.xlane.f32.xlu1 %v2386_v38  ;;  %v13283_v26 = vpop.eup %11699 }
 0xc81   : > { %v2389_v15 = vsel %vm1117_vm6, %v13283_v26, 0.0 }
 0xc82   : > { %v2384_v14 = vmul.f32 1.442695, %v2375_v61 }
 0xc84   : > { %11705 = vpow2.f32 %v2384_v14 }
 0xc86   : > { %v13287_v0 = vpop.eup %11701 }
 0xc87   : > { %v2581_v63 = vpop.xlane.xlu1 %2580  ;;  %v2392_v19 = vsel %vm1117_vm6, %v13287_v0, 0.0 }
 0xc88   : > { %v2594_v30 = vsub.f32 %v13190_v39, %v2581_v63  ;;  %2390 = vadd.xlane.f32.xlu0 %v2389_v15 }
 0xc89   : > { %v2584_v51 = vpop.xlane.xlu0 %2583 }
 0xc8a   : > { %v13290_v8 = vpop.eup %11703  ;;  %v2599_v44 = vmul.f32 1.442695, %v2594_v30  ;;  %v2595_v40 = vsub.f32 %v13193_v37, %v2584_v51 }
 0xc8b   : > { %v2395_v5 = vsel %vm1117_vm6, %v13290_v8, 0.0 }
 0xc8c   : > { %11707 = vpow2.f32 %v2599_v44  ;;  %v2601_v45 = vmul.f32 1.442695, %v2595_v40  ;;  %2393 = vadd.xlane.f32.xlu0 %v2392_v19  ;;  %2396 = vadd.xlane.f32.xlu1 %v2395_v5 }
 0xc8e   : > { %v13297_v28 = vpop.eup %11705  ;;  %11709 = vpow2.f32 %v2601_v45 }
 0xc8f   : > { %v2587_v39 = vpop.xlane.xlu1 %2586  ;;  %v2398_v13 = vsel %vm1117_vm6, %v13297_v28, 0.0 }
 0xc90   : > { %v2596_v52 = vsub.f32 %v13200_v18, %v2587_v39  ;;  %2399 = vadd.xlane.f32.xlu0 %v2398_v13 }
 0xc91   : > { %v2590_v37 = vpop.xlane.xlu0 %2589 }
 0xc92   : > { %v2603_v56 = vmul.f32 1.442695, %v2596_v52  ;;  %v2597_v4 = vsub.f32 %v13203_v48, %v2590_v37 }
 0xc94   : > { %11711 = vpow2.f32 %v2603_v56  ;;  %v2605_v20 = vmul.f32 1.442695, %v2597_v4 }
 0xc96   : > { %v13303_v62 = vpop.eup %11707  ;;  %11713 = vpow2.f32 %v2605_v20 }
 0xc97   : > { %v2593_v59 = vpop.xlane.xlu1 %2592  ;;  %v2609_v10 = vsel %vm1117_vm6, %v13303_v62, 0.0 }
 0xc98   : > { %v13307_v35 = vpop.eup %11709  ;;  %v2598_v9 = vsub.f32 %v13210_v47, %v2593_v59  ;;  %2610 = vadd.xlane.f32.xlu1 %v2609_v10 }
 0xc99   : > { %v2612_v18 = vsel %vm1117_vm6, %v13307_v35, 0.0 }
 0xc9a   : > { %v2607_v16 = vmul.f32 1.442695, %v2598_v9  ;;  %2613 = vadd.xlane.f32.xlu0 %v2612_v18 }
 0xc9c   : > { %11715 = vpow2.f32 %v2607_v16 }
 0xc9e   : > { %v13312_v48 = vpop.eup %11711 }
 0xc9f   : > { %v2615_v23 = vsel %vm1117_vm6, %v13312_v48, 0.0  ;;  %v2801_v63 = vpop.xlane.xlu0 %2800 }
 0xca0   : > { %v13316_v12 = vpop.eup %11713  ;;  %2616 = vadd.xlane.f32.xlu0 %v2615_v23  ;;  %v2814_v15 = vsub.f32 %v13215_v2, %v2801_v63 }
 0xca1   : > { %v2804_v21 = vpop.xlane.xlu1 %2803  ;;  %v2618_v47 = vsel %vm1117_vm6, %v13316_v12, 0.0 }
 0xca2   : > { %v2815_v41 = vsub.f32 %v13218_v54, %v2804_v21  ;;  %v2819_v30 = vmul.f32 1.442695, %v2814_v15 }
 0xca3   : > { %v13336_v40 = vpop.permute.xlu0 %2857 }
 0xca4   : > { %v2821_v55 = vmul.f32 1.442695, %v2815_v41  ;;  %2619 = vadd.xlane.f32.xlu0 %v2618_v47 }
 0xca5   : > { %v13338_v19 = vpop.permute.xlu1 %2641 }
 0xca6   : > { %v13321_v38 = vpop.eup %11715  ;;  %11717 = vpow2.f32 %v2821_v55 }
 0xca7   : > { %v2621_v61 = vsel %vm1117_vm6, %v13321_v38, 0.0  ;;  %11719 = vpow2.f32 %v2819_v30 }
 0xca8   : > { %2622 = vadd.xlane.f32.xlu0 %v2621_v61 }
 0xca9   : > { %2861 = vrot.lane.b32.xlu1 %v13046_v32, %s16068_s25 }
 0xcb0   : > { %v13327_v14 = vpop.eup %11717 }
 0xcb1   : > { %v2832_v54 = vsel %vm1117_vm6, %v13327_v14, 0.0  ;;  %v13332_v51 = vpop.eup %11719 }
 0xcb2   : > { %2833 = vadd.xlane.f32.xlu0 %v2832_v54  ;;  %v2829_v44 = vsel %vm1117_vm6, %v13332_v51, 0.0 }
 0xccd   : > { %2830 = vadd.xlane.f32.xlu1 %v2829_v44 }
 0xcd4   : > { %v2807_v5 = vpop.xlane.xlu0 %2806 }
 0xcd5   : > { %v2816_v45 = vsub.f32 %v13229_v42, %v2807_v5 }
 0xcd6   : > { %v2810_v39 = vpop.xlane.xlu1 %2809 }
 0xcd7   : > { %v2823_v13 = vmul.f32 1.442695, %v2816_v45  ;;  %v2817_v52 = vsub.f32 %v13232_v36, %v2810_v39 }
 0xcd8   : > { %v2813_v2 = vpop.xlane.xlu0 %2812 }
 0xcd9   : > { %11721 = vpow2.f32 %v2823_v13  ;;  %v2825_v37 = vmul.f32 1.442695, %v2817_v52  ;;  %v2818_v56 = vsub.f32 %v13235_v49, %v2813_v2 }
 0xcda   : > { %v3021_v4 = vpop.xlane.xlu1 %3020 }
 0xcdb   : > { %11723 = vpow2.f32 %v2825_v37  ;;  %v2827_v20 = vmul.f32 1.442695, %v2818_v56  ;;  %v3034_v59 = vsub.f32 %v13240_v50, %v3021_v4 }
 0xcdc   : > { %v3024_v10 = vpop.xlane.xlu0 %3023 }
 0xcdd   : > { %11725 = vpow2.f32 %v2827_v20  ;;  %v3039_v9 = vmul.f32 1.442695, %v3034_v59  ;;  %v3035_v18 = vsub.f32 %v13245_v33, %v3024_v10 }
 0xcde   : > { %v3027_v42 = vpop.xlane.xlu1 %3026 }
 0xcdf   : > { %11727 = vpow2.f32 %v3039_v9  ;;  %v3041_v16 = vmul.f32 1.442695, %v3035_v18  ;;  %v3036_v36 = vsub.f32 %v13250_v53, %v3027_v42 }
 0xce0   : > { %v3030_v23 = vpop.xlane.xlu0 %3029 }
 0xce1   : > { %11729 = vpow2.f32 %v3041_v16  ;;  %v3043_v21 = vmul.f32 1.442695, %v3036_v36  ;;  %v3037_v49 = vsub.f32 %v13255_v22, %v3030_v23 }
 0xce2   : > { %v3033_v39 = vpop.xlane.xlu1 %3032 }
 0xce3   : > { %v13347_v41 = vpop.eup %11721  ;;  %11731 = vpow2.f32 %v3043_v21  ;;  %v3045_v47 = vmul.f32 1.442695, %v3037_v49  ;;  %v3038_v13 = vsub.f32 %v13260_v43, %v3033_v39 }
 0xce4   : > { %v2835_v50 = vsel %vm1117_vm6, %v13347_v41, 0.0  ;;  %v13382_v52 = vpop.permute.xlu0 %2859 }
 0xce5   : > { %v13351_v55 = vpop.eup %11723  ;;  %11733 = vpow2.f32 %v3045_v47  ;;  %2836 = vadd.xlane.f32.xlu0 %v2835_v50  ;;  %v3047_v37 = vmul.f32 1.442695, %v3038_v13 }
 0xce6   : > { %v2838_v53 = vsel %vm1117_vm6, %v13351_v55, 0.0 }
 0xce7   : > { %v13353_v33 = vpop.eup %11725 }
 0xce8   : > { %v2841_v61 = vsel %vm1117_vm6, %v13353_v33, 0.0 }
 0xce9   : > { %v13359_v22 = vpop.eup %11727  ;;  %2839 = vadd.xlane.f32.xlu0 %v2838_v53  ;;  %2842 = vadd.xlane.f32.xlu1 %v2841_v61 }
 0xcea   : > { %v3049_v63 = vsel %vm1117_vm6, %v13359_v22, 0.0 }
 0xceb   : > { %v13361_v54 = vpop.eup %11729 }
 0xcec   : > { %v3052_v15 = vsel %vm1117_vm6, %v13361_v54, 0.0 }
 0xced   : > { %v13367_v30 = vpop.eup %11731  ;;  %3050 = vadd.xlane.f32.xlu0 %v3049_v63  ;;  %3053 = vadd.xlane.f32.xlu1 %v3052_v15 }
 0xcee   : > { %v3055_v45 = vsel %vm1117_vm6, %v13367_v30, 0.0 }
 0xcef   : > { %v13369_v44 = vpop.eup %11733 }
 0xcf0   : > { %v3058_v5 = vsel %vm1117_vm6, %v13369_v44, 0.0 }
 0xcf1   : > { %3059 = vadd.xlane.f32.xlu0 %v3058_v5  ;;  %3056 = vadd.xlane.f32.xlu1 %v3055_v45 }
 0xd02   : > { %3079 = vrot.lane.b32.xlu1 %v13042_v31, %s16069_s30 }
 0xd06   : > { %3081 = vrot.lane.b32.xlu1 %v13046_v32, %s16069_s30 }
 0xd07   : > { %3077 = vrot.lane.b32.xlu0 %v13036_v58, %s16069_s30 }
 0xd0d   : > { %v2388_v2 = vpop.xlane.xlu1 %2387 }
 0xd0e   : > { %11735 = vrcp.f32 %v2388_v2 }
 0xd15   : > { %v2391_v56 = vpop.xlane.xlu0 %2390 }
 0xd16   : > { %11737 = vrcp.f32 %v2391_v56 }
 0xd17   : > { %11739 = vpow2.f32 %v3047_v37 }
 0xd18   : > { %v11736_v31 = vpop.eup %11735 }
 0xd19   : > { %v2394_v4 = vpop.xlane.xlu0 %2393  ;;  %v2397_v20 = vpop.xlane.xlu1 %2396  ;;  %v2406_v58 = vmul.f32 %v11736_v31, %v13278_v25 }
 0xd1a   : > { %11741 = vrcp.f32 %v2394_v4 }
 0xd1b   : > { %11743 = vrcp.f32 %v2397_v20 }
 0xd1d   : > { %v2400_v32 = vpop.xlane.xlu0 %2399 }
 0xd1e   : > { %11745 = vrcp.f32 %v2400_v32 }
 0xd20   : > { %v11738_v59 = vpop.eup %11737 }
 0xd21   : > { %v2407_v10 = vmul.f32 %v11738_v59, %v13283_v26  ;;  %v13386_v43 = vpop.eup %11739 }
 0xd22   : > { %v3061_v16 = vsel %vm1117_vm6, %v13386_v43, 0.0 }
 0xd23   : > { %v2411_v9 = vpack.c.bf16 %v2407_v10, %v2406_v58 }
 0xd24   : > { %v11742_v18 = vpop.eup %11741 }
 0xd25   : > { %v11744_v42 = vpop.eup %11743  ;;  %10402 = vmatmul.mubr.msk.bf16.vlgmr.msra.gmra.mrb[76].mxu1 %vm1117_vm6, %v2411_v9  ;;  %v2408_v25 = vmul.f32 %v11742_v18, %v13287_v0  ;;  %v2611_v23 = vpop.xlane.xlu1 %2610 }
 0xd26   : > { %10432 = vmatpush3.bf16.msra.mxu1 %v13270_v7  ;;  %3062 = vadd.xlane.f32.xlu0 %v3061_v16  ;;  %v2409_v26 = vmul.f32 %v11744_v42, %v13290_v8  ;;  %v2655_v7 = vsel %vm1193_vm5, %v13338_v19, 0 }
 0xd27   : > { %v2614_v36 = vpop.xlane.xlu0 %2613  ;;  %10433 = vmatprep.subr.bf16.mxu1 %v12210_v1  ;;  %10405 = vmatprep.mubr.msk.bf16.mxu1 %vm12211_vm1, %v12210_v1 }
 0xd28   : > { %11747 = vrcp.f32 %v2614_v36  ;;  %v2412_v21 = vpack.c.bf16 %v2409_v26, %v2408_v25  ;;  %v11746_v49 = vpop.eup %11745 }
 0xd29   : > { %11749 = vrcp.f32 %v2611_v23  ;;  %v2410_v0 = vmul.f32 %v11746_v49, %v13297_v28  ;;  %v2862_v39 = vpop.permute.xlu1 %2861 }
 0xd2a   : > { %10434 = vmatpush3.bf16.msra.mxu1 %v13272_v34  ;;  %v2875_v2 = vsel %vm1193_vm5, %v2862_v39, 0 }
 0xd2b   : > { %10435 = vmatprep.subr.bf16.mxu1 %v12210_v1  ;;  %v2413_v8 = vpack.c.bf16 %v2410_v0, %v2410_v0 }
 0xd2d   : > { %v2617_v47 = vpop.xlane.xlu0 %2616  ;;  %10406 = vmatmul.mubr.msk.bf16.gmra.mrb[80].mxu1 %vm1117_vm6, %v2412_v21 }
 0xd2e   : > { %10436 = vmatpush3.bf16.msra.mxu1 %v2655_v7  ;;  %10409 = vmatprep.mubr.msk.bf16.mxu1 %vm12211_vm1, %v12210_v1 }
 0xd2f   : > { %10467 = vmatprep.subr.bf16.mxu1 %v12210_v1 }
 0xd31   : > { %v2620_v34 = vpop.xlane.xlu0 %2619 }
 0xd32   : > { %11751 = vrcp.f32 %v2620_v34  ;;  %v11748_v50 = vpop.eup %11747 }
 0xd33   : > { %11753 = vrcp.f32 %v2617_v47  ;;  %v11750_v53 = vpop.eup %11749  ;;  %v2630_v19 = vmul.f32 %v11748_v50, %v13307_v35 }
 0xd34   : > { %v2629_v63 = vmul.f32 %v11750_v53, %v13303_v62 }
 0xd35   : > { %10410 = vmatmul.mubr.msk.bf16.gmra.mrb[84].mxu1 %vm1117_vm6, %v2413_v8  ;;  %v2623_v61 = vpop.xlane.xlu0 %2622 }
 0xd36   : > { %10437 = vmatprep.mubr.msk.bf16.mxu1 %vm12211_vm1, %v12210_v1  ;;  %11755 = vrcp.f32 %v2623_v61  ;;  %v2634_v28 = vpack.c.bf16 %v2630_v19, %v2629_v63 }
 0xd3c   : > { %v11752_v15 = vpop.eup %11751 }
 0xd3d   : > { %10438 = vmatmul.mubr.msk.bf16.vlgmr.msra.gmra.mrb[88].mxu1 %vm1117_vm6, %v2634_v28  ;;  %v11754_v5 = vpop.eup %11753  ;;  %v2632_v45 = vmul.f32 %v11752_v15, %v13316_v12 }
 0xd3e   : > { %10468 = vmatpush3.bf16.msra.mxu1 %v13336_v40  ;;  %10441 = vmatprep.mubr.msk.bf16.mxu1 %vm12211_vm1, %v12210_v1  ;;  %v2631_v35 = vmul.f32 %v11754_v5, %v13312_v48 }
 0xd3f   : > { %10469 = vmatprep.subr.bf16.mxu1 %v12210_v1  ;;  %v2834_v12 = vpop.xlane.xlu0 %2833 }
 0xd40   : > { %v2635_v62 = vpack.c.bf16 %v2632_v45, %v2631_v35  ;;  %v11756_v13 = vpop.eup %11755  ;;  %11757 = vrcp.f32 %v2834_v12 }
 0xd41   : > { %v2633_v40 = vmul.f32 %v11756_v13, %v13321_v38 }
 0xd42   : > { %10470 = vmatpush3.bf16.msra.mxu1 %v13382_v52 }
 0xd43   : > { %10471 = vmatprep.subr.bf16.mxu1 %v12210_v1  ;;  %v2636_v48 = vpack.c.bf16 %v2633_v40, %v2633_v40 }
 0xd45   : > { %10442 = vmatmul.mubr.msk.bf16.gmra.mrb[92].mxu1 %vm1117_vm6, %v2635_v62 }
 0xd46   : > { %10472 = vmatpush3.bf16.msra.mxu1 %v2875_v2  ;;  %10445 = vmatprep.mubr.msk.bf16.mxu1 %vm12211_vm1, %v12210_v1 }
 0xd47   : > { %10503 = vmatprep.subr.bf16.mxu1 %v12210_v1 }
 0xd4a   : > { %v11758_v37 = vpop.eup %11757 }
 0xd4b   : > { %v2850_v4 = vmul.f32 %v11758_v37, %v13327_v14 }
 0xd4d   : > { %10446 = vmatmul.mubr.msk.bf16.gmra.mrb[96].mxu1 %vm1117_vm6, %v2636_v48 }
 0xd4e   : > { %10473 = vmatprep.mubr.msk.bf16.mxu1 %vm12211_vm1, %v12210_v1 }
 0xd5a   : > { %v2831_v52 = vpop.xlane.xlu1 %2830 }
 0xd5b   : > { %11759 = vrcp.f32 %v2831_v52 }
 0xd65   : > { %v11760_v56 = vpop.eup %11759 }
 0xd66   : > { %v2849_v20 = vmul.f32 %v11760_v56, %v13332_v51 }
 0xd68   : > { %v2854_v31 = vpack.c.bf16 %v2850_v4, %v2849_v20 }
 0xd6a   : > { %10474 = vmatmul.mubr.msk.bf16.vlgmr.msra.gmra.mrb[100].mxu1 %vm1117_vm6, %v2854_v31 }
 0xd6b   : > { %10477 = vmatprep.mubr.msk.bf16.mxu1 %vm12211_vm1, %v12210_v1 }
 0xd72   : > { %v2837_v38 = vpop.xlane.xlu0 %2836 }
 0xd73   : > { %11761 = vrcp.f32 %v2837_v38 }
 0xd76   : > { %v2840_v32 = vpop.xlane.xlu0 %2839  ;;  %v2843_v59 = vpop.xlane.xlu1 %2842 }
 0xd77   : > { %11763 = vrcp.f32 %v2840_v32 }
 0xd78   : > { %11765 = vrcp.f32 %v2843_v59 }
 0xd7a   : > { %v3051_v58 = vpop.xlane.xlu0 %3050  ;;  %v3054_v10 = vpop.xlane.xlu1 %3053 }
 0xd7b   : > { %11767 = vrcp.f32 %v3051_v58 }
 0xd7c   : > { %11769 = vrcp.f32 %v3054_v10 }
 0xd7d   : > { %v11762_v42 = vpop.eup %11761 }
 0xd7e   : > { %v3060_v9 = vpop.xlane.xlu0 %3059  ;;  %v3057_v18 = vpop.xlane.xlu1 %3056  ;;  %v2851_v36 = vmul.f32 %v11762_v42, %v13347_v41 }
 0xd7f   : > { %11771 = vrcp.f32 %v3060_v9 }
 0xd80   : > { %11773 = vrcp.f32 %v3057_v18  ;;  %v11541_v18 = vld [vmem:[%s15994_s9 + $0x10] sm:$0xff]  }
 0xd81   : > { %v11764_v14 = vpop.eup %11763  ;;  %10522 = vmatpush3.bf16.msra.mxu0 %v11541_v18 }
 0xd82   : > { %v3078_v51 = vpop.permute.xlu0 %3077  ;;  %v3080_v16 = vpop.permute.xlu1 %3079  ;;  %v2852_v25 = vmul.f32 %v11764_v14, %v13351_v55  ;;  %10523 = vmatprep.subr.bf16.mxu0 %v12210_v1 }
 0xd83   : > { %10504 = vmatpush3.bf16.msra.mxu1 %v3078_v51  ;;  %v11766_v23 = vpop.eup %11765 }
 0xd84   : > { %v2855_v26 = vpack.c.bf16 %v2852_v25, %v2851_v36  ;;  %10505 = vmatprep.subr.bf16.mxu1 %v12210_v1  ;;  %v2853_v49 = vmul.f32 %v11766_v23, %v13353_v33 }
 0xd85   : > { %v11768_v55 = vpop.eup %11767 }
 0xd86   : > { %10478 = vmatmul.mubr.msk.bf16.gmra.mrb[104].mxu1 %vm1117_vm6, %v2855_v26  ;;  %v3082_v21 = vpop.permute.xlu1 %3081  ;;  %v2856_v7 = vpack.c.bf16 %v2853_v49, %v2853_v49  ;;  %v11770_v47 = vpop.eup %11769  ;;  %v3069_v0 = vmul.f32 %v11768_v55, %v13359_v22 }
 0xd87   : > { %10506 = vmatpush3.bf16.msra.mxu1 %v3080_v16  ;;  %10481 = vmatprep.mubr.msk.bf16.mxu1 %vm12211_vm1, %v12210_v1  ;;  %v3095_v41 = vsel %vm1193_vm5, %v3082_v21, 0  ;;  %v3070_v34 = vmul.f32 %v11770_v47, %v13361_v54 }
 0xd88   : > { %10507 = vmatprep.subr.bf16.mxu1 %v12210_v1 }
 0xd89   : > { %v11772_v33 = vpop.eup %11771  ;;  %v3074_v8 = vpack.c.bf16 %v3070_v34, %v3069_v0 }
 0xd8a   : > { %v11774_v50 = vpop.eup %11773  ;;  %v3072_v19 = vmul.f32 %v11772_v33, %v13369_v44 }
 0xd8b   : > { %10508 = vmatpush3.bf16.msra.mxu1 %v3095_v41  ;;  %v3071_v53 = vmul.f32 %v11774_v50, %v13367_v30 }
 0xd8c   : > { %10537 = vmatprep.subr.bf16.mxu1 %v12210_v1 }
 0xd8d   : > { %v3075_v61 = vpack.c.bf16 %v3072_v19, %v3071_v53 }
 0xd8e   : > { %10482 = vmatmul.mubr.msk.bf16.gmra.mrb[108].mxu1 %vm1117_vm6, %v2856_v7  ;;  %v11542_v7 = vld [vmem:[%s15994_s9 + $0x18] sm:$0xff]  }
 0xd8f   : > { %10509 = vmatprep.mubr.msk.bf16.mxu1 %vm12211_vm1, %v12210_v1  ;;  %10524 = vmatpush3.bf16.msra.mxu0 %v11542_v7 }
 0xd90   : > { %10553 = vmatprep.subr.bf16.mxu0 %v12210_v1 }
 0xd96   : > { %10510 = vmatmul.mubr.msk.bf16.vlgmr.msra.gmra.mrb[112].mxu1 %vm1117_vm6, %v3074_v8 }
 0xd97   : > { %10513 = vmatprep.mubr.msk.bf16.mxu1 %vm12211_vm1, %v12210_v1 }
 0xd9e   : > { %10514 = vmatmul.mubr.msk.bf16.gmra.mrb[116].mxu1 %vm1117_vm6, %v3075_v61 }
 0xd9f   : > { %10517 = vmatprep.mubr.msk.bf16.mxu1 %vm12211_vm1, %v12210_v1 }
 0xdb3   : > { %v3063_v22 = vpop.xlane.xlu0 %3062 }
 0xdb4   : > { %11775 = vrcp.f32 %v3063_v22 }
 0xdbe   : > { %v11776_v54 = vpop.eup %11775 }
 0xdbf   : > { %v3073_v63 = vmul.f32 %v11776_v54, %v13386_v43 }
 0xdc1   : > { %v3076_v28 = vpack.c.bf16 %v3073_v63, %v3073_v63 }
 0xdc3   : > { %10518 = vmatmul.mubr.msk.bf16.gmra.mrb[120].mxu1 %vm1117_vm6, %v3076_v28 }
 0xdc4   : > { %10541 = vmatprep.mubr.msk.bf16.mxu1 %vm12211_vm1, %v12210_v1 }
 0xdf8   : > { %v13461_v30 = vpop.f32.mrb[76].mxu1 }
 0xdf9   : > { %v10403_v44 = vpop.f32.mrb[77].mxu1 }
 0xdfa   : > { %v13463_v15 = vpop.f32.mrb[78].mxu1 }
 0xdfb   : > { %v10404_v5 = vpop.f32.mrb[79].mxu1 }
 0xe00   : > { %v13465_v45 = vpop.f32.mrb[80].mxu1 }
 0xe01   : > { %v10407_v35 = vpop.f32.mrb[81].mxu1 }
 0xe02   : > { %v13467_v39 = vpop.f32.mrb[82].mxu1 }
 0xe03   : > { %v10408_v62 = vpop.f32.mrb[83].mxu1 }
 0xe08   : > { %v13469_v13 = vpop.f32.mrb[84].mxu1 }
 0xe09   : > { %v10411_v43 = vpop.f32.mrb[85].mxu1 }
 0xe0a   : > { %v2487_v2 = vpop.f32.mrb[86].mxu1 }
 0xe0b   : > { %v10412_v40 = vpop.f32.mrb[87].mxu1 }
 0xe10   : > { %v2691_v48 = vpop.f32.mrb[88].mxu1 }
 0xe11   : > { %v10439_v12 = vpop.f32.mrb[89].mxu1 }
 0xe12   : > { %v2694_v52 = vpop.f32.mrb[90].mxu1 }
 0xe13   : > { %v11379_v37 = vpack.i.bf16 %v2694_v52, %v2691_v48  ;;  %v10440_v56 = vpop.f32.mrb[91].mxu1 }
 0xe15   : > { %11380 = vrot.lane.b32.xlu1 %v11379_v37, %s16070_s0 }
 0xe18   : > { %v2699_v4 = vpop.f32.mrb[92].mxu1 }
 0xe19   : > { %v10443_v20 = vpop.f32.mrb[93].mxu1 }
 0xe1a   : > { %v2702_v31 = vpop.f32.mrb[94].mxu1 }
 0xe1b   : > { %v11389_v38 = vpack.i.bf16 %v2702_v31, %v2699_v4  ;;  %v10444_v32 = vpop.f32.mrb[95].mxu1 }
 0xe1d   : > { %11390 = vrot.lane.b32.xlu1 %v11389_v38, %s16070_s0 }
 0xe20   : > { %v2707_v59 = vpop.f32.mrb[96].mxu1 }
 0xe21   : > { %v10447_v58 = vpop.f32.mrb[97].mxu1 }
 0xe22   : > { %v2710_v10 = vpop.f32.mrb[98].mxu1 }
 0xe23   : > { %v10448_v9 = vpop.f32.mrb[99].mxu1 }
 0xe3d   : > { %v2911_v42 = vpop.f32.mrb[100].mxu1 }
 0xe3e   : > { %v10475_v14 = vpop.f32.mrb[101].mxu1 }
 0xe3f   : > { %v2914_v51 = vpop.f32.mrb[102].mxu1 }
 0xe40   : > { %v11384_v16 = vpack.i.bf16 %v2914_v51, %v2911_v42  ;;  %v10476_v36 = vpop.f32.mrb[103].mxu1 }
 0xe42   : > { %11385 = vrot.lane.b32.xlu0 %v11384_v16, %s16071_s27 }
 0xe59   : > { %v2919_v25 = vpop.f32.mrb[104].mxu1 }
 0xe5a   : > { %v10479_v26 = vpop.f32.mrb[105].mxu1 }
 0xe5b   : > { %v2922_v23 = vpop.f32.mrb[106].mxu1 }
 0xe5c   : > { %v11399_v21 = vpack.i.bf16 %v2922_v23, %v2919_v25  ;;  %v10480_v49 = vpop.f32.mrb[107].mxu1 }
 0xe61   : > { %v2927_v41 = vpop.f32.mrb[108].mxu1 }
 0xe62   : > { %v10483_v55 = vpop.f32.mrb[109].mxu1 }
 0xe63   : > { %v2930_v47 = vpop.f32.mrb[110].mxu1 }
 0xe64   : > { %v10484_v0 = vpop.f32.mrb[111].mxu1 }
 0xe69   : > { %v3131_v34 = vpop.f32.mrb[112].mxu1 }
 0xe6a   : > { %v10511_v33 = vpop.f32.mrb[113].mxu1 }
 0xe6b   : > { %v3134_v8 = vpop.f32.mrb[114].mxu1  ;;  %v9526_v33 = vld [vmem:[%s16064_s10 + $0x1] ss:$0 sm:$0xff] }
 0xe6c   : > { %v11394_v50 = vpack.i.bf16 %v3134_v8, %v3131_v34  ;;  %v10512_v53 = vpop.f32.mrb[115].mxu1 }
 0xe6e   : > { %11395 = vrot.lane.b32.xlu1 %v11394_v50, %s16072_s28 }
 0xe71   : > { %v3139_v19 = vpop.f32.mrb[116].mxu1 }
 0xe72   : > { %11400 = vrot.lane.b32.xlu1 %v11399_v21, %s16071_s27  ;;  %v10515_v61 = vpop.f32.mrb[117].mxu1 }
 0xe73   : > { %v3142_v22 = vpop.f32.mrb[118].mxu1 }
 0xe74   : > { %v11404_v54 = vpack.i.bf16 %v3142_v22, %v3139_v19  ;;  %v10516_v63 = vpop.f32.mrb[119].mxu1 }
 0xe76   : > { %11405 = vrot.lane.b32.xlu1 %v11404_v54, %s16072_s28 }
 0xe7a   : > { %3166 = vrot.lane.b32.xlu1 %v2707_v59, %s16070_s0 }
 0xe7e   : > { %3186 = vrot.lane.b32.xlu1 %v2927_v41, %s16071_s27 }
 0xe87   : > { %v11381_v62 = vpop.permute.xlu1 %11380 }
 0xe88   : > { %v11383_v40 = vunpack.i.h.bf16 %v11381_v62  ;;  %v11382_v48 = vunpack.i.l.bf16 %v11381_v62 }
 0xe8a   : > { %v3214_v56 = vsel %vm1042_vm4, %v13463_v15, %v11383_v40  ;;  %v3213_v4 = vsel %vm1042_vm4, %v13461_v30, %v11382_v48 }
 0xe8f   : > { %v11391_v2 = vpop.permute.xlu1 %11390 }
 0xe90   : > { %v11393_v18 = vunpack.i.h.bf16 %v11391_v2  ;;  %v11392_v42 = vunpack.i.l.bf16 %v11391_v2 }
 0xe92   : > { %v3216_v15 = vsel %vm1042_vm4, %v13467_v39, %v11393_v18  ;;  %v3215_v16 = vsel %vm1042_vm4, %v13465_v45, %v11392_v42 }
 0xe96   : > { %v3147_v28 = vpop.f32.mrb[120].mxu1 }
 0xe97   : > { %3206 = vrot.lane.b32.xlu0 %v3147_v28, %s16072_s28  ;;  %v10519_v44 = vpop.f32.mrb[121].mxu1 }
 0xe98   : > { %v3150_v5 = vpop.f32.mrb[122].mxu1 }
 0xe99   : > { %v10520_v35 = vpop.f32.mrb[123].mxu1 }
 0xeb4   : > { %v11386_v43 = vpop.permute.xlu0 %11385 }
 0xeb5   : > { %v11388_v12 = vunpack.i.h.bf16 %v11386_v43  ;;  %v11387_v52 = vunpack.i.l.bf16 %v11386_v43 }
 0xeb7   : > { %v3218_v38 = vsel %vm1981_vm7, %v3213_v4, %v11387_v52  ;;  %v3219_v32 = vsel %vm1981_vm7, %v3214_v56, %v11388_v12 }
 0xee0   : > { %v11396_v37 = vpop.permute.xlu1 %11395 }
 0xee1   : > { %v11398_v20 = vunpack.i.h.bf16 %v11396_v37  ;;  %v11397_v31 = vunpack.i.l.bf16 %v11396_v37 }
 0xee3   : > { %v3223_v59 = vsel %vm1987_vm8, %v3218_v38, %v11397_v31  ;;  %v3224_v58 = vsel %vm1987_vm8, %v3219_v32, %v11398_v20 }
 0xee4   : > { %v3228_v10 = vpack.c.bf16 %v3224_v58, %v3223_v59  ;;  %v11401_v9 = vpop.permute.xlu1 %11400 }
 0xee5   : > { %v11403_v14 = vunpack.i.h.bf16 %v11401_v9  ;;  %v11402_v51 = vunpack.i.l.bf16 %v11401_v9 }
 0xee6   : > { %10526 = vmatmul.mubr.msk.bf16.vlgmr.msra.gmra.mrb[120].mxu0 %vm799_vm3, %v3228_v10 }
 0xee7   : > { %10529 = vmatprep.mubr.msk.bf16.mxu0 %vm12211_vm1, %v12210_v1  ;;  %v3220_v26 = vsel %vm1981_vm7, %v3215_v16, %v11402_v51  ;;  %v3221_v23 = vsel %vm1981_vm7, %v3216_v15, %v11403_v14 }
 0xee8   : > { %v11406_v30 = vpop.permute.xlu1 %11405 }
 0xee9   : > { %v11408_v36 = vunpack.i.h.bf16 %v11406_v30  ;;  %v11407_v25 = vunpack.i.l.bf16 %v11406_v30 }
 0xeeb   : > { %v3225_v21 = vsel %vm1987_vm8, %v3220_v26, %v11407_v25  ;;  %v3226_v49 = vsel %vm1987_vm8, %v3221_v23, %v11408_v36 }
 0xeec   : > { %v3229_v41 = vpack.c.bf16 %v3226_v49, %v3225_v21  ;;  %v3167_v39 = vpop.permute.xlu1 %3166  ;;  %v3391_v21 = vadd.f32 1.0, %v12433_v60 }
 0xeed   : > { %v3217_v45 = vsel %vm1042_vm4, %v13469_v13, %v3167_v39  ;;  %v11543_v39 = vld [vmem:[%s15993_s8 + $0x20] sm:$0xff]  }
 0xeee   : > { %10530 = vmatmul.mubr.msk.bf16.gmra.mrb[124].mxu0 %vm799_vm3, %v3229_v41  ;;  %v3395_v49 = vrot.slane %v3391_v21, %v12444_v24  ;;  %10538 = vmatpush3.bf16.msra.mxu1 %v11543_v39 }
 0xeef   : > { %10533 = vmatprep.mubr.msk.bf16.mxu0 %vm12211_vm1, %v12210_v1  ;;  %10539 = vmatprep.subr.bf16.mxu1 %v12210_v1 }
 0xef0   : > { %v3187_v55 = vpop.permute.xlu1 %3186 }
 0xef1   : > { %v3222_v7 = vsel %vm1981_vm7, %v3217_v45, %v3187_v55 }
 0xf09   : > { %v3207_v47 = vpop.permute.xlu0 %3206 }
 0xf0a   : > { %v3227_v0 = vsel %vm1987_vm8, %v3222_v7, %v3207_v47  ;;  %v11544_v7 = vld [vmem:[%s15993_s8 + $0x28] sm:$0xff]  }
 0xf0b   : > { %v3230_v34 = vpack.c.bf16 %v3227_v0, %v3227_v0  ;;  %10540 = vmatpush3.bf16.msra.mxu1 %v11544_v7 }
 0xf0c   : > { %10571 = vmatprep.subr.bf16.mxu1 %v12210_v1 }
 0xf0d   : > { %10534 = vmatmul.mubr.msk.bf16.gmra.mrb[128].mxu0 %vm799_vm3, %v3230_v34 }
 0xf0e   : > { %10559 = vmatprep.mubr.msk.bf16.mxu0 %vm12211_vm1, %v12210_v1 }
 0xfb9   : > { %v3299_v8 = vpop.f32.mrb[120].mxu0 }
 0xfba   : > { %v3300_v50 = vadd.f32 %v9526_v33, %v3299_v8  ;;  %v10527_v53 = vpop.f32.mrb[121].mxu0 }
 0xfbb   : > { %v3302_v19 = vpop.f32.mrb[122].mxu0 }
 0xfbc   : > { %v13521_v13 = vadd.f32 %v3300_v50, %v12981_v46  ;;  %v3303_v61 = vadd.f32 %v9526_v33, %v3302_v19  ;;  %v10528_v22 = vpop.f32.mrb[123].mxu0 }
 0xfbe   : > { %v13524_v54 = vadd.f32 %v3303_v61, %v12986_v3  ;;  %v3326_v63 = vsel %vm799_vm3, %v13521_v13, 0.0 }
 0xfbf   : > { %3327 = vadd.xlane.f32.xlu1 %v3326_v63 }
 0xfc0   : > { %v3329_v28 = vsel %vm799_vm3, %v13524_v54, 0.0 }
 0xfc1   : > { %3330 = vadd.xlane.f32.xlu0 %v3329_v28  ;;  %v3307_v44 = vpop.f32.mrb[124].mxu0 }
 0xfc2   : > { %v3308_v5 = vadd.f32 %v9526_v33, %v3307_v44  ;;  %v10531_v35 = vpop.f32.mrb[125].mxu0 }
 0xfc3   : > { %v3310_v62 = vpop.f32.mrb[126].mxu0 }
 0xfc4   : > { %v13531_v46 = vadd.f32 %v3308_v5, %v12991_v27  ;;  %v3311_v43 = vadd.f32 %v9526_v33, %v3310_v62  ;;  %v10532_v2 = vpop.f32.mrb[127].mxu0 }
 0xfc6   : > { %v13534_v3 = vadd.f32 %v3311_v43, %v12996_v29  ;;  %v3332_v40 = vsel %vm799_vm3, %v13531_v46, 0.0 }
 0xfc7   : > { %3333 = vadd.xlane.f32.xlu0 %v3332_v40 }
 0xfc8   : > { %v3335_v48 = vsel %vm799_vm3, %v13534_v3, 0.0 }
 0xfcb   : > { %3336 = vadd.xlane.f32.xlu0 %v3335_v48 }
 0xfe0   : > { %v3315_v12 = vpop.f32.mrb[128].mxu0 }
 0xfe1   : > { %v3316_v52 = vadd.f32 %v9526_v33, %v3315_v12  ;;  %v10535_v37 = vpop.f32.mrb[129].mxu0  ;;  %v3408_v12 = vrot.slane %v12433_v60, %v12444_v24 }
 0xfe2   : > { %v3318_v56 = vpop.f32.mrb[130].mxu0 }
 0xfe3   : > { %v13541_v27 = vadd.f32 %v3316_v52, %v13001_v17  ;;  %v10536_v4 = vpop.f32.mrb[131].mxu0 }
 0xfe5   : > { %v3338_v29 = vsel %vm799_vm3, %v13541_v27, 0.0 }
 0xfe6   : > { %3339 = vadd.xlane.f32.xlu1 %v3338_v29 }
0x104c   : > { %v3328_v20 = vpop.xlane.xlu1 %3327 }
0x104d   : > { %v3341_v31 = vmul.f32 0.03125, %v3328_v20 }
0x104e   : > { %v3331_v38 = vpop.xlane.xlu0 %3330 }
0x104f   : > { %v3346_v32 = vsub.f32 %v13521_v13, %v3341_v31  ;;  %v3342_v59 = vmul.f32 0.03125, %v3331_v38 }
0x1051   : > { %v3347_v58 = vsub.f32 %v13524_v54, %v3342_v59  ;;  %v3351_v10 = vmul.f32 %v3346_v32, %v3346_v32 }
0x1053   : > { %v3356_v9 = vsel %vm799_vm3, %v3351_v10, 0.0  ;;  %v3352_v18 = vmul.f32 %v3347_v58, %v3347_v58 }
0x1054   : > { %v3334_v42 = vpop.xlane.xlu0 %3333  ;;  %3357 = vadd.xlane.f32.xlu0 %v3356_v9 }
0x1055   : > { %v3343_v17 = vmul.f32 0.03125, %v3334_v42  ;;  %v3359_v14 = vsel %vm799_vm3, %v3352_v18, 0.0 }
0x1056   : > { %3360 = vadd.xlane.f32.xlu1 %v3359_v14 }
0x1057   : > { %v3348_v51 = vsub.f32 %v13531_v46, %v3343_v17 }
0x1058   : > { %v3337_v30 = vpop.xlane.xlu0 %3336 }
0x1059   : > { %v3344_v15 = vmul.f32 0.03125, %v3337_v30  ;;  %v3353_v16 = vmul.f32 %v3348_v51, %v3348_v51 }
0x105b   : > { %v3349_v36 = vsub.f32 %v13534_v3, %v3344_v15  ;;  %v3362_v25 = vsel %vm799_vm3, %v3353_v16, 0.0 }
0x105c   : > { %3363 = vadd.xlane.f32.xlu0 %v3362_v25 }
0x105d   : > { %v3354_v26 = vmul.f32 %v3349_v36, %v3349_v36 }
0x105f   : > { %v3365_v23 = vsel %vm799_vm3, %v3354_v26, 0.0 }
0x1060   : > { %3366 = vadd.xlane.f32.xlu1 %v3365_v23 }
0x1071   : > { %3397 = vrot.lane.b32.xlu1 %v3395_v49, %s16036_s24 }
0x1073   : > { %v3340_v41 = vpop.xlane.xlu1 %3339 }
0x1074   : > { %v3345_v55 = vmul.f32 0.03125, %v3340_v41 }
0x1076   : > { %v3350_v45 = vsub.f32 %v13541_v27, %v3345_v55 }
0x1078   : > { %v3355_v47 = vmul.f32 %v3350_v45, %v3350_v45 }
0x107a   : > { %v3368_v0 = vsel %vm799_vm3, %v3355_v47, 0.0 }
0x107b   : > { %3369 = vadd.xlane.f32.xlu0 %v3368_v0 }
0x10e1   : > { %v3358_v34 = vpop.xlane.xlu0 %3357 }
0x10e2   : > { %v3371_v33 = vmul.f32 0.03125, %v3358_v34 }
0x10e3   : > { %v3361_v8 = vpop.xlane.xlu1 %3360 }
0x10e4   : > { %v3376_v50 = vadd.f32 1e-05, %v3371_v33  ;;  %v3372_v53 = vmul.f32 0.03125, %v3361_v8 }
0x10e6   : > { %11777 = vrsqrt.f32 %v3376_v50  ;;  %v3377_v19 = vadd.f32 1e-05, %v3372_v53 }
0x10e8   : > { %11779 = vrsqrt.f32 %v3377_v19 }
0x10e9   : > { %v3364_v61 = vpop.xlane.xlu0 %3363 }
0x10ea   : > { %v3373_v22 = vmul.f32 0.03125, %v3364_v61 }
0x10ec   : > { %v3378_v63 = vadd.f32 1e-05, %v3373_v22 }
0x10ed   : > { %v3367_v28 = vpop.xlane.xlu1 %3366 }
0x10ee   : > { %11781 = vrsqrt.f32 %v3378_v63  ;;  %v3374_v44 = vmul.f32 0.03125, %v3367_v28 }
0x10f0   : > { %v11778_v5 = vpop.eup %11777  ;;  %v3379_v35 = vadd.f32 1e-05, %v3374_v44 }
0x10f1   : > { %v3386_v62 = vmul.f32 %v11778_v5, %v3346_v32  ;;  %v3398_v43 = vpop.permute.xlu1 %3397 }
0x10f2   : > { %v11780_v2 = vpop.eup %11779  ;;  %11783 = vrsqrt.f32 %v3379_v35 }
0x10f3   : > { %v3387_v40 = vmul.f32 %v11780_v2, %v3347_v58  ;;  %v3400_v48 = vmul.f32 %v3398_v43, %v3386_v62 }
0x10f5   : > { %v3401_v52 = vmul.f32 %v3398_v43, %v3387_v40  ;;  %v3409_v37 = vadd.f32 %v3408_v12, %v3400_v48 }
0x10f7   : > { %v3410_v56 = vadd.f32 %v3408_v12, %v3401_v52 }
0x10f8   : > { %v11782_v4 = vpop.eup %11781 }
0x10f9   : > { %v3414_v29 = vpack.c.bf16 %v3410_v56, %v3409_v37  ;;  %v3388_v20 = vmul.f32 %v11782_v4, %v3348_v51 }
0x10fb   : > { %10542 = vmatmul.mubr.msk.bf16.vlgmr.msra.gmra.mrb[124].mxu1 %vm799_vm3, %v3414_v29  ;;  %v3402_v32 = vmul.f32 %v3398_v43, %v3388_v20 }
0x10fc   : > { %v11784_v31 = vpop.eup %11783  ;;  %10545 = vmatprep.mubr.msk.bf16.mxu1 %vm12211_vm1, %v12210_v1 }
0x10fd   : > { %v3389_v38 = vmul.f32 %v11784_v31, %v3349_v36  ;;  %v3411_v58 = vadd.f32 %v3408_v12, %v3402_v32 }
0x10ff   : > { %v3403_v59 = vmul.f32 %v3398_v43, %v3389_v38 }
0x1101   : > { %v3412_v10 = vadd.f32 %v3408_v12, %v3403_v59 }
0x1103   : > { %v3415_v9 = vpack.c.bf16 %v3412_v10, %v3411_v58 }
0x1105   : > { %10546 = vmatmul.mubr.msk.bf16.gmra.mrb[128].mxu1 %vm799_vm3, %v3415_v9 }
0x1106   : > { %10549 = vmatprep.mubr.msk.bf16.mxu1 %vm12211_vm1, %v12210_v1 }
0x1108   : > { %v3370_v60 = vpop.xlane.xlu0 %3369 }
0x1109   : > { %v3375_v18 = vmul.f32 0.03125, %v3370_v60 }
0x110b   : > { %v3380_v42 = vadd.f32 1e-05, %v3375_v18 }
0x110d   : > { %11785 = vrsqrt.f32 %v3380_v42 }
0x1117   : > { %v11786_v17 = vpop.eup %11785 }
0x1118   : > { %v3390_v14 = vmul.f32 %v11786_v17, %v3350_v45 }
0x111a   : > { %v3404_v51 = vmul.f32 %v3398_v43, %v3390_v14 }
0x111c   : > { %v3413_v30 = vadd.f32 %v3408_v12, %v3404_v51 }
0x111e   : > { %v3416_v15 = vpack.c.bf16 %v3413_v30, %v3413_v30 }
0x1120   : > { %10550 = vmatmul.mubr.msk.bf16.gmra.mrb[132].mxu1 %vm799_vm3, %v3416_v15 }
0x1121   : > { %10577 = vmatprep.mubr.msk.bf16.mxu1 %vm12211_vm1, %v12210_v1 }
0x11ce   : > { %v3477_v16 = vpop.f32.mrb[124].mxu1 }
0x11cf   : > { %v10543_v36 = vpop.f32.mrb[125].mxu1  ;;  %v3499_v26 = vmul.f32 0.35355338, %v3477_v16 }
0x11d0   : > { %v3480_v25 = vpop.f32.mrb[126].mxu1 }
0x11d1   : > { %v3500_v23 = vmul.f32 0.35355338, %v3480_v25  ;;  %v13577_v21 = vpack.c.bf16 %v3480_v25, %v3477_v16  ;;  %v10544_v49 = vpop.f32.mrb[127].mxu1 }
0x11d3   : > { %3519 = vrot.lane.b32.xlu0 %v13577_v21, %s16036_s24  ;;  %v3504_v41 = vpack.c.bf16 %v3500_v23, %v3499_v26 }
0x11d8   : > { %v3485_v39 = vpop.f32.mrb[128].mxu1 }
0x11d9   : > { %v10547_v55 = vpop.f32.mrb[129].mxu1  ;;  %v3501_v7 = vmul.f32 0.35355338, %v3485_v39 }
0x11da   : > { %v3488_v45 = vpop.f32.mrb[130].mxu1  ;;  %v13694_v55 = vld [vmem:[%s12607_s4 + $0x58] sm:$0xff] }
0x11db   : > { %v3502_v47 = vmul.f32 0.35355338, %v3488_v45  ;;  %v13581_v0 = vpack.c.bf16 %v3488_v45, %v3485_v39  ;;  %v10548_v34 = vpop.f32.mrb[131].mxu1 }
0x11dd   : > { %3744 = vrot.lane.b32.xlu0 %v13581_v0, %s16073_s5  ;;  %3521 = vrot.lane.b32.xlu1 %v13581_v0, %s16036_s24  ;;  %v3505_v33 = vpack.c.bf16 %v3502_v47, %v3501_v7 }
0x11e1   : > { %3736 = vrot.lane.b32.xlu0 %v3504_v41, %s16074_s21 }
0x11e5   : > { %3738 = vrot.lane.b32.xlu0 %v3505_v33, %s16074_s21 }
0x11f3   : > { %v3493_v8 = vpop.f32.mrb[132].mxu1 }
0x11f4   : > { %v3503_v50 = vmul.f32 0.35355338, %v3493_v8  ;;  %v13589_v53 = vpack.c.bf16 %v3493_v8, %v3493_v8  ;;  %v10551_v19 = vpop.f32.mrb[133].mxu1 }
0x11f5   : > { %v3496_v61 = vpop.f32.mrb[134].mxu1  ;;  %v13707_v19 = vld [vmem:[%s12607_s4 + $0x60] sm:$0xff] }
0x11f6   : > { %v3506_v22 = vpack.c.bf16 %v3503_v50, %v3503_v50  ;;  %3523 = vrot.lane.b32.xlu1 %v13589_v53, %s16036_s24  ;;  %v10552_v63 = vpop.f32.mrb[135].mxu1  ;;  %s16077_s24 = smov 64  }
0x11f8   : > { %3740 = vrot.lane.b32.xlu0 %v3506_v22, %s16074_s21 }
0x11fa   : > { %3742 = vrot.lane.b32.xlu1 %v13577_v21, %s16073_s5 }
0x11fc   : > { %3956 = vrot.lane.b32.xlu0 %v3504_v41, %s16065_s23 }
0x11fe   : > { %3746 = vrot.lane.b32.xlu1 %v13589_v53, %s16073_s5 }
0x1200   : > { %3958 = vrot.lane.b32.xlu0 %v3505_v33, %s16065_s23 }
0x1202   : > { %3962 = vrot.lane.b32.xlu1 %v13577_v21, %s16075_s3 }
0x1204   : > { %3960 = vrot.lane.b32.xlu0 %v3506_v22, %s16065_s23 }
0x1206   : > { %3964 = vrot.lane.b32.xlu1 %v13581_v0, %s16075_s3 }
0x1208   : > { %4176 = vrot.lane.b32.xlu0 %v3504_v41, %s16066_s29 }
0x120a   : > { %3966 = vrot.lane.b32.xlu1 %v13589_v53, %s16075_s3 }
0x120c   : > { %4180 = vrot.lane.b32.xlu0 %v3506_v22, %s16066_s29 }
0x120e   : > { %4182 = vrot.lane.b32.xlu1 %v13577_v21, %s16076_s26 }
0x1210   : > { %3657 = vrot.lane.b32.xlu0 %v13577_v21, %s16077_s24 }
0x1212   : > { %4184 = vrot.lane.b32.xlu1 %v13581_v0, %s16076_s26 }
0x1214   : > { %3661 = vrot.lane.b32.xlu0 %v13589_v53, %s16077_s24 }
0x1216   : > { %4186 = vrot.lane.b32.xlu1 %v13589_v53, %s16076_s26 }
0x1218   : > { %3882 = vrot.lane.b32.xlu0 %v13581_v0, %s16067_s2 }
0x121a   : > { %4178 = vrot.lane.b32.xlu1 %v3505_v33, %s16066_s29 }
0x121c   : > { %3884 = vrot.lane.b32.xlu0 %v13589_v53, %s16067_s2 }
0x121e   : > { %3659 = vrot.lane.b32.xlu1 %v13581_v0, %s16077_s24 }
0x1245   : > { %v3520_v28 = vpop.permute.xlu0 %3519 }
0x1246   : > { %v3535_v44 = vsel %vm1042_vm4, %v3520_v28, 0 }
0x1247   : > { %10554 = vmatpush3.bf16.xpose.msra.mxu0 %v3535_v44 }
0x1248   : > { %10555 = vmatprep.subr.bf16.mxu0 %v12210_v1 }
0x124f   : > { %v3522_v5 = vpop.permute.xlu1 %3521  ;;  %v3745_v62 = vpop.permute.xlu0 %3744 }
0x1250   : > { %v3538_v35 = vsel %vm1042_vm4, %v3522_v5, 0  ;;  %v3761_v32 = vsel %vm1042_vm4, %v3745_v62, 0 }
0x1251   : > { %10556 = vmatpush3.bf16.xpose.msra.mxu0 %v3538_v35 }
0x1252   : > { %10557 = vmatprep.subr.bf16.mxu0 %v12210_v1 }
0x1253   : > { %v3737_v43 = vpop.permute.xlu0 %3736 }
0x1257   : > { %v3739_v2 = vpop.permute.xlu0 %3738 }
0x1268   : > { %v3524_v40 = vpop.permute.xlu1 %3523 }
0x1269   : > { %v3541_v48 = vsel %vm1042_vm4, %v3524_v40, 0 }
0x126a   : > { %10558 = vmatpush3.bf16.xpose.msra.mxu0 %v3541_v48  ;;  %v3741_v12 = vpop.permute.xlu0 %3740 }
0x126b   : > { %10589 = vmatprep.subr.bf16.mxu0 %v12210_v1 }
0x126c   : > { %v3743_v52 = vpop.permute.xlu1 %3742 }
0x126d   : > { %v3758_v4 = vsel %vm1042_vm4, %v3743_v52, 0 }
0x126e   : > { %v3957_v37 = vpop.permute.xlu0 %3956 }
0x1270   : > { %v3747_v56 = vpop.permute.xlu1 %3746 }
0x1271   : > { %10560 = vmatmul.mubr.msk.bf16.vlgmr.msra.gmra.mrb[132].mxu0 %vm1042_vm4, %v3504_v41  ;;  %v3764_v60 = vsel %vm1042_vm4, %v3747_v56, 0  ;;  %v13691_v41 = vld [vmem:[%s12607_s4 + $0x50] sm:$0xff] }
0x1272   : > { %10590 = vmatpush3.bf16.xpose.msra.mxu0 %v3758_v4  ;;  %v3959_v29 = vpop.permute.xlu0 %3958  ;;  %10563 = vmatprep.mubr.msk.bf16.mxu0 %vm12211_vm1, %v12210_v1 }
0x1273   : > { %10591 = vmatprep.subr.bf16.mxu0 %v12210_v1 }
0x1274   : > { %v3963_v20 = vpop.permute.xlu1 %3962 }
0x1275   : > { %v3978_v14 = vsel %vm1042_vm4, %v3963_v20, 0 }
0x1276   : > { %v3961_v31 = vpop.permute.xlu0 %3960 }
0x1278   : > { %v3965_v38 = vpop.permute.xlu1 %3964 }
0x1279   : > { %10564 = vmatmul.mubr.msk.bf16.gmra.mrb[136].mxu0 %vm1042_vm4, %v3505_v33  ;;  %v3981_v15 = vsel %vm1042_vm4, %v3965_v38, 0 }
0x127a   : > { %10592 = vmatpush3.bf16.xpose.msra.mxu0 %v3761_v32  ;;  %v4177_v59 = vpop.permute.xlu0 %4176  ;;  %10567 = vmatprep.mubr.msk.bf16.mxu0 %vm12211_vm1, %v12210_v1 }
0x127b   : > { %10593 = vmatprep.subr.bf16.mxu0 %v12210_v1 }
0x127c   : > { %v3967_v58 = vpop.permute.xlu1 %3966 }
0x127d   : > { %v3984_v25 = vsel %vm1042_vm4, %v3967_v58, 0 }
0x127e   : > { %v4181_v10 = vpop.permute.xlu0 %4180 }
0x1280   : > { %v4183_v9 = vpop.permute.xlu1 %4182 }
0x1281   : > { %10568 = vmatmul.mubr.msk.bf16.gmra.mrb[140].mxu0 %vm1042_vm4, %v3506_v22  ;;  %v4198_v26 = vsel %vm1042_vm4, %v4183_v9, 0  ;;  %v13710_v22 = vld [vmem:[%s12607_s4 + $0x68] sm:$0xff]  ;;  %v13735_v9 = vld [vmem:[%s12607_s4 + $0x70] sm:$0xff] }
0x1282   : > { %10594 = vmatpush3.bf16.xpose.msra.mxu0 %v3764_v60  ;;  %v3658_v18 = vpop.permute.xlu0 %3657  ;;  %10595 = vmatprep.mubr.msk.bf16.mxu0 %vm12211_vm1, %v12210_v1 }
0x1283   : > { %10572 = vmatpush3.bf16.msra.mxu1 %v3658_v18  ;;  %10625 = vmatprep.subr.bf16.mxu0 %v12210_v1 }
0x1284   : > { %v4185_v42 = vpop.permute.xlu1 %4184  ;;  %10573 = vmatprep.subr.bf16.mxu1 %v12210_v1 }
0x1285   : > { %v4201_v23 = vsel %vm1042_vm4, %v4185_v42, 0 }
0x1286   : > { %v3662_v16 = vpop.permute.xlu0 %3661 }
0x1287   : > { %v3675_v36 = vsel %vm1193_vm5, %v3662_v16, 0 }
0x1288   : > { %v4187_v17 = vpop.permute.xlu1 %4186 }
0x1289   : > { %10596 = vmatmul.mubr.msk.bf16.vlgmr.msra.gmra.mrb[144].mxu0 %vm1042_vm4, %v3737_v43  ;;  %v4204_v49 = vsel %vm1042_vm4, %v4187_v17, 0 }
0x128a   : > { %10626 = vmatpush3.bf16.xpose.msra.mxu0 %v3978_v14  ;;  %10599 = vmatprep.mubr.msk.bf16.mxu0 %vm12211_vm1, %v12210_v1 }
0x128b   : > { %10627 = vmatprep.subr.bf16.mxu0 %v12210_v1 }
0x128c   : > { %v4179_v51 = vpop.permute.xlu1 %4178 }
0x1290   : > { %v3660_v30 = vpop.permute.xlu1 %3659 }
0x1291   : > { %10574 = vmatpush3.bf16.msra.mxu1 %v3660_v30  ;;  %10600 = vmatmul.mubr.msk.bf16.gmra.mrb[148].mxu0 %vm1042_vm4, %v3739_v2 }
0x1292   : > { %10628 = vmatpush3.bf16.xpose.msra.mxu0 %v3981_v15  ;;  %10575 = vmatprep.subr.bf16.mxu1 %v12210_v1 }
0x1293   : > { %10603 = vmatprep.mubr.msk.bf16.mxu0 %vm12211_vm1, %v12210_v1  ;;  %10629 = vmatprep.subr.bf16.mxu0 %v12210_v1 }
0x1295   : > { %10576 = vmatpush3.bf16.msra.mxu1 %v3675_v36 }
0x1296   : > { %10607 = vmatprep.subr.bf16.mxu1 %v12210_v1 }
0x1299   : > { %10604 = vmatmul.mubr.msk.bf16.gmra.mrb[152].mxu0 %vm1042_vm4, %v3741_v12 }
0x129a   : > { %10630 = vmatpush3.bf16.xpose.msra.mxu0 %v3984_v25  ;;  %10631 = vmatprep.mubr.msk.bf16.mxu0 %vm12211_vm1, %v12210_v1 }
0x129b   : > { %10661 = vmatprep.subr.bf16.mxu0 %v12210_v1 }
0x12a1   : > { %10632 = vmatmul.mubr.msk.bf16.vlgmr.msra.gmra.mrb[156].mxu0 %vm1042_vm4, %v3957_v37 }
0x12a2   : > { %10662 = vmatpush3.bf16.xpose.msra.mxu0 %v4198_v26  ;;  %10635 = vmatprep.mubr.msk.bf16.mxu0 %vm12211_vm1, %v12210_v1 }
0x12a3   : > { %10663 = vmatprep.subr.bf16.mxu0 %v12210_v1 }
0x12a9   : > { %10636 = vmatmul.mubr.msk.bf16.gmra.mrb[160].mxu0 %vm1042_vm4, %v3959_v29 }
0x12aa   : > { %10664 = vmatpush3.bf16.xpose.msra.mxu0 %v4201_v23  ;;  %10639 = vmatprep.mubr.msk.bf16.mxu0 %vm12211_vm1, %v12210_v1 }
0x12ab   : > { %10665 = vmatprep.subr.bf16.mxu0 %v12210_v1 }
0x12b1   : > { %10640 = vmatmul.mubr.msk.bf16.gmra.mrb[164].mxu0 %vm1042_vm4, %v3961_v31 }
0x12b2   : > { %10666 = vmatpush3.bf16.xpose.msra.mxu0 %v4204_v49  ;;  %10667 = vmatprep.mubr.msk.bf16.mxu0 %vm12211_vm1, %v12210_v1 }
0x12b3   : > { %10697 = vmatprep.subr.bf16.mxu0 %v12210_v1 }
0x12b9   : > { %10668 = vmatmul.mubr.msk.bf16.vlgmr.msra.gmra.mrb[168].mxu0 %vm1042_vm4, %v4177_v59 }
0x12ba   : > { %10671 = vmatprep.mubr.msk.bf16.mxu0 %vm12211_vm1, %v12210_v1 }
0x12c1   : > { %10672 = vmatmul.mubr.msk.bf16.gmra.mrb[172].mxu0 %vm1042_vm4, %v4179_v51 }
0x12c2   : > { %10675 = vmatprep.mubr.msk.bf16.mxu0 %vm12211_vm1, %v12210_v1 }
0x12c9   : > { %10676 = vmatmul.mubr.msk.bf16.gmra.mrb[176].mxu0 %vm1042_vm4, %v4181_v10 }
0x12ca   : > { %10701 = vmatprep.mubr.msk.bf16.mxu0 %vm12211_vm1, %v12210_v1 }
0x1344   : > { %v3577_v39 = vpop.f32.mrb[132].mxu0 }
0x1345   : > { %v13697_v45 = vadd.f32 %v13691_v41, %v3577_v39  ;;  %v10561_v7 = vpop.f32.mrb[133].mxu0 }
0x1346   : > { %v3580_v47 = vpop.f32.mrb[134].mxu0 }
0x1347   : > { %v13700_v34 = vadd.f32 %v13694_v55, %v3580_v47  ;;  %v10562_v33 = vpop.f32.mrb[135].mxu0  ;;  %v3599_v8 = vsel %vm1117_vm6, %v13697_v45, -inf }
0x1348   : > { %3600 = vmax.xlane.f32.xlu1 %v3599_v8 }
0x1349   : > { %v3602_v50 = vsel %vm1117_vm6, %v13700_v34, -inf }
0x134a   : > { %3603 = vmax.xlane.f32.xlu0 %v3602_v50 }
0x134c   : > { %v3585_v61 = vpop.f32.mrb[136].mxu0 }
0x134d   : > { %v13713_v63 = vadd.f32 %v13707_v19, %v3585_v61  ;;  %v10565_v28 = vpop.f32.mrb[137].mxu0 }
0x134e   : > { %v3588_v44 = vpop.f32.mrb[138].mxu0 }
0x134f   : > { %v13716_v5 = vadd.f32 %v13710_v22, %v3588_v44  ;;  %v10566_v35 = vpop.f32.mrb[139].mxu0  ;;  %v3605_v62 = vsel %vm1117_vm6, %v13713_v63, -inf }
0x1350   : > { %3606 = vmax.xlane.f32.xlu0 %v3605_v62 }
0x1351   : > { %v3608_v43 = vsel %vm1117_vm6, %v13716_v5, -inf }
0x1354   : > { %3609 = vmax.xlane.f32.xlu0 %v3608_v43  ;;  %v3593_v2 = vpop.f32.mrb[140].mxu0 }
0x1355   : > { %v10569_v40 = vpop.f32.mrb[141].mxu0  ;;  %v13746_v26 = vadd.f32 %v13735_v9, %v3593_v2 }
0x1356   : > { %v3596_v48 = vpop.f32.mrb[142].mxu0 }
0x1357   : > { %v10570_v12 = vpop.f32.mrb[143].mxu0  ;;  %v3611_v7 = vsel %vm1117_vm6, %v13746_v26, -inf }
0x1359   : > { %3880 = vrot.lane.b32.xlu1 %v13577_v21, %s16067_s2 }
0x135c   : > { %v3800_v52 = vpop.f32.mrb[144].mxu0 }
0x135d   : > { %v13725_v37 = vadd.f32 %v13691_v41, %v3800_v52  ;;  %v10597_v56 = vpop.f32.mrb[145].mxu0 }
0x135e   : > { %v3803_v4 = vpop.f32.mrb[146].mxu0 }
0x135f   : > { %v10598_v29 = vpop.f32.mrb[147].mxu0  ;;  %v3822_v20 = vsel %vm1117_vm6, %v13725_v37, -inf  ;;  %v13751_v49 = vadd.f32 %v13694_v55, %v3803_v4 }
0x1360   : > { %3823 = vmax.xlane.f32.xlu0 %v3822_v20 }
0x1361   : > { %v3825_v28 = vsel %vm1117_vm6, %v13751_v49, -inf }
0x1364   : > { %v3808_v31 = vpop.f32.mrb[148].mxu0 }
0x1365   : > { %v13730_v38 = vadd.f32 %v13707_v19, %v3808_v31  ;;  %v10601_v32 = vpop.f32.mrb[149].mxu0 }
0x1366   : > { %v3811_v59 = vpop.f32.mrb[150].mxu0 }
0x1367   : > { %v10602_v58 = vpop.f32.mrb[151].mxu0  ;;  %v3828_v10 = vsel %vm1117_vm6, %v13730_v38, -inf  ;;  %v13759_v61 = vadd.f32 %v13710_v22, %v3811_v59 }
0x1368   : > { %3829 = vmax.xlane.f32.xlu0 %v3828_v10 }
0x1369   : > { %v3831_v43 = vsel %vm1117_vm6, %v13759_v61, -inf }
0x136c   : > { %v3816_v60 = vpop.f32.mrb[152].mxu0 }
0x136d   : > { %v13738_v18 = vadd.f32 %v13735_v9, %v3816_v60  ;;  %v10605_v42 = vpop.f32.mrb[153].mxu0 }
0x136e   : > { %v3819_v17 = vpop.f32.mrb[154].mxu0 }
0x136f   : > { %v10606_v14 = vpop.f32.mrb[155].mxu0  ;;  %v3834_v51 = vsel %vm1117_vm6, %v13738_v18, -inf }
0x1370   : > { %3835 = vmax.xlane.f32.xlu0 %v3834_v51 }
0x1374   : > { %v4020_v30 = vpop.f32.mrb[156].mxu0 }
0x1375   : > { %v10633_v15 = vpop.f32.mrb[157].mxu0  ;;  %v13766_v35 = vadd.f32 %v13691_v41, %v4020_v30 }
0x1376   : > { %v4023_v16 = vpop.f32.mrb[158].mxu0 }
0x1377   : > { %v13743_v36 = vadd.f32 %v13694_v55, %v4023_v16  ;;  %v10634_v25 = vpop.f32.mrb[159].mxu0  ;;  %v4042_v52 = vsel %vm1117_vm6, %v13766_v35, -inf }
0x1379   : > { %v4045_v23 = vsel %vm1117_vm6, %v13743_v36, -inf }
0x137a   : > { %4046 = vmax.xlane.f32.xlu0 %v4045_v23 }
0x137c   : > { %v4028_v39 = vpop.f32.mrb[160].mxu0 }
0x137d   : > { %3612 = vmax.xlane.f32.xlu1 %v3611_v7  ;;  %v10637_v47 = vpop.f32.mrb[161].mxu0  ;;  %v13771_v12 = vadd.f32 %v13707_v19, %v4028_v39 }
0x137e   : > { %v4031_v33 = vpop.f32.mrb[162].mxu0  ;;  %v13807_v47 = vpop.permute.xlu0 %3882 }
0x137f   : > { %v13756_v8 = vadd.f32 %v13710_v22, %v4031_v33  ;;  %v10638_v50 = vpop.f32.mrb[163].mxu0  ;;  %v4048_v29 = vsel %vm1117_vm6, %v13771_v12, -inf }
0x1381   : > { %3826 = vmax.xlane.f32.xlu1 %v3825_v28  ;;  %v4051_v44 = vsel %vm1117_vm6, %v13756_v8, -inf }
0x1382   : > { %4052 = vmax.xlane.f32.xlu0 %v4051_v44  ;;  %v13809_v33 = vpop.permute.xlu0 %3884 }
0x1384   : > { %v4036_v62 = vpop.f32.mrb[164].mxu0 }
0x1385   : > { %3832 = vmax.xlane.f32.xlu1 %v3831_v43  ;;  %v10641_v2 = vpop.f32.mrb[165].mxu0  ;;  %v13776_v56 = vadd.f32 %v13735_v9, %v4036_v62 }
0x1386   : > { %v4039_v40 = vpop.f32.mrb[166].mxu0 }
0x1387   : > { %v10642_v48 = vpop.f32.mrb[167].mxu0  ;;  %v4054_v60 = vsel %vm1117_vm6, %v13776_v56, -inf }
0x1389   : > { %4043 = vmax.xlane.f32.xlu1 %v4042_v52 }
0x138c   : > { %v4240_v4 = vpop.f32.mrb[168].mxu0 }
0x138d   : > { %v13781_v20 = vadd.f32 %v13691_v41, %v4240_v4  ;;  %4049 = vmax.xlane.f32.xlu1 %v4048_v29  ;;  %v10669_v31 = vpop.f32.mrb[169].mxu0 }
0x138e   : > { %v4243_v32 = vpop.f32.mrb[170].mxu0 }
0x138f   : > { %v10670_v59 = vpop.f32.mrb[171].mxu0  ;;  %v4262_v58 = vsel %vm1117_vm6, %v13781_v20, -inf  ;;  %v13786_v10 = vadd.f32 %v13694_v55, %v4243_v32 }
0x1390   : > { %4263 = vmax.xlane.f32.xlu0 %v4262_v58 }
0x1391   : > { %4055 = vmax.xlane.f32.xlu1 %v4054_v60  ;;  %v4265_v41 = vsel %vm1117_vm6, %v13786_v10, -inf }
0x1394   : > { %v4248_v42 = vpop.f32.mrb[172].mxu0 }
0x1395   : > { %v13793_v17 = vadd.f32 %v13707_v19, %v4248_v42  ;;  %4266 = vmax.xlane.f32.xlu1 %v4265_v41  ;;  %v10673_v14 = vpop.f32.mrb[173].mxu0 }
0x1396   : > { %v4251_v51 = vpop.f32.mrb[174].mxu0 }
0x1397   : > { %v13796_v30 = vadd.f32 %v13710_v22, %v4251_v51  ;;  %v10674_v55 = vpop.f32.mrb[175].mxu0  ;;  %v4268_v15 = vsel %vm1117_vm6, %v13793_v17, -inf }
0x1398   : > { %4269 = vmax.xlane.f32.xlu0 %v4268_v15 }
0x1399   : > { %v4271_v16 = vsel %vm1117_vm6, %v13796_v30, -inf }
0x139a   : > { %4272 = vmax.xlane.f32.xlu1 %v4271_v16 }
0x139c   : > { %v4256_v25 = vpop.f32.mrb[176].mxu0 }
0x139d   : > { %v13803_v23 = vadd.f32 %v13735_v9, %v4256_v25  ;;  %v10677_v19 = vpop.f32.mrb[177].mxu0 }
0x139e   : > { %v4259_v39 = vpop.f32.mrb[178].mxu0 }
0x139f   : > { %v10678_v7 = vpop.f32.mrb[179].mxu0  ;;  %v4274_v22 = vsel %vm1117_vm6, %v13803_v23, -inf }
0x13a0   : > { %4275 = vmax.xlane.f32.xlu0 %v4274_v22 }
0x13d5   : > { %v3601_v50 = vpop.xlane.xlu1 %3600 }
0x13d6   : > { %v3614_v28 = vsub.f32 %v13697_v45, %v3601_v50 }
0x13d7   : > { %v3604_v44 = vpop.xlane.xlu0 %3603 }
0x13d8   : > { %v3619_v62 = vmul.f32 1.442695, %v3614_v28  ;;  %v3615_v43 = vsub.f32 %v13700_v34, %v3604_v44 }
0x13d9   : > { %v13835_v60 = vpop.permute.xlu1 %3880 }
0x13da   : > { %11787 = vpow2.f32 %v3619_v62  ;;  %v3621_v9 = vmul.f32 1.442695, %v3615_v43 }
0x13dc   : > { %11789 = vpow2.f32 %v3621_v9 }
0x13dd   : > { %v3607_v2 = vpop.xlane.xlu0 %3606 }
0x13de   : > { %v3616_v40 = vsub.f32 %v13713_v63, %v3607_v2 }
0x13e0   : > { %v3623_v48 = vmul.f32 1.442695, %v3616_v40 }
0x13e1   : > { %v3610_v52 = vpop.xlane.xlu0 %3609 }
0x13e2   : > { %11791 = vpow2.f32 %v3623_v48  ;;  %v3617_v4 = vsub.f32 %v13716_v5, %v3610_v52 }
0x13e4   : > { %v13815_v29 = vpop.eup %11787  ;;  %v3625_v31 = vmul.f32 1.442695, %v3617_v4 }
0x13e5   : > { %v3629_v45 = vsel %vm1117_vm6, %v13815_v29, 0.0 }
0x13e6   : > { %v13819_v32 = vpop.eup %11789  ;;  %11793 = vpow2.f32 %v3625_v31  ;;  %3630 = vadd.xlane.f32.xlu0 %v3629_v45 }
0x13e7   : > { %v3632_v34 = vsel %vm1117_vm6, %v13819_v32, 0.0 }
0x13e8   : > { %3633 = vadd.xlane.f32.xlu1 %v3632_v34 }
0x13ec   : > { %v13823_v63 = vpop.eup %11791 }
0x13ed   : > { %v3635_v59 = vsel %vm1117_vm6, %v13823_v63, 0.0  ;;  %v3824_v55 = vpop.xlane.xlu0 %3823 }
0x13ee   : > { %3636 = vadd.xlane.f32.xlu0 %v3635_v59  ;;  %v3837_v16 = vsub.f32 %v13725_v37, %v3824_v55 }
0x13f0   : > { %v13827_v5 = vpop.eup %11793  ;;  %v3842_v39 = vmul.f32 1.442695, %v3837_v16 }
0x13f1   : > { %v3638_v58 = vsel %vm1117_vm6, %v13827_v5, 0.0 }
0x13f2   : > { %3639 = vadd.xlane.f32.xlu1 %v3638_v58 }
0x13f5   : > { %v3830_v19 = vpop.xlane.xlu0 %3829 }
0x13f6   : > { %v3839_v7 = vsub.f32 %v13730_v38, %v3830_v19 }
0x13f8   : > { %v3846_v50 = vmul.f32 1.442695, %v3839_v7 }
0x13fd   : > { %v3836_v44 = vpop.xlane.xlu0 %3835 }
0x1403   : > { %4100 = vrot.lane.b32.xlu1 %v13577_v21, %s16068_s25 }
0x1404   : > { %4102 = vrot.lane.b32.xlu0 %v13581_v0, %s16068_s25 }
0x1407   : > { %v4047_v43 = vpop.xlane.xlu0 %4046 }
0x1408   : > { %4104 = vrot.lane.b32.xlu0 %v13589_v53, %s16068_s25  ;;  %v4058_v38 = vsub.f32 %v13743_v36, %v4047_v43 }
0x140a   : > { %v3613_v42 = vpop.xlane.xlu1 %3612 }
0x140b   : > { %v3618_v14 = vsub.f32 %v13746_v26, %v3613_v42 }
0x140d   : > { %v3627_v15 = vmul.f32 1.442695, %v3618_v14 }
0x140e   : > { %v3827_v41 = vpop.xlane.xlu1 %3826 }
0x140f   : > { %v3838_v51 = vsub.f32 %v13751_v49, %v3827_v41  ;;  %11795 = vpow2.f32 %v3627_v15  ;;  %v3841_v49 = vsub.f32 %v13738_v18, %v3836_v44  ;;  %v4064_v18 = vmul.f32 1.442695, %v4058_v38  ;;  %v4053_v31 = vpop.xlane.xlu0 %4052 }
0x1410   : > { %v4060_v59 = vsub.f32 %v13756_v8, %v4053_v31 }
0x1411   : > { %v3844_v25 = vmul.f32 1.442695, %v3838_v51  ;;  %v3850_v2 = vmul.f32 1.442695, %v3841_v49 }
0x1412   : > { %v3833_v22 = vpop.xlane.xlu1 %3832  ;;  %v4068_v14 = vmul.f32 1.442695, %v4060_v59 }
0x1413   : > { %11797 = vpow2.f32 %v3844_v25  ;;  %v3840_v28 = vsub.f32 %v13759_v61, %v3833_v22 }
0x1414   : > { %11799 = vpow2.f32 %v3842_v39 }
0x1415   : > { %11801 = vpow2.f32 %v3846_v50  ;;  %v3848_v62 = vmul.f32 1.442695, %v3840_v28 }
0x1416   : > { %v13844_v26 = vpop.xlane.xlu1 %4043 }
0x1417   : > { %11803 = vpow2.f32 %v3848_v62 }
0x1418   : > { %11805 = vpow2.f32 %v3850_v2 }
0x1419   : > { %v13847_v37 = vpop.eup %11795  ;;  %11807 = vpow2.f32 %v4064_v18 }
0x141a   : > { %v4050_v40 = vpop.xlane.xlu1 %4049  ;;  %v3641_v61 = vsel %vm1117_vm6, %v13847_v37, 0.0 }
0x141b   : > { %v4059_v4 = vsub.f32 %v13771_v12, %v4050_v40 }
0x141d   : > { %v13849_v9 = vpop.eup %11797  ;;  %v4066_v58 = vmul.f32 1.442695, %v4059_v4  ;;  %v4264_v51 = vpop.xlane.xlu0 %4263 }
0x141e   : > { %v3855_v48 = vsel %vm1117_vm6, %v13849_v9, 0.0  ;;  %v13856_v52 = vpop.eup %11799  ;;  %v4056_v34 = vpop.xlane.xlu1 %4055 }
0x141f   : > { %v3852_v36 = vsel %vm1117_vm6, %v13856_v52, 0.0  ;;  %v13861_v45 = vpop.eup %11801  ;;  %11809 = vpow2.f32 %v4066_v58  ;;  %v4061_v12 = vsub.f32 %v13776_v56, %v4056_v34 }
0x1420   : > { %v3858_v42 = vsel %vm1117_vm6, %v13861_v45, 0.0  ;;  %11811 = vpow2.f32 %v4068_v14 }
0x1421   : > { %v13866_v41 = vpop.eup %11803  ;;  %v4070_v8 = vmul.f32 1.442695, %v4061_v12 }
0x1422   : > { %v4267_v55 = vpop.xlane.xlu1 %4266  ;;  %v3861_v15 = vsel %vm1117_vm6, %v13866_v41, 0.0  ;;  %v13871_v16 = vpop.eup %11805 }
0x1423   : > { %v4278_v25 = vsub.f32 %v13786_v10, %v4267_v55  ;;  %v3864_v39 = vsel %vm1117_vm6, %v13871_v16, 0.0  ;;  %v13876_v7 = vpop.eup %11807  ;;  %11813 = vpow2.f32 %v4070_v8 }
0x1424   : > { %v4075_v28 = vsel %vm1117_vm6, %v13876_v7, 0.0 }
0x1425   : > { %v4270_v19 = vpop.xlane.xlu0 %4269  ;;  %v4284_v56 = vmul.f32 1.442695, %v4278_v25 }
0x1426   : > { %v4279_v22 = vsub.f32 %v13793_v17, %v4270_v19 }
0x1427   : > { %3642 = vadd.xlane.f32.xlu1 %v3641_v61  ;;  %3856 = vadd.xlane.f32.xlu0 %v3855_v48  ;;  %v4273_v50 = vpop.xlane.xlu1 %4272  ;;  %11815 = vpow2.f32 %v4284_v56  ;;  %v4277_v48 = vsub.f32 %v13781_v20, %v4264_v51 }
0x1428   : > { %v4286_v10 = vmul.f32 1.442695, %v4279_v22  ;;  %v4280_v49 = vsub.f32 %v13796_v30, %v4273_v50  ;;  %v4057_v30 = vsub.f32 %v13766_v35, %v13844_v26  ;;  %v3898_v22 = vsel %vm1193_vm5, %v13809_v33, 0 }
0x1429   : > { %v13881_v44 = vpop.eup %11809  ;;  %v4282_v31 = vmul.f32 1.442695, %v4277_v48 }
0x142a   : > { %v4078_v62 = vsel %vm1117_vm6, %v13881_v44, 0.0  ;;  %v13888_v43 = vpop.eup %11811  ;;  %11817 = vpow2.f32 %v4286_v10  ;;  %v4288_v17 = vmul.f32 1.442695, %v4280_v49  ;;  %v4062_v61 = vmul.f32 1.442695, %v4057_v30 }
0x142b   : > { %3853 = vadd.xlane.f32.xlu1 %v3852_v36  ;;  %v4081_v2 = vsel %vm1117_vm6, %v13888_v43, 0.0 }
0x142c   : > { %11819 = vpow2.f32 %v4288_v17 }
0x142d   : > { %v13892_v38 = vpop.eup %11813  ;;  %11821 = vpow2.f32 %v4062_v61 }
0x142e   : > { %11823 = vpow2.f32 %v4282_v31 }
0x142f   : > { %3859 = vadd.xlane.f32.xlu1 %v3858_v42  ;;  %v4276_v42 = vpop.xlane.xlu0 %4275 }
0x1431   : > { %v13898_v40 = vpop.eup %11815 }
0x1432   : > { %v4295_v18 = vsel %vm1117_vm6, %v13898_v40, 0.0 }
0x1433   : > { %3862 = vadd.xlane.f32.xlu1 %v3861_v15  ;;  %v4281_v15 = vsub.f32 %v13803_v23, %v4276_v42 }
0x1434   : > { %v13903_v4 = vpop.eup %11817 }
0x1435   : > { %v4298_v35 = vsel %vm1117_vm6, %v13903_v4, 0.0 }
0x1436   : > { %v13907_v26 = vpop.eup %11819 }
0x1437   : > { %3865 = vadd.xlane.f32.xlu1 %v3864_v39  ;;  %v4301_v36 = vsel %vm1117_vm6, %v13907_v26, 0.0  ;;  %v13911_v20 = vpop.eup %11821  ;;  %v4290_v39 = vmul.f32 1.442695, %v4281_v15 }
0x1438   : > { %v4072_v34 = vsel %vm1117_vm6, %v13911_v20, 0.0  ;;  %v13915_v59 = vpop.eup %11823 }
0x1439   : > { %v4292_v58 = vsel %vm1117_vm6, %v13915_v59, 0.0 }
0x143b   : > { %4076 = vadd.xlane.f32.xlu1 %v4075_v28 }
0x143d   : > { %4320 = vrot.lane.b32.xlu0 %v13577_v21, %s16069_s30  ;;  %v4084_v21 = vsel %vm1117_vm6, %v13892_v38, 0.0 }
0x143f   : > { %4079 = vadd.xlane.f32.xlu1 %v4078_v62 }
0x1443   : > { %4082 = vadd.xlane.f32.xlu1 %v4081_v2 }
0x1447   : > { %4085 = vadd.xlane.f32.xlu1 %v4084_v21 }
0x144b   : > { %4296 = vadd.xlane.f32.xlu1 %v4295_v18 }
0x144f   : > { %4299 = vadd.xlane.f32.xlu1 %v4298_v35 }
0x1453   : > { %4302 = vadd.xlane.f32.xlu1 %v4301_v36 }
0x145c   : > { %4073 = vadd.xlane.f32.xlu0 %v4072_v34 }
0x1460   : > { %4293 = vadd.xlane.f32.xlu0 %v4292_v58 }
0x1464   : > { %4322 = vrot.lane.b32.xlu1 %v13581_v0, %s16069_s30 }
0x1473   : > { %v3631_v14 = vpop.xlane.xlu0 %3630 }
0x1474   : > { %11825 = vrcp.f32 %v3631_v14 }
0x1475   : > { %v3634_v12 = vpop.xlane.xlu1 %3633 }
0x1476   : > { %11827 = vrcp.f32 %v3634_v12  ;;  %4324 = vrot.lane.b32.xlu0 %v13589_v53, %s16069_s30 }
0x147b   : > { %v3637_v51 = vpop.xlane.xlu0 %3636 }
0x147c   : > { %11829 = vrcp.f32 %v3637_v51 }
0x147e   : > { %v11826_v55 = vpop.eup %11825 }
0x147f   : > { %v3640_v8 = vpop.xlane.xlu1 %3639  ;;  %v3649_v19 = vmul.f32 %v11826_v55, %v13815_v29 }
0x1480   : > { %v11828_v25 = vpop.eup %11827  ;;  %11831 = vrcp.f32 %v3640_v8 }
0x1481   : > { %v3650_v0 = vmul.f32 %v11828_v25, %v13819_v32  ;;  %11833 = vpow2.f32 %v4290_v39 }
0x1483   : > { %v3654_v56 = vpack.c.bf16 %v3650_v0, %v3649_v19 }
0x1485   : > { %10578 = vmatmul.mubr.msk.bf16.vlgmr.msra.gmra.mrb[136].mxu1 %vm1117_vm6, %v3654_v56 }
0x1486   : > { %10608 = vmatpush3.bf16.msra.mxu1 %v13835_v60  ;;  %10581 = vmatprep.mubr.msk.bf16.mxu1 %vm12211_vm1, %v12210_v1  ;;  %v11830_v53 = vpop.eup %11829 }
0x1487   : > { %10609 = vmatprep.subr.bf16.mxu1 %v12210_v1  ;;  %v3651_v29 = vmul.f32 %v11830_v53, %v13823_v63  ;;  %v4103_v63 = vpop.permute.xlu0 %4102 }
0x148a   : > { %v11832_v23 = vpop.eup %11831  ;;  %10610 = vmatpush3.bf16.msra.mxu1 %v13807_v47 }
0x148b   : > { %10611 = vmatprep.subr.bf16.mxu1 %v12210_v1  ;;  %v3652_v32 = vmul.f32 %v11832_v23, %v13827_v5  ;;  %v13941_v50 = vpop.eup %11833  ;;  %v4101_v5 = vpop.permute.xlu1 %4100 }
0x148c   : > { %v4304_v47 = vsel %vm1117_vm6, %v13941_v50, 0.0  ;;  %v4105_v28 = vpop.permute.xlu0 %4104 }
0x148d   : > { %v3655_v60 = vpack.c.bf16 %v3652_v32, %v3651_v29  ;;  %v4118_v12 = vsel %vm1193_vm5, %v4105_v28, 0 }
0x148e   : > { %10612 = vmatpush3.bf16.msra.mxu1 %v3898_v22 }
0x148f   : > { %10582 = vmatmul.mubr.msk.bf16.gmra.mrb[140].mxu1 %vm1117_vm6, %v3655_v60  ;;  %10643 = vmatprep.subr.bf16.mxu1 %v12210_v1 }
0x1490   : > { %10585 = vmatprep.mubr.msk.bf16.mxu1 %vm12211_vm1, %v12210_v1 }
0x1495   : > { %4305 = vadd.xlane.f32.xlu0 %v4304_v47 }
0x14b4   : > { %v3643_v10 = vpop.xlane.xlu1 %3642  ;;  %v3857_v33 = vpop.xlane.xlu0 %3856 }
0x14b5   : > { %11835 = vrcp.f32 %v3643_v10 }
0x14b8   : > { %v3854_v49 = vpop.xlane.xlu1 %3853  ;;  %v4321_v15 = vpop.permute.xlu0 %4320 }
0x14b9   : > { %11837 = vrcp.f32 %v3854_v49 }
0x14ba   : > { %11839 = vrcp.f32 %v3857_v33 }
0x14bc   : > { %v3860_v62 = vpop.xlane.xlu1 %3859 }
0x14bf   : > { %v11836_v17 = vpop.eup %11835 }
0x14c0   : > { %v3863_v2 = vpop.xlane.xlu1 %3862  ;;  %v3653_v30 = vmul.f32 %v11836_v17, %v13847_v37 }
0x14c1   : > { %11841 = vrcp.f32 %v3863_v2 }
0x14c2   : > { %v3656_v21 = vpack.c.bf16 %v3653_v30, %v3653_v30  ;;  %11843 = vrcp.f32 %v3860_v62 }
0x14c3   : > { %v11838_v61 = vpop.eup %11837 }
0x14c4   : > { %10586 = vmatmul.mubr.msk.bf16.gmra.mrb[144].mxu1 %vm1117_vm6, %v3656_v21  ;;  %v11840_v48 = vpop.eup %11839  ;;  %v3872_v18 = vmul.f32 %v11838_v61, %v13856_v52  ;;  %v3866_v31 = vpop.xlane.xlu1 %3865 }
0x14c5   : > { %10613 = vmatprep.mubr.msk.bf16.mxu1 %vm12211_vm1, %v12210_v1  ;;  %v3873_v35 = vmul.f32 %v11840_v48, %v13849_v9  ;;  %11845 = vrcp.f32 %v3866_v31 }
0x14c7   : > { %v3877_v36 = vpack.c.bf16 %v3873_v35, %v3872_v18 }
0x14c8   : > { %v4077_v14 = vpop.xlane.xlu1 %4076 }
0x14c9   : > { %11847 = vrcp.f32 %v4077_v14 }
0x14cb   : > { %v11842_v34 = vpop.eup %11841 }
0x14cc   : > { %10614 = vmatmul.mubr.msk.bf16.vlgmr.msra.gmra.mrb[148].mxu1 %vm1117_vm6, %v3877_v36  ;;  %v11844_v37 = vpop.eup %11843  ;;  %v3875_v58 = vmul.f32 %v11842_v34, %v13866_v41  ;;  %v4080_v41 = vpop.xlane.xlu1 %4079 }
0x14cd   : > { %10644 = vmatpush3.bf16.msra.mxu1 %v4101_v5  ;;  %10617 = vmatprep.mubr.msk.bf16.mxu1 %vm12211_vm1, %v12210_v1  ;;  %v3874_v42 = vmul.f32 %v11844_v37, %v13861_v45 }
0x14ce   : > { %10645 = vmatprep.subr.bf16.mxu1 %v12210_v1 }
0x14cf   : > { %v3878_v9 = vpack.c.bf16 %v3875_v58, %v3874_v42  ;;  %v11846_v52 = vpop.eup %11845 }
0x14d0   : > { %v3876_v51 = vmul.f32 %v11846_v52, %v13871_v16  ;;  %v4083_v55 = vpop.xlane.xlu1 %4082 }
0x14d1   : > { %10646 = vmatpush3.bf16.msra.mxu1 %v4103_v63 }
0x14d2   : > { %10647 = vmatprep.subr.bf16.mxu1 %v12210_v1  ;;  %v3879_v45 = vpack.c.bf16 %v3876_v51, %v3876_v51 }
0x14d3   : > { %v11848_v16 = vpop.eup %11847 }
0x14d4   : > { %10618 = vmatmul.mubr.msk.bf16.gmra.mrb[152].mxu1 %vm1117_vm6, %v3878_v9  ;;  %v4086_v8 = vpop.xlane.xlu1 %4085  ;;  %v4093_v56 = vmul.f32 %v11848_v16, %v13876_v7 }
0x14d5   : > { %10648 = vmatpush3.bf16.msra.mxu1 %v4118_v12  ;;  %10621 = vmatprep.mubr.msk.bf16.mxu1 %vm12211_vm1, %v12210_v1 }
0x14d6   : > { %10679 = vmatprep.subr.bf16.mxu1 %v12210_v1 }
0x14d8   : > { %v4297_v19 = vpop.xlane.xlu1 %4296 }
0x14dc   : > { %10622 = vmatmul.mubr.msk.bf16.gmra.mrb[156].mxu1 %vm1117_vm6, %v3879_v45  ;;  %v4300_v0 = vpop.xlane.xlu1 %4299 }
0x14dd   : > { %10649 = vmatprep.mubr.msk.bf16.mxu1 %vm12211_vm1, %v12210_v1 }
0x14e0   : > { %v4303_v23 = vpop.xlane.xlu1 %4302 }
0x14e4   : > { %v4323_v63 = vpop.permute.xlu1 %4322 }
0x14e9   : > { %v4074_v25 = vpop.xlane.xlu0 %4073 }
0x14ea   : > { %11849 = vrcp.f32 %v4074_v25 }
0x14eb   : > { %11851 = vrcp.f32 %v4083_v55 }
0x14ec   : > { %11853 = vrcp.f32 %v4080_v41 }
0x14ed   : > { %11855 = vrcp.f32 %v4086_v8  ;;  %v4294_v22 = vpop.xlane.xlu0 %4293 }
0x14ee   : > { %11857 = vrcp.f32 %v4294_v22 }
0x14ef   : > { %11859 = vrcp.f32 %v4297_v19 }
0x14f0   : > { %11861 = vrcp.f32 %v4303_v23  ;;  %v11545_v23 = vld [vmem:[%s15994_s9 + $0x20] sm:$0xff]  }
0x14f1   : > { %11863 = vrcp.f32 %v4300_v0  ;;  %10698 = vmatpush3.bf16.msra.mxu0 %v11545_v23 }
0x14f2   : > { %10699 = vmatprep.subr.bf16.mxu0 %v12210_v1 }
0x14f4   : > { %v11850_v39 = vpop.eup %11849 }
0x14f5   : > { %v4092_v53 = vmul.f32 %v11850_v39, %v13911_v20  ;;  %v11852_v32 = vpop.eup %11851  ;;  %v4325_v20 = vpop.permute.xlu0 %4324 }
0x14f6   : > { %v11854_v60 = vpop.eup %11853  ;;  %v4095_v47 = vmul.f32 %v11852_v32, %v13888_v43  ;;  %v4338_v10 = vsel %vm1193_vm5, %v4325_v20, 0 }
0x14f7   : > { %v4097_v29 = vpack.c.bf16 %v4093_v56, %v4092_v53  ;;  %v4094_v7 = vmul.f32 %v11854_v60, %v13881_v44  ;;  %v11856_v28 = vpop.eup %11855 }
0x14f8   : > { %v4096_v43 = vmul.f32 %v11856_v28, %v13892_v38  ;;  %v11858_v33 = vpop.eup %11857 }
0x14f9   : > { %10650 = vmatmul.mubr.msk.bf16.vlgmr.msra.gmra.mrb[160].mxu1 %vm1117_vm6, %v4097_v29  ;;  %v4098_v5 = vpack.c.bf16 %v4095_v47, %v4094_v7  ;;  %v11860_v49 = vpop.eup %11859  ;;  %v4312_v62 = vmul.f32 %v11858_v33, %v13915_v59  ;;  %v11546_v29 = vld [vmem:[%s15994_s9 + $0x28] sm:$0xff]  }
0x14fa   : > { %10680 = vmatpush3.bf16.msra.mxu1 %v4321_v15  ;;  %10653 = vmatprep.mubr.msk.bf16.mxu1 %vm12211_vm1, %v12210_v1  ;;  %v4099_v44 = vpack.c.bf16 %v4096_v43, %v4096_v43  ;;  %v4313_v17 = vmul.f32 %v11860_v49, %v13898_v40  ;;  %v11862_v30 = vpop.eup %11861 }
0x14fb   : > { %10681 = vmatprep.subr.bf16.mxu1 %v12210_v1  ;;  %v11864_v21 = vpop.eup %11863  ;;  %v4315_v38 = vmul.f32 %v11862_v30, %v13907_v26  ;;  %10700 = vmatpush3.bf16.msra.mxu0 %v11546_v29 }
0x14fc   : > { %v4317_v2 = vpack.c.bf16 %v4313_v17, %v4312_v62  ;;  %v4314_v61 = vmul.f32 %v11864_v21, %v13903_v4  ;;  %10713 = vmatprep.subr.bf16.mxu0 %v12210_v1 }
0x14fe   : > { %10682 = vmatpush3.bf16.msra.mxu1 %v4323_v63  ;;  %v4318_v48 = vpack.c.bf16 %v4315_v38, %v4314_v61 }
0x14ff   : > { %10683 = vmatprep.subr.bf16.mxu1 %v12210_v1 }
0x1501   : > { %10654 = vmatmul.mubr.msk.bf16.gmra.mrb[164].mxu1 %vm1117_vm6, %v4098_v5 }
0x1502   : > { %10684 = vmatpush3.bf16.msra.mxu1 %v4338_v10  ;;  %10657 = vmatprep.mubr.msk.bf16.mxu1 %vm12211_vm1, %v12210_v1 }
0x1509   : > { %10658 = vmatmul.mubr.msk.bf16.gmra.mrb[168].mxu1 %vm1117_vm6, %v4099_v44 }
0x150a   : > { %10685 = vmatprep.mubr.msk.bf16.mxu1 %vm12211_vm1, %v12210_v1 }
0x1511   : > { %10686 = vmatmul.mubr.msk.bf16.vlgmr.msra.gmra.mrb[172].mxu1 %vm1117_vm6, %v4317_v2 }
0x1512   : > { %10689 = vmatprep.mubr.msk.bf16.mxu1 %vm12211_vm1, %v12210_v1 }
0x1519   : > { %10690 = vmatmul.mubr.msk.bf16.gmra.mrb[176].mxu1 %vm1117_vm6, %v4318_v48 }
0x151a   : > { %10693 = vmatprep.mubr.msk.bf16.mxu1 %vm12211_vm1, %v12210_v1 }
0x1522   : > { %v4306_v59 = vpop.xlane.xlu0 %4305 }
0x1523   : > { %11865 = vrcp.f32 %v4306_v59 }
0x152d   : > { %v11866_v40 = vpop.eup %11865 }
0x152e   : > { %v4316_v18 = vmul.f32 %v11866_v40, %v13941_v50 }
0x1530   : > { %v4319_v31 = vpack.c.bf16 %v4316_v18, %v4316_v18 }
0x1532   : > { %10694 = vmatmul.mubr.msk.bf16.gmra.mrb[180].mxu1 %vm1117_vm6, %v4319_v31 }
0x1533   : > { %4733 = vmatprep.mubr.bf16.mxu1 %v12212_v6 }
0x1558   : > { %v13997_v35 = vpop.f32.mrb[136].mxu1 }
0x1559   : > { %v10579_v26 = vpop.f32.mrb[137].mxu1 }
0x155a   : > { %v13999_v4 = vpop.f32.mrb[138].mxu1 }
0x155b   : > { %v10580_v36 = vpop.f32.mrb[139].mxu1 }
0x1562   : > { %v14001_v34 = vpop.f32.mrb[140].mxu1 }
0x1563   : > { %v10583_v37 = vpop.f32.mrb[141].mxu1 }
0x1564   : > { %v14003_v58 = vpop.f32.mrb[142].mxu1 }
0x1565   : > { %v10584_v42 = vpop.f32.mrb[143].mxu1 }
0x1597   : > { %v14005_v9 = vpop.f32.mrb[144].mxu1 }
0x1598   : > { %v10587_v50 = vpop.f32.mrb[145].mxu1 }
0x1599   : > { %v3730_v52 = vpop.f32.mrb[146].mxu1 }
0x159a   : > { %v10588_v14 = vpop.f32.mrb[147].mxu1 }
0x159f   : > { %v3934_v12 = vpop.f32.mrb[148].mxu1 }
0x15a0   : > { %v10615_v51 = vpop.f32.mrb[149].mxu1 }
0x15a1   : > { %v3937_v41 = vpop.f32.mrb[150].mxu1 }
0x15a2   : > { %v11409_v45 = vpack.i.bf16 %v3937_v41, %v3934_v12  ;;  %v10616_v55 = vpop.f32.mrb[151].mxu1 }
0x15a4   : > { %11410 = vrot.lane.b32.xlu1 %v11409_v45, %s16070_s0 }
0x15a7   : > { %v3942_v15 = vpop.f32.mrb[152].mxu1 }
0x15a8   : > { %v10619_v8 = vpop.f32.mrb[153].mxu1 }
0x15a9   : > { %v3945_v25 = vpop.f32.mrb[154].mxu1 }
0x15aa   : > { %v11424_v19 = vpack.i.bf16 %v3945_v25, %v3942_v15  ;;  %v10620_v0 = vpop.f32.mrb[155].mxu1 }
0x15af   : > { %v3950_v16 = vpop.f32.mrb[156].mxu1 }
0x15b0   : > { %v10623_v39 = vpop.f32.mrb[157].mxu1 }
0x15b1   : > { %v3953_v56 = vpop.f32.mrb[158].mxu1 }
0x15b2   : > { %v10624_v53 = vpop.f32.mrb[159].mxu1 }
0x15cc   : > { %v4154_v32 = vpop.f32.mrb[160].mxu1 }
0x15cd   : > { %v10651_v22 = vpop.f32.mrb[161].mxu1 }
0x15ce   : > { %v4157_v60 = vpop.f32.mrb[162].mxu1 }
0x15cf   : > { %v11414_v47 = vpack.i.bf16 %v4157_v60, %v4154_v32  ;;  %v10652_v63 = vpop.f32.mrb[163].mxu1 }
0x15d1   : > { %11415 = vrot.lane.b32.xlu1 %v11414_v47, %s16071_s27 }
0x15d4   : > { %v4162_v7 = vpop.f32.mrb[164].mxu1 }
0x15d5   : > { %v10655_v20 = vpop.f32.mrb[165].mxu1 }
0x15d6   : > { %v4165_v5 = vpop.f32.mrb[166].mxu1 }
0x15d7   : > { %v11429_v28 = vpack.i.bf16 %v4165_v5, %v4162_v7  ;;  %v10656_v10 = vpop.f32.mrb[167].mxu1 }
0x15dc   : > { %v4170_v43 = vpop.f32.mrb[168].mxu1 }
0x15dd   : > { %v10659_v44 = vpop.f32.mrb[169].mxu1 }
0x15de   : > { %v4173_v33 = vpop.f32.mrb[170].mxu1 }
0x15df   : > { %v10660_v49 = vpop.f32.mrb[171].mxu1 }
0x15e4   : > { %v4374_v62 = vpop.f32.mrb[172].mxu1 }
0x15e5   : > { %v10687_v17 = vpop.f32.mrb[173].mxu1 }
0x15e6   : > { %v4377_v2 = vpop.f32.mrb[174].mxu1 }
0x15e7   : > { %v11419_v30 = vpack.i.bf16 %v4377_v2, %v4374_v62  ;;  %v10688_v21 = vpop.f32.mrb[175].mxu1  ;;  %v9575_v62 = vld [vmem:[%s16064_s10 + $0x2] ss:$0 sm:$0xff]  ;;  %s16081_s10 = smov 32  }
0x15e9   : > { %11420 = vrot.lane.b32.xlu1 %v11419_v30, %s16072_s28 }
0x15ec   : > { %v4382_v38 = vpop.f32.mrb[176].mxu1 }
0x15ed   : > { %11425 = vrot.lane.b32.xlu1 %v11424_v19, %s16070_s0  ;;  %v10691_v61 = vpop.f32.mrb[177].mxu1 }
0x15ee   : > { %v4385_v48 = vpop.f32.mrb[178].mxu1 }
0x15ef   : > { %v11434_v59 = vpack.i.bf16 %v4385_v48, %v4382_v38  ;;  %v10692_v40 = vpop.f32.mrb[179].mxu1 }
0x15f1   : > { %11430 = vrot.lane.b32.xlu1 %v11429_v28, %s16071_s27  ;;  %11435 = vrot.lane.b32.xlu0 %v11434_v59, %s16072_s28 }
0x15f5   : > { %4409 = vrot.lane.b32.xlu1 %v3950_v16, %s16070_s0 }
0x15f9   : > { %4429 = vrot.lane.b32.xlu1 %v4170_v43, %s16071_s27 }
0x1605   : > { %v4390_v18 = vpop.f32.mrb[180].mxu1 }
0x1606   : > { %4449 = vrot.lane.b32.xlu1 %v4390_v18, %s16072_s28  ;;  %v10695_v31 = vpop.f32.mrb[181].mxu1 }
0x1607   : > { %v4393_v26 = vpop.f32.mrb[182].mxu1 }
0x1608   : > { %v10696_v36 = vpop.f32.mrb[183].mxu1 }
0x1616   : > { %v11411_v37 = vpop.permute.xlu1 %11410 }
0x1617   : > { %v11413_v50 = vunpack.i.h.bf16 %v11411_v37  ;;  %v11412_v52 = vunpack.i.l.bf16 %v11411_v37 }
0x1619   : > { %v4457_v41 = vsel %vm1042_vm4, %v13999_v4, %v11413_v50  ;;  %v4456_v45 = vsel %vm1042_vm4, %v13997_v35, %v11412_v52 }
0x1643   : > { %v11416_v42 = vpop.permute.xlu1 %11415 }
0x1644   : > { %v11418_v14 = vunpack.i.h.bf16 %v11416_v42  ;;  %v11417_v12 = vunpack.i.l.bf16 %v11416_v42 }
0x1646   : > { %v4462_v8 = vsel %vm1981_vm7, %v4457_v41, %v11418_v14  ;;  %v4461_v25 = vsel %vm1981_vm7, %v4456_v45, %v11417_v12 }
0x165b   : > { %v11421_v51 = vpop.permute.xlu1 %11420 }
0x165c   : > { %v11423_v55 = vunpack.i.h.bf16 %v11421_v51  ;;  %v11422_v15 = vunpack.i.l.bf16 %v11421_v51 }
0x165e   : > { %v4467_v19 = vsel %vm1987_vm8, %v4462_v8, %v11423_v55  ;;  %v4466_v0 = vsel %vm1987_vm8, %v4461_v25, %v11422_v15 }
0x165f   : > { %v4471_v16 = vpack.c.bf16 %v4467_v19, %v4466_v0  ;;  %v11426_v39 = vpop.permute.xlu1 %11425 }
0x1660   : > { %v11428_v56 = vunpack.i.h.bf16 %v11426_v39  ;;  %v11427_v53 = vunpack.i.l.bf16 %v11426_v39 }
0x1661   : > { %10702 = vmatmul.mubr.msk.bf16.vlgmr.msra.gmra.mrb[180].mxu0 %vm799_vm3, %v4471_v16 }
0x1662   : > { %10705 = vmatprep.mubr.msk.bf16.mxu0 %vm12211_vm1, %v12210_v1  ;;  %v4459_v60 = vsel %vm1042_vm4, %v14003_v58, %v11428_v56  ;;  %v4458_v47 = vsel %vm1042_vm4, %v14001_v34, %v11427_v53 }
0x1663   : > { %v11431_v35 = vpop.permute.xlu1 %11430  ;;  %v11436_v4 = vpop.permute.xlu0 %11435 }
0x1664   : > { %v11433_v23 = vunpack.i.h.bf16 %v11431_v35  ;;  %v11432_v29 = vunpack.i.l.bf16 %v11431_v35  ;;  %v11438_v32 = vunpack.i.h.bf16 %v11436_v4  ;;  %v11437_v22 = vunpack.i.l.bf16 %v11436_v4 }
0x1666   : > { %v4463_v63 = vsel %vm1981_vm7, %v4458_v47, %v11432_v29  ;;  %v4464_v7 = vsel %vm1981_vm7, %v4459_v60, %v11433_v23 }
0x1667   : > { %v4469_v20 = vsel %vm1987_vm8, %v4464_v7, %v11438_v32  ;;  %v4468_v5 = vsel %vm1987_vm8, %v4463_v63, %v11437_v22  ;;  %v4410_v10 = vpop.permute.xlu1 %4409 }
0x1668   : > { %v4472_v28 = vpack.c.bf16 %v4469_v20, %v4468_v5  ;;  %v4460_v58 = vsel %vm1042_vm4, %v14005_v9, %v4410_v10 }
0x166a   : > { %10706 = vmatmul.mubr.msk.bf16.gmra.mrb[184].mxu0 %vm799_vm3, %v4472_v28 }
0x166b   : > { %10709 = vmatprep.mubr.msk.bf16.mxu0 %vm12211_vm1, %v12210_v1  ;;  %v4430_v43 = vpop.permute.xlu1 %4429 }
0x166c   : > { %v4465_v34 = vsel %vm1981_vm7, %v4460_v58, %v4430_v43  ;;  %v11549_v43 = vld [vmem:[%s15997_s12 + $0x4] ss:$8 sps:$4 sm:$0xff]   ;;  %v11547_v58 = vld [vmem:[%s15997_s12] ss:$8 sps:$4 sm:$0xff]  }
0x166d   : > { %4701 = vmatprep.subr.bf16.mxu1 %v11549_v43  ;;  %v11563_v43 = vld [vmem:[%s15991_s6 + $0x24] ss:$8 sps:$4 sm:$0xff]  }
0x166e   : > { %4702 = vmatpush1.bf16.msra.mxu1 %v11547_v58  ;;  %v11566_v58 = vld [vmem:[%s15991_s6 + $0x34] ss:$8 sps:$4 sm:$0xff]  }
0x1678   : > { %v4450_v44 = vpop.permute.xlu1 %4449 }
0x1679   : > { %v4470_v33 = vsel %vm1987_vm8, %v4465_v34, %v4450_v44  ;;  %v11552_v34 = vld [vmem:[%s15997_s12 + $0x14] ss:$8 sps:$4 sm:$0xff]   ;;  %v11550_v44 = vld [vmem:[%s15997_s12 + $0x10] ss:$8 sps:$4 sm:$0xff]  }
0x167a   : > { %v4473_v49 = vpack.c.bf16 %v4470_v33, %v4470_v33  ;;  %4703 = vmatprep.subr.bf16.mxu1 %v11552_v34  ;;  %v11564_v34 = vld [vmem:[%s15991_s6 + $0x30] ss:$8 sps:$4 sm:$0xff]  }
0x167b   : > { %4704 = vmatpush1.bf16.msra.mxu1 %v11550_v44  ;;  %v4660_v44 = vld [vmem:[%s15998_s13] sm:$0x3] }
0x167c   : > { %10710 = vmatmul.mubr.msk.bf16.gmra.mrb[188].mxu0 %vm799_vm3, %v4473_v49  ;;  %4985 = vmatprep.subr.bf16.mxu1 %v11563_v43 }
0x167d   : > { %10729 = vmatprep.mubr.msk.bf16.mxu0 %vm12211_vm1, %v12210_v1 }
0x1734   : > { %v4542_v17 = vpop.f32.mrb[180].mxu0 }
0x1735   : > { %v4543_v2 = vadd.f32 %v9575_v62, %v4542_v17  ;;  %v10703_v30 = vpop.f32.mrb[181].mxu0 }
0x1736   : > { %v4545_v21 = vpop.f32.mrb[182].mxu0 }
0x1737   : > { %v14057_v9 = vadd.f32 %v4543_v2, %v13521_v13  ;;  %v4546_v38 = vadd.f32 %v9575_v62, %v4545_v21  ;;  %v10704_v61 = vpop.f32.mrb[183].mxu0 }
0x1738   : > { %v4569_v61 = vld [vmem:[%s16078_s11] sm:$0x3]  ;;  %s16083_s11 = sld [smem:[#allocation12_spill]] }
0x1739   : > { %v14060_v48 = vadd.f32 %v4546_v38, %v13524_v54  ;;  %v4570_v59 = vsel %vm799_vm3, %v14057_v9, 0.0 }
0x173a   : > { %4571 = vadd.xlane.f32.xlu1 %v4570_v59 }
0x173b   : > { %v4573_v40 = vsel %vm799_vm3, %v14060_v48, 0.0 }
0x173c   : > { %4574 = vadd.xlane.f32.xlu0 %v4573_v40 }
0x173d   : > { %v4550_v18 = vpop.f32.mrb[184].mxu0 }
0x173e   : > { %v4551_v31 = vadd.f32 %v9575_v62, %v4550_v18  ;;  %v10707_v26 = vpop.f32.mrb[185].mxu0  ;;  %v4638_v18 = vrot.slane %v4569_v61, %v12444_v24 }
0x173f   : > { %v4553_v36 = vpop.f32.mrb[186].mxu0 }
0x1740   : > { %v14067_v13 = vadd.f32 %v4551_v31, %v13531_v46  ;;  %v4554_v37 = vadd.f32 %v9575_v62, %v4553_v36  ;;  %v10708_v42 = vpop.f32.mrb[187].mxu0 }
0x1742   : > { %v14070_v54 = vadd.f32 %v4554_v37, %v13534_v3  ;;  %v4576_v50 = vsel %vm799_vm3, %v14067_v13, 0.0 }
0x1743   : > { %4577 = vadd.xlane.f32.xlu1 %v4576_v50  ;;  %v4647_v50 = vrot.slane %v4569_v61, %v12427_v57 }
0x1744   : > { %v4579_v52 = vsel %vm799_vm3, %v14070_v54, 0.0 }
0x1747   : > { %4580 = vadd.xlane.f32.xlu1 %v4579_v52 }
0x174f   : > { %v4558_v14 = vpop.f32.mrb[188].mxu0 }
0x1750   : > { %v4559_v12 = vadd.f32 %v9575_v62, %v4558_v14  ;;  %v10711_v51 = vpop.f32.mrb[189].mxu0 }
0x1751   : > { %v4561_v41 = vpop.f32.mrb[190].mxu0 }
0x1752   : > { %v14077_v46 = vadd.f32 %v4559_v12, %v13541_v27  ;;  %v10712_v45 = vpop.f32.mrb[191].mxu0 }
0x1754   : > { %v4582_v3 = vsel %vm799_vm3, %v14077_v46, 0.0 }
0x1755   : > { %4583 = vadd.xlane.f32.xlu0 %v4582_v3 }
0x17c7   : > { %v4572_v55 = vpop.xlane.xlu1 %4571 }
0x17c8   : > { %v4585_v15 = vmul.f32 0.03125, %v4572_v55 }
0x17c9   : > { %v4575_v8 = vpop.xlane.xlu0 %4574 }
0x17ca   : > { %v4590_v25 = vsub.f32 %v14057_v9, %v4585_v15  ;;  %v4586_v19 = vmul.f32 0.03125, %v4575_v8 }
0x17cc   : > { %v4591_v0 = vsub.f32 %v14060_v48, %v4586_v19  ;;  %v4595_v16 = vmul.f32 %v4590_v25, %v4590_v25 }
0x17ce   : > { %v4600_v39 = vsel %vm799_vm3, %v4595_v16, 0.0  ;;  %v4596_v56 = vmul.f32 %v4591_v0, %v4591_v0 }
0x17cf   : > { %4601 = vadd.xlane.f32.xlu1 %v4600_v39 }
0x17d0   : > { %v4578_v27 = vpop.xlane.xlu1 %4577  ;;  %v4603_v53 = vsel %vm799_vm3, %v4596_v56, 0.0 }
0x17d1   : > { %v4587_v35 = vmul.f32 0.03125, %v4578_v27  ;;  %4604 = vadd.xlane.f32.xlu0 %v4603_v53 }
0x17d3   : > { %v4592_v4 = vsub.f32 %v14067_v13, %v4587_v35 }
0x17d4   : > { %v4581_v23 = vpop.xlane.xlu1 %4580 }
0x17d5   : > { %v4588_v29 = vmul.f32 0.03125, %v4581_v23  ;;  %v4597_v32 = vmul.f32 %v4592_v4, %v4592_v4 }
0x17d7   : > { %v4593_v22 = vsub.f32 %v14070_v54, %v4588_v29  ;;  %v4606_v60 = vsel %vm799_vm3, %v4597_v32, 0.0 }
0x17d8   : > { %4607 = vadd.xlane.f32.xlu1 %v4606_v60  ;;  %v11554_v60 = vld [vmem:[%s15999_s14 + $0x8] sm:$0xff]  }
0x17d9   : > { %v4598_v47 = vmul.f32 %v4593_v22, %v4593_v22 }
0x17db   : > { %v4609_v63 = vsel %vm799_vm3, %v4598_v47, 0.0  ;;  %v11555_v47 = vld [vmem:[%s15999_s14 + $0x10] sm:$0xff]  }
0x17dc   : > { %4610 = vadd.xlane.f32.xlu0 %v4609_v63  ;;  %v11556_v63 = vld [vmem:[%s15999_s14 + $0x18] sm:$0xff]  }
0x17e2   : > { %v4584_v7 = vpop.xlane.xlu0 %4583 }
0x17e3   : > { %v4589_v20 = vmul.f32 0.03125, %v4584_v7  ;;  %v11557_v7 = vld [vmem:[%s15999_s14 + $0x20] sm:$0xff]  }
0x17e5   : > { %v4594_v5 = vsub.f32 %v14077_v46, %v4589_v20  ;;  %v11558_v20 = vld [vmem:[%s15999_s14 + $0x28] sm:$0xff]  }
0x17e7   : > { %v4599_v28 = vmul.f32 %v4594_v5, %v4594_v5 }
0x17e9   : > { %v4612_v10 = vsel %vm799_vm3, %v4599_v28, 0.0  ;;  %v11560_v28 = vld [vmem:[%s15999_s14 + $0x38] sm:$0xff]  }
0x17ea   : > { %4613 = vadd.xlane.f32.xlu1 %v4612_v10  ;;  %v11561_v10 = vld [vmem:[%s15991_s6 + $0x20] ss:$8 sps:$4 sm:$0xff]  }
0x185c   : > { %v4602_v33 = vpop.xlane.xlu1 %4601 }
0x185d   : > { %v4615_v49 = vmul.f32 0.03125, %v4602_v33  ;;  %v4669_v33 = vrot.slane %v4660_v44, %v12427_v57 }
0x185e   : > { %v4605_v62 = vpop.xlane.xlu0 %4604 }
0x185f   : > { %v4620_v17 = vadd.f32 1e-05, %v4615_v49  ;;  %v4616_v2 = vmul.f32 0.03125, %v4605_v62 }
0x1861   : > { %11867 = vrsqrt.f32 %v4620_v17  ;;  %v4621_v30 = vadd.f32 1e-05, %v4616_v2 }
0x1863   : > { %11869 = vrsqrt.f32 %v4621_v30 }
0x1865   : > { %v4608_v21 = vpop.xlane.xlu1 %4607 }
0x1866   : > { %v4617_v38 = vmul.f32 0.03125, %v4608_v21 }
0x1868   : > { %v4622_v59 = vadd.f32 1e-05, %v4617_v38 }
0x1869   : > { %v4611_v40 = vpop.xlane.xlu0 %4610 }
0x186a   : > { %11871 = vrsqrt.f32 %v4622_v59  ;;  %v4618_v31 = vmul.f32 0.03125, %v4611_v40 }
0x186b   : > { %v11868_v26 = vpop.eup %11867 }
0x186c   : > { %v4630_v36 = vmul.f32 %v11868_v26, %v4590_v25  ;;  %v4623_v37 = vadd.f32 1e-05, %v4618_v31 }
0x186d   : > { %v11870_v42 = vpop.eup %11869 }
0x186e   : > { %v4639_v52 = vmul.f32 %v4638_v18, %v4630_v36  ;;  %v4631_v14 = vmul.f32 %v11870_v42, %v4591_v0  ;;  %11873 = vrsqrt.f32 %v4623_v37 }
0x1870   : > { %v4640_v12 = vmul.f32 %v4638_v18, %v4631_v14  ;;  %v4648_v51 = vadd.f32 %v4647_v50, %v4639_v52 }
0x1872   : > { %v4649_v41 = vadd.f32 %v4647_v50, %v4640_v12 }
0x1874   : > { %v11872_v45 = vpop.eup %11871  ;;  %v4653_v3 = vpack.c.bf16 %v4649_v41, %v4648_v51 }
0x1875   : > { %v4632_v55 = vmul.f32 %v11872_v45, %v4592_v4 }
0x1876   : > { %9585 = vmatmul.mubr.msk.bf16.vlgmr.msra.gmra.mrb[184].mxu1 %vm799_vm3, %v4653_v3 }
0x1877   : > { %v4614_v15 = vpop.xlane.xlu1 %4613  ;;  %4743 = vmatprep.mubr.bf16.mxu1 %v12212_v6  ;;  %v4641_v16 = vmul.f32 %v4638_v18, %v4632_v55  ;;  %4986 = vmatpush1.bf16.msra.mxu1 %v11561_v10 }
0x1878   : > { %v11874_v8 = vpop.eup %11873  ;;  %v4619_v25 = vmul.f32 0.03125, %v4614_v15  ;;  %4987 = vmatprep.subr.bf16.mxu1 %v11566_v58 }
0x1879   : > { %v4633_v19 = vmul.f32 %v11874_v8, %v4593_v22  ;;  %v4650_v0 = vadd.f32 %v4647_v50, %v4641_v16  ;;  %v11553_v22 = vld [vmem:[%s15999_s14] sm:$0xff]  }
0x187a   : > { %v4624_v39 = vadd.f32 1e-05, %v4619_v25  ;;  %10714 = vmatpush3.bf16.msra.mxu0 %v11553_v22 }
0x187b   : > { %v4642_v56 = vmul.f32 %v4638_v18, %v4633_v19  ;;  %10715 = vmatprep.subr.bf16.mxu0 %v12210_v1  ;;  %4988 = vmatpush1.bf16.msra.mxu1 %v11564_v34 }
0x187c   : > { %11875 = vrsqrt.f32 %v4624_v39  ;;  %10741 = vmatprep.subr.bf16.mxu1 %v12210_v1 }
0x187d   : > { %v4651_v27 = vadd.f32 %v4647_v50, %v4642_v56 }
0x187e   : > { %10716 = vmatpush3.bf16.msra.mxu0 %v11554_v60 }
0x187f   : > { %v4654_v53 = vpack.c.bf16 %v4651_v27, %v4650_v0  ;;  %10717 = vmatprep.subr.bf16.mxu0 %v12210_v1  ;;  %v4665_v0 = vrot.slane %v4660_v44, %v12444_v24 }
0x1881   : > { %9586 = vmatmul.mubr.msk.bf16.gmra.mrb[188].mxu1 %vm799_vm3, %v4654_v53 }
0x1882   : > { %4753 = vmatprep.mubr.bf16.mxu1 %v12212_v6  ;;  %10718 = vmatpush3.bf16.msra.mxu0 %v11555_v47 }
0x1883   : > { %10719 = vmatprep.subr.bf16.mxu0 %v12210_v1 }
0x1886   : > { %v11876_v35 = vpop.eup %11875  ;;  %10720 = vmatpush3.bf16.msra.mxu0 %v11556_v63 }
0x1887   : > { %v4634_v4 = vmul.f32 %v11876_v35, %v4594_v5  ;;  %10721 = vmatprep.subr.bf16.mxu0 %v12210_v1  ;;  %v11559_v5 = vld [vmem:[%s15999_s14 + $0x30] sm:$0xff]  }
0x1889   : > { %v4643_v23 = vmul.f32 %v4638_v18, %v4634_v4 }
0x188a   : > { %10722 = vmatpush3.bf16.msra.mxu0 %v11557_v7 }
0x188b   : > { %v4652_v29 = vadd.f32 %v4647_v50, %v4643_v23  ;;  %10723 = vmatprep.subr.bf16.mxu0 %v12210_v1 }
0x188d   : > { %v4655_v32 = vpack.c.bf16 %v4652_v29, %v4652_v29 }
0x188e   : > { %10724 = vmatpush3.bf16.msra.mxu0 %v11558_v20 }
0x188f   : > { %9587 = vmatmul.mubr.msk.bf16.gmra.mrb[192].mxu1 %vm799_vm3, %v4655_v32  ;;  %10725 = vmatprep.subr.bf16.mxu0 %v12210_v1 }
0x1890   : > { %5017 = vmatprep.mubr.bf16.mxu1 %v12212_v6 }
0x1892   : > { %10726 = vmatpush3.bf16.msra.mxu0 %v11559_v5 }
0x1893   : > { %10727 = vmatprep.subr.bf16.mxu0 %v12210_v1 }
0x1896   : > { %10728 = vmatpush3.bf16.msra.mxu0 %v11560_v28 }
0x1897   : > { %10757 = vmatprep.subr.bf16.mxu0 %v12210_v1  ;;  %9606 = vmatmul.mubr.msk.bf16.vlgmr.msra.gmra.mrb[196].mxu1 %vm799_vm3, %v12373_v11 }
0x1898   : > { %10745 = vmatprep.mubr.msk.bf16.mxu1 %vm12211_vm1, %v12210_v1 }
0x1949   : > { %v4735_v49 = vpop.f32.mrb[184].mxu1 }
0x194a   : > { %v4737_v62 = vpop.f32.mrb[185].mxu1  ;;  %v4736_v63 = vadd.f32 %v4735_v49, %v4665_v0 }
0x194b   : > { %v4738_v17 = vadd.f32 %v4737_v62, %v4669_v33  ;;  %v4739_v2 = vpop.f32.mrb[186].mxu1 }
0x194c   : > { %v4741_v30 = vpop.f32.mrb[187].mxu1  ;;  %v4740_v10 = vadd.f32 %v4739_v2, %v4665_v0 }
0x194d   : > { %v4762_v21 = vmul.f32 %v4738_v17, %v4738_v17  ;;  %v4742_v38 = vadd.f32 %v4741_v30, %v4669_v33 }
0x194f   : > { %v4767_v61 = vmul.f32 %v4762_v21, %v4738_v17  ;;  %v4763_v59 = vmul.f32 %v4742_v38, %v4742_v38 }
0x1951   : > { %v4772_v40 = vmul.f32 0.044715, %v4767_v61  ;;  %v4768_v18 = vmul.f32 %v4763_v59, %v4742_v38 }
0x1953   : > { %v4777_v31 = vadd.f32 %v4772_v40, %v4738_v17  ;;  %v4773_v26 = vmul.f32 0.044715, %v4768_v18 }
0x1954   : > { %v4745_v36 = vpop.f32.mrb[188].mxu1 }
0x1955   : > { %v4782_v37 = vmul.f32 0.7978846, %v4777_v31  ;;  %v4778_v42 = vadd.f32 %v4773_v26, %v4742_v38  ;;  %v4747_v50 = vpop.f32.mrb[189].mxu1 }
0x1956   : > { %v4748_v52 = vadd.f32 %v4747_v50, %v4669_v33  ;;  %v4749_v14 = vpop.f32.mrb[190].mxu1 }
0x1957   : > { %11877 = vtanh.f32 %v4782_v37  ;;  %v4783_v12 = vmul.f32 0.7978846, %v4778_v42  ;;  %v4751_v51 = vpop.f32.mrb[191].mxu1 }
0x1958   : > { %v4764_v41 = vmul.f32 %v4748_v52, %v4748_v52  ;;  %v4752_v45 = vadd.f32 %v4751_v51, %v4669_v33 }
0x1959   : > { %11879 = vtanh.f32 %v4783_v12 }
0x195a   : > { %v4769_v3 = vmul.f32 %v4764_v41, %v4748_v52  ;;  %v4765_v55 = vmul.f32 %v4752_v45, %v4752_v45 }
0x195c   : > { %v4774_v15 = vmul.f32 0.044715, %v4769_v3  ;;  %v4770_v8 = vmul.f32 %v4765_v55, %v4752_v45 }
0x195e   : > { %v4779_v25 = vadd.f32 %v4774_v15, %v4748_v52  ;;  %v4775_v19 = vmul.f32 0.044715, %v4770_v8 }
0x1960   : > { %v4784_v16 = vmul.f32 0.7978846, %v4779_v25  ;;  %v4780_v39 = vadd.f32 %v4775_v19, %v4752_v45 }
0x1961   : > { %v11878_v56 = vpop.eup %11877 }
0x1962   : > { %v4792_v27 = vadd.f32 1.0, %v11878_v56  ;;  %11881 = vtanh.f32 %v4784_v16  ;;  %v4785_v53 = vmul.f32 0.7978846, %v4780_v39  ;;  %v4755_v35 = vpop.f32.mrb[192].mxu1 }
0x1963   : > { %v11880_v4 = vpop.eup %11879  ;;  %v4757_v23 = vpop.f32.mrb[193].mxu1  ;;  %v4756_v41 = vadd.f32 %v4755_v35, %v4665_v0 }
0x1964   : > { %v4797_v29 = vmul.f32 0.5, %v4792_v27  ;;  %v4793_v32 = vadd.f32 1.0, %v11880_v4  ;;  %11883 = vtanh.f32 %v4785_v53  ;;  %v4758_v22 = vadd.f32 %v4757_v23, %v4669_v33  ;;  %v4759_v60 = vpop.f32.mrb[194].mxu1 }
0x1965   : > { %v4760_v47 = vpop.f32.mrb[195].mxu1 }
0x1966   : > { %v4802_v7 = vmul.f32 %v4797_v29, %v4738_v17  ;;  %v4798_v20 = vmul.f32 0.5, %v4793_v32  ;;  %v4766_v5 = vmul.f32 %v4758_v22, %v4758_v22  ;;  %v4746_v17 = vadd.f32 %v4745_v36, %v4665_v0  ;;  %v9588_v36 = vld [vmem:[%s16000_s15] ss:$0 sm:$0xff] }
0x1968   : > { %v4807_v28 = vmul.f32 %v4802_v7, %v4736_v63  ;;  %v4803_v43 = vmul.f32 %v4798_v20, %v4742_v38  ;;  %v4771_v58 = vmul.f32 %v4766_v5, %v4758_v22  ;;  %v4750_v38 = vadd.f32 %v4749_v14, %v4665_v0  ;;  %v9601_v5 = vld [vmem:[%s15992_s7 + $0x2] sm:$0x3] }
0x196a   : > { %v4808_v34 = vmul.f32 %v4803_v43, %v4740_v10  ;;  %v4776_v44 = vmul.f32 0.044715, %v4771_v58  ;;  %v4982_v10 = vrot.slane %v9601_v5, %v12427_v57 }
0x196c   : > { %v11882_v62 = vpop.eup %11881  ;;  %v4781_v30 = vadd.f32 %v4776_v44, %v4758_v22  ;;  %v4812_v21 = vpack.c.bf16 %v4808_v34, %v4807_v28  ;;  %v5019_v28 = vpop.f32.mrb[196].mxu1 }
0x196d   : > { %v4794_v61 = vadd.f32 1.0, %v11882_v62  ;;  %v5021_v43 = vpop.f32.mrb[197].mxu1 }
0x196e   : > { %v11884_v59 = vpop.eup %11883  ;;  %v4786_v40 = vmul.f32 0.7978846, %v4781_v30  ;;  %10730 = vmatmul.mubr.bf16.vlgmr.msra.gmra.mrb[192].mxu0 %v4812_v21  ;;  %v5023_v58 = vpop.f32.mrb[198].mxu1  ;;  %v14206_v34 = vadd.f32 %v5021_v43, %v4982_v10 }
0x196f   : > { %10733 = vmatprep.mubr.msk.bf16.mxu0 %vm12211_vm1, %v12210_v1  ;;  %v4795_v33 = vadd.f32 1.0, %v11884_v59  ;;  %v4799_v49 = vmul.f32 0.5, %v4794_v61  ;;  %v5024_v44 = vpop.f32.mrb[199].mxu1 }
0x1970   : > { %11885 = vtanh.f32 %v4786_v40 }
0x1971   : > { %v4800_v18 = vmul.f32 0.5, %v4795_v33  ;;  %v4804_v2 = vmul.f32 %v4799_v49, %v4748_v52 }
0x1973   : > { %v4805_v31 = vmul.f32 %v4800_v18, %v4752_v45  ;;  %v4809_v26 = vmul.f32 %v4804_v2, %v4746_v17 }
0x1975   : > { %v4810_v37 = vmul.f32 %v4805_v31, %v4750_v38 }
0x1977   : > { %v4813_v42 = vpack.c.bf16 %v4810_v37, %v4809_v26 }
0x1979   : > { %10734 = vmatmul.mubr.bf16.gmra.mrb[196].mxu0 %v4813_v42 }
0x197a   : > { %v11886_v50 = vpop.eup %11885  ;;  %10737 = vmatprep.mubr.msk.bf16.mxu0 %vm12211_vm1, %v12210_v1 }
0x197b   : > { %v4796_v12 = vadd.f32 1.0, %v11886_v50 }
0x197d   : > { %v4801_v51 = vmul.f32 0.5, %v4796_v12 }
0x197f   : > { %v4806_v3 = vmul.f32 %v4801_v51, %v4758_v22 }
0x1981   : > { %v4811_v55 = vmul.f32 %v4806_v3, %v4756_v41 }
0x1983   : > { %v4814_v15 = vpack.c.bf16 %v4811_v55, %v4811_v55 }
0x1985   : > { %10738 = vmatmul.mubr.bf16.gmra.mrb[200].mxu0 %v4814_v15  ;;  %v4978_v15 = vrot.slane %v9601_v5, %v12444_v24 }
0x1986   : > { %10763 = vmatprep.mubr.msk.bf16.mxu0 %vm12211_vm1, %v12210_v1 }
0x1a41   : > { %v4920_v52 = vpop.f32.mrb[192].mxu0 }
0x1a42   : > { %v4921_v14 = vadd.f32 %v9588_v36, %v4920_v52  ;;  %v10731_v45 = vpop.f32.mrb[193].mxu0 }
0x1a43   : > { %v4923_v8 = vpop.f32.mrb[194].mxu0 }
0x1a44   : > { %v14178_v25 = vadd.f32 %v4921_v14, %v14057_v9  ;;  %v4924_v19 = vadd.f32 %v9588_v36, %v4923_v8  ;;  %v10732_v16 = vpop.f32.mrb[195].mxu0  ;;  %v5020_v14 = vadd.f32 %v5019_v28, %v4978_v15 }
0x1a45   : > { %v11568_v16 = vld [vmem:[%s15993_s8 + $0x38] sm:$0xff]  }
0x1a46   : > { %v14181_v39 = vadd.f32 %v4924_v19, %v14060_v48  ;;  %v5026_v56 = vsel %vm799_vm3, %v14178_v25, 0.0  ;;  %v5091_v45 = vadd.f32 1.0, %v5020_v14  ;;  %v11567_v19 = vld [vmem:[%s15993_s8 + $0x30] sm:$0xff]   ;;  %v14233_v10 = vrot.slane %v5020_v14, %v12444_v24 }
0x1a47   : > { %5027 = vadd.xlane.f32.xlu0 %v5026_v56  ;;  %10742 = vmatpush3.bf16.msra.mxu1 %v11567_v19 }
0x1a48   : > { %v5029_v0 = vsel %vm799_vm3, %v14181_v39, 0.0  ;;  %v14220_v8 = vrot.slane %v5091_v45, %v12444_v24  ;;  %10743 = vmatprep.subr.bf16.mxu1 %v12210_v1 }
0x1a49   : > { %5030 = vadd.xlane.f32.xlu1 %v5029_v0 }
0x1a4b   : > { %10744 = vmatpush3.bf16.msra.mxu1 %v11568_v16 }
0x1a4c   : > { %v4928_v27 = vpop.f32.mrb[196].mxu0  ;;  %10775 = vmatprep.subr.bf16.mxu1 %v12210_v1 }
0x1a4d   : > { %v4929_v53 = vadd.f32 %v9588_v36, %v4928_v27  ;;  %v10735_v35 = vpop.f32.mrb[197].mxu0 }
0x1a4e   : > { %v4931_v4 = vpop.f32.mrb[198].mxu0 }
0x1a4f   : > { %v14188_v9 = vadd.f32 %v4929_v53, %v14067_v13  ;;  %v4932_v23 = vadd.f32 %v9588_v36, %v4931_v4  ;;  %v10736_v29 = vpop.f32.mrb[199].mxu0 }
0x1a51   : > { %v14191_v48 = vadd.f32 %v4932_v23, %v14070_v54  ;;  %v5032_v32 = vsel %vm799_vm3, %v14188_v9, 0.0 }
0x1a52   : > { %5033 = vadd.xlane.f32.xlu0 %v5032_v32 }
0x1a53   : > { %v5035_v22 = vsel %vm799_vm3, %v14191_v48, 0.0 }
0x1a54   : > { %5036 = vadd.xlane.f32.xlu1 %v5035_v22 }
0x1a58   : > { %v4936_v60 = vpop.f32.mrb[200].mxu0 }
0x1a59   : > { %v4937_v47 = vadd.f32 %v9588_v36, %v4936_v60  ;;  %v10739_v63 = vpop.f32.mrb[201].mxu0 }
0x1a5a   : > { %v4939_v7 = vpop.f32.mrb[202].mxu0 }
0x1a5b   : > { %v14198_v13 = vadd.f32 %v4937_v47, %v14077_v46  ;;  %v10740_v20 = vpop.f32.mrb[203].mxu0 }
0x1a5d   : > { %v5038_v54 = vsel %vm799_vm3, %v14198_v13, 0.0 }
0x1a5e   : > { %5039 = vadd.xlane.f32.xlu0 %v5038_v54 }
0x1ad4   : > { %v5028_v62 = vpop.xlane.xlu0 %5027 }
0x1ad5   : > { %v5041_v46 = vmul.f32 0.03125, %v5028_v62 }
0x1ad6   : > { %v5031_v30 = vpop.xlane.xlu1 %5030 }
0x1ad7   : > { %v5046_v21 = vsub.f32 %v14178_v25, %v5041_v46  ;;  %v5042_v61 = vmul.f32 0.03125, %v5031_v30 }
0x1ad9   : > { %v5047_v59 = vsub.f32 %v14181_v39, %v5042_v61  ;;  %v5051_v40 = vmul.f32 %v5046_v21, %v5046_v21 }
0x1adb   : > { %v5056_v33 = vsel %vm799_vm3, %v5051_v40, 0.0  ;;  %v5052_v49 = vmul.f32 %v5047_v59, %v5047_v59 }
0x1adc   : > { %5057 = vadd.xlane.f32.xlu1 %v5056_v33 }
0x1add   : > { %v5059_v17 = vsel %vm799_vm3, %v5052_v49, 0.0 }
0x1ade   : > { %5060 = vadd.xlane.f32.xlu0 %v5059_v17 }
0x1adf   : > { %v5034_v18 = vpop.xlane.xlu0 %5033 }
0x1ae0   : > { %v5043_v2 = vmul.f32 0.03125, %v5034_v18 }
0x1ae1   : > { %v5037_v38 = vpop.xlane.xlu1 %5036 }
0x1ae2   : > { %v5048_v31 = vsub.f32 %v14188_v9, %v5043_v2  ;;  %v5044_v26 = vmul.f32 0.03125, %v5037_v38 }
0x1ae4   : > { %v5049_v37 = vsub.f32 %v14191_v48, %v5044_v26  ;;  %v5053_v42 = vmul.f32 %v5048_v31, %v5048_v31 }
0x1ae6   : > { %v5062_v50 = vsel %vm799_vm3, %v5053_v42, 0.0  ;;  %v5054_v12 = vmul.f32 %v5049_v37, %v5049_v37 }
0x1ae7   : > { %5063 = vadd.xlane.f32.xlu1 %v5062_v50 }
0x1ae8   : > { %v5065_v51 = vsel %vm799_vm3, %v5054_v12, 0.0 }
0x1ae9   : > { %5066 = vadd.xlane.f32.xlu0 %v5065_v51 }
0x1aeb   : > { %v5040_v41 = vpop.xlane.xlu0 %5039 }
0x1aec   : > { %v5045_v3 = vmul.f32 0.03125, %v5040_v41 }
0x1aee   : > { %v5050_v55 = vsub.f32 %v14198_v13, %v5045_v3 }
0x1af0   : > { %v5055_v36 = vmul.f32 %v5050_v55, %v5050_v55 }
0x1af2   : > { %v5068_v52 = vsel %vm799_vm3, %v5055_v36, 0.0 }
0x1af3   : > { %5069 = vadd.xlane.f32.xlu1 %v5068_v52 }
0x1aff   : > { %5097 = vrot.lane.b32.xlu0 %v14220_v8, %s16079_s1 }
0x1b69   : > { %v5058_v56 = vpop.xlane.xlu1 %5057 }
0x1b6a   : > { %v5071_v0 = vmul.f32 0.03125, %v5058_v56 }
0x1b6b   : > { %v5061_v27 = vpop.xlane.xlu0 %5060 }
0x1b6c   : > { %v5076_v53 = vadd.f32 1e-05, %v5071_v0  ;;  %v5072_v35 = vmul.f32 0.03125, %v5061_v27 }
0x1b6e   : > { %11887 = vrsqrt.f32 %v5076_v53  ;;  %v5077_v4 = vadd.f32 1e-05, %v5072_v35 }
0x1b70   : > { %11889 = vrsqrt.f32 %v5077_v4 }
0x1b74   : > { %v5064_v23 = vpop.xlane.xlu1 %5063 }
0x1b75   : > { %v5073_v29 = vmul.f32 0.03125, %v5064_v23 }
0x1b76   : > { %v5067_v32 = vpop.xlane.xlu0 %5066 }
0x1b77   : > { %v5078_v22 = vadd.f32 1e-05, %v5073_v29  ;;  %v5074_v60 = vmul.f32 0.03125, %v5067_v32 }
0x1b78   : > { %v11888_v47 = vpop.eup %11887 }
0x1b79   : > { %11891 = vrsqrt.f32 %v5078_v22  ;;  %v5079_v63 = vadd.f32 1e-05, %v5074_v60  ;;  %v5086_v7 = vmul.f32 %v11888_v47, %v5046_v21 }
0x1b7a   : > { %v11890_v20 = vpop.eup %11889  ;;  %v5098_v54 = vpop.permute.xlu0 %5097 }
0x1b7b   : > { %11893 = vrsqrt.f32 %v5079_v63  ;;  %v5087_v5 = vmul.f32 %v11890_v20, %v5047_v59  ;;  %v5100_v28 = vmul.f32 %v5098_v54, %v5086_v7 }
0x1b7d   : > { %v5101_v43 = vmul.f32 %v5098_v54, %v5087_v5  ;;  %v5109_v58 = vadd.f32 %v14233_v10, %v5100_v28 }
0x1b7f   : > { %v5110_v44 = vadd.f32 %v14233_v10, %v5101_v43 }
0x1b80   : > { %v5070_v62 = vpop.xlane.xlu1 %5069 }
0x1b81   : > { %v5075_v46 = vmul.f32 0.03125, %v5070_v62  ;;  %v5114_v30 = vpack.c.bf16 %v5110_v44, %v5109_v58 }
0x1b83   : > { %v11892_v61 = vpop.eup %11891  ;;  %v5080_v40 = vadd.f32 1e-05, %v5075_v46  ;;  %10746 = vmatmul.mubr.msk.bf16.vlgmr.msra.gmra.mrb[200].mxu1 %vm799_vm3, %v5114_v30 }
0x1b84   : > { %10749 = vmatprep.mubr.msk.bf16.mxu1 %vm12211_vm1, %v12210_v1  ;;  %v5088_v21 = vmul.f32 %v11892_v61, %v5048_v31 }
0x1b85   : > { %v11894_v59 = vpop.eup %11893  ;;  %11895 = vrsqrt.f32 %v5080_v40 }
0x1b86   : > { %v5089_v33 = vmul.f32 %v11894_v59, %v5049_v37  ;;  %v5102_v49 = vmul.f32 %v5098_v54, %v5088_v21 }
0x1b88   : > { %v5103_v17 = vmul.f32 %v5098_v54, %v5089_v33  ;;  %v5111_v18 = vadd.f32 %v14233_v10, %v5102_v49 }
0x1b8a   : > { %v5112_v2 = vadd.f32 %v14233_v10, %v5103_v17 }
0x1b8c   : > { %v5115_v38 = vpack.c.bf16 %v5112_v2, %v5111_v18 }
0x1b8e   : > { %10750 = vmatmul.mubr.msk.bf16.gmra.mrb[204].mxu1 %vm799_vm3, %v5115_v38 }
0x1b8f   : > { %v11896_v26 = vpop.eup %11895  ;;  %10753 = vmatprep.mubr.msk.bf16.mxu1 %vm12211_vm1, %v12210_v1 }
0x1b90   : > { %v5090_v42 = vmul.f32 %v11896_v26, %v5050_v55 }
0x1b92   : > { %v5104_v50 = vmul.f32 %v5098_v54, %v5090_v42 }
0x1b94   : > { %v5113_v31 = vadd.f32 %v14233_v10, %v5104_v50 }
0x1b96   : > { %v5116_v12 = vpack.c.bf16 %v5113_v31, %v5113_v31 }
0x1b98   : > { %10754 = vmatmul.mubr.msk.bf16.gmra.mrb[208].mxu1 %vm799_vm3, %v5116_v12 }
0x1b99   : > { %10781 = vmatprep.mubr.msk.bf16.mxu1 %vm12211_vm1, %v12210_v1 }
0x1c56   : > { %v5177_v37 = vpop.f32.mrb[200].mxu1 }
0x1c57   : > { %v10747_v51 = vpop.f32.mrb[201].mxu1  ;;  %v5199_v3 = vmul.f32 0.35355338, %v5177_v37 }
0x1c58   : > { %v5180_v41 = vpop.f32.mrb[202].mxu1 }
0x1c59   : > { %v5200_v15 = vmul.f32 0.35355338, %v5180_v41  ;;  %v14249_v36 = vpack.c.bf16 %v5180_v41, %v5177_v37  ;;  %v10748_v52 = vpop.f32.mrb[203].mxu1 }
0x1c5b   : > { %v5204_v14 = vpack.c.bf16 %v5200_v15, %v5199_v3  ;;  %5213 = vrot.lane.b32.xlu1 %v14249_v36, %s16079_s1 }
0x1c61   : > { %v5185_v55 = vpop.f32.mrb[204].mxu1 }
0x1c62   : > { %v10751_v45 = vpop.f32.mrb[205].mxu1  ;;  %v5201_v16 = vmul.f32 0.35355338, %v5185_v55 }
0x1c63   : > { %v5188_v19 = vpop.f32.mrb[206].mxu1 }
0x1c64   : > { %v5202_v56 = vmul.f32 0.35355338, %v5188_v19  ;;  %v14253_v0 = vpack.c.bf16 %v5188_v19, %v5185_v55  ;;  %v10752_v27 = vpop.f32.mrb[207].mxu1 }
0x1c66   : > { %v5205_v53 = vpack.c.bf16 %v5202_v56, %v5201_v16  ;;  %5215 = vrot.lane.b32.xlu1 %v14253_v0, %s16079_s1  ;;  %v14365_v16 = vld [vmem:[%s12607_s4] sm:$0xff] }
0x1c6a   : > { %5436 = vrot.lane.b32.xlu1 %v14249_v36, %s16073_s5 }
0x1c6b   : > { %v5193_v35 = vpop.f32.mrb[208].mxu1 }
0x1c6c   : > { %v14259_v4 = vpack.c.bf16 %v5193_v35, %v5193_v35  ;;  %v10755_v23 = vpop.f32.mrb[209].mxu1  ;;  %v5203_v22 = vmul.f32 0.35355338, %v5193_v35  ;;  %v14371_v35 = vld [vmem:[%s12607_s4 + $0x8] sm:$0xff] }
0x1c6d   : > { %v5196_v29 = vpop.f32.mrb[210].mxu1 }
0x1c6e   : > { %5440 = vrot.lane.b32.xlu1 %v14259_v4, %s16073_s5  ;;  %5217 = vrot.lane.b32.xlu0 %v14259_v4, %s16079_s1  ;;  %v10756_v32 = vpop.f32.mrb[211].mxu1  ;;  %v5206_v60 = vpack.c.bf16 %v5203_v22, %v5203_v22 }
0x1c72   : > { %5656 = vrot.lane.b32.xlu1 %v14249_v36, %s16075_s3  ;;  %5438 = vrot.lane.b32.xlu0 %v14253_v0, %s16073_s5 }
0x1c76   : > { %5658 = vrot.lane.b32.xlu1 %v14253_v0, %s16075_s3  ;;  %5430 = vrot.lane.b32.xlu0 %v5204_v14, %s16074_s21 }
0x1c7a   : > { %5660 = vrot.lane.b32.xlu1 %v14259_v4, %s16075_s3  ;;  %5432 = vrot.lane.b32.xlu0 %v5205_v53, %s16074_s21 }
0x1c7e   : > { %5876 = vrot.lane.b32.xlu1 %v14249_v36, %s16076_s26  ;;  %5434 = vrot.lane.b32.xlu0 %v5206_v60, %s16074_s21 }
0x1c82   : > { %5878 = vrot.lane.b32.xlu1 %v14253_v0, %s16076_s26  ;;  %5650 = vrot.lane.b32.xlu0 %v5204_v14, %s16065_s23 }
0x1c86   : > { %5880 = vrot.lane.b32.xlu1 %v14259_v4, %s16076_s26  ;;  %5652 = vrot.lane.b32.xlu0 %v5205_v53, %s16065_s23 }
0x1c8a   : > { %5872 = vrot.lane.b32.xlu1 %v5205_v53, %s16066_s29  ;;  %5654 = vrot.lane.b32.xlu0 %v5206_v60, %s16065_s23 }
0x1c8e   : > { %5351 = vrot.lane.b32.xlu1 %v14249_v36, %s16077_s24  ;;  %5870 = vrot.lane.b32.xlu0 %v5204_v14, %s16066_s29 }
0x1c92   : > { %5355 = vrot.lane.b32.xlu1 %v14259_v4, %s16077_s24  ;;  %5874 = vrot.lane.b32.xlu0 %v5206_v60, %s16066_s29 }
0x1c96   : > { %5576 = vrot.lane.b32.xlu1 %v14253_v0, %s16067_s2  ;;  %5353 = vrot.lane.b32.xlu0 %v14253_v0, %s16077_s24 }
0x1c9a   : > { %5578 = vrot.lane.b32.xlu1 %v14259_v4, %s16067_s2  ;;  %5574 = vrot.lane.b32.xlu0 %v14249_v36, %s16067_s2 }
0x1ccd   : > { %v5214_v47 = vpop.permute.xlu1 %5213 }
0x1cce   : > { %v5229_v63 = vsel %vm1042_vm4, %v5214_v47, 0  ;;  %v14381_v47 = vld [vmem:[%s12607_s4 + $0x10] sm:$0xff] }
0x1ccf   : > { %10758 = vmatpush3.bf16.xpose.msra.mxu0 %v5229_v63 }
0x1cd0   : > { %10759 = vmatprep.subr.bf16.mxu0 %v12210_v1 }
0x1cd8   : > { %v5216_v7 = vpop.permute.xlu1 %5215 }
0x1cd9   : > { %v5232_v20 = vsel %vm1042_vm4, %v5216_v7, 0 }
0x1cda   : > { %10760 = vmatpush3.bf16.xpose.msra.mxu0 %v5232_v20 }
0x1cdb   : > { %10761 = vmatprep.subr.bf16.mxu0 %v12210_v1 }
0x1cdc   : > { %v5437_v54 = vpop.permute.xlu1 %5436 }
0x1cdd   : > { %v5452_v30 = vsel %vm1042_vm4, %v5437_v54, 0  ;;  %v14387_v54 = vld [vmem:[%s12607_s4 + $0x18] sm:$0xff] }
0x1ce0   : > { %v5441_v5 = vpop.permute.xlu1 %5440  ;;  %v5218_v28 = vpop.permute.xlu0 %5217 }
0x1ce1   : > { %v5235_v43 = vsel %vm1042_vm4, %v5218_v28, 0  ;;  %v5458_v38 = vsel %vm1042_vm4, %v5441_v5, 0 }
0x1ce2   : > { %10762 = vmatpush3.bf16.xpose.msra.mxu0 %v5235_v43 }
0x1ce3   : > { %10793 = vmatprep.subr.bf16.mxu0 %v12210_v1 }
0x1ce4   : > { %v5657_v58 = vpop.permute.xlu1 %5656  ;;  %v5439_v44 = vpop.permute.xlu0 %5438 }
0x1ce5   : > { %v5455_v33 = vsel %vm1042_vm4, %v5439_v44, 0  ;;  %v5672_v12 = vsel %vm1042_vm4, %v5657_v58, 0 }
0x1ce8   : > { %v5659_v62 = vpop.permute.xlu1 %5658  ;;  %v5431_v46 = vpop.permute.xlu0 %5430 }
0x1ce9   : > { %10764 = vmatmul.mubr.msk.bf16.vlgmr.msra.gmra.mrb[204].mxu0 %vm1042_vm4, %v5204_v14  ;;  %v5675_v41 = vsel %vm1042_vm4, %v5659_v62, 0  ;;  %v14397_v62 = vld [vmem:[%s12607_s4 + $0x20] sm:$0xff] }
0x1cea   : > { %10794 = vmatpush3.bf16.xpose.msra.mxu0 %v5452_v30  ;;  %10767 = vmatprep.mubr.msk.bf16.mxu0 %vm12211_vm1, %v12210_v1 }
0x1ceb   : > { %10795 = vmatprep.subr.bf16.mxu0 %v12210_v1 }
0x1cec   : > { %v5661_v61 = vpop.permute.xlu1 %5660  ;;  %v5433_v40 = vpop.permute.xlu0 %5432 }
0x1ced   : > { %v5678_v52 = vsel %vm1042_vm4, %v5661_v61, 0 }
0x1cf0   : > { %v5877_v21 = vpop.permute.xlu1 %5876  ;;  %v5435_v59 = vpop.permute.xlu0 %5434 }
0x1cf1   : > { %10768 = vmatmul.mubr.msk.bf16.gmra.mrb[208].mxu0 %vm1042_vm4, %v5205_v53  ;;  %v5892_v14 = vsel %vm1042_vm4, %v5877_v21, 0 }
0x1cf2   : > { %10796 = vmatpush3.bf16.xpose.msra.mxu0 %v5455_v33  ;;  %10771 = vmatprep.mubr.msk.bf16.mxu0 %vm12211_vm1, %v12210_v1 }
0x1cf3   : > { %10797 = vmatprep.subr.bf16.mxu0 %v12210_v1 }
0x1cf4   : > { %v5879_v49 = vpop.permute.xlu1 %5878  ;;  %v5651_v17 = vpop.permute.xlu0 %5650 }
0x1cf5   : > { %v5895_v55 = vsel %vm1042_vm4, %v5879_v49, 0 }
0x1cf8   : > { %v5881_v18 = vpop.permute.xlu1 %5880  ;;  %v5653_v2 = vpop.permute.xlu0 %5652 }
0x1cf9   : > { %10772 = vmatmul.mubr.msk.bf16.gmra.mrb[212].mxu0 %vm1042_vm4, %v5206_v60  ;;  %v5898_v45 = vsel %vm1042_vm4, %v5881_v18, 0 }
0x1cfa   : > { %10798 = vmatpush3.bf16.xpose.msra.mxu0 %v5458_v38  ;;  %10799 = vmatprep.mubr.msk.bf16.mxu0 %vm12211_vm1, %v12210_v1 }
0x1cfb   : > { %10829 = vmatprep.subr.bf16.mxu0 %v12210_v1 }
0x1cfc   : > { %v5873_v26 = vpop.permute.xlu1 %5872  ;;  %v5655_v42 = vpop.permute.xlu0 %5654 }
0x1d00   : > { %v5352_v50 = vpop.permute.xlu1 %5351  ;;  %v5871_v31 = vpop.permute.xlu0 %5870 }
0x1d01   : > { %10776 = vmatpush3.bf16.msra.mxu1 %v5352_v50  ;;  %10800 = vmatmul.mubr.msk.bf16.vlgmr.msra.gmra.mrb[216].mxu0 %vm1042_vm4, %v5431_v46 }
0x1d02   : > { %10830 = vmatpush3.bf16.xpose.msra.mxu0 %v5672_v12  ;;  %10777 = vmatprep.subr.bf16.mxu1 %v12210_v1 }
0x1d03   : > { %10803 = vmatprep.mubr.msk.bf16.mxu0 %vm12211_vm1, %v12210_v1  ;;  %10831 = vmatprep.subr.bf16.mxu0 %v12210_v1 }
0x1d04   : > { %v5875_v37 = vpop.permute.xlu0 %5874  ;;  %v5356_v3 = vpop.permute.xlu1 %5355 }
0x1d05   : > { %v5369_v15 = vsel %vm1193_vm5, %v5356_v3, 0 }
0x1d08   : > { %v5354_v51 = vpop.permute.xlu0 %5353 }
0x1d09   : > { %10778 = vmatpush3.bf16.msra.mxu1 %v5354_v51  ;;  %10804 = vmatmul.mubr.msk.bf16.gmra.mrb[220].mxu0 %vm1042_vm4, %v5433_v40 }
0x1d0a   : > { %10832 = vmatpush3.bf16.xpose.msra.mxu0 %v5675_v41  ;;  %10779 = vmatprep.subr.bf16.mxu1 %v12210_v1 }
0x1d0b   : > { %10807 = vmatprep.mubr.msk.bf16.mxu0 %vm12211_vm1, %v12210_v1  ;;  %10833 = vmatprep.subr.bf16.mxu0 %v12210_v1 }
0x1d0d   : > { %10780 = vmatpush3.bf16.msra.mxu1 %v5369_v15 }
0x1d0e   : > { %10811 = vmatprep.subr.bf16.mxu1 %v12210_v1 }
0x1d11   : > { %10808 = vmatmul.mubr.msk.bf16.gmra.mrb[224].mxu0 %vm1042_vm4, %v5435_v59 }
0x1d12   : > { %10834 = vmatpush3.bf16.xpose.msra.mxu0 %v5678_v52  ;;  %10835 = vmatprep.mubr.msk.bf16.mxu0 %vm12211_vm1, %v12210_v1 }
0x1d13   : > { %10865 = vmatprep.subr.bf16.mxu0 %v12210_v1 }
0x1d19   : > { %10836 = vmatmul.mubr.msk.bf16.vlgmr.msra.gmra.mrb[228].mxu0 %vm1042_vm4, %v5651_v17 }
0x1d1a   : > { %10866 = vmatpush3.bf16.xpose.msra.mxu0 %v5892_v14  ;;  %10839 = vmatprep.mubr.msk.bf16.mxu0 %vm12211_vm1, %v12210_v1 }
0x1d1b   : > { %10867 = vmatprep.subr.bf16.mxu0 %v12210_v1 }
0x1d21   : > { %10840 = vmatmul.mubr.msk.bf16.gmra.mrb[232].mxu0 %vm1042_vm4, %v5653_v2 }
0x1d22   : > { %10868 = vmatpush3.bf16.xpose.msra.mxu0 %v5895_v55  ;;  %10843 = vmatprep.mubr.msk.bf16.mxu0 %vm12211_vm1, %v12210_v1 }
0x1d23   : > { %10869 = vmatprep.subr.bf16.mxu0 %v12210_v1 }
0x1d29   : > { %10844 = vmatmul.mubr.msk.bf16.gmra.mrb[236].mxu0 %vm1042_vm4, %v5655_v42 }
0x1d2a   : > { %10870 = vmatpush3.bf16.xpose.msra.mxu0 %v5898_v45  ;;  %10871 = vmatprep.mubr.msk.bf16.mxu0 %vm12211_vm1, %v12210_v1 }
0x1d2b   : > { %10901 = vmatprep.subr.bf16.mxu0 %v12210_v1 }
0x1d31   : > { %10872 = vmatmul.mubr.msk.bf16.vlgmr.msra.gmra.mrb[240].mxu0 %vm1042_vm4, %v5871_v31 }
0x1d32   : > { %10875 = vmatprep.mubr.msk.bf16.mxu0 %vm12211_vm1, %v12210_v1 }
0x1d39   : > { %10876 = vmatmul.mubr.msk.bf16.gmra.mrb[244].mxu0 %vm1042_vm4, %v5873_v26 }
0x1d3a   : > { %10879 = vmatprep.mubr.msk.bf16.mxu0 %vm12211_vm1, %v12210_v1 }
0x1d41   : > { %10880 = vmatmul.mubr.msk.bf16.gmra.mrb[248].mxu0 %vm1042_vm4, %v5875_v37 }
0x1d42   : > { %10905 = vmatprep.mubr.msk.bf16.mxu0 %vm12211_vm1, %v12210_v1 }
0x1dbc   : > { %v5271_v19 = vpop.f32.mrb[204].mxu0 }
0x1dbd   : > { %v14368_v56 = vadd.f32 %v14365_v16, %v5271_v19  ;;  %v10765_v27 = vpop.f32.mrb[205].mxu0 }
0x1dbe   : > { %v5274_v53 = vpop.f32.mrb[206].mxu0 }
0x1dbf   : > { %v14374_v23 = vadd.f32 %v14371_v35, %v5274_v53  ;;  %v10766_v29 = vpop.f32.mrb[207].mxu0  ;;  %v5293_v32 = vsel %vm1117_vm6, %v14368_v56, -inf }
0x1dc0   : > { %5294 = vmax.xlane.f32.xlu1 %v5293_v32 }
0x1dc1   : > { %v5296_v22 = vsel %vm1117_vm6, %v14374_v23, -inf }
0x1dc2   : > { %5297 = vmax.xlane.f32.xlu0 %v5296_v22 }
0x1dc4   : > { %v5279_v60 = vpop.f32.mrb[208].mxu0 }
0x1dc5   : > { %v14384_v63 = vadd.f32 %v14381_v47, %v5279_v60  ;;  %v10769_v7 = vpop.f32.mrb[209].mxu0 }
0x1dc6   : > { %v5282_v20 = vpop.f32.mrb[210].mxu0 }
0x1dc7   : > { %v14390_v5 = vadd.f32 %v14387_v54, %v5282_v20  ;;  %v10770_v28 = vpop.f32.mrb[211].mxu0  ;;  %v5299_v43 = vsel %vm1117_vm6, %v14384_v63, -inf }
0x1dc8   : > { %5300 = vmax.xlane.f32.xlu0 %v5299_v43 }
0x1dc9   : > { %v5302_v58 = vsel %vm1117_vm6, %v14390_v5, -inf }
0x1dca   : > { %5303 = vmax.xlane.f32.xlu1 %v5302_v58 }
0x1dcc   : > { %v5287_v44 = vpop.f32.mrb[212].mxu0 }
0x1dcd   : > { %v14400_v46 = vadd.f32 %v14397_v62, %v5287_v44  ;;  %v10773_v30 = vpop.f32.mrb[213].mxu0 }
0x1dce   : > { %v5290_v61 = vpop.f32.mrb[214].mxu0 }
0x1dcf   : > { %v10774_v40 = vpop.f32.mrb[215].mxu0  ;;  %v5305_v21 = vsel %vm1117_vm6, %v14400_v46, -inf }
0x1dd0   : > { %5306 = vmax.xlane.f32.xlu0 %v5305_v21 }
0x1dd4   : > { %v5494_v59 = vpop.f32.mrb[216].mxu0 }
0x1dd5   : > { %v14405_v33 = vadd.f32 %v14365_v16, %v5494_v59  ;;  %v10801_v49 = vpop.f32.mrb[217].mxu0 }
0x1dd6   : > { %v5497_v17 = vpop.f32.mrb[218].mxu0 }
0x1dd7   : > { %v14408_v18 = vadd.f32 %v14371_v35, %v5497_v17  ;;  %v10802_v2 = vpop.f32.mrb[219].mxu0  ;;  %v5516_v38 = vsel %vm1117_vm6, %v14405_v33, -inf }
0x1dd8   : > { %5517 = vmax.xlane.f32.xlu1 %v5516_v38 }
0x1dd9   : > { %v5519_v26 = vsel %vm1117_vm6, %v14408_v18, -inf }
0x1dda   : > { %5520 = vmax.xlane.f32.xlu0 %v5519_v26 }
0x1ddc   : > { %v5502_v42 = vpop.f32.mrb[220].mxu0 }
0x1ddd   : > { %v14415_v50 = vadd.f32 %v14381_v47, %v5502_v42  ;;  %v10805_v31 = vpop.f32.mrb[221].mxu0 }
0x1dde   : > { %v5505_v12 = vpop.f32.mrb[222].mxu0 }
0x1ddf   : > { %v14418_v37 = vadd.f32 %v14387_v54, %v5505_v12  ;;  %v10806_v51 = vpop.f32.mrb[223].mxu0  ;;  %v5522_v41 = vsel %vm1117_vm6, %v14415_v50, -inf }
0x1de0   : > { %5523 = vmax.xlane.f32.xlu1 %v5522_v41 }
0x1de1   : > { %v5525_v3 = vsel %vm1117_vm6, %v14418_v37, -inf }
0x1de2   : > { %5526 = vmax.xlane.f32.xlu0 %v5525_v3 }
0x1de4   : > { %v5510_v15 = vpop.f32.mrb[224].mxu0 }
0x1de5   : > { %v14425_v52 = vadd.f32 %v14397_v62, %v5510_v15  ;;  %v10809_v14 = vpop.f32.mrb[225].mxu0 }
0x1de6   : > { %v5513_v55 = vpop.f32.mrb[226].mxu0 }
0x1de7   : > { %v10810_v45 = vpop.f32.mrb[227].mxu0  ;;  %v5528_v19 = vsel %vm1117_vm6, %v14425_v52, -inf }
0x1de8   : > { %5529 = vmax.xlane.f32.xlu1 %v5528_v19 }
0x1dec   : > { %v5714_v27 = vpop.f32.mrb[228].mxu0 }
0x1ded   : > { %v14430_v53 = vadd.f32 %v14365_v16, %v5714_v27  ;;  %v10837_v29 = vpop.f32.mrb[229].mxu0 }
0x1dee   : > { %v5717_v32 = vpop.f32.mrb[230].mxu0 }
0x1def   : > { %v14433_v22 = vadd.f32 %v14371_v35, %v5717_v32  ;;  %v10838_v60 = vpop.f32.mrb[231].mxu0  ;;  %v5736_v7 = vsel %vm1117_vm6, %v14430_v53, -inf }
0x1df0   : > { %5737 = vmax.xlane.f32.xlu0 %v5736_v7 }
0x1df1   : > { %v5739_v20 = vsel %vm1117_vm6, %v14433_v22, -inf }
0x1df2   : > { %5740 = vmax.xlane.f32.xlu1 %v5739_v20 }
0x1df4   : > { %v5722_v28 = vpop.f32.mrb[232].mxu0 }
0x1df5   : > { %v14440_v43 = vadd.f32 %v14381_v47, %v5722_v28  ;;  %v10841_v58 = vpop.f32.mrb[233].mxu0 }
0x1df6   : > { %v5725_v44 = vpop.f32.mrb[234].mxu0 }
0x1df7   : > { %v14443_v30 = vadd.f32 %v14387_v54, %v5725_v44  ;;  %v10842_v61 = vpop.f32.mrb[235].mxu0  ;;  %v5742_v40 = vsel %vm1117_vm6, %v14440_v43, -inf  ;;  %v14483_v44 = vpop.permute.xlu1 %5576 }
0x1df8   : > { %5743 = vmax.xlane.f32.xlu0 %v5742_v40 }
0x1df9   : > { %v5745_v21 = vsel %vm1117_vm6, %v14443_v30, -inf }
0x1dfa   : > { %5746 = vmax.xlane.f32.xlu1 %v5745_v21 }
0x1dfb   : > { %v14485_v61 = vpop.permute.xlu1 %5578 }
0x1dfc   : > { %v5730_v59 = vpop.f32.mrb[236].mxu0 }
0x1dfd   : > { %v14450_v49 = vadd.f32 %v14397_v62, %v5730_v59  ;;  %v10845_v17 = vpop.f32.mrb[237].mxu0 }
0x1dfe   : > { %v5733_v2 = vpop.f32.mrb[238].mxu0 }
0x1dff   : > { %v10846_v38 = vpop.f32.mrb[239].mxu0  ;;  %v5748_v26 = vsel %vm1117_vm6, %v14450_v49, -inf }
0x1e00   : > { %5749 = vmax.xlane.f32.xlu0 %v5748_v26 }
0x1e04   : > { %v5934_v42 = vpop.f32.mrb[240].mxu0 }
0x1e05   : > { %v10873_v31 = vpop.f32.mrb[241].mxu0 }
0x1e06   : > { %v5937_v12 = vpop.f32.mrb[242].mxu0 }
0x1e07   : > { %v14455_v51 = vadd.f32 %v14371_v35, %v5937_v12  ;;  %v10874_v41 = vpop.f32.mrb[243].mxu0  ;;  %v14464_v35 = vadd.f32 %v14365_v16, %v5934_v42 }
0x1e09   : > { %v5959_v3 = vsel %vm1117_vm6, %v14455_v51, -inf  ;;  %v5956_v7 = vsel %vm1117_vm6, %v14464_v35, -inf }
0x1e0a   : > { %5960 = vmax.xlane.f32.xlu0 %v5959_v3 }
0x1e0b   : > { %5794 = vrot.lane.b32.xlu1 %v14249_v36, %s16068_s25 }
0x1e0c   : > { %v5942_v15 = vpop.f32.mrb[244].mxu0 }
0x1e0d   : > { %v10877_v14 = vpop.f32.mrb[245].mxu0  ;;  %v14467_v60 = vadd.f32 %v14381_v47, %v5942_v15 }
0x1e0e   : > { %v5945_v55 = vpop.f32.mrb[246].mxu0 }
0x1e0f   : > { %v10878_v45 = vpop.f32.mrb[247].mxu0  ;;  %v5962_v28 = vsel %vm1117_vm6, %v14467_v60, -inf  ;;  %v14479_v16 = vadd.f32 %v14387_v54, %v5945_v55 }
0x1e11   : > { %v5965_v47 = vsel %vm1117_vm6, %v14479_v16, -inf }
0x1e14   : > { %v5950_v19 = vpop.f32.mrb[248].mxu0 }
0x1e15   : > { %v10881_v27 = vpop.f32.mrb[249].mxu0  ;;  %v14472_v20 = vadd.f32 %v14397_v62, %v5950_v19  ;;  %v14487_v62 = vpop.permute.xlu0 %5574 }
0x1e16   : > { %v5953_v29 = vpop.f32.mrb[250].mxu0 }
0x1e17   : > { %v10882_v32 = vpop.f32.mrb[251].mxu0  ;;  %v5968_v58 = vsel %vm1117_vm6, %v14472_v20, -inf }
0x1e20   : > { %5796 = vrot.lane.b32.xlu0 %v14253_v0, %s16068_s25 }
0x1e2f   : > { %5957 = vmax.xlane.f32.xlu1 %v5956_v7 }
0x1e33   : > { %5963 = vmax.xlane.f32.xlu1 %v5962_v28 }
0x1e37   : > { %5969 = vmax.xlane.f32.xlu1 %v5968_v58 }
0x1e3f   : > { %5966 = vmax.xlane.f32.xlu0 %v5965_v47 }
0x1e4d   : > { %v5295_v40 = vpop.xlane.xlu1 %5294 }
0x1e4e   : > { %v5308_v21 = vsub.f32 %v14368_v56, %v5295_v40 }
0x1e4f   : > { %v5298_v59 = vpop.xlane.xlu0 %5297 }
0x1e50   : > { %v5313_v17 = vmul.f32 1.442695, %v5308_v21  ;;  %v5309_v2 = vsub.f32 %v14374_v23, %v5298_v59 }
0x1e52   : > { %11897 = vpow2.f32 %v5313_v17  ;;  %v5315_v54 = vmul.f32 1.442695, %v5309_v2 }
0x1e54   : > { %11899 = vpow2.f32 %v5315_v54 }
0x1e55   : > { %v5301_v38 = vpop.xlane.xlu0 %5300 }
0x1e56   : > { %v5310_v26 = vsub.f32 %v14384_v63, %v5301_v38 }
0x1e57   : > { %v5304_v42 = vpop.xlane.xlu1 %5303 }
0x1e58   : > { %v5317_v31 = vmul.f32 1.442695, %v5310_v26  ;;  %v5311_v12 = vsub.f32 %v14390_v5, %v5304_v42 }
0x1e5a   : > { %11901 = vpow2.f32 %v5317_v31  ;;  %v5319_v41 = vmul.f32 1.442695, %v5311_v12 }
0x1e5c   : > { %v14493_v3 = vpop.eup %11897  ;;  %11903 = vpow2.f32 %v5319_v41 }
0x1e5d   : > { %v5307_v56 = vpop.xlane.xlu0 %5306  ;;  %v5323_v15 = vsel %vm1117_vm6, %v14493_v3, 0.0 }
0x1e5e   : > { %v14497_v23 = vpop.eup %11899  ;;  %v5312_v14 = vsub.f32 %v14400_v46, %v5307_v56  ;;  %5324 = vadd.xlane.f32.xlu1 %v5323_v15 }
0x1e5f   : > { %v5326_v63 = vsel %vm1117_vm6, %v14497_v23, 0.0 }
0x1e60   : > { %v5321_v55 = vmul.f32 1.442695, %v5312_v14  ;;  %5327 = vadd.xlane.f32.xlu0 %v5326_v63 }
0x1e62   : > { %11905 = vpow2.f32 %v5321_v55 }
0x1e64   : > { %v14502_v5 = vpop.eup %11901 }
0x1e65   : > { %v5518_v45 = vpop.xlane.xlu1 %5517  ;;  %v5329_v19 = vsel %vm1117_vm6, %v14502_v5, 0.0 }
0x1e66   : > { %v14506_v27 = vpop.eup %11903  ;;  %v5531_v29 = vsub.f32 %v14405_v33, %v5518_v45  ;;  %5330 = vadd.xlane.f32.xlu0 %v5329_v19 }
0x1e67   : > { %v5521_v32 = vpop.xlane.xlu0 %5520  ;;  %v5332_v46 = vsel %vm1117_vm6, %v14506_v27, 0.0 }
0x1e68   : > { %v5536_v7 = vmul.f32 1.442695, %v5531_v29  ;;  %v5532_v28 = vsub.f32 %v14408_v18, %v5521_v32  ;;  %5333 = vadd.xlane.f32.xlu1 %v5332_v46 }
0x1e6a   : > { %11907 = vpow2.f32 %v5536_v7  ;;  %v5538_v58 = vmul.f32 1.442695, %v5532_v28 }
0x1e6c   : > { %v14512_v47 = vpop.eup %11905  ;;  %11909 = vpow2.f32 %v5538_v58 }
0x1e6d   : > { %v5524_v40 = vpop.xlane.xlu1 %5523  ;;  %v5335_v21 = vsel %vm1117_vm6, %v14512_v47, 0.0 }
0x1e6e   : > { %v5533_v33 = vsub.f32 %v14415_v50, %v5524_v40  ;;  %5336 = vadd.xlane.f32.xlu0 %v5335_v21 }
0x1e6f   : > { %v5527_v59 = vpop.xlane.xlu0 %5526 }
0x1e70   : > { %v5540_v17 = vmul.f32 1.442695, %v5533_v33  ;;  %v5534_v2 = vsub.f32 %v14418_v37, %v5527_v59 }
0x1e72   : > { %11911 = vpow2.f32 %v5540_v17  ;;  %v5542_v54 = vmul.f32 1.442695, %v5534_v2 }
0x1e74   : > { %v14518_v18 = vpop.eup %11907  ;;  %11913 = vpow2.f32 %v5542_v54 }
0x1e75   : > { %v5530_v38 = vpop.xlane.xlu1 %5529  ;;  %v5546_v26 = vsel %vm1117_vm6, %v14518_v18, 0.0 }
0x1e76   : > { %v14522_v42 = vpop.eup %11909  ;;  %v5535_v31 = vsub.f32 %v14425_v52, %v5530_v38  ;;  %5547 = vadd.xlane.f32.xlu1 %v5546_v26 }
0x1e77   : > { %v5549_v50 = vsel %vm1117_vm6, %v14522_v42, 0.0 }
0x1e78   : > { %v5544_v12 = vmul.f32 1.442695, %v5535_v31  ;;  %5550 = vadd.xlane.f32.xlu0 %v5549_v50 }
0x1e7a   : > { %11915 = vpow2.f32 %v5544_v12 }
0x1e7c   : > { %v14527_v37 = vpop.eup %11911 }
0x1e7d   : > { %v5738_v41 = vpop.xlane.xlu0 %5737  ;;  %v5552_v56 = vsel %vm1117_vm6, %v14527_v37, 0.0 }
0x1e7e   : > { %v14531_v15 = vpop.eup %11913  ;;  %v5751_v14 = vsub.f32 %v14430_v53, %v5738_v41  ;;  %5553 = vadd.xlane.f32.xlu0 %v5552_v56 }
0x1e7f   : > { %v5741_v63 = vpop.xlane.xlu1 %5740  ;;  %v5555_v45 = vsel %vm1117_vm6, %v14531_v15, 0.0 }
0x1e80   : > { %v5756_v52 = vmul.f32 1.442695, %v5751_v14  ;;  %v5752_v55 = vsub.f32 %v14433_v22, %v5741_v63 }
0x1e82   : > { %11917 = vpow2.f32 %v5756_v52  ;;  %v5758_v19 = vmul.f32 1.442695, %v5752_v55  ;;  %5556 = vadd.xlane.f32.xlu0 %v5555_v45 }
0x1e84   : > { %v14537_v29 = vpop.eup %11915  ;;  %11919 = vpow2.f32 %v5758_v19 }
0x1e85   : > { %v5744_v32 = vpop.xlane.xlu0 %5743  ;;  %v5558_v46 = vsel %vm1117_vm6, %v14537_v29, 0.0 }
0x1e86   : > { %v5753_v53 = vsub.f32 %v14440_v43, %v5744_v32  ;;  %5559 = vadd.xlane.f32.xlu0 %v5558_v46 }
0x1e87   : > { %v5747_v7 = vpop.xlane.xlu1 %5746 }
0x1e88   : > { %v5760_v28 = vmul.f32 1.442695, %v5753_v53  ;;  %v5754_v22 = vsub.f32 %v14443_v30, %v5747_v7 }
0x1e8a   : > { %11921 = vpow2.f32 %v5760_v28  ;;  %v5762_v58 = vmul.f32 1.442695, %v5754_v22 }
0x1e8b   : > { %v14571_v14 = vpop.permute.xlu1 %5794 }
0x1e8c   : > { %v14543_v40 = vpop.eup %11917  ;;  %11923 = vpow2.f32 %v5762_v58 }
0x1e8d   : > { %v5750_v21 = vpop.xlane.xlu0 %5749  ;;  %v5766_v33 = vsel %vm1117_vm6, %v14543_v40, 0.0 }
0x1e8e   : > { %v14547_v59 = vpop.eup %11919  ;;  %v5755_v17 = vsub.f32 %v14450_v49, %v5750_v21  ;;  %5767 = vadd.xlane.f32.xlu1 %v5766_v33 }
0x1e8f   : > { %v5769_v43 = vsel %vm1117_vm6, %v14547_v59, 0.0 }
0x1e90   : > { %v5764_v2 = vmul.f32 1.442695, %v5755_v17  ;;  %5770 = vadd.xlane.f32.xlu0 %v5769_v43 }
0x1e92   : > { %11925 = vpow2.f32 %v5764_v2 }
0x1e94   : > { %v14552_v30 = vpop.eup %11921 }
0x1e95   : > { %v5772_v54 = vsel %vm1117_vm6, %v14552_v30, 0.0 }
0x1e96   : > { %v14556_v38 = vpop.eup %11923  ;;  %5773 = vadd.xlane.f32.xlu0 %v5772_v54 }
0x1e97   : > { %v5961_v26 = vpop.xlane.xlu0 %5960  ;;  %v5775_v49 = vsel %vm1117_vm6, %v14556_v38, 0.0 }
0x1e98   : > { %v5972_v31 = vsub.f32 %v14455_v51, %v5961_v26 }
0x1e9a   : > { %v5978_v50 = vmul.f32 1.442695, %v5972_v31  ;;  %5776 = vadd.xlane.f32.xlu0 %v5775_v49 }
0x1e9b   : > { %v14575_v46 = vpop.permute.xlu0 %5796 }
0x1e9c   : > { %v14561_v12 = vpop.eup %11925  ;;  %11927 = vpow2.f32 %v5978_v50 }
0x1e9d   : > { %v5778_v41 = vsel %vm1117_vm6, %v14561_v12, 0.0 }
0x1e9e   : > { %5779 = vadd.xlane.f32.xlu0 %v5778_v41 }
0x1e9f   : > { %5798 = vrot.lane.b32.xlu1 %v14259_v4, %s16068_s25 }
0x1ea6   : > { %v14567_v56 = vpop.eup %11927 }
0x1ea7   : > { %v5989_v51 = vsel %vm1117_vm6, %v14567_v56, 0.0 }
0x1ea8   : > { %5990 = vadd.xlane.f32.xlu0 %v5989_v51 }
0x1ebc   : > { %v5958_v63 = vpop.xlane.xlu1 %5957 }
0x1ebd   : > { %v5971_v52 = vsub.f32 %v14464_v35, %v5958_v63 }
0x1ebf   : > { %v5976_v55 = vmul.f32 1.442695, %v5971_v52 }
0x1ec0   : > { %v5964_v45 = vpop.xlane.xlu1 %5963 }
0x1ec1   : > { %11929 = vpow2.f32 %v5976_v55  ;;  %v5973_v19 = vsub.f32 %v14467_v60, %v5964_v45 }
0x1ec3   : > { %v5980_v32 = vmul.f32 1.442695, %v5973_v19 }
0x1ec4   : > { %v5970_v17 = vpop.xlane.xlu1 %5969 }
0x1ec5   : > { %11931 = vpow2.f32 %v5980_v32  ;;  %v5975_v2 = vsub.f32 %v14472_v20, %v5970_v17 }
0x1ec7   : > { %v5984_v26 = vmul.f32 1.442695, %v5975_v2 }
0x1ecb   : > { %v14577_v53 = vpop.eup %11929 }
0x1ecc   : > { %v5967_v7 = vpop.xlane.xlu0 %5966  ;;  %v5986_v28 = vsel %vm1117_vm6, %v14577_v53, 0.0 }
0x1ecd   : > { %v5974_v22 = vsub.f32 %v14479_v16, %v5967_v7  ;;  %5987 = vadd.xlane.f32.xlu1 %v5986_v28 }
0x1ecf   : > { %v14582_v58 = vpop.eup %11931  ;;  %v5982_v35 = vmul.f32 1.442695, %v5974_v22 }
0x1ed0   : > { %v5992_v21 = vsel %vm1117_vm6, %v14582_v58, 0.0 }
0x1ed1   : > { %11933 = vpow2.f32 %v5982_v35  ;;  %5993 = vadd.xlane.f32.xlu0 %v5992_v21 }
0x1edb   : > { %v14586_v60 = vpop.eup %11933 }
0x1edc   : > { %v5995_v33 = vsel %vm1117_vm6, %v14586_v60, 0.0 }
0x1edd   : > { %5996 = vadd.xlane.f32.xlu1 %v5995_v33 }
0x1ee7   : > { %6014 = vrot.lane.b32.xlu0 %v14249_v36, %s16069_s30 }
0x1eeb   : > { %v5325_v16 = vpop.xlane.xlu1 %5324 }
0x1eec   : > { %11935 = vrcp.f32 %v5325_v16 }
0x1eed   : > { %v5328_v43 = vpop.xlane.xlu0 %5327 }
0x1eee   : > { %11937 = vrcp.f32 %v5328_v43  ;;  %6016 = vrot.lane.b32.xlu1 %v14253_v0, %s16069_s30 }
0x1ef2   : > { %6018 = vrot.lane.b32.xlu1 %v14259_v4, %s16069_s30 }
0x1ef3   : > { %v5331_v54 = vpop.xlane.xlu0 %5330 }
0x1ef4   : > { %11939 = vrcp.f32 %v5331_v54 }
0x1ef5   : > { %v5334_v31 = vpop.xlane.xlu1 %5333 }
0x1ef6   : > { %v11936_v49 = vpop.eup %11935  ;;  %11941 = vrcp.f32 %v5334_v31 }
0x1ef7   : > { %11943 = vpow2.f32 %v5984_v26  ;;  %v5343_v36 = vmul.f32 %v11936_v49, %v14493_v3 }
0x1ef8   : > { %v11938_v50 = vpop.eup %11937 }
0x1ef9   : > { %v5344_v41 = vmul.f32 %v11938_v50, %v14497_v23 }
0x1efb   : > { %v5348_v51 = vpack.c.bf16 %v5344_v41, %v5343_v36  ;;  %v5337_v63 = vpop.xlane.xlu0 %5336 }
0x1efc   : > { %11945 = vrcp.f32 %v5337_v63 }
0x1efd   : > { %10782 = vmatmul.mubr.msk.bf16.vlgmr.msra.gmra.mrb[212].mxu1 %vm1117_vm6, %v5348_v51 }
0x1efe   : > { %v11940_v0 = vpop.eup %11939  ;;  %10812 = vmatpush3.bf16.msra.mxu1 %v14487_v62  ;;  %10785 = vmatprep.mubr.msk.bf16.mxu1 %vm12211_vm1, %v12210_v1  ;;  %v5592_v62 = vsel %vm1193_vm5, %v14485_v61, 0 }
0x1eff   : > { %10813 = vmatprep.subr.bf16.mxu1 %v12210_v1  ;;  %v5345_v20 = vmul.f32 %v11940_v0, %v14502_v5 }
0x1f00   : > { %v11942_v4 = vpop.eup %11941 }
0x1f01   : > { %v5346_v3 = vmul.f32 %v11942_v4, %v14506_v27  ;;  %v14606_v52 = vpop.eup %11943 }
0x1f02   : > { %10814 = vmatpush3.bf16.msra.mxu1 %v14483_v44  ;;  %v5998_v5 = vsel %vm1117_vm6, %v14606_v52, 0.0 }
0x1f03   : > { %v5548_v23 = vpop.xlane.xlu1 %5547  ;;  %10815 = vmatprep.subr.bf16.mxu1 %v12210_v1  ;;  %v5349_v55 = vpack.c.bf16 %v5346_v3, %v5345_v20 }
0x1f04   : > { %11947 = vrcp.f32 %v5548_v23 }
0x1f05   : > { %v5551_v45 = vpop.xlane.xlu0 %5550  ;;  %10786 = vmatmul.mubr.msk.bf16.gmra.mrb[216].mxu1 %vm1117_vm6, %v5349_v55 }
0x1f06   : > { %v11946_v19 = vpop.eup %11945  ;;  %11949 = vrcp.f32 %v5551_v45  ;;  %10816 = vmatpush3.bf16.msra.mxu1 %v5592_v62  ;;  %5999 = vadd.xlane.f32.xlu0 %v5998_v5 }
0x1f07   : > { %10789 = vmatprep.mubr.msk.bf16.mxu1 %vm12211_vm1, %v12210_v1  ;;  %v5347_v44 = vmul.f32 %v11946_v19, %v14512_v47  ;;  %10847 = vmatprep.subr.bf16.mxu1 %v12210_v1 }
0x1f09   : > { %v5350_v32 = vpack.c.bf16 %v5347_v44, %v5347_v44 }
0x1f0b   : > { %v5554_v27 = vpop.xlane.xlu0 %5553 }
0x1f0c   : > { %11951 = vrcp.f32 %v5554_v27 }
0x1f0d   : > { %10790 = vmatmul.mubr.msk.bf16.gmra.mrb[220].mxu1 %vm1117_vm6, %v5350_v32 }
0x1f0e   : > { %v11948_v61 = vpop.eup %11947  ;;  %10817 = vmatprep.mubr.msk.bf16.mxu1 %vm12211_vm1, %v12210_v1 }
0x1f0f   : > { %v5557_v7 = vpop.xlane.xlu0 %5556  ;;  %v5566_v22 = vmul.f32 %v11948_v61, %v14518_v18 }
0x1f10   : > { %v11950_v28 = vpop.eup %11949  ;;  %11953 = vrcp.f32 %v5557_v7 }
0x1f11   : > { %v5567_v35 = vmul.f32 %v11950_v28, %v14522_v42 }
0x1f13   : > { %v5571_v21 = vpack.c.bf16 %v5567_v35, %v5566_v22  ;;  %v5560_v47 = vpop.xlane.xlu0 %5559 }
0x1f14   : > { %11955 = vrcp.f32 %v5560_v47 }
0x1f15   : > { %10818 = vmatmul.mubr.msk.bf16.vlgmr.msra.gmra.mrb[224].mxu1 %vm1117_vm6, %v5571_v21 }
0x1f16   : > { %10848 = vmatpush3.bf16.msra.mxu1 %v14571_v14  ;;  %10821 = vmatprep.mubr.msk.bf16.mxu1 %vm12211_vm1, %v12210_v1  ;;  %v11952_v33 = vpop.eup %11951 }
0x1f17   : > { %10849 = vmatprep.subr.bf16.mxu1 %v12210_v1  ;;  %v5568_v18 = vmul.f32 %v11952_v33, %v14527_v37 }
0x1f1a   : > { %v11954_v17 = vpop.eup %11953  ;;  %10850 = vmatpush3.bf16.msra.mxu1 %v14575_v46 }
0x1f1b   : > { %v5768_v16 = vpop.xlane.xlu1 %5767  ;;  %v5569_v42 = vmul.f32 %v11954_v17, %v14531_v15  ;;  %10851 = vmatprep.subr.bf16.mxu1 %v12210_v1 }
0x1f1c   : > { %11957 = vrcp.f32 %v5768_v16 }
0x1f1d   : > { %v5771_v43 = vpop.xlane.xlu0 %5770  ;;  %v5572_v2 = vpack.c.bf16 %v5569_v42, %v5568_v18 }
0x1f1e   : > { %v11956_v14 = vpop.eup %11955  ;;  %11959 = vrcp.f32 %v5771_v43 }
0x1f1f   : > { %10822 = vmatmul.mubr.msk.bf16.gmra.mrb[228].mxu1 %vm1117_vm6, %v5572_v2  ;;  %v5799_v54 = vpop.permute.xlu1 %5798  ;;  %v5570_v37 = vmul.f32 %v11956_v14, %v14537_v29 }
0x1f20   : > { %v5812_v26 = vsel %vm1193_vm5, %v5799_v54, 0  ;;  %10825 = vmatprep.mubr.msk.bf16.mxu1 %vm12211_vm1, %v12210_v1 }
0x1f21   : > { %10852 = vmatpush3.bf16.msra.mxu1 %v5812_v26  ;;  %v5573_v46 = vpack.c.bf16 %v5570_v37, %v5570_v37 }
0x1f22   : > { %10883 = vmatprep.subr.bf16.mxu1 %v12210_v1 }
0x1f23   : > { %v5774_v15 = vpop.xlane.xlu0 %5773 }
0x1f24   : > { %11961 = vrcp.f32 %v5774_v15 }
0x1f26   : > { %v11958_v31 = vpop.eup %11957 }
0x1f27   : > { %v5777_v49 = vpop.xlane.xlu0 %5776  ;;  %10826 = vmatmul.mubr.msk.bf16.gmra.mrb[232].mxu1 %vm1117_vm6, %v5573_v46  ;;  %v5786_v41 = vmul.f32 %v11958_v31, %v14543_v40 }
0x1f28   : > { %v11960_v50 = vpop.eup %11959  ;;  %11963 = vrcp.f32 %v5777_v49  ;;  %10853 = vmatprep.mubr.msk.bf16.mxu1 %vm12211_vm1, %v12210_v1 }
0x1f29   : > { %v5787_v36 = vmul.f32 %v11960_v50, %v14547_v59 }
0x1f2b   : > { %v5780_v51 = vpop.xlane.xlu0 %5779  ;;  %v5791_v29 = vpack.c.bf16 %v5787_v36, %v5786_v41 }
0x1f2c   : > { %11965 = vrcp.f32 %v5780_v51 }
0x1f2e   : > { %v11962_v63 = vpop.eup %11961 }
0x1f2f   : > { %10854 = vmatmul.mubr.msk.bf16.vlgmr.msra.gmra.mrb[236].mxu1 %vm1117_vm6, %v5791_v29  ;;  %v5788_v4 = vmul.f32 %v11962_v63, %v14552_v30 }
0x1f30   : > { %10857 = vmatprep.mubr.msk.bf16.mxu1 %vm12211_vm1, %v12210_v1 }
0x1f32   : > { %v11964_v0 = vpop.eup %11963 }
0x1f33   : > { %v5789_v20 = vmul.f32 %v11964_v0, %v14556_v38 }
0x1f35   : > { %v5792_v3 = vpack.c.bf16 %v5789_v20, %v5788_v4  ;;  %v5991_v55 = vpop.xlane.xlu0 %5990 }
0x1f36   : > { %v11966_v23 = vpop.eup %11965 }
0x1f37   : > { %10858 = vmatmul.mubr.msk.bf16.gmra.mrb[240].mxu1 %vm1117_vm6, %v5792_v3  ;;  %v5790_v40 = vmul.f32 %v11966_v23, %v14561_v12 }
0x1f38   : > { %10861 = vmatprep.mubr.msk.bf16.mxu1 %vm12211_vm1, %v12210_v1 }
0x1f39   : > { %v5793_v59 = vpack.c.bf16 %v5790_v40, %v5790_v40 }
0x1f3f   : > { %10862 = vmatmul.mubr.msk.bf16.gmra.mrb[244].mxu1 %vm1117_vm6, %v5793_v59 }
0x1f40   : > { %10889 = vmatprep.mubr.msk.bf16.mxu1 %vm12211_vm1, %v12210_v1 }
0x1f5a   : > { %v5988_v30 = vpop.xlane.xlu1 %5987 }
0x1f5b   : > { %11967 = vrcp.f32 %v5988_v30  ;;  %v11569_v30 = vld [vmem:[%s15994_s9 + $0x30] sm:$0xff]  }
0x1f5c   : > { %11969 = vrcp.f32 %v5991_v55  ;;  %10902 = vmatpush3.bf16.msra.mxu0 %v11569_v30 }
0x1f5d   : > { %10903 = vmatprep.subr.bf16.mxu0 %v12210_v1 }
0x1f5e   : > { %v5994_v62 = vpop.xlane.xlu0 %5993 }
0x1f62   : > { %v6015_v45 = vpop.permute.xlu0 %6014 }
0x1f63   : > { %10884 = vmatpush3.bf16.msra.mxu1 %v6015_v45 }
0x1f64   : > { %10885 = vmatprep.subr.bf16.mxu1 %v12210_v1 }
0x1f65   : > { %v11968_v5 = vpop.eup %11967 }
0x1f66   : > { %v11970_v19 = vpop.eup %11969  ;;  %v6006_v44 = vmul.f32 %v11968_v5, %v14577_v53 }
0x1f67   : > { %v6007_v32 = vmul.f32 %v11970_v19, %v14567_v56 }
0x1f69   : > { %v6011_v7 = vpack.c.bf16 %v6007_v32, %v6006_v44 }
0x1f6a   : > { %v5997_v38 = vpop.xlane.xlu1 %5996 }
0x1f6b   : > { %11971 = vrcp.f32 %v5997_v38 }
0x1f6c   : > { %11973 = vrcp.f32 %v5994_v62 }
0x1f6e   : > { %v6017_v12 = vpop.permute.xlu1 %6016 }
0x1f6f   : > { %10886 = vmatpush3.bf16.msra.mxu1 %v6017_v12 }
0x1f70   : > { %10887 = vmatprep.subr.bf16.mxu1 %v12210_v1 }
0x1f72   : > { %v6019_v27 = vpop.permute.xlu1 %6018 }
0x1f73   : > { %v6032_v61 = vsel %vm1193_vm5, %v6019_v27, 0 }
0x1f74   : > { %10888 = vmatpush3.bf16.msra.mxu1 %v6032_v61 }
0x1f75   : > { %10917 = vmatprep.subr.bf16.mxu1 %v12210_v1  ;;  %v11972_v28 = vpop.eup %11971 }
0x1f76   : > { %v11974_v22 = vpop.eup %11973  ;;  %v6009_v35 = vmul.f32 %v11972_v28, %v14586_v60 }
0x1f77   : > { %10890 = vmatmul.mubr.msk.bf16.vlgmr.msra.gmra.mrb[248].mxu1 %vm1117_vm6, %v6011_v7  ;;  %v6008_v53 = vmul.f32 %v11974_v22, %v14582_v58  ;;  %v11570_v7 = vld [vmem:[%s15994_s9 + $0x38] sm:$0xff]  }
0x1f78   : > { %10893 = vmatprep.mubr.msk.bf16.mxu1 %vm12211_vm1, %v12210_v1  ;;  %10904 = vmatpush3.bf16.msra.mxu0 %v11570_v7 }
0x1f79   : > { %v6012_v21 = vpack.c.bf16 %v6009_v35, %v6008_v53  ;;  %10933 = vmatprep.subr.bf16.mxu0 %v12210_v1 }
0x1f7f   : > { %10894 = vmatmul.mubr.msk.bf16.gmra.mrb[252].mxu1 %vm1117_vm6, %v6012_v21 }
0x1f80   : > { %10897 = vmatprep.mubr.msk.bf16.mxu1 %vm12211_vm1, %v12210_v1 }
0x1f93   : > { %v6000_v56 = vpop.xlane.xlu0 %5999 }
0x1f94   : > { %11975 = vrcp.f32 %v6000_v56 }
0x1f9e   : > { %v11976_v47 = vpop.eup %11975 }
0x1f9f   : > { %v6010_v33 = vmul.f32 %v11976_v47, %v14606_v52 }
0x1fa1   : > { %v6013_v17 = vpack.c.bf16 %v6010_v33, %v6010_v33 }
0x1fa3   : > { %10898 = vmatmul.mubr.msk.bf16.gmra.mrb[0].mxu1 %vm1117_vm6, %v6013_v17 }
0x1fa4   : > { %10921 = vmatprep.mubr.msk.bf16.mxu1 %vm12211_vm1, %v12210_v1 }
0x1fd0   : > { %v14674_v60 = vpop.f32.mrb[212].mxu1 }
0x1fd1   : > { %v10783_v58 = vpop.f32.mrb[213].mxu1 }
0x1fd2   : > { %v14676_v16 = vpop.f32.mrb[214].mxu1 }
0x1fd3   : > { %v10784_v18 = vpop.f32.mrb[215].mxu1 }
0x1fd8   : > { %v14678_v42 = vpop.f32.mrb[216].mxu1 }
0x1fd9   : > { %v10787_v43 = vpop.f32.mrb[217].mxu1 }
0x1fda   : > { %v14680_v2 = vpop.f32.mrb[218].mxu1 }
0x1fdb   : > { %v10788_v14 = vpop.f32.mrb[219].mxu1 }
0x1fe0   : > { %v14682_v54 = vpop.f32.mrb[220].mxu1 }
0x1fe1   : > { %v10791_v52 = vpop.f32.mrb[221].mxu1 }
0x1fe2   : > { %v5424_v26 = vpop.f32.mrb[222].mxu1 }
0x1fe3   : > { %v10792_v37 = vpop.f32.mrb[223].mxu1 }
0x1fe8   : > { %v5628_v15 = vpop.f32.mrb[224].mxu1 }
0x1fe9   : > { %v10819_v46 = vpop.f32.mrb[225].mxu1 }
0x1fea   : > { %v5631_v31 = vpop.f32.mrb[226].mxu1 }
0x1feb   : > { %v11439_v49 = vpack.i.bf16 %v5631_v31, %v5628_v15  ;;  %v10820_v50 = vpop.f32.mrb[227].mxu1 }
0x1fed   : > { %11440 = vrot.lane.b32.xlu0 %v11439_v49, %s16070_s0 }
0x1ff2   : > { %v5636_v36 = vpop.f32.mrb[228].mxu1 }
0x1ff3   : > { %v10823_v41 = vpop.f32.mrb[229].mxu1 }
0x1ff4   : > { %v5639_v51 = vpop.f32.mrb[230].mxu1 }
0x1ff5   : > { %v11444_v29 = vpack.i.bf16 %v5639_v51, %v5636_v36  ;;  %v10824_v63 = vpop.f32.mrb[231].mxu1 }
0x1ff7   : > { %11445 = vrot.lane.b32.xlu1 %v11444_v29, %s16070_s0 }
0x1ffa   : > { %v5644_v0 = vpop.f32.mrb[232].mxu1 }
0x1ffb   : > { %v10827_v4 = vpop.f32.mrb[233].mxu1 }
0x1ffc   : > { %v5647_v20 = vpop.f32.mrb[234].mxu1 }
0x1ffd   : > { %v10828_v3 = vpop.f32.mrb[235].mxu1 }
0x2002   : > { %v5848_v23 = vpop.f32.mrb[236].mxu1 }
0x2003   : > { %v10855_v40 = vpop.f32.mrb[237].mxu1 }
0x2004   : > { %v5851_v59 = vpop.f32.mrb[238].mxu1 }
0x2005   : > { %v11449_v55 = vpack.i.bf16 %v5851_v59, %v5848_v23  ;;  %v10856_v62 = vpop.f32.mrb[239].mxu1 }
0x2007   : > { %11450 = vrot.lane.b32.xlu1 %v11449_v55, %s16071_s27 }
0x200a   : > { %v5856_v45 = vpop.f32.mrb[240].mxu1 }
0x200b   : > { %v10859_v38 = vpop.f32.mrb[241].mxu1 }
0x200c   : > { %v5859_v5 = vpop.f32.mrb[242].mxu1 }
0x200d   : > { %v11459_v12 = vpack.i.bf16 %v5859_v5, %v5856_v45  ;;  %v10860_v19 = vpop.f32.mrb[243].mxu1 }
0x2012   : > { %v5864_v44 = vpop.f32.mrb[244].mxu1 }
0x2013   : > { %6123 = vrot.lane.b32.xlu0 %v5864_v44, %s16071_s27  ;;  %v10863_v27 = vpop.f32.mrb[245].mxu1 }
0x2014   : > { %v5867_v32 = vpop.f32.mrb[246].mxu1 }
0x2015   : > { %v10864_v61 = vpop.f32.mrb[247].mxu1 }
0x204a   : > { %v6068_v28 = vpop.f32.mrb[248].mxu1 }
0x204b   : > { %v10891_v22 = vpop.f32.mrb[249].mxu1 }
0x204c   : > { %v6071_v35 = vpop.f32.mrb[250].mxu1 }
0x204d   : > { %v11454_v53 = vpack.i.bf16 %v6071_v35, %v6068_v28  ;;  %v10892_v21 = vpop.f32.mrb[251].mxu1 }
0x204f   : > { %11455 = vrot.lane.b32.xlu1 %v11454_v53, %s16072_s28  ;;  %v9645_v53 = vld [vmem:[%s16080_s22 + $0x3] ss:$0 sm:$0xff] }
0x2052   : > { %v6076_v56 = vpop.f32.mrb[252].mxu1 }
0x2053   : > { %11460 = vrot.lane.b32.xlu1 %v11459_v12, %s16071_s27  ;;  %v10895_v47 = vpop.f32.mrb[253].mxu1 }
0x2054   : > { %v6079_v33 = vpop.f32.mrb[254].mxu1 }
0x2055   : > { %v11464_v17 = vpack.i.bf16 %v6079_v33, %v6076_v56  ;;  %v10896_v58 = vpop.f32.mrb[255].mxu1 }
0x2057   : > { %11465 = vrot.lane.b32.xlu1 %v11464_v17, %s16072_s28 }
0x205b   : > { %6103 = vrot.lane.b32.xlu1 %v5644_v0, %s16070_s0 }
0x205f   : > { %v11441_v37 = vpop.permute.xlu0 %11440 }
0x2060   : > { %v11443_v46 = vunpack.i.h.bf16 %v11441_v37  ;;  %v11442_v31 = vunpack.i.l.bf16 %v11441_v37 }
0x2062   : > { %v6151_v41 = vsel %vm1042_vm4, %v14676_v16, %v11443_v46  ;;  %v6150_v51 = vsel %vm1042_vm4, %v14674_v60, %v11442_v31 }
0x2069   : > { %v11446_v26 = vpop.permute.xlu1 %11445 }
0x206a   : > { %v11448_v59 = vunpack.i.h.bf16 %v11446_v26  ;;  %v11447_v55 = vunpack.i.l.bf16 %v11446_v26 }
0x206c   : > { %v6153_v16 = vsel %vm1042_vm4, %v14680_v2, %v11448_v59  ;;  %v6152_v45 = vsel %vm1042_vm4, %v14678_v42, %v11447_v55 }
0x2076   : > { %v6084_v18 = vpop.f32.mrb[0].mxu1 }
0x2077   : > { %6143 = vrot.lane.b32.xlu1 %v6084_v18, %s16072_s28  ;;  %v10899_v43 = vpop.f32.mrb[1].mxu1 }
0x2078   : > { %v6087_v14 = vpop.f32.mrb[2].mxu1 }
0x2079   : > { %v10900_v52 = vpop.f32.mrb[3].mxu1  ;;  %v11451_v15 = vpop.permute.xlu1 %11450 }
0x207a   : > { %v11453_v49 = vunpack.i.h.bf16 %v11451_v15  ;;  %v11452_v50 = vunpack.i.l.bf16 %v11451_v15 }
0x207c   : > { %v6156_v0 = vsel %vm1981_vm7, %v6151_v41, %v11453_v49  ;;  %v6155_v4 = vsel %vm1981_vm7, %v6150_v51, %v11452_v50 }
0x2085   : > { %v6124_v61 = vpop.permute.xlu0 %6123 }
0x20c1   : > { %v11456_v36 = vpop.permute.xlu1 %11455 }
0x20c2   : > { %v11458_v29 = vunpack.i.h.bf16 %v11456_v36  ;;  %v11457_v63 = vunpack.i.l.bf16 %v11456_v36 }
0x20c4   : > { %v6160_v20 = vsel %vm1987_vm8, %v6155_v4, %v11457_v63  ;;  %v6161_v3 = vsel %vm1987_vm8, %v6156_v0, %v11458_v29 }
0x20c5   : > { %v6165_v23 = vpack.c.bf16 %v6161_v3, %v6160_v20  ;;  %v11461_v40 = vpop.permute.xlu1 %11460 }
0x20c6   : > { %v11463_v62 = vunpack.i.h.bf16 %v11461_v40  ;;  %v11462_v30 = vunpack.i.l.bf16 %v11461_v40 }
0x20c7   : > { %10906 = vmatmul.mubr.msk.bf16.vlgmr.msra.gmra.mrb[252].mxu0 %vm799_vm3, %v6165_v23 }
0x20c8   : > { %10909 = vmatprep.mubr.msk.bf16.mxu0 %vm12211_vm1, %v12210_v1  ;;  %v6157_v12 = vsel %vm1981_vm7, %v6152_v45, %v11462_v30  ;;  %v6158_v19 = vsel %vm1981_vm7, %v6153_v16, %v11463_v62 }
0x20c9   : > { %v11466_v60 = vpop.permute.xlu1 %11465 }
0x20ca   : > { %v11468_v38 = vunpack.i.h.bf16 %v11466_v60  ;;  %v11467_v5 = vunpack.i.l.bf16 %v11466_v60 }
0x20cc   : > { %v6162_v44 = vsel %vm1987_vm8, %v6157_v12, %v11467_v5  ;;  %v6163_v27 = vsel %vm1987_vm8, %v6158_v19, %v11468_v38 }
0x20cd   : > { %v6166_v32 = vpack.c.bf16 %v6163_v27, %v6162_v44  ;;  %v6104_v2 = vpop.permute.xlu1 %6103 }
0x20ce   : > { %v6154_v42 = vsel %vm1042_vm4, %v14682_v54, %v6104_v2 }
0x20cf   : > { %10910 = vmatmul.mubr.msk.bf16.gmra.mrb[0].mxu0 %vm799_vm3, %v6166_v32  ;;  %v6159_v7 = vsel %vm1981_vm7, %v6154_v42, %v6124_v61 }
0x20d0   : > { %10913 = vmatprep.mubr.msk.bf16.mxu0 %vm12211_vm1, %v12210_v1 }
0x20e9   : > { %v6144_v28 = vpop.permute.xlu1 %6143 }
0x20ea   : > { %v6164_v22 = vsel %vm1987_vm8, %v6159_v7, %v6144_v28  ;;  %v11571_v28 = vld [vmem:[%s15993_s8 + $0x40] sm:$0xff]  }
0x20eb   : > { %v6167_v35 = vpack.c.bf16 %v6164_v22, %v6164_v22  ;;  %10918 = vmatpush3.bf16.msra.mxu1 %v11571_v28  ;;  %v11572_v22 = vld [vmem:[%s15993_s8 + $0x48] sm:$0xff]  }
0x20ec   : > { %10919 = vmatprep.subr.bf16.mxu1 %v12210_v1 }
0x20ed   : > { %10914 = vmatmul.mubr.msk.bf16.gmra.mrb[4].mxu0 %vm799_vm3, %v6167_v35 }
0x20ee   : > { %10939 = vmatprep.mubr.msk.bf16.mxu0 %vm12211_vm1, %v12210_v1 }
0x20ef   : > { %10920 = vmatpush3.bf16.msra.mxu1 %v11572_v22 }
0x20f0   : > { %10951 = vmatprep.subr.bf16.mxu1 %v12210_v1 }
0x219a   : > { %v6236_v21 = vpop.f32.mrb[252].mxu0 }
0x219b   : > { %v6237_v56 = vadd.f32 %v9645_v53, %v6236_v21  ;;  %v10907_v47 = vpop.f32.mrb[253].mxu0 }
0x219c   : > { %v6239_v54 = vpop.f32.mrb[254].mxu0 }
0x219d   : > { %v14734_v33 = vadd.f32 %v6237_v56, %v14178_v25  ;;  %v6240_v17 = vadd.f32 %v9645_v53, %v6239_v54  ;;  %v10908_v58 = vpop.f32.mrb[255].mxu0 }
0x219f   : > { %v14737_v18 = vadd.f32 %v6240_v17, %v14181_v39  ;;  %v6263_v43 = vsel %vm799_vm3, %v14734_v33, 0.0 }
0x21a0   : > { %6264 = vadd.xlane.f32.xlu0 %v6263_v43 }
0x21a1   : > { %v6266_v14 = vsel %vm799_vm3, %v14737_v18, 0.0 }
0x21a2   : > { %6267 = vadd.xlane.f32.xlu1 %v6266_v14  ;;  %v6244_v52 = vpop.f32.mrb[0].mxu0 }
0x21a3   : > { %v6245_v26 = vadd.f32 %v9645_v53, %v6244_v52  ;;  %v10911_v37 = vpop.f32.mrb[1].mxu0 }
0x21a4   : > { %v6247_v15 = vpop.f32.mrb[2].mxu0 }
0x21a5   : > { %v14744_v25 = vadd.f32 %v6245_v26, %v14188_v9  ;;  %v6248_v46 = vadd.f32 %v9645_v53, %v6247_v15  ;;  %v10912_v31 = vpop.f32.mrb[3].mxu0 }
0x21a7   : > { %v14747_v39 = vadd.f32 %v6248_v46, %v14191_v48  ;;  %v6269_v49 = vsel %vm799_vm3, %v14744_v25, 0.0 }
0x21a8   : > { %6270 = vadd.xlane.f32.xlu0 %v6269_v49 }
0x21a9   : > { %v6272_v50 = vsel %vm799_vm3, %v14747_v39, 0.0 }
0x21ac   : > { %6273 = vadd.xlane.f32.xlu0 %v6272_v50 }
0x21c0   : > { %v6252_v36 = vpop.f32.mrb[4].mxu0 }
0x21c1   : > { %v6253_v41 = vadd.f32 %v9645_v53, %v6252_v36  ;;  %v10915_v51 = vpop.f32.mrb[5].mxu0 }
0x21c2   : > { %v6255_v29 = vpop.f32.mrb[6].mxu0 }
0x21c3   : > { %v14754_v9 = vadd.f32 %v6253_v41, %v14198_v13  ;;  %v10916_v63 = vpop.f32.mrb[7].mxu0 }
0x21c5   : > { %v6275_v48 = vsel %vm799_vm3, %v14754_v9, 0.0 }
0x21c6   : > { %6276 = vadd.xlane.f32.xlu1 %v6275_v48 }
0x222d   : > { %v6265_v0 = vpop.xlane.xlu0 %6264 }
0x222e   : > { %v6278_v4 = vmul.f32 0.03125, %v6265_v0 }
0x222f   : > { %v6268_v20 = vpop.xlane.xlu1 %6267 }
0x2230   : > { %v6283_v3 = vsub.f32 %v14734_v33, %v6278_v4  ;;  %v6279_v23 = vmul.f32 0.03125, %v6268_v20 }
0x2232   : > { %v6284_v40 = vsub.f32 %v14737_v18, %v6279_v23  ;;  %v6288_v59 = vmul.f32 %v6283_v3, %v6283_v3 }
0x2234   : > { %v6293_v55 = vsel %vm799_vm3, %v6288_v59, 0.0  ;;  %v6289_v62 = vmul.f32 %v6284_v40, %v6284_v40 }
0x2235   : > { %v6271_v30 = vpop.xlane.xlu0 %6270  ;;  %6294 = vadd.xlane.f32.xlu0 %v6293_v55 }
0x2236   : > { %v6280_v13 = vmul.f32 0.03125, %v6271_v30  ;;  %v6296_v60 = vsel %vm799_vm3, %v6289_v62, 0.0 }
0x2237   : > { %6297 = vadd.xlane.f32.xlu1 %v6296_v60 }
0x2238   : > { %v6285_v16 = vsub.f32 %v14744_v25, %v6280_v13 }
0x2239   : > { %v6274_v45 = vpop.xlane.xlu0 %6273 }
0x223a   : > { %v6281_v38 = vmul.f32 0.03125, %v6274_v45  ;;  %v6290_v5 = vmul.f32 %v6285_v16, %v6285_v16 }
0x223c   : > { %v6286_v12 = vsub.f32 %v14747_v39, %v6281_v38  ;;  %v6299_v19 = vsel %vm799_vm3, %v6290_v5, 0.0 }
0x223d   : > { %6300 = vadd.xlane.f32.xlu0 %v6299_v19 }
0x223e   : > { %v6291_v44 = vmul.f32 %v6286_v12, %v6286_v12 }
0x2240   : > { %v6302_v27 = vsel %vm799_vm3, %v6291_v44, 0.0 }
0x2241   : > { %6303 = vadd.xlane.f32.xlu1 %v6302_v27 }
0x2252   : > { %6328 = vrot.lane.b32.xlu1 %v14220_v8, %s16081_s10 }
0x2253   : > { %v6277_v32 = vpop.xlane.xlu1 %6276 }
0x2254   : > { %v6282_v2 = vmul.f32 0.03125, %v6277_v32 }
0x2256   : > { %v6287_v42 = vsub.f32 %v14754_v9, %v6282_v2 }
0x2258   : > { %v6292_v61 = vmul.f32 %v6287_v42, %v6287_v42 }
0x225a   : > { %v6305_v7 = vsel %vm799_vm3, %v6292_v61, 0.0 }
0x225b   : > { %6306 = vadd.xlane.f32.xlu0 %v6305_v7 }
0x2271   : > { %6337 = vrot.lane.b32.xlu0 %v14233_v10, %s16077_s24 }
0x22c2   : > { %v6295_v8 = vpop.xlane.xlu0 %6294 }
0x22c3   : > { %v6308_v53 = vmul.f32 0.03125, %v6295_v8 }
0x22c4   : > { %v6298_v35 = vpop.xlane.xlu1 %6297 }
0x22c5   : > { %v6309_v21 = vmul.f32 0.03125, %v6298_v35  ;;  %v6313_v47 = vadd.f32 1e-05, %v6308_v53 }
0x22c7   : > { %v6314_v17 = vadd.f32 1e-05, %v6309_v21  ;;  %11977 = vrsqrt.f32 %v6313_v47 }
0x22c9   : > { %11979 = vrsqrt.f32 %v6314_v17 }
0x22ca   : > { %v6301_v56 = vpop.xlane.xlu0 %6300 }
0x22cb   : > { %v6310_v58 = vmul.f32 0.03125, %v6301_v56 }
0x22cd   : > { %v6315_v14 = vadd.f32 1e-05, %v6310_v58 }
0x22ce   : > { %v6304_v54 = vpop.xlane.xlu1 %6303 }
0x22cf   : > { %v6311_v43 = vmul.f32 0.03125, %v6304_v54  ;;  %11981 = vrsqrt.f32 %v6315_v14 }
0x22d1   : > { %v6316_v52 = vadd.f32 1e-05, %v6311_v43  ;;  %v11978_v26 = vpop.eup %11977 }
0x22d2   : > { %v6323_v15 = vmul.f32 %v11978_v26, %v6283_v3  ;;  %v6329_v46 = vpop.permute.xlu1 %6328 }
0x22d3   : > { %11983 = vrsqrt.f32 %v6316_v52  ;;  %v11980_v37 = vpop.eup %11979 }
0x22d4   : > { %v6324_v10 = vmul.f32 %v11980_v37, %v6284_v40  ;;  %v6331_v41 = vmul.f32 %v6329_v46, %v6323_v15 }
0x22d6   : > { %v6332_v51 = vmul.f32 %v6329_v46, %v6324_v10 }
0x22d9   : > { %v11982_v49 = vpop.eup %11981 }
0x22da   : > { %v6325_v63 = vmul.f32 %v11982_v49, %v6285_v16 }
0x22dc   : > { %v6333_v59 = vmul.f32 %v6329_v46, %v6325_v63 }
0x22dd   : > { %v11984_v36 = vpop.eup %11983 }
0x22de   : > { %v6326_v0 = vmul.f32 %v11984_v36, %v6286_v12 }
0x22e0   : > { %v6334_v55 = vmul.f32 %v6329_v46, %v6326_v0 }
0x22e8   : > { %v6307_v31 = vpop.xlane.xlu0 %6306 }
0x22e9   : > { %v6312_v50 = vmul.f32 0.03125, %v6307_v31 }
0x22eb   : > { %v6317_v29 = vadd.f32 1e-05, %v6312_v50 }
0x22ec   : > { %v6338_v48 = vpop.permute.xlu0 %6337 }
0x22ed   : > { %11985 = vrsqrt.f32 %v6317_v29  ;;  %v6340_v4 = vadd.f32 %v6338_v48, %v6331_v41  ;;  %v6341_v20 = vadd.f32 %v6338_v48, %v6332_v51  ;;  %v6342_v3 = vadd.f32 %v6338_v48, %v6333_v59 }
0x22ee   : > { %v6343_v40 = vadd.f32 %v6338_v48, %v6334_v55 }
0x22ef   : > { %v6345_v23 = vpack.c.bf16 %v6341_v20, %v6340_v4 }
0x22f0   : > { %v6346_v30 = vpack.c.bf16 %v6343_v40, %v6342_v3 }
0x22f1   : > { %10922 = vmatmul.mubr.msk.bf16.vlgmr.msra.gmra.mrb[4].mxu1 %vm799_vm3, %v6345_v23 }
0x22f2   : > { %10925 = vmatprep.mubr.msk.bf16.mxu1 %vm12211_vm1, %v12210_v1 }
0x22f7   : > { %v11986_v62 = vpop.eup %11985 }
0x22f8   : > { %v6327_v13 = vmul.f32 %v11986_v62, %v6287_v42 }
0x22f9   : > { %10926 = vmatmul.mubr.msk.bf16.gmra.mrb[8].mxu1 %vm799_vm3, %v6346_v30 }
0x22fa   : > { %v6335_v60 = vmul.f32 %v6329_v46, %v6327_v13  ;;  %10929 = vmatprep.mubr.msk.bf16.mxu1 %vm12211_vm1, %v12210_v1 }
0x22fc   : > { %v6344_v16 = vadd.f32 %v6338_v48, %v6335_v60 }
0x22fe   : > { %v6347_v45 = vpack.c.bf16 %v6344_v16, %v6344_v16 }
0x2301   : > { %10930 = vmatmul.mubr.msk.bf16.gmra.mrb[12].mxu1 %vm799_vm3, %v6347_v45 }
0x2302   : > { %10957 = vmatprep.mubr.msk.bf16.mxu1 %vm12211_vm1, %v12210_v1 }
0x23c4   : > { %v6408_v38 = vpop.f32.mrb[4].mxu1 }
0x23c5   : > { %v10923_v5 = vpop.f32.mrb[5].mxu1  ;;  %v6430_v19 = vmul.f32 0.35355338, %v6408_v38 }
0x23c6   : > { %v6411_v12 = vpop.f32.mrb[6].mxu1 }
0x23c7   : > { %v6431_v44 = vmul.f32 0.35355338, %v6411_v12  ;;  %v14789_v27 = vpack.c.bf16 %v6411_v12, %v6408_v38  ;;  %v10924_v32 = vpop.f32.mrb[7].mxu1 }
0x23c9   : > { %v6435_v2 = vpack.c.bf16 %v6431_v44, %v6430_v19  ;;  %6444 = vrot.lane.b32.xlu1 %v14789_v27, %s16079_s1 }
0x23cc   : > { %v6416_v42 = vpop.f32.mrb[8].mxu1 }
0x23cd   : > { %v10927_v61 = vpop.f32.mrb[9].mxu1  ;;  %v6432_v28 = vmul.f32 0.35355338, %v6416_v42 }
0x23ce   : > { %v6419_v7 = vpop.f32.mrb[10].mxu1  ;;  %v14905_v61 = vld [vmem:[%s12607_s4 + $0x28] sm:$0xff] }
0x23cf   : > { %v6433_v22 = vmul.f32 0.35355338, %v6419_v7  ;;  %v14793_v8 = vpack.c.bf16 %v6419_v7, %v6416_v42  ;;  %v10928_v35 = vpop.f32.mrb[11].mxu1 }
0x23d0   : > { %v14911_v35 = vld [vmem:[%s12607_s4 + $0x30] sm:$0xff] }
0x23d1   : > { %v6436_v53 = vpack.c.bf16 %v6433_v22, %v6432_v28  ;;  %6446 = vrot.lane.b32.xlu1 %v14793_v8, %s16079_s1 }
0x23d4   : > { %v6424_v21 = vpop.f32.mrb[12].mxu1 }
0x23d5   : > { %v14797_v56 = vpack.c.bf16 %v6424_v21, %v6424_v21  ;;  %6667 = vrot.lane.b32.xlu1 %v14789_v27, %s16073_s5  ;;  %v10931_v47 = vpop.f32.mrb[13].mxu1  ;;  %v6434_v58 = vmul.f32 0.35355338, %v6424_v21 }
0x23d6   : > { %v6427_v54 = vpop.f32.mrb[14].mxu1 }
0x23d7   : > { %6448 = vrot.lane.b32.xlu0 %v14797_v56, %s16079_s1  ;;  %v10932_v17 = vpop.f32.mrb[15].mxu1  ;;  %v6437_v43 = vpack.c.bf16 %v6434_v58, %v6434_v58  ;;  %v14921_v58 = vld [vmem:[%s12607_s4 + $0x38] sm:$0xff] }
0x23d9   : > { %6671 = vrot.lane.b32.xlu1 %v14797_v56, %s16073_s5 }
0x23db   : > { %6669 = vrot.lane.b32.xlu0 %v14793_v8, %s16073_s5 }
0x23dd   : > { %6887 = vrot.lane.b32.xlu1 %v14789_v27, %s16075_s3 }
0x23df   : > { %6661 = vrot.lane.b32.xlu0 %v6435_v2, %s16074_s21 }
0x23e1   : > { %6889 = vrot.lane.b32.xlu1 %v14793_v8, %s16075_s3 }
0x23e3   : > { %6663 = vrot.lane.b32.xlu0 %v6436_v53, %s16074_s21 }
0x23e5   : > { %6891 = vrot.lane.b32.xlu1 %v14797_v56, %s16075_s3 }
0x23e7   : > { %6665 = vrot.lane.b32.xlu0 %v6437_v43, %s16074_s21 }
0x23e9   : > { %7107 = vrot.lane.b32.xlu1 %v14789_v27, %s16076_s26 }
0x23eb   : > { %6881 = vrot.lane.b32.xlu0 %v6435_v2, %s16065_s23 }
0x23ed   : > { %7109 = vrot.lane.b32.xlu1 %v14793_v8, %s16076_s26 }
0x23ef   : > { %6883 = vrot.lane.b32.xlu0 %v6436_v53, %s16065_s23 }
0x23f1   : > { %7111 = vrot.lane.b32.xlu1 %v14797_v56, %s16076_s26 }
0x23f3   : > { %6885 = vrot.lane.b32.xlu0 %v6437_v43, %s16065_s23 }
0x23f5   : > { %7103 = vrot.lane.b32.xlu1 %v6436_v53, %s16066_s29 }
0x23f7   : > { %7101 = vrot.lane.b32.xlu0 %v6435_v2, %s16066_s29 }
0x23f9   : > { %6582 = vrot.lane.b32.xlu1 %v14789_v27, %s16077_s24 }
0x23fb   : > { %7105 = vrot.lane.b32.xlu0 %v6437_v43, %s16066_s29 }
0x23fd   : > { %6586 = vrot.lane.b32.xlu1 %v14797_v56, %s16077_s24 }
0x23ff   : > { %6584 = vrot.lane.b32.xlu0 %v14793_v8, %s16077_s24 }
0x2401   : > { %6807 = vrot.lane.b32.xlu1 %v14793_v8, %s16067_s2 }
0x2403   : > { %6805 = vrot.lane.b32.xlu0 %v14789_v27, %s16067_s2 }
0x2405   : > { %6809 = vrot.lane.b32.xlu1 %v14797_v56, %s16067_s2 }
0x243b   : > { %v6445_v14 = vpop.permute.xlu1 %6444 }
0x243c   : > { %v6460_v52 = vsel %vm1042_vm4, %v6445_v14, 0 }
0x243d   : > { %10934 = vmatpush3.bf16.xpose.msra.mxu0 %v6460_v52 }
0x243e   : > { %10935 = vmatprep.subr.bf16.mxu0 %v12210_v1 }
0x2443   : > { %v6447_v26 = vpop.permute.xlu1 %6446 }
0x2444   : > { %v6463_v37 = vsel %vm1042_vm4, %v6447_v26, 0  ;;  %v14927_v26 = vld [vmem:[%s12607_s4 + $0x40] sm:$0xff] }
0x2445   : > { %10936 = vmatpush3.bf16.xpose.msra.mxu0 %v6463_v37 }
0x2446   : > { %10937 = vmatprep.subr.bf16.mxu0 %v12210_v1 }
0x2447   : > { %v6668_v15 = vpop.permute.xlu1 %6667 }
0x2448   : > { %v6683_v51 = vsel %vm1042_vm4, %v6668_v15, 0 }
0x2449   : > { %v6449_v10 = vpop.permute.xlu0 %6448 }
0x244a   : > { %v6466_v31 = vsel %vm1042_vm4, %v6449_v10, 0 }
0x244b   : > { %v6672_v46 = vpop.permute.xlu1 %6671 }
0x244c   : > { %v6689_v3 = vsel %vm1042_vm4, %v6672_v46, 0 }
0x244d   : > { %10938 = vmatpush3.bf16.xpose.msra.mxu0 %v6466_v31  ;;  %v6670_v49 = vpop.permute.xlu0 %6669 }
0x244e   : > { %10969 = vmatprep.subr.bf16.mxu0 %v12210_v1  ;;  %v6686_v4 = vsel %vm1042_vm4, %v6670_v49, 0  ;;  %v14937_v49 = vld [vmem:[%s12607_s4 + $0x48] sm:$0xff] }
0x244f   : > { %v6888_v50 = vpop.permute.xlu1 %6887 }
0x2450   : > { %v6903_v60 = vsel %vm1042_vm4, %v6888_v50, 0 }
0x2451   : > { %v6662_v36 = vpop.permute.xlu0 %6661 }
0x2453   : > { %v6890_v41 = vpop.permute.xlu1 %6889 }
0x2454   : > { %10940 = vmatmul.mubr.msk.bf16.vlgmr.msra.gmra.mrb[8].mxu0 %vm1042_vm4, %v6435_v2  ;;  %v6906_v5 = vsel %vm1042_vm4, %v6890_v41, 0 }
0x2455   : > { %10970 = vmatpush3.bf16.xpose.msra.mxu0 %v6683_v51  ;;  %v6664_v29 = vpop.permute.xlu0 %6663  ;;  %10943 = vmatprep.mubr.msk.bf16.mxu0 %vm12211_vm1, %v12210_v1 }
0x2456   : > { %10971 = vmatprep.subr.bf16.mxu0 %v12210_v1 }
0x2457   : > { %v6892_v63 = vpop.permute.xlu1 %6891 }
0x2458   : > { %v6909_v19 = vsel %vm1042_vm4, %v6892_v63, 0 }
0x2459   : > { %v6666_v48 = vpop.permute.xlu0 %6665 }
0x245b   : > { %v7108_v0 = vpop.permute.xlu1 %7107 }
0x245c   : > { %10944 = vmatmul.mubr.msk.bf16.gmra.mrb[12].mxu0 %vm1042_vm4, %v6436_v53  ;;  %v7123_v44 = vsel %vm1042_vm4, %v7108_v0, 0 }
0x245d   : > { %10972 = vmatpush3.bf16.xpose.msra.mxu0 %v6686_v4  ;;  %v6882_v20 = vpop.permute.xlu0 %6881  ;;  %10947 = vmatprep.mubr.msk.bf16.mxu0 %vm12211_vm1, %v12210_v1 }
0x245e   : > { %10973 = vmatprep.subr.bf16.mxu0 %v12210_v1 }
0x245f   : > { %v7110_v23 = vpop.permute.xlu1 %7109 }
0x2460   : > { %v7126_v32 = vsel %vm1042_vm4, %v7110_v23, 0 }
0x2461   : > { %v6884_v59 = vpop.permute.xlu0 %6883 }
0x2463   : > { %v7112_v55 = vpop.permute.xlu1 %7111 }
0x2464   : > { %10948 = vmatmul.mubr.msk.bf16.gmra.mrb[16].mxu0 %vm1042_vm4, %v6437_v43  ;;  %v7129_v2 = vsel %vm1042_vm4, %v7112_v55, 0 }
0x2465   : > { %10974 = vmatpush3.bf16.xpose.msra.mxu0 %v6689_v3  ;;  %v6886_v40 = vpop.permute.xlu0 %6885  ;;  %10975 = vmatprep.mubr.msk.bf16.mxu0 %vm12211_vm1, %v12210_v1 }
0x2466   : > { %11005 = vmatprep.subr.bf16.mxu0 %v12210_v1 }
0x2467   : > { %v7104_v62 = vpop.permute.xlu1 %7103 }
0x2469   : > { %v7102_v30 = vpop.permute.xlu0 %7101 }
0x246b   : > { %v6583_v13 = vpop.permute.xlu1 %6582 }
0x246c   : > { %10952 = vmatpush3.bf16.msra.mxu1 %v6583_v13  ;;  %10976 = vmatmul.mubr.msk.bf16.vlgmr.msra.gmra.mrb[20].mxu0 %vm1042_vm4, %v6662_v36 }
0x246d   : > { %v7106_v16 = vpop.permute.xlu0 %7105  ;;  %11006 = vmatpush3.bf16.xpose.msra.mxu0 %v6903_v60  ;;  %10953 = vmatprep.subr.bf16.mxu1 %v12210_v1 }
0x246e   : > { %10979 = vmatprep.mubr.msk.bf16.mxu0 %vm12211_vm1, %v12210_v1  ;;  %11007 = vmatprep.subr.bf16.mxu0 %v12210_v1 }
0x246f   : > { %v6587_v38 = vpop.permute.xlu1 %6586 }
0x2470   : > { %v6600_v12 = vsel %vm1193_vm5, %v6587_v38, 0 }
0x2471   : > { %v6585_v45 = vpop.permute.xlu0 %6584 }
0x2472   : > { %10954 = vmatpush3.bf16.msra.mxu1 %v6585_v45 }
0x2473   : > { %10955 = vmatprep.subr.bf16.mxu1 %v12210_v1 }
0x2474   : > { %10980 = vmatmul.mubr.msk.bf16.gmra.mrb[24].mxu0 %vm1042_vm4, %v6664_v29 }
0x2475   : > { %11008 = vmatpush3.bf16.xpose.msra.mxu0 %v6906_v5  ;;  %10983 = vmatprep.mubr.msk.bf16.mxu0 %vm12211_vm1, %v12210_v1 }
0x2476   : > { %10956 = vmatpush3.bf16.msra.mxu1 %v6600_v12  ;;  %11009 = vmatprep.subr.bf16.mxu0 %v12210_v1 }
0x2477   : > { %10987 = vmatprep.subr.bf16.mxu1 %v12210_v1 }
0x247c   : > { %10984 = vmatmul.mubr.msk.bf16.gmra.mrb[28].mxu0 %vm1042_vm4, %v6666_v48 }
0x247d   : > { %11010 = vmatpush3.bf16.xpose.msra.mxu0 %v6909_v19  ;;  %11011 = vmatprep.mubr.msk.bf16.mxu0 %vm12211_vm1, %v12210_v1 }
0x247e   : > { %11041 = vmatprep.subr.bf16.mxu0 %v12210_v1 }
0x2484   : > { %11012 = vmatmul.mubr.msk.bf16.vlgmr.msra.gmra.mrb[32].mxu0 %vm1042_vm4, %v6882_v20 }
0x2485   : > { %11042 = vmatpush3.bf16.xpose.msra.mxu0 %v7123_v44  ;;  %11015 = vmatprep.mubr.msk.bf16.mxu0 %vm12211_vm1, %v12210_v1 }
0x2486   : > { %11043 = vmatprep.subr.bf16.mxu0 %v12210_v1 }
0x248c   : > { %11016 = vmatmul.mubr.msk.bf16.gmra.mrb[36].mxu0 %vm1042_vm4, %v6884_v59 }
0x248d   : > { %11044 = vmatpush3.bf16.xpose.msra.mxu0 %v7126_v32  ;;  %11019 = vmatprep.mubr.msk.bf16.mxu0 %vm12211_vm1, %v12210_v1 }
0x248e   : > { %11045 = vmatprep.subr.bf16.mxu0 %v12210_v1 }
0x2494   : > { %11020 = vmatmul.mubr.msk.bf16.gmra.mrb[40].mxu0 %vm1042_vm4, %v6886_v40 }
0x2495   : > { %11046 = vmatpush3.bf16.xpose.msra.mxu0 %v7129_v2  ;;  %11047 = vmatprep.mubr.msk.bf16.mxu0 %vm12211_vm1, %v12210_v1 }
0x2496   : > { %11077 = vmatprep.subr.bf16.mxu0 %v12210_v1 }
0x249c   : > { %11048 = vmatmul.mubr.msk.bf16.vlgmr.msra.gmra.mrb[44].mxu0 %vm1042_vm4, %v7102_v30 }
0x249d   : > { %11051 = vmatprep.mubr.msk.bf16.mxu0 %vm12211_vm1, %v12210_v1 }
0x24a4   : > { %11052 = vmatmul.mubr.msk.bf16.gmra.mrb[48].mxu0 %vm1042_vm4, %v7104_v62 }
0x24a5   : > { %11055 = vmatprep.mubr.msk.bf16.mxu0 %vm12211_vm1, %v12210_v1 }
0x24ac   : > { %11056 = vmatmul.mubr.msk.bf16.gmra.mrb[52].mxu0 %vm1042_vm4, %v7106_v16 }
0x24ad   : > { %11081 = vmatprep.mubr.msk.bf16.mxu0 %vm12211_vm1, %v12210_v1 }
0x2527   : > { %v6502_v42 = vpop.f32.mrb[8].mxu0 }
0x2528   : > { %v14908_v7 = vadd.f32 %v14905_v61, %v6502_v42  ;;  %v10941_v28 = vpop.f32.mrb[9].mxu0 }
0x2529   : > { %v6505_v22 = vpop.f32.mrb[10].mxu0 }
0x252a   : > { %v14914_v53 = vadd.f32 %v14911_v35, %v6505_v22  ;;  %v10942_v21 = vpop.f32.mrb[11].mxu0  ;;  %v6524_v47 = vsel %vm1117_vm6, %v14908_v7, -inf }
0x252b   : > { %6525 = vmax.xlane.f32.xlu1 %v6524_v47 }
0x252c   : > { %v6527_v54 = vsel %vm1117_vm6, %v14914_v53, -inf }
0x252d   : > { %6528 = vmax.xlane.f32.xlu0 %v6527_v54 }
0x252f   : > { %v6510_v17 = vpop.f32.mrb[12].mxu0 }
0x2530   : > { %v14924_v43 = vadd.f32 %v14921_v58, %v6510_v17  ;;  %v10945_v14 = vpop.f32.mrb[13].mxu0 }
0x2531   : > { %v6513_v52 = vpop.f32.mrb[14].mxu0 }
0x2532   : > { %v14930_v37 = vadd.f32 %v14927_v26, %v6513_v52  ;;  %v10946_v15 = vpop.f32.mrb[15].mxu0  ;;  %v6530_v10 = vsel %vm1117_vm6, %v14924_v43, -inf }
0x2533   : > { %6531 = vmax.xlane.f32.xlu0 %v6530_v10 }
0x2534   : > { %v6533_v46 = vsel %vm1117_vm6, %v14930_v37, -inf }
0x2535   : > { %6534 = vmax.xlane.f32.xlu1 %v6533_v46 }
0x2537   : > { %v6518_v31 = vpop.f32.mrb[16].mxu0 }
0x2538   : > { %v14940_v50 = vadd.f32 %v14937_v49, %v6518_v31  ;;  %v10949_v36 = vpop.f32.mrb[17].mxu0 }
0x2539   : > { %v6521_v41 = vpop.f32.mrb[18].mxu0 }
0x253a   : > { %v10950_v51 = vpop.f32.mrb[19].mxu0  ;;  %v6536_v29 = vsel %vm1117_vm6, %v14940_v50, -inf }
0x253b   : > { %6537 = vmax.xlane.f32.xlu0 %v6536_v29 }
0x253f   : > { %v6725_v63 = vpop.f32.mrb[20].mxu0 }
0x2540   : > { %v14945_v48 = vadd.f32 %v14905_v61, %v6725_v63  ;;  %v10977_v0 = vpop.f32.mrb[21].mxu0 }
0x2541   : > { %v6728_v4 = vpop.f32.mrb[22].mxu0 }
0x2542   : > { %v14948_v20 = vadd.f32 %v14911_v35, %v6728_v4  ;;  %v10978_v23 = vpop.f32.mrb[23].mxu0  ;;  %v6747_v59 = vsel %vm1117_vm6, %v14945_v48, -inf }
0x2543   : > { %6748 = vmax.xlane.f32.xlu1 %v6747_v59 }
0x2544   : > { %v6750_v55 = vsel %vm1117_vm6, %v14948_v20, -inf }
0x2545   : > { %6751 = vmax.xlane.f32.xlu0 %v6750_v55 }
0x2547   : > { %v6733_v3 = vpop.f32.mrb[24].mxu0 }
0x2548   : > { %v14955_v40 = vadd.f32 %v14921_v58, %v6733_v3  ;;  %v10981_v62 = vpop.f32.mrb[25].mxu0 }
0x2549   : > { %v6736_v30 = vpop.f32.mrb[26].mxu0 }
0x254a   : > { %v14958_v13 = vadd.f32 %v14927_v26, %v6736_v30  ;;  %v10982_v60 = vpop.f32.mrb[27].mxu0  ;;  %v6753_v16 = vsel %vm1117_vm6, %v14955_v40, -inf }
0x254b   : > { %6754 = vmax.xlane.f32.xlu1 %v6753_v16 }
0x254c   : > { %v6756_v45 = vsel %vm1117_vm6, %v14958_v13, -inf }
0x254d   : > { %6757 = vmax.xlane.f32.xlu0 %v6756_v45 }
0x254f   : > { %v6741_v38 = vpop.f32.mrb[28].mxu0 }
0x2550   : > { %v14965_v5 = vadd.f32 %v14937_v49, %v6741_v38  ;;  %v10985_v12 = vpop.f32.mrb[29].mxu0 }
0x2551   : > { %v6744_v19 = vpop.f32.mrb[30].mxu0 }
0x2552   : > { %v10986_v44 = vpop.f32.mrb[31].mxu0  ;;  %v6759_v32 = vsel %vm1117_vm6, %v14965_v5, -inf }
0x2553   : > { %6760 = vmax.xlane.f32.xlu1 %v6759_v32 }
0x2557   : > { %v6945_v2 = vpop.f32.mrb[32].mxu0 }
0x2558   : > { %v14970_v42 = vadd.f32 %v14905_v61, %v6945_v2  ;;  %v11013_v28 = vpop.f32.mrb[33].mxu0 }
0x2559   : > { %v6948_v22 = vpop.f32.mrb[34].mxu0 }
0x255a   : > { %v14973_v21 = vadd.f32 %v14911_v35, %v6948_v22  ;;  %v11014_v47 = vpop.f32.mrb[35].mxu0  ;;  %v6967_v54 = vsel %vm1117_vm6, %v14970_v42, -inf }
0x255b   : > { %6968 = vmax.xlane.f32.xlu0 %v6967_v54 }
0x255c   : > { %v6970_v17 = vsel %vm1117_vm6, %v14973_v21, -inf }
0x255d   : > { %6971 = vmax.xlane.f32.xlu1 %v6970_v17 }
0x255f   : > { %v6953_v14 = vpop.f32.mrb[36].mxu0 }
0x2560   : > { %v14980_v52 = vadd.f32 %v14921_v58, %v6953_v14  ;;  %v11017_v15 = vpop.f32.mrb[37].mxu0  ;;  %v15023_v14 = vpop.permute.xlu1 %6807 }
0x2561   : > { %v6956_v10 = vpop.f32.mrb[38].mxu0 }
0x2562   : > { %v14983_v46 = vadd.f32 %v14927_v26, %v6956_v10  ;;  %v11018_v31 = vpop.f32.mrb[39].mxu0  ;;  %v6973_v36 = vsel %vm1117_vm6, %v14980_v52, -inf }
0x2563   : > { %6974 = vmax.xlane.f32.xlu0 %v6973_v36 }
0x2564   : > { %v6976_v41 = vsel %vm1117_vm6, %v14983_v46, -inf  ;;  %v15025_v15 = vpop.permute.xlu1 %6809 }
0x2565   : > { %6977 = vmax.xlane.f32.xlu1 %v6976_v41 }
0x2567   : > { %v6961_v51 = vpop.f32.mrb[40].mxu0 }
0x2568   : > { %v14990_v29 = vadd.f32 %v14937_v49, %v6961_v51  ;;  %v11021_v63 = vpop.f32.mrb[41].mxu0 }
0x2569   : > { %v6964_v0 = vpop.f32.mrb[42].mxu0 }
0x256a   : > { %v11022_v4 = vpop.f32.mrb[43].mxu0  ;;  %v6979_v23 = vsel %vm1117_vm6, %v14990_v29, -inf }
0x256b   : > { %6980 = vmax.xlane.f32.xlu0 %v6979_v23 }
0x256f   : > { %v7165_v59 = vpop.f32.mrb[44].mxu0 }
0x2570   : > { %v11049_v55 = vpop.f32.mrb[45].mxu0 }
0x2571   : > { %v7168_v3 = vpop.f32.mrb[46].mxu0 }
0x2572   : > { %v14995_v62 = vadd.f32 %v14911_v35, %v7168_v3  ;;  %v11050_v30 = vpop.f32.mrb[47].mxu0  ;;  %v15004_v35 = vadd.f32 %v14905_v61, %v7165_v59 }
0x2574   : > { %v7190_v60 = vsel %vm1117_vm6, %v14995_v62, -inf  ;;  %v7187_v22 = vsel %vm1117_vm6, %v15004_v35, -inf }
0x2575   : > { %7191 = vmax.xlane.f32.xlu0 %v7190_v60 }
0x2576   : > { %7025 = vrot.lane.b32.xlu1 %v14789_v27, %s16068_s25 }
0x2577   : > { %v7173_v16 = vpop.f32.mrb[48].mxu0 }
0x2578   : > { %v11053_v45 = vpop.f32.mrb[49].mxu0  ;;  %v15007_v28 = vadd.f32 %v14921_v58, %v7173_v16 }
0x2579   : > { %v7176_v38 = vpop.f32.mrb[50].mxu0 }
0x257a   : > { %v11054_v12 = vpop.f32.mrb[51].mxu0  ;;  %v7193_v54 = vsel %vm1117_vm6, %v15007_v28, -inf  ;;  %v15019_v61 = vadd.f32 %v14927_v26, %v7176_v38 }
0x257c   : > { %v7196_v58 = vsel %vm1117_vm6, %v15019_v61, -inf }
0x257f   : > { %v7181_v19 = vpop.f32.mrb[52].mxu0 }
0x2580   : > { %v11057_v44 = vpop.f32.mrb[53].mxu0  ;;  %v15012_v47 = vadd.f32 %v14937_v49, %v7181_v19  ;;  %v15027_v49 = vpop.permute.xlu0 %6805 }
0x2581   : > { %v7184_v32 = vpop.f32.mrb[54].mxu0 }
0x2582   : > { %v11058_v2 = vpop.f32.mrb[55].mxu0  ;;  %v7199_v17 = vsel %vm1117_vm6, %v15012_v47, -inf }
0x258b   : > { %7027 = vrot.lane.b32.xlu0 %v14793_v8, %s16068_s25 }
0x259a   : > { %7188 = vmax.xlane.f32.xlu1 %v7187_v22 }
0x259e   : > { %7194 = vmax.xlane.f32.xlu1 %v7193_v54 }
0x25a2   : > { %7200 = vmax.xlane.f32.xlu1 %v7199_v17 }
0x25aa   : > { %7197 = vmax.xlane.f32.xlu0 %v7196_v58 }
0x25b8   : > { %v6526_v10 = vpop.xlane.xlu1 %6525 }
0x25b9   : > { %v6539_v31 = vsub.f32 %v14908_v7, %v6526_v10 }
0x25ba   : > { %v6529_v36 = vpop.xlane.xlu0 %6528 }
0x25bb   : > { %v6544_v41 = vmul.f32 1.442695, %v6539_v31  ;;  %v6540_v51 = vsub.f32 %v14914_v53, %v6529_v36 }
0x25bd   : > { %11987 = vpow2.f32 %v6544_v41  ;;  %v6546_v26 = vmul.f32 1.442695, %v6540_v51 }
0x25bf   : > { %11989 = vpow2.f32 %v6546_v26 }
0x25c0   : > { %v6532_v63 = vpop.xlane.xlu0 %6531 }
0x25c1   : > { %v6541_v0 = vsub.f32 %v14924_v43, %v6532_v63 }
0x25c2   : > { %v6535_v4 = vpop.xlane.xlu1 %6534 }
0x25c3   : > { %v6548_v23 = vmul.f32 1.442695, %v6541_v0  ;;  %v6542_v59 = vsub.f32 %v14930_v37, %v6535_v4 }
0x25c5   : > { %11991 = vpow2.f32 %v6548_v23  ;;  %v6550_v55 = vmul.f32 1.442695, %v6542_v59 }
0x25c7   : > { %v15033_v3 = vpop.eup %11987  ;;  %11993 = vpow2.f32 %v6550_v55 }
0x25c8   : > { %v6538_v7 = vpop.xlane.xlu0 %6537  ;;  %v6554_v30 = vsel %vm1117_vm6, %v15033_v3, 0.0 }
0x25c9   : > { %v15037_v53 = vpop.eup %11989  ;;  %v6543_v60 = vsub.f32 %v14940_v50, %v6538_v7  ;;  %6555 = vadd.xlane.f32.xlu1 %v6554_v30 }
0x25ca   : > { %v6557_v43 = vsel %vm1117_vm6, %v15037_v53, 0.0 }
0x25cb   : > { %v6552_v16 = vmul.f32 1.442695, %v6543_v60  ;;  %6558 = vadd.xlane.f32.xlu0 %v6557_v43 }
0x25cd   : > { %11995 = vpow2.f32 %v6552_v16 }
0x25cf   : > { %v15042_v37 = vpop.eup %11991 }
0x25d0   : > { %v6749_v45 = vpop.xlane.xlu1 %6748  ;;  %v6560_v38 = vsel %vm1117_vm6, %v15042_v37, 0.0 }
0x25d1   : > { %v15046_v12 = vpop.eup %11993  ;;  %v6762_v19 = vsub.f32 %v14945_v48, %v6749_v45  ;;  %6561 = vadd.xlane.f32.xlu0 %v6560_v38 }
0x25d2   : > { %v6752_v44 = vpop.xlane.xlu0 %6751  ;;  %v6563_v50 = vsel %vm1117_vm6, %v15046_v12, 0.0 }
0x25d3   : > { %v6767_v32 = vmul.f32 1.442695, %v6762_v19  ;;  %v6763_v2 = vsub.f32 %v14948_v20, %v6752_v44  ;;  %6564 = vadd.xlane.f32.xlu1 %v6563_v50 }
0x25d5   : > { %11997 = vpow2.f32 %v6767_v32  ;;  %v6769_v22 = vmul.f32 1.442695, %v6763_v2 }
0x25d7   : > { %v15052_v54 = vpop.eup %11995  ;;  %11999 = vpow2.f32 %v6769_v22 }
0x25d8   : > { %v6755_v17 = vpop.xlane.xlu1 %6754  ;;  %v6566_v58 = vsel %vm1117_vm6, %v15052_v54, 0.0 }
0x25d9   : > { %v6764_v48 = vsub.f32 %v14955_v40, %v6755_v17  ;;  %6567 = vadd.xlane.f32.xlu0 %v6566_v58 }
0x25da   : > { %v6758_v10 = vpop.xlane.xlu0 %6757 }
0x25db   : > { %v6771_v31 = vmul.f32 1.442695, %v6764_v48  ;;  %v6765_v36 = vsub.f32 %v14958_v13, %v6758_v10 }
0x25dd   : > { %12001 = vpow2.f32 %v6771_v31  ;;  %v6773_v41 = vmul.f32 1.442695, %v6765_v36 }
0x25df   : > { %v15058_v20 = vpop.eup %11997  ;;  %12003 = vpow2.f32 %v6773_v41 }
0x25e0   : > { %v6761_v51 = vpop.xlane.xlu1 %6760  ;;  %v6777_v26 = vsel %vm1117_vm6, %v15058_v20, 0.0 }
0x25e1   : > { %v15062_v63 = vpop.eup %11999  ;;  %v6766_v0 = vsub.f32 %v14965_v5, %v6761_v51  ;;  %6778 = vadd.xlane.f32.xlu1 %v6777_v26 }
0x25e2   : > { %v6780_v40 = vsel %vm1117_vm6, %v15062_v63, 0.0 }
0x25e3   : > { %v6775_v4 = vmul.f32 1.442695, %v6766_v0  ;;  %6781 = vadd.xlane.f32.xlu0 %v6780_v40 }
0x25e5   : > { %12005 = vpow2.f32 %v6775_v4 }
0x25e7   : > { %v15067_v13 = vpop.eup %12001 }
0x25e8   : > { %v6969_v23 = vpop.xlane.xlu0 %6968  ;;  %v6783_v59 = vsel %vm1117_vm6, %v15067_v13, 0.0 }
0x25e9   : > { %v15071_v55 = vpop.eup %12003  ;;  %v6982_v7 = vsub.f32 %v14970_v42, %v6969_v23  ;;  %6784 = vadd.xlane.f32.xlu0 %v6783_v59 }
0x25ea   : > { %v6972_v30 = vpop.xlane.xlu1 %6971  ;;  %v6786_v43 = vsel %vm1117_vm6, %v15071_v55, 0.0 }
0x25eb   : > { %v6987_v5 = vmul.f32 1.442695, %v6982_v7  ;;  %v6983_v60 = vsub.f32 %v14973_v21, %v6972_v30 }
0x25ed   : > { %12007 = vpow2.f32 %v6987_v5  ;;  %v6989_v16 = vmul.f32 1.442695, %v6983_v60  ;;  %6787 = vadd.xlane.f32.xlu0 %v6786_v43 }
0x25ef   : > { %v15077_v45 = vpop.eup %12005  ;;  %12009 = vpow2.f32 %v6989_v16 }
0x25f0   : > { %v6975_v38 = vpop.xlane.xlu0 %6974  ;;  %v6789_v19 = vsel %vm1117_vm6, %v15077_v45, 0.0 }
0x25f1   : > { %v6984_v42 = vsub.f32 %v14980_v52, %v6975_v38  ;;  %6790 = vadd.xlane.f32.xlu0 %v6789_v19 }
0x25f2   : > { %v6978_v44 = vpop.xlane.xlu1 %6977 }
0x25f3   : > { %v6991_v50 = vmul.f32 1.442695, %v6984_v42  ;;  %v6985_v21 = vsub.f32 %v14983_v46, %v6978_v44 }
0x25f5   : > { %12011 = vpow2.f32 %v6991_v50  ;;  %v6993_v32 = vmul.f32 1.442695, %v6985_v21 }
0x25f6   : > { %v15111_v23 = vpop.permute.xlu1 %7025 }
0x25f7   : > { %v15083_v2 = vpop.eup %12007  ;;  %12013 = vpow2.f32 %v6993_v32 }
0x25f8   : > { %v6981_v22 = vpop.xlane.xlu0 %6980  ;;  %v6997_v17 = vsel %vm1117_vm6, %v15083_v2, 0.0 }
0x25f9   : > { %v15087_v58 = vpop.eup %12009  ;;  %v6986_v48 = vsub.f32 %v14990_v29, %v6981_v22  ;;  %6998 = vadd.xlane.f32.xlu1 %v6997_v17 }
0x25fa   : > { %v7000_v52 = vsel %vm1117_vm6, %v15087_v58, 0.0 }
0x25fb   : > { %v6995_v10 = vmul.f32 1.442695, %v6986_v48  ;;  %7001 = vadd.xlane.f32.xlu0 %v7000_v52 }
0x25fd   : > { %12015 = vpow2.f32 %v6995_v10 }
0x25ff   : > { %v15092_v46 = vpop.eup %12011 }
0x2600   : > { %v7003_v31 = vsel %vm1117_vm6, %v15092_v46, 0.0 }
0x2601   : > { %v15096_v36 = vpop.eup %12013  ;;  %7004 = vadd.xlane.f32.xlu0 %v7003_v31 }
0x2602   : > { %v7192_v41 = vpop.xlane.xlu0 %7191  ;;  %v7006_v29 = vsel %vm1117_vm6, %v15096_v36, 0.0 }
0x2603   : > { %v7203_v51 = vsub.f32 %v14995_v62, %v7192_v41 }
0x2605   : > { %v7209_v26 = vmul.f32 1.442695, %v7203_v51  ;;  %7007 = vadd.xlane.f32.xlu0 %v7006_v29 }
0x2606   : > { %v15115_v16 = vpop.permute.xlu0 %7027 }
0x2607   : > { %v15101_v0 = vpop.eup %12015  ;;  %12017 = vpow2.f32 %v7209_v26 }
0x2608   : > { %v7009_v40 = vsel %vm1117_vm6, %v15101_v0, 0.0 }
0x2609   : > { %7010 = vadd.xlane.f32.xlu0 %v7009_v40 }
0x260a   : > { %7029 = vrot.lane.b32.xlu1 %v14797_v56, %s16068_s25 }
0x2611   : > { %v15107_v4 = vpop.eup %12017 }
0x2612   : > { %v7220_v62 = vsel %vm1117_vm6, %v15107_v4, 0.0 }
0x2613   : > { %7221 = vadd.xlane.f32.xlu0 %v7220_v62 }
0x2627   : > { %v7189_v59 = vpop.xlane.xlu1 %7188 }
0x2628   : > { %v7202_v7 = vsub.f32 %v15004_v35, %v7189_v59 }
0x262a   : > { %v7207_v30 = vmul.f32 1.442695, %v7202_v7 }
0x262b   : > { %v7195_v5 = vpop.xlane.xlu1 %7194 }
0x262c   : > { %12019 = vpow2.f32 %v7207_v30  ;;  %v7204_v60 = vsub.f32 %v15007_v28, %v7195_v5 }
0x262e   : > { %v7211_v43 = vmul.f32 1.442695, %v7204_v60 }
0x262f   : > { %v7201_v22 = vpop.xlane.xlu1 %7200 }
0x2630   : > { %12021 = vpow2.f32 %v7211_v43  ;;  %v7206_v48 = vsub.f32 %v15012_v47, %v7201_v22 }
0x2632   : > { %v7215_v10 = vmul.f32 1.442695, %v7206_v48 }
0x2636   : > { %v15117_v38 = vpop.eup %12019 }
0x2637   : > { %v7198_v19 = vpop.xlane.xlu0 %7197  ;;  %v7217_v42 = vsel %vm1117_vm6, %v15117_v38, 0.0 }
0x2638   : > { %v7205_v44 = vsub.f32 %v15019_v61, %v7198_v19  ;;  %7218 = vadd.xlane.f32.xlu1 %v7217_v42 }
0x263a   : > { %v15122_v50 = vpop.eup %12021  ;;  %v7213_v35 = vmul.f32 1.442695, %v7205_v44 }
0x263b   : > { %v7223_v21 = vsel %vm1117_vm6, %v15122_v50, 0.0 }
0x263c   : > { %12023 = vpow2.f32 %v7213_v35  ;;  %7224 = vadd.xlane.f32.xlu0 %v7223_v21 }
0x2646   : > { %v15126_v28 = vpop.eup %12023 }
0x2647   : > { %v7226_v32 = vsel %vm1117_vm6, %v15126_v28, 0.0 }
0x2648   : > { %7227 = vadd.xlane.f32.xlu1 %v7226_v32 }
0x2652   : > { %7245 = vrot.lane.b32.xlu0 %v14789_v27, %s16069_s30 }
0x2656   : > { %v6556_v61 = vpop.xlane.xlu1 %6555 }
0x2657   : > { %12025 = vrcp.f32 %v6556_v61 }
0x2658   : > { %v6559_v17 = vpop.xlane.xlu0 %6558 }
0x2659   : > { %12027 = vrcp.f32 %v6559_v17  ;;  %7247 = vrot.lane.b32.xlu1 %v14793_v8, %s16069_s30 }
0x265d   : > { %7249 = vrot.lane.b32.xlu1 %v14797_v56, %s16069_s30 }
0x265e   : > { %v6562_v52 = vpop.xlane.xlu0 %6561 }
0x265f   : > { %12029 = vrcp.f32 %v6562_v52 }
0x2660   : > { %v6565_v31 = vpop.xlane.xlu1 %6564 }
0x2661   : > { %v12026_v41 = vpop.eup %12025  ;;  %12031 = vrcp.f32 %v6565_v31 }
0x2662   : > { %12033 = vpow2.f32 %v7215_v10  ;;  %v6574_v27 = vmul.f32 %v12026_v41, %v15033_v3 }
0x2663   : > { %v12028_v51 = vpop.eup %12027 }
0x2664   : > { %v6575_v29 = vmul.f32 %v12028_v51, %v15037_v53 }
0x2666   : > { %v6579_v26 = vpack.c.bf16 %v6575_v29, %v6574_v27  ;;  %v6568_v40 = vpop.xlane.xlu0 %6567 }
0x2667   : > { %12035 = vrcp.f32 %v6568_v40 }
0x2668   : > { %10958 = vmatmul.mubr.msk.bf16.vlgmr.msra.gmra.mrb[16].mxu1 %vm1117_vm6, %v6579_v26 }
0x2669   : > { %v12030_v8 = vpop.eup %12029  ;;  %10988 = vmatpush3.bf16.msra.mxu1 %v15027_v49  ;;  %10961 = vmatprep.mubr.msk.bf16.mxu1 %vm12211_vm1, %v12210_v1  ;;  %v6823_v49 = vsel %vm1193_vm5, %v15025_v15, 0 }
0x266a   : > { %10989 = vmatprep.subr.bf16.mxu1 %v12210_v1  ;;  %v6576_v47 = vmul.f32 %v12030_v8, %v15042_v37 }
0x266b   : > { %v12032_v56 = vpop.eup %12031 }
0x266c   : > { %v6577_v3 = vmul.f32 %v12032_v56, %v15046_v12  ;;  %v15146_v62 = vpop.eup %12033 }
0x266d   : > { %10990 = vmatpush3.bf16.msra.mxu1 %v15023_v14  ;;  %v7229_v37 = vsel %vm1117_vm6, %v15146_v62, 0.0 }
0x266e   : > { %v6580_v53 = vpack.c.bf16 %v6577_v3, %v6576_v47  ;;  %v6779_v59 = vpop.xlane.xlu1 %6778  ;;  %10991 = vmatprep.subr.bf16.mxu1 %v12210_v1 }
0x266f   : > { %12037 = vrcp.f32 %v6779_v59 }
0x2670   : > { %v6782_v7 = vpop.xlane.xlu0 %6781  ;;  %10962 = vmatmul.mubr.msk.bf16.gmra.mrb[20].mxu1 %vm1117_vm6, %v6580_v53 }
0x2671   : > { %v12036_v30 = vpop.eup %12035  ;;  %12039 = vrcp.f32 %v6782_v7  ;;  %10992 = vmatpush3.bf16.msra.mxu1 %v6823_v49  ;;  %7230 = vadd.xlane.f32.xlu0 %v7229_v37 }
0x2672   : > { %v6578_v14 = vmul.f32 %v12036_v30, %v15052_v54  ;;  %10965 = vmatprep.mubr.msk.bf16.mxu1 %vm12211_vm1, %v12210_v1  ;;  %11023 = vmatprep.subr.bf16.mxu1 %v12210_v1 }
0x2674   : > { %v6581_v12 = vpack.c.bf16 %v6578_v14, %v6578_v14 }
0x2676   : > { %v6785_v5 = vpop.xlane.xlu0 %6784 }
0x2677   : > { %12041 = vrcp.f32 %v6785_v5 }
0x2678   : > { %10966 = vmatmul.mubr.msk.bf16.gmra.mrb[24].mxu1 %vm1117_vm6, %v6581_v12 }
0x2679   : > { %v12038_v15 = vpop.eup %12037  ;;  %10993 = vmatprep.mubr.msk.bf16.mxu1 %vm12211_vm1, %v12210_v1 }
0x267a   : > { %v6788_v60 = vpop.xlane.xlu0 %6787  ;;  %v6797_v19 = vmul.f32 %v12038_v15, %v15058_v20 }
0x267b   : > { %v12040_v43 = vpop.eup %12039  ;;  %12043 = vrcp.f32 %v6788_v60 }
0x267c   : > { %v6798_v54 = vmul.f32 %v12040_v43, %v15062_v63 }
0x267e   : > { %v6802_v42 = vpack.c.bf16 %v6798_v54, %v6797_v19  ;;  %v6791_v44 = vpop.xlane.xlu0 %6790 }
0x267f   : > { %12045 = vrcp.f32 %v6791_v44 }
0x2680   : > { %10994 = vmatmul.mubr.msk.bf16.vlgmr.msra.gmra.mrb[28].mxu1 %vm1117_vm6, %v6802_v42 }
0x2681   : > { %11024 = vmatpush3.bf16.msra.mxu1 %v15111_v23  ;;  %10997 = vmatprep.mubr.msk.bf16.mxu1 %vm12211_vm1, %v12210_v1  ;;  %v12042_v35 = vpop.eup %12041 }
0x2682   : > { %11025 = vmatprep.subr.bf16.mxu1 %v12210_v1  ;;  %v6799_v20 = vmul.f32 %v12042_v35, %v15067_v13 }
0x2685   : > { %v12044_v21 = vpop.eup %12043  ;;  %11026 = vmatpush3.bf16.msra.mxu1 %v15115_v16 }
0x2686   : > { %v6800_v63 = vmul.f32 %v12044_v21, %v15071_v55  ;;  %v6999_v32 = vpop.xlane.xlu1 %6998  ;;  %11027 = vmatprep.subr.bf16.mxu1 %v12210_v1 }
0x2687   : > { %12047 = vrcp.f32 %v6999_v32 }
0x2688   : > { %v6803_v22 = vpack.c.bf16 %v6800_v63, %v6799_v20  ;;  %v7002_v61 = vpop.xlane.xlu0 %7001 }
0x2689   : > { %v12046_v23 = vpop.eup %12045  ;;  %12049 = vrcp.f32 %v7002_v61 }
0x268a   : > { %10998 = vmatmul.mubr.msk.bf16.gmra.mrb[32].mxu1 %vm1117_vm6, %v6803_v22  ;;  %v7030_v17 = vpop.permute.xlu1 %7029  ;;  %v6801_v13 = vmul.f32 %v12046_v23, %v15077_v45 }
0x268b   : > { %v7043_v48 = vsel %vm1193_vm5, %v7030_v17, 0  ;;  %11001 = vmatprep.mubr.msk.bf16.mxu1 %vm12211_vm1, %v12210_v1 }
0x268c   : > { %11028 = vmatpush3.bf16.msra.mxu1 %v7043_v48  ;;  %v6804_v16 = vpack.c.bf16 %v6801_v13, %v6801_v13 }
0x268d   : > { %11059 = vmatprep.subr.bf16.mxu1 %v12210_v1 }
0x268e   : > { %v7005_v55 = vpop.xlane.xlu0 %7004 }
0x268f   : > { %12051 = vrcp.f32 %v7005_v55 }
0x2691   : > { %v12048_v52 = vpop.eup %12047 }
0x2692   : > { %v7008_v10 = vpop.xlane.xlu0 %7007  ;;  %11002 = vmatmul.mubr.msk.bf16.gmra.mrb[36].mxu1 %vm1117_vm6, %v6804_v16  ;;  %v7017_v51 = vmul.f32 %v12048_v52, %v15083_v2 }
0x2693   : > { %v12050_v31 = vpop.eup %12049  ;;  %12053 = vrcp.f32 %v7008_v10  ;;  %11029 = vmatprep.mubr.msk.bf16.mxu1 %vm12211_vm1, %v12210_v1 }
0x2694   : > { %v7018_v41 = vmul.f32 %v12050_v31, %v15087_v58 }
0x2696   : > { %v7011_v45 = vpop.xlane.xlu0 %7010  ;;  %v7022_v27 = vpack.c.bf16 %v7018_v41, %v7017_v51 }
0x2697   : > { %12055 = vrcp.f32 %v7011_v45 }
0x2699   : > { %v12052_v29 = vpop.eup %12051 }
0x269a   : > { %11030 = vmatmul.mubr.msk.bf16.vlgmr.msra.gmra.mrb[40].mxu1 %vm1117_vm6, %v7022_v27  ;;  %v7019_v40 = vmul.f32 %v12052_v29, %v15092_v46 }
0x269b   : > { %11033 = vmatprep.mubr.msk.bf16.mxu1 %vm12211_vm1, %v12210_v1 }
0x269d   : > { %v12054_v26 = vpop.eup %12053 }
0x269e   : > { %v7020_v8 = vmul.f32 %v12054_v26, %v15096_v36 }
0x26a0   : > { %v7023_v56 = vpack.c.bf16 %v7020_v8, %v7019_v40  ;;  %v7222_v3 = vpop.xlane.xlu0 %7221 }
0x26a1   : > { %v12056_v47 = vpop.eup %12055 }
0x26a2   : > { %11034 = vmatmul.mubr.msk.bf16.gmra.mrb[44].mxu1 %vm1117_vm6, %v7023_v56  ;;  %v7021_v2 = vmul.f32 %v12056_v47, %v15101_v0 }
0x26a3   : > { %11037 = vmatprep.mubr.msk.bf16.mxu1 %vm12211_vm1, %v12210_v1 }
0x26a4   : > { %v7024_v58 = vpack.c.bf16 %v7021_v2, %v7021_v2 }
0x26aa   : > { %11038 = vmatmul.mubr.msk.bf16.gmra.mrb[48].mxu1 %vm1117_vm6, %v7024_v58 }
0x26ab   : > { %11065 = vmatprep.mubr.msk.bf16.mxu1 %vm12211_vm1, %v12210_v1 }
0x26c5   : > { %v7219_v46 = vpop.xlane.xlu1 %7218 }
0x26c6   : > { %12057 = vrcp.f32 %v7219_v46 }
0x26c7   : > { %12059 = vrcp.f32 %v7222_v3  ;;  %v11573_v3 = vld [vmem:[%s15994_s9 + $0x40] sm:$0xff]  }
0x26c8   : > { %11078 = vmatpush3.bf16.msra.mxu0 %v11573_v3 }
0x26c9   : > { %v7225_v53 = vpop.xlane.xlu0 %7224  ;;  %11079 = vmatprep.subr.bf16.mxu0 %v12210_v1 }
0x26cd   : > { %v7246_v59 = vpop.permute.xlu0 %7245 }
0x26ce   : > { %11060 = vmatpush3.bf16.msra.mxu1 %v7246_v59 }
0x26cf   : > { %11061 = vmatprep.subr.bf16.mxu1 %v12210_v1 }
0x26d0   : > { %v12058_v49 = vpop.eup %12057 }
0x26d1   : > { %v12060_v7 = vpop.eup %12059  ;;  %v7237_v37 = vmul.f32 %v12058_v49, %v15117_v38 }
0x26d2   : > { %v7238_v14 = vmul.f32 %v12060_v7, %v15107_v4 }
0x26d4   : > { %v7242_v5 = vpack.c.bf16 %v7238_v14, %v7237_v37  ;;  %v11574_v14 = vld [vmem:[%s15994_s9 + $0x48] sm:$0xff]  }
0x26d5   : > { %v7228_v36 = vpop.xlane.xlu1 %7227  ;;  %11080 = vmatpush3.bf16.msra.mxu0 %v11574_v14 }
0x26d6   : > { %12061 = vrcp.f32 %v7228_v36  ;;  %11109 = vmatprep.subr.bf16.mxu0 %v12210_v1 }
0x26d7   : > { %12063 = vrcp.f32 %v7225_v53 }
0x26d9   : > { %v7248_v0 = vpop.permute.xlu1 %7247 }
0x26da   : > { %11062 = vmatpush3.bf16.msra.mxu1 %v7248_v0 }
0x26db   : > { %11063 = vmatprep.subr.bf16.mxu1 %v12210_v1 }
0x26dd   : > { %v7250_v30 = vpop.permute.xlu1 %7249 }
0x26de   : > { %v7263_v12 = vsel %vm1193_vm5, %v7250_v30, 0 }
0x26df   : > { %11064 = vmatpush3.bf16.msra.mxu1 %v7263_v12 }
0x26e0   : > { %11093 = vmatprep.subr.bf16.mxu1 %v12210_v1  ;;  %v12062_v15 = vpop.eup %12061 }
0x26e1   : > { %v12064_v60 = vpop.eup %12063  ;;  %v7240_v43 = vmul.f32 %v12062_v15, %v15126_v28 }
0x26e2   : > { %11066 = vmatmul.mubr.msk.bf16.vlgmr.msra.gmra.mrb[52].mxu1 %vm1117_vm6, %v7242_v5  ;;  %v7239_v38 = vmul.f32 %v12064_v60, %v15122_v50 }
0x26e3   : > { %11069 = vmatprep.mubr.msk.bf16.mxu1 %vm12211_vm1, %v12210_v1 }
0x26e4   : > { %v7243_v19 = vpack.c.bf16 %v7240_v43, %v7239_v38 }
0x26ea   : > { %11070 = vmatmul.mubr.msk.bf16.gmra.mrb[56].mxu1 %vm1117_vm6, %v7243_v19 }
0x26eb   : > { %11073 = vmatprep.mubr.msk.bf16.mxu1 %vm12211_vm1, %v12210_v1 }
0x26fe   : > { %v7231_v4 = vpop.xlane.xlu0 %7230 }
0x26ff   : > { %12065 = vrcp.f32 %v7231_v4 }
0x2709   : > { %v12066_v54 = vpop.eup %12065 }
0x270a   : > { %v7241_v42 = vmul.f32 %v12066_v54, %v15146_v62 }
0x270c   : > { %v7244_v44 = vpack.c.bf16 %v7241_v42, %v7241_v42 }
0x270e   : > { %11074 = vmatmul.mubr.msk.bf16.gmra.mrb[60].mxu1 %vm1117_vm6, %v7244_v44 }
0x270f   : > { %11097 = vmatprep.mubr.msk.bf16.mxu1 %vm12211_vm1, %v12210_v1 }
0x273b   : > { %v15214_v28 = vpop.f32.mrb[16].mxu1 }
0x273c   : > { %v10959_v50 = vpop.f32.mrb[17].mxu1 }
0x273d   : > { %v15216_v35 = vpop.f32.mrb[18].mxu1 }
0x273e   : > { %v10960_v21 = vpop.f32.mrb[19].mxu1 }
0x2743   : > { %v15218_v20 = vpop.f32.mrb[20].mxu1 }
0x2744   : > { %v10963_v63 = vpop.f32.mrb[21].mxu1 }
0x2745   : > { %v15220_v32 = vpop.f32.mrb[22].mxu1 }
0x2746   : > { %v10964_v22 = vpop.f32.mrb[23].mxu1 }
0x274b   : > { %v15222_v61 = vpop.f32.mrb[24].mxu1 }
0x274c   : > { %v10967_v62 = vpop.f32.mrb[25].mxu1 }
0x274d   : > { %v6655_v23 = vpop.f32.mrb[26].mxu1 }
0x274e   : > { %v10968_v17 = vpop.f32.mrb[27].mxu1 }
0x2753   : > { %v6859_v48 = vpop.f32.mrb[28].mxu1 }
0x2754   : > { %v10995_v13 = vpop.f32.mrb[29].mxu1 }
0x2755   : > { %v6862_v55 = vpop.f32.mrb[30].mxu1 }
0x2756   : > { %v11469_v16 = vpack.i.bf16 %v6862_v55, %v6859_v48  ;;  %v10996_v52 = vpop.f32.mrb[31].mxu1 }
0x2758   : > { %11470 = vrot.lane.b32.xlu0 %v11469_v16, %s16070_s0 }
0x275d   : > { %v6867_v10 = vpop.f32.mrb[32].mxu1 }
0x275e   : > { %v10999_v31 = vpop.f32.mrb[33].mxu1 }
0x275f   : > { %v6870_v41 = vpop.f32.mrb[34].mxu1 }
0x2760   : > { %v11474_v51 = vpack.i.bf16 %v6870_v41, %v6867_v10  ;;  %v11000_v45 = vpop.f32.mrb[35].mxu1 }
0x2762   : > { %11475 = vrot.lane.b32.xlu1 %v11474_v51, %s16070_s0 }
0x2765   : > { %v6875_v27 = vpop.f32.mrb[36].mxu1 }
0x2766   : > { %v11003_v29 = vpop.f32.mrb[37].mxu1 }
0x2767   : > { %v6878_v26 = vpop.f32.mrb[38].mxu1 }
0x2768   : > { %v11004_v40 = vpop.f32.mrb[39].mxu1 }
0x276d   : > { %v7079_v8 = vpop.f32.mrb[40].mxu1 }
0x276e   : > { %v11031_v56 = vpop.f32.mrb[41].mxu1 }
0x276f   : > { %v7082_v47 = vpop.f32.mrb[42].mxu1 }
0x2770   : > { %v11479_v2 = vpack.i.bf16 %v7082_v47, %v7079_v8  ;;  %v11032_v58 = vpop.f32.mrb[43].mxu1 }
0x2772   : > { %11480 = vrot.lane.b32.xlu1 %v11479_v2, %s16071_s27 }
0x2775   : > { %v7087_v53 = vpop.f32.mrb[44].mxu1 }
0x2776   : > { %v11035_v46 = vpop.f32.mrb[45].mxu1 }
0x2777   : > { %v7090_v59 = vpop.f32.mrb[46].mxu1 }
0x2778   : > { %v11489_v36 = vpack.i.bf16 %v7090_v59, %v7087_v53  ;;  %v11036_v49 = vpop.f32.mrb[47].mxu1 }
0x277d   : > { %v7095_v0 = vpop.f32.mrb[48].mxu1 }
0x277e   : > { %7354 = vrot.lane.b32.xlu0 %v7095_v0, %s16071_s27  ;;  %v11039_v7 = vpop.f32.mrb[49].mxu1 }
0x277f   : > { %v7098_v37 = vpop.f32.mrb[50].mxu1 }
0x2780   : > { %v11040_v30 = vpop.f32.mrb[51].mxu1 }
0x27b5   : > { %v7299_v12 = vpop.f32.mrb[52].mxu1 }
0x27b6   : > { %v11067_v5 = vpop.f32.mrb[53].mxu1 }
0x27b7   : > { %v7302_v15 = vpop.f32.mrb[54].mxu1  ;;  %v9689_v5 = vld [vmem:[%s16080_s22 + $0x4] ss:$0 sm:$0xff] }
0x27b8   : > { %v11484_v60 = vpack.i.bf16 %v7302_v15, %v7299_v12  ;;  %v11068_v43 = vpop.f32.mrb[55].mxu1 }
0x27ba   : > { %11485 = vrot.lane.b32.xlu1 %v11484_v60, %s16072_s28 }
0x27bd   : > { %v7307_v38 = vpop.f32.mrb[56].mxu1 }
0x27be   : > { %11490 = vrot.lane.b32.xlu1 %v11489_v36, %s16071_s27  ;;  %v11071_v19 = vpop.f32.mrb[57].mxu1 }
0x27bf   : > { %v7310_v4 = vpop.f32.mrb[58].mxu1 }
0x27c0   : > { %v11494_v54 = vpack.i.bf16 %v7310_v4, %v7307_v38  ;;  %v11072_v42 = vpop.f32.mrb[59].mxu1 }
0x27c2   : > { %11495 = vrot.lane.b32.xlu1 %v11494_v54, %s16072_s28 }
0x27c6   : > { %7334 = vrot.lane.b32.xlu1 %v6875_v27, %s16070_s0 }
0x27ca   : > { %v11471_v62 = vpop.permute.xlu0 %11470 }
0x27cb   : > { %v11473_v17 = vunpack.i.h.bf16 %v11471_v62  ;;  %v11472_v48 = vunpack.i.l.bf16 %v11471_v62 }
0x27cd   : > { %v7382_v52 = vsel %vm1042_vm4, %v15216_v35, %v11473_v17  ;;  %v7381_v10 = vsel %vm1042_vm4, %v15214_v28, %v11472_v48 }
0x27d4   : > { %v11476_v22 = vpop.permute.xlu1 %11475 }
0x27d5   : > { %v11478_v8 = vunpack.i.h.bf16 %v11476_v22  ;;  %v11477_v56 = vunpack.i.l.bf16 %v11476_v22 }
0x27d7   : > { %v7384_v35 = vsel %vm1042_vm4, %v15220_v32, %v11478_v8  ;;  %v7383_v58 = vsel %vm1042_vm4, %v15218_v20, %v11477_v56 }
0x27e1   : > { %v7315_v44 = vpop.f32.mrb[60].mxu1 }
0x27e2   : > { %7374 = vrot.lane.b32.xlu1 %v7315_v44, %s16072_s28  ;;  %v11075_v50 = vpop.f32.mrb[61].mxu1 }
0x27e3   : > { %v7318_v21 = vpop.f32.mrb[62].mxu1 }
0x27e4   : > { %v11076_v63 = vpop.f32.mrb[63].mxu1  ;;  %v11481_v23 = vpop.permute.xlu1 %11480 }
0x27e5   : > { %v11483_v13 = vunpack.i.h.bf16 %v11481_v23  ;;  %v11482_v55 = vunpack.i.l.bf16 %v11481_v23 }
0x27e7   : > { %v7387_v51 = vsel %vm1981_vm7, %v7382_v52, %v11483_v13  ;;  %v7386_v45 = vsel %vm1981_vm7, %v7381_v10, %v11482_v55 }
0x27f0   : > { %v7355_v7 = vpop.permute.xlu0 %7354 }
0x282c   : > { %v11486_v16 = vpop.permute.xlu1 %11485 }
0x282d   : > { %v11488_v31 = vunpack.i.h.bf16 %v11486_v16  ;;  %v11487_v41 = vunpack.i.l.bf16 %v11486_v16 }
0x282f   : > { %v7391_v27 = vsel %vm1987_vm8, %v7386_v45, %v11487_v41  ;;  %v7392_v29 = vsel %vm1987_vm8, %v7387_v51, %v11488_v31 }
0x2830   : > { %v7396_v26 = vpack.c.bf16 %v7392_v29, %v7391_v27  ;;  %v11491_v40 = vpop.permute.xlu1 %11490 }
0x2831   : > { %v11493_v47 = vunpack.i.h.bf16 %v11491_v40  ;;  %v11492_v2 = vunpack.i.l.bf16 %v11491_v40 }
0x2832   : > { %11082 = vmatmul.mubr.msk.bf16.vlgmr.msra.gmra.mrb[56].mxu0 %vm799_vm3, %v7396_v26 }
0x2833   : > { %11085 = vmatprep.mubr.msk.bf16.mxu0 %vm12211_vm1, %v12210_v1  ;;  %v7388_v46 = vsel %vm1981_vm7, %v7383_v58, %v11492_v2  ;;  %v7389_v59 = vsel %vm1981_vm7, %v7384_v35, %v11493_v47 }
0x2834   : > { %v11496_v28 = vpop.permute.xlu1 %11495 }
0x2835   : > { %v11498_v3 = vunpack.i.h.bf16 %v11496_v28  ;;  %v11497_v53 = vunpack.i.l.bf16 %v11496_v28 }
0x2837   : > { %v7393_v36 = vsel %vm1987_vm8, %v7388_v46, %v11497_v53  ;;  %v7394_v49 = vsel %vm1987_vm8, %v7389_v59, %v11498_v3 }
0x2838   : > { %v7397_v0 = vpack.c.bf16 %v7394_v49, %v7393_v36  ;;  %v7335_v32 = vpop.permute.xlu1 %7334  ;;  %v7559_v36 = vadd.f32 1.0, %v14206_v34 }
0x2839   : > { %v7385_v20 = vsel %vm1042_vm4, %v15222_v61, %v7335_v32 }
0x283a   : > { %11086 = vmatmul.mubr.msk.bf16.gmra.mrb[60].mxu0 %vm799_vm3, %v7397_v0  ;;  %v7390_v37 = vsel %vm1981_vm7, %v7385_v20, %v7355_v7  ;;  %v7563_v49 = vrot.slane %v7559_v36, %v12444_v24  ;;  %v11575_v20 = vld [vmem:[%s15993_s8 + $0x50] sm:$0xff]  }
0x283b   : > { %11089 = vmatprep.mubr.msk.bf16.mxu0 %vm12211_vm1, %v12210_v1  ;;  %11094 = vmatpush3.bf16.msra.mxu1 %v11575_v20 }
0x283c   : > { %11095 = vmatprep.subr.bf16.mxu1 %v12210_v1 }
0x2854   : > { %v7375_v30 = vpop.permute.xlu1 %7374 }
0x2855   : > { %v7395_v14 = vsel %vm1987_vm8, %v7390_v37, %v7375_v30  ;;  %v11576_v30 = vld [vmem:[%s15993_s8 + $0x58] sm:$0xff]  }
0x2856   : > { %v7398_v12 = vpack.c.bf16 %v7395_v14, %v7395_v14  ;;  %11096 = vmatpush3.bf16.msra.mxu1 %v11576_v30 }
0x2857   : > { %11127 = vmatprep.subr.bf16.mxu1 %v12210_v1 }
0x2858   : > { %11090 = vmatmul.mubr.msk.bf16.gmra.mrb[64].mxu0 %vm799_vm3, %v7398_v12 }
0x2859   : > { %11115 = vmatprep.mubr.msk.bf16.mxu0 %vm12211_vm1, %v12210_v1 }
0x2905   : > { %v7467_v15 = vpop.f32.mrb[56].mxu0 }
0x2906   : > { %v7468_v60 = vadd.f32 %v9689_v5, %v7467_v15  ;;  %v11083_v43 = vpop.f32.mrb[57].mxu0 }
0x2907   : > { %v7470_v61 = vpop.f32.mrb[58].mxu0 }
0x2908   : > { %v15274_v38 = vadd.f32 %v7468_v60, %v14734_v33  ;;  %v7471_v19 = vadd.f32 %v9689_v5, %v7470_v61  ;;  %v11084_v4 = vpop.f32.mrb[59].mxu0 }
0x290a   : > { %v15277_v54 = vadd.f32 %v7471_v19, %v14737_v18  ;;  %v7494_v42 = vsel %vm799_vm3, %v15274_v38, 0.0 }
0x290b   : > { %7495 = vadd.xlane.f32.xlu0 %v7494_v42 }
0x290c   : > { %v7497_v44 = vsel %vm799_vm3, %v15277_v54, 0.0 }
0x290d   : > { %7498 = vadd.xlane.f32.xlu1 %v7497_v44  ;;  %v7475_v50 = vpop.f32.mrb[60].mxu0 }
0x290e   : > { %v7476_v21 = vadd.f32 %v9689_v5, %v7475_v50  ;;  %v11087_v63 = vpop.f32.mrb[61].mxu0 }
0x290f   : > { %v7478_v22 = vpop.f32.mrb[62].mxu0 }
0x2910   : > { %v15284_v33 = vadd.f32 %v7476_v21, %v14744_v25  ;;  %v7479_v62 = vadd.f32 %v9689_v5, %v7478_v22  ;;  %v11088_v23 = vpop.f32.mrb[63].mxu0 }
0x2912   : > { %v15287_v18 = vadd.f32 %v7479_v62, %v14747_v39  ;;  %v7500_v17 = vsel %vm799_vm3, %v15284_v33, 0.0 }
0x2913   : > { %7501 = vadd.xlane.f32.xlu0 %v7500_v17 }
0x2914   : > { %v7503_v48 = vsel %vm799_vm3, %v15287_v18, 0.0 }
0x2917   : > { %7504 = vadd.xlane.f32.xlu0 %v7503_v48 }
0x292b   : > { %v7483_v13 = vpop.f32.mrb[64].mxu0 }
0x292c   : > { %v7484_v55 = vadd.f32 %v9689_v5, %v7483_v13  ;;  %v11091_v16 = vpop.f32.mrb[65].mxu0  ;;  %v7576_v13 = vrot.slane %v14206_v34, %v12444_v24 }
0x292d   : > { %v7486_v52 = vpop.f32.mrb[66].mxu0 }
0x292e   : > { %v15294_v25 = vadd.f32 %v7484_v55, %v14754_v9  ;;  %v11092_v10 = vpop.f32.mrb[67].mxu0 }
0x2930   : > { %v7506_v39 = vsel %vm799_vm3, %v15294_v25, 0.0 }
0x2931   : > { %7507 = vadd.xlane.f32.xlu1 %v7506_v39 }
0x2998   : > { %v7496_v31 = vpop.xlane.xlu0 %7495 }
0x2999   : > { %v7509_v41 = vmul.f32 0.03125, %v7496_v31 }
0x299a   : > { %v7499_v51 = vpop.xlane.xlu1 %7498 }
0x299b   : > { %v7514_v45 = vsub.f32 %v15274_v38, %v7509_v41  ;;  %v7510_v27 = vmul.f32 0.03125, %v7499_v51 }
0x299d   : > { %v7515_v29 = vsub.f32 %v15277_v54, %v7510_v27  ;;  %v7519_v26 = vmul.f32 %v7514_v45, %v7514_v45 }
0x299f   : > { %v7524_v40 = vsel %vm799_vm3, %v7519_v26, 0.0  ;;  %v7520_v8 = vmul.f32 %v7515_v29, %v7515_v29 }
0x29a0   : > { %v7502_v56 = vpop.xlane.xlu0 %7501  ;;  %7525 = vadd.xlane.f32.xlu0 %v7524_v40 }
0x29a1   : > { %v7511_v9 = vmul.f32 0.03125, %v7502_v56  ;;  %v7527_v47 = vsel %vm799_vm3, %v7520_v8, 0.0 }
0x29a2   : > { %7528 = vadd.xlane.f32.xlu1 %v7527_v47 }
0x29a3   : > { %v7516_v2 = vsub.f32 %v15284_v33, %v7511_v9 }
0x29a4   : > { %v7505_v28 = vpop.xlane.xlu0 %7504 }
0x29a5   : > { %v7512_v35 = vmul.f32 0.03125, %v7505_v28  ;;  %v7521_v58 = vmul.f32 %v7516_v2, %v7516_v2 }
0x29a7   : > { %v7517_v3 = vsub.f32 %v15287_v18, %v7512_v35  ;;  %v7530_v53 = vsel %vm799_vm3, %v7521_v58, 0.0 }
0x29a8   : > { %7531 = vadd.xlane.f32.xlu0 %v7530_v53 }
0x29a9   : > { %v7522_v46 = vmul.f32 %v7517_v3, %v7517_v3 }
0x29ab   : > { %v7533_v59 = vsel %vm799_vm3, %v7522_v46, 0.0 }
0x29ac   : > { %7534 = vadd.xlane.f32.xlu1 %v7533_v59 }
0x29bd   : > { %7565 = vrot.lane.b32.xlu1 %v7563_v49, %s16079_s1 }
0x29be   : > { %v7508_v0 = vpop.xlane.xlu1 %7507 }
0x29bf   : > { %v7513_v32 = vmul.f32 0.03125, %v7508_v0 }
0x29c1   : > { %v7518_v7 = vsub.f32 %v15294_v25, %v7513_v32 }
0x29c3   : > { %v7523_v37 = vmul.f32 %v7518_v7, %v7518_v7 }
0x29c5   : > { %v7536_v14 = vsel %vm799_vm3, %v7523_v37, 0.0 }
0x29c6   : > { %7537 = vadd.xlane.f32.xlu0 %v7536_v14 }
0x2a2d   : > { %v7526_v12 = vpop.xlane.xlu0 %7525 }
0x2a2e   : > { %v7539_v5 = vmul.f32 0.03125, %v7526_v12 }
0x2a2f   : > { %v7529_v15 = vpop.xlane.xlu1 %7528 }
0x2a30   : > { %v7544_v60 = vadd.f32 1e-05, %v7539_v5  ;;  %v7540_v43 = vmul.f32 0.03125, %v7529_v15 }
0x2a32   : > { %12067 = vrsqrt.f32 %v7544_v60  ;;  %v7545_v61 = vadd.f32 1e-05, %v7540_v43 }
0x2a34   : > { %12069 = vrsqrt.f32 %v7545_v61 }
0x2a35   : > { %v7532_v19 = vpop.xlane.xlu0 %7531 }
0x2a36   : > { %v7541_v4 = vmul.f32 0.03125, %v7532_v19 }
0x2a38   : > { %v7546_v42 = vadd.f32 1e-05, %v7541_v4 }
0x2a39   : > { %v7535_v44 = vpop.xlane.xlu1 %7534 }
0x2a3a   : > { %12071 = vrsqrt.f32 %v7546_v42  ;;  %v7542_v50 = vmul.f32 0.03125, %v7535_v44 }
0x2a3c   : > { %v12068_v21 = vpop.eup %12067  ;;  %v7547_v63 = vadd.f32 1e-05, %v7542_v50 }
0x2a3d   : > { %v7554_v22 = vmul.f32 %v12068_v21, %v7514_v45  ;;  %v7566_v62 = vpop.permute.xlu1 %7565 }
0x2a3e   : > { %v12070_v23 = vpop.eup %12069  ;;  %12073 = vrsqrt.f32 %v7547_v63 }
0x2a3f   : > { %v7555_v17 = vmul.f32 %v12070_v23, %v7515_v29  ;;  %v7568_v48 = vmul.f32 %v7566_v62, %v7554_v22 }
0x2a41   : > { %v7569_v55 = vmul.f32 %v7566_v62, %v7555_v17  ;;  %v7577_v16 = vadd.f32 %v7576_v13, %v7568_v48 }
0x2a43   : > { %v7578_v52 = vadd.f32 %v7576_v13, %v7569_v55 }
0x2a44   : > { %v12072_v10 = vpop.eup %12071 }
0x2a45   : > { %v7556_v39 = vmul.f32 %v12072_v10, %v7516_v2  ;;  %v7582_v31 = vpack.c.bf16 %v7578_v52, %v7577_v16 }
0x2a47   : > { %11098 = vmatmul.mubr.msk.bf16.vlgmr.msra.gmra.mrb[64].mxu1 %vm799_vm3, %v7582_v31  ;;  %v7570_v45 = vmul.f32 %v7566_v62, %v7556_v39 }
0x2a48   : > { %v12074_v41 = vpop.eup %12073  ;;  %11101 = vmatprep.mubr.msk.bf16.mxu1 %vm12211_vm1, %v12210_v1 }
0x2a49   : > { %v7557_v51 = vmul.f32 %v12074_v41, %v7517_v3  ;;  %v7579_v29 = vadd.f32 %v7576_v13, %v7570_v45 }
0x2a4b   : > { %v7571_v27 = vmul.f32 %v7566_v62, %v7557_v51 }
0x2a4d   : > { %v7580_v26 = vadd.f32 %v7576_v13, %v7571_v27 }
0x2a4f   : > { %v7583_v40 = vpack.c.bf16 %v7580_v26, %v7579_v29 }
0x2a51   : > { %11102 = vmatmul.mubr.msk.bf16.gmra.mrb[68].mxu1 %vm799_vm3, %v7583_v40 }
0x2a52   : > { %11105 = vmatprep.mubr.msk.bf16.mxu1 %vm12211_vm1, %v12210_v1 }
0x2a53   : > { %v7538_v34 = vpop.xlane.xlu0 %7537 }
0x2a54   : > { %v7543_v8 = vmul.f32 0.03125, %v7538_v34 }
0x2a56   : > { %v7548_v56 = vadd.f32 1e-05, %v7543_v8 }
0x2a58   : > { %12075 = vrsqrt.f32 %v7548_v56 }
0x2a62   : > { %v12076_v9 = vpop.eup %12075 }
0x2a63   : > { %v7558_v47 = vmul.f32 %v12076_v9, %v7518_v7 }
0x2a65   : > { %v7572_v2 = vmul.f32 %v7566_v62, %v7558_v47 }
0x2a67   : > { %v7581_v28 = vadd.f32 %v7576_v13, %v7572_v2 }
0x2a69   : > { %v7584_v35 = vpack.c.bf16 %v7581_v28, %v7581_v28 }
0x2a6b   : > { %11106 = vmatmul.mubr.msk.bf16.gmra.mrb[72].mxu1 %vm799_vm3, %v7584_v35 }
0x2a6c   : > { %11133 = vmatprep.mubr.msk.bf16.mxu1 %vm12211_vm1, %v12210_v1 }
0x2b1a   : > { %v7645_v58 = vpop.f32.mrb[64].mxu1 }
0x2b1b   : > { %v11099_v3 = vpop.f32.mrb[65].mxu1  ;;  %v7667_v46 = vmul.f32 0.35355338, %v7645_v58 }
0x2b1c   : > { %v7648_v53 = vpop.f32.mrb[66].mxu1 }
0x2b1d   : > { %v7668_v59 = vmul.f32 0.35355338, %v7648_v53  ;;  %v15330_v36 = vpack.c.bf16 %v7648_v53, %v7645_v58  ;;  %v11100_v49 = vpop.f32.mrb[67].mxu1 }
0x2b1f   : > { %v7672_v0 = vpack.c.bf16 %v7668_v59, %v7667_v46  ;;  %7681 = vrot.lane.b32.xlu0 %v15330_v36, %s16079_s1 }
0x2b23   : > { %7904 = vrot.lane.b32.xlu0 %v15330_v36, %s16073_s5 }
0x2b24   : > { %v7653_v32 = vpop.f32.mrb[68].mxu1 }
0x2b25   : > { %v11103_v20 = vpop.f32.mrb[69].mxu1  ;;  %v7669_v37 = vmul.f32 0.35355338, %v7653_v32 }
0x2b26   : > { %v7656_v7 = vpop.f32.mrb[70].mxu1 }
0x2b27   : > { %v7670_v30 = vmul.f32 0.35355338, %v7656_v7  ;;  %v15336_v14 = vpack.c.bf16 %v7656_v7, %v7653_v32  ;;  %v11104_v12 = vpop.f32.mrb[71].mxu1  ;;  %v15446_v32 = vld [vmem:[%s12607_s4 + $0x50] sm:$0xff] }
0x2b29   : > { %v7673_v5 = vpack.c.bf16 %v7670_v30, %v7669_v37  ;;  %7683 = vrot.lane.b32.xlu1 %v15336_v14, %s16079_s1  ;;  %v15452_v30 = vld [vmem:[%s12607_s4 + $0x58] sm:$0xff] }
0x2b3e   : > { %v7661_v15 = vpop.f32.mrb[72].mxu1 }
0x2b3f   : > { %v15340_v60 = vpack.c.bf16 %v7661_v15, %v7661_v15  ;;  %v11107_v43 = vpop.f32.mrb[73].mxu1  ;;  %v7671_v4 = vmul.f32 0.35355338, %v7661_v15 }
0x2b40   : > { %v7664_v61 = vpop.f32.mrb[74].mxu1 }
0x2b41   : > { %7908 = vrot.lane.b32.xlu0 %v15340_v60, %s16073_s5  ;;  %7685 = vrot.lane.b32.xlu1 %v15340_v60, %s16079_s1  ;;  %v11108_v19 = vpop.f32.mrb[75].mxu1  ;;  %v7674_v42 = vpack.c.bf16 %v7671_v4, %v7671_v4 }
0x2b42   : > { %v15462_v19 = vld [vmem:[%s12607_s4 + $0x60] sm:$0xff] }
0x2b45   : > { %8124 = vrot.lane.b32.xlu0 %v15330_v36, %s16075_s3  ;;  %7906 = vrot.lane.b32.xlu1 %v15336_v14, %s16073_s5 }
0x2b49   : > { %8126 = vrot.lane.b32.xlu0 %v15336_v14, %s16075_s3  ;;  %7898 = vrot.lane.b32.xlu1 %v7672_v0, %s16074_s21 }
0x2b4d   : > { %8128 = vrot.lane.b32.xlu0 %v15340_v60, %s16075_s3  ;;  %7900 = vrot.lane.b32.xlu1 %v7673_v5, %s16074_s21  ;;  %s16089_s3 = sld [smem:[#allocation16_spill]] }
0x2b51   : > { %8344 = vrot.lane.b32.xlu0 %v15330_v36, %s16076_s26  ;;  %7902 = vrot.lane.b32.xlu1 %v7674_v42, %s16074_s21 }
0x2b55   : > { %8346 = vrot.lane.b32.xlu0 %v15336_v14, %s16076_s26  ;;  %8118 = vrot.lane.b32.xlu1 %v7672_v0, %s16065_s23 }
0x2b59   : > { %8348 = vrot.lane.b32.xlu0 %v15340_v60, %s16076_s26  ;;  %8120 = vrot.lane.b32.xlu1 %v7673_v5, %s16065_s23 }
0x2b5d   : > { %8340 = vrot.lane.b32.xlu0 %v7673_v5, %s16066_s29  ;;  %8122 = vrot.lane.b32.xlu1 %v7674_v42, %s16065_s23  ;;  %s16085_s23 = sld [smem:[#allocation14_spill]] }
0x2b61   : > { %7819 = vrot.lane.b32.xlu0 %v15330_v36, %s16077_s24  ;;  %8338 = vrot.lane.b32.xlu1 %v7672_v0, %s16066_s29 }
0x2b65   : > { %7823 = vrot.lane.b32.xlu0 %v15340_v60, %s16077_s24  ;;  %8342 = vrot.lane.b32.xlu1 %v7674_v42, %s16066_s29 }
0x2b69   : > { %8044 = vrot.lane.b32.xlu0 %v15336_v14, %s16067_s2  ;;  %7821 = vrot.lane.b32.xlu1 %v15336_v14, %s16077_s24  ;;  %s16084_s24 = sld [smem:[#allocation13_spill]] }
0x2b6d   : > { %8046 = vrot.lane.b32.xlu0 %v15340_v60, %s16067_s2  ;;  %8042 = vrot.lane.b32.xlu1 %v15330_v36, %s16067_s2 }
0x2b91   : > { %v7682_v44 = vpop.permute.xlu0 %7681 }
0x2b92   : > { %v7697_v50 = vsel %vm1042_vm4, %v7682_v44, 0 }
0x2b93   : > { %11110 = vmatpush3.bf16.xpose.msra.mxu0 %v7697_v50  ;;  %v15468_v50 = vld [vmem:[%s12607_s4 + $0x68] sm:$0xff] }
0x2b94   : > { %11111 = vmatprep.subr.bf16.mxu0 %v12210_v1 }
0x2b95   : > { %v7905_v22 = vpop.permute.xlu0 %7904 }
0x2b96   : > { %v7920_v52 = vsel %vm1042_vm4, %v7905_v22, 0 }
0x2b9b   : > { %v7684_v21 = vpop.permute.xlu1 %7683 }
0x2b9c   : > { %v7700_v63 = vsel %vm1042_vm4, %v7684_v21, 0 }
0x2b9d   : > { %11112 = vmatpush3.bf16.xpose.msra.mxu0 %v7700_v63 }
0x2b9e   : > { %11113 = vmatprep.subr.bf16.mxu0 %v12210_v1 }
0x2bb3   : > { %v7909_v62 = vpop.permute.xlu0 %7908  ;;  %v7686_v23 = vpop.permute.xlu1 %7685 }
0x2bb4   : > { %v7703_v17 = vsel %vm1042_vm4, %v7686_v23, 0  ;;  %v7926_v40 = vsel %vm1042_vm4, %v7909_v62, 0 }
0x2bb5   : > { %11114 = vmatpush3.bf16.xpose.msra.mxu0 %v7703_v17  ;;  %v15478_v17 = vld [vmem:[%s12607_s4 + $0x70] sm:$0xff] }
0x2bb6   : > { %11145 = vmatprep.subr.bf16.mxu0 %v12210_v1 }
0x2bb7   : > { %v8125_v48 = vpop.permute.xlu0 %8124  ;;  %v7907_v13 = vpop.permute.xlu1 %7906 }
0x2bb8   : > { %v7923_v51 = vsel %vm1042_vm4, %v7907_v13, 0  ;;  %v8140_v47 = vsel %vm1042_vm4, %v8125_v48, 0 }
0x2bbb   : > { %v8127_v55 = vpop.permute.xlu0 %8126  ;;  %v7899_v16 = vpop.permute.xlu1 %7898 }
0x2bbc   : > { %11116 = vmatmul.mubr.msk.bf16.vlgmr.msra.gmra.mrb[68].mxu0 %vm1042_vm4, %v7672_v0  ;;  %v8143_v35 = vsel %vm1042_vm4, %v8127_v55, 0 }
0x2bbd   : > { %11146 = vmatpush3.bf16.xpose.msra.mxu0 %v7920_v52  ;;  %11119 = vmatprep.mubr.msk.bf16.mxu0 %vm12211_vm1, %v12210_v1 }
0x2bbe   : > { %11147 = vmatprep.subr.bf16.mxu0 %v12210_v1 }
0x2bbf   : > { %v8129_v10 = vpop.permute.xlu0 %8128  ;;  %v7901_v39 = vpop.permute.xlu1 %7900 }
0x2bc0   : > { %v8146_v53 = vsel %vm1042_vm4, %v8129_v10, 0 }
0x2bc3   : > { %v8345_v31 = vpop.permute.xlu0 %8344  ;;  %v7903_v41 = vpop.permute.xlu1 %7902 }
0x2bc4   : > { %11120 = vmatmul.mubr.msk.bf16.gmra.mrb[72].mxu0 %vm1042_vm4, %v7673_v5  ;;  %v8360_v46 = vsel %vm1042_vm4, %v8345_v31, 0 }
0x2bc5   : > { %11148 = vmatpush3.bf16.xpose.msra.mxu0 %v7923_v51  ;;  %11123 = vmatprep.mubr.msk.bf16.mxu0 %vm12211_vm1, %v12210_v1 }
0x2bc6   : > { %11149 = vmatprep.subr.bf16.mxu0 %v12210_v1 }
0x2bc7   : > { %v8347_v45 = vpop.permute.xlu0 %8346  ;;  %v8119_v27 = vpop.permute.xlu1 %8118 }
0x2bc8   : > { %v8363_v59 = vsel %vm1042_vm4, %v8347_v45, 0 }
0x2bcb   : > { %v8349_v29 = vpop.permute.xlu0 %8348  ;;  %v8121_v26 = vpop.permute.xlu1 %8120 }
0x2bcc   : > { %11124 = vmatmul.mubr.msk.bf16.gmra.mrb[76].mxu0 %vm1042_vm4, %v7674_v42  ;;  %v8366_v49 = vsel %vm1042_vm4, %v8349_v29, 0 }
0x2bcd   : > { %11150 = vmatpush3.bf16.xpose.msra.mxu0 %v7926_v40  ;;  %11151 = vmatprep.mubr.msk.bf16.mxu0 %vm12211_vm1, %v12210_v1 }
0x2bce   : > { %11181 = vmatprep.subr.bf16.mxu0 %v12210_v1 }
0x2bcf   : > { %v8341_v34 = vpop.permute.xlu0 %8340  ;;  %v8123_v8 = vpop.permute.xlu1 %8122 }
0x2bd3   : > { %v7820_v56 = vpop.permute.xlu0 %7819  ;;  %v8339_v9 = vpop.permute.xlu1 %8338 }
0x2bd4   : > { %11128 = vmatpush3.bf16.msra.mxu1 %v7820_v56  ;;  %11152 = vmatmul.mubr.msk.bf16.vlgmr.msra.gmra.mrb[80].mxu0 %vm1042_vm4, %v7899_v16 }
0x2bd5   : > { %11182 = vmatpush3.bf16.xpose.msra.mxu0 %v8140_v47  ;;  %11129 = vmatprep.subr.bf16.mxu1 %v12210_v1 }
0x2bd6   : > { %11155 = vmatprep.mubr.msk.bf16.mxu0 %vm12211_vm1, %v12210_v1  ;;  %11183 = vmatprep.subr.bf16.mxu0 %v12210_v1 }
0x2bd7   : > { %v8343_v2 = vpop.permute.xlu1 %8342  ;;  %v7824_v58 = vpop.permute.xlu0 %7823 }
0x2bd8   : > { %v7837_v3 = vsel %vm1193_vm5, %v7824_v58, 0 }
0x2bdb   : > { %v7822_v28 = vpop.permute.xlu1 %7821 }
0x2bdc   : > { %11130 = vmatpush3.bf16.msra.mxu1 %v7822_v28  ;;  %11156 = vmatmul.mubr.msk.bf16.gmra.mrb[84].mxu0 %vm1042_vm4, %v7901_v39 }
0x2bdd   : > { %11184 = vmatpush3.bf16.xpose.msra.mxu0 %v8143_v35  ;;  %11131 = vmatprep.subr.bf16.mxu1 %v12210_v1 }
0x2bde   : > { %11159 = vmatprep.mubr.msk.bf16.mxu0 %vm12211_vm1, %v12210_v1  ;;  %11185 = vmatprep.subr.bf16.mxu0 %v12210_v1 }
0x2be0   : > { %11132 = vmatpush3.bf16.msra.mxu1 %v7837_v3 }
0x2be1   : > { %11163 = vmatprep.subr.bf16.mxu1 %v12210_v1 }
0x2be4   : > { %11160 = vmatmul.mubr.msk.bf16.gmra.mrb[88].mxu0 %vm1042_vm4, %v7903_v41 }
0x2be5   : > { %11186 = vmatpush3.bf16.xpose.msra.mxu0 %v8146_v53  ;;  %11187 = vmatprep.mubr.msk.bf16.mxu0 %vm12211_vm1, %v12210_v1 }
0x2be6   : > { %11217 = vmatprep.subr.bf16.mxu0 %v12210_v1 }
0x2bec   : > { %11188 = vmatmul.mubr.msk.bf16.vlgmr.msra.gmra.mrb[92].mxu0 %vm1042_vm4, %v8119_v27 }
0x2bed   : > { %11218 = vmatpush3.bf16.xpose.msra.mxu0 %v8360_v46  ;;  %11191 = vmatprep.mubr.msk.bf16.mxu0 %vm12211_vm1, %v12210_v1 }
0x2bee   : > { %11219 = vmatprep.subr.bf16.mxu0 %v12210_v1 }
0x2bf4   : > { %11192 = vmatmul.mubr.msk.bf16.gmra.mrb[96].mxu0 %vm1042_vm4, %v8121_v26 }
0x2bf5   : > { %11220 = vmatpush3.bf16.xpose.msra.mxu0 %v8363_v59  ;;  %11195 = vmatprep.mubr.msk.bf16.mxu0 %vm12211_vm1, %v12210_v1 }
0x2bf6   : > { %11221 = vmatprep.subr.bf16.mxu0 %v12210_v1 }
0x2bfc   : > { %11196 = vmatmul.mubr.msk.bf16.gmra.mrb[100].mxu0 %vm1042_vm4, %v8123_v8 }
0x2bfd   : > { %11222 = vmatpush3.bf16.xpose.msra.mxu0 %v8366_v49  ;;  %11223 = vmatprep.mubr.msk.bf16.mxu0 %vm12211_vm1, %v12210_v1 }
0x2bfe   : > { %11253 = vmatprep.subr.bf16.mxu0 %v12210_v1 }
0x2c04   : > { %11224 = vmatmul.mubr.msk.bf16.vlgmr.msra.gmra.mrb[104].mxu0 %vm1042_vm4, %v8339_v9 }
0x2c05   : > { %11227 = vmatprep.mubr.msk.bf16.mxu0 %vm12211_vm1, %v12210_v1 }
0x2c0c   : > { %11228 = vmatmul.mubr.msk.bf16.gmra.mrb[108].mxu0 %vm1042_vm4, %v8341_v34 }
0x2c0d   : > { %11231 = vmatprep.mubr.msk.bf16.mxu0 %vm12211_vm1, %v12210_v1 }
0x2c14   : > { %11232 = vmatmul.mubr.msk.bf16.gmra.mrb[112].mxu0 %vm1042_vm4, %v8343_v2 }
0x2c15   : > { %11257 = vmatprep.mubr.msk.bf16.mxu0 %vm12211_vm1, %v12210_v1 }
0x2c8f   : > { %v7739_v0 = vpop.f32.mrb[68].mxu0 }
0x2c90   : > { %v15449_v20 = vadd.f32 %v15446_v32, %v7739_v0  ;;  %v11117_v7 = vpop.f32.mrb[69].mxu0 }
0x2c91   : > { %v7742_v37 = vpop.f32.mrb[70].mxu0 }
0x2c92   : > { %v15455_v12 = vadd.f32 %v15452_v30, %v7742_v37  ;;  %v11118_v5 = vpop.f32.mrb[71].mxu0  ;;  %v7761_v15 = vsel %vm1117_vm6, %v15449_v20, -inf }
0x2c93   : > { %7762 = vmax.xlane.f32.xlu0 %v7761_v15 }
0x2c94   : > { %v7764_v43 = vsel %vm1117_vm6, %v15455_v12, -inf }
0x2c95   : > { %7765 = vmax.xlane.f32.xlu1 %v7764_v43 }
0x2c97   : > { %v7747_v61 = vpop.f32.mrb[72].mxu0 }
0x2c98   : > { %v15465_v4 = vadd.f32 %v15462_v19, %v7747_v61  ;;  %v11121_v42 = vpop.f32.mrb[73].mxu0 }
0x2c99   : > { %v7750_v44 = vpop.f32.mrb[74].mxu0 }
0x2c9a   : > { %v15471_v21 = vadd.f32 %v15468_v50, %v7750_v44  ;;  %v11122_v63 = vpop.f32.mrb[75].mxu0  ;;  %v7767_v22 = vsel %vm1117_vm6, %v15465_v4, -inf }
0x2c9b   : > { %7768 = vmax.xlane.f32.xlu0 %v7767_v22 }
0x2c9c   : > { %v7770_v62 = vsel %vm1117_vm6, %v15471_v21, -inf }
0x2c9f   : > { %7771 = vmax.xlane.f32.xlu0 %v7770_v62  ;;  %v7755_v23 = vpop.f32.mrb[76].mxu0 }
0x2ca0   : > { %v15481_v48 = vadd.f32 %v15478_v17, %v7755_v23  ;;  %v11125_v13 = vpop.f32.mrb[77].mxu0 }
0x2ca1   : > { %v7758_v55 = vpop.f32.mrb[78].mxu0 }
0x2ca2   : > { %v11126_v16 = vpop.f32.mrb[79].mxu0  ;;  %v7773_v52 = vsel %vm1117_vm6, %v15481_v48, -inf }
0x2ca3   : > { %7774 = vmax.xlane.f32.xlu1 %v7773_v52 }
0x2ca7   : > { %v7962_v10 = vpop.f32.mrb[80].mxu0 }
0x2ca8   : > { %v15486_v39 = vadd.f32 %v15446_v32, %v7962_v10  ;;  %v11153_v31 = vpop.f32.mrb[81].mxu0 }
0x2ca9   : > { %v7965_v41 = vpop.f32.mrb[82].mxu0 }
0x2caa   : > { %v15489_v51 = vadd.f32 %v15452_v30, %v7965_v41  ;;  %v11154_v45 = vpop.f32.mrb[83].mxu0  ;;  %v7984_v27 = vsel %vm1117_vm6, %v15486_v39, -inf }
0x2cab   : > { %7985 = vmax.xlane.f32.xlu0 %v7984_v27 }
0x2cac   : > { %v7987_v29 = vsel %vm1117_vm6, %v15489_v51, -inf }
0x2cad   : > { %7988 = vmax.xlane.f32.xlu1 %v7987_v29 }
0x2caf   : > { %v7970_v26 = vpop.f32.mrb[84].mxu0 }
0x2cb0   : > { %v15496_v40 = vadd.f32 %v15462_v19, %v7970_v26  ;;  %v11157_v34 = vpop.f32.mrb[85].mxu0 }
0x2cb1   : > { %v7973_v8 = vpop.f32.mrb[86].mxu0 }
0x2cb2   : > { %v15499_v56 = vadd.f32 %v15468_v50, %v7973_v8  ;;  %v11158_v9 = vpop.f32.mrb[87].mxu0  ;;  %v7990_v47 = vsel %vm1117_vm6, %v15496_v40, -inf }
0x2cb3   : > { %7991 = vmax.xlane.f32.xlu0 %v7990_v47 }
0x2cb4   : > { %v7993_v2 = vsel %vm1117_vm6, %v15499_v56, -inf }
0x2cb5   : > { %7994 = vmax.xlane.f32.xlu1 %v7993_v2 }
0x2cb7   : > { %v7978_v28 = vpop.f32.mrb[88].mxu0 }
0x2cb8   : > { %v15506_v35 = vadd.f32 %v15478_v17, %v7978_v28  ;;  %v11161_v58 = vpop.f32.mrb[89].mxu0 }
0x2cb9   : > { %v7981_v3 = vpop.f32.mrb[90].mxu0 }
0x2cba   : > { %v11162_v53 = vpop.f32.mrb[91].mxu0  ;;  %v7996_v46 = vsel %vm1117_vm6, %v15506_v35, -inf }
0x2cbb   : > { %7997 = vmax.xlane.f32.xlu0 %v7996_v46 }
0x2cbf   : > { %v8182_v59 = vpop.f32.mrb[92].mxu0 }
0x2cc0   : > { %v15511_v49 = vadd.f32 %v15446_v32, %v8182_v59  ;;  %v11189_v0 = vpop.f32.mrb[93].mxu0 }
0x2cc1   : > { %v8185_v7 = vpop.f32.mrb[94].mxu0 }
0x2cc2   : > { %v15514_v37 = vadd.f32 %v15452_v30, %v8185_v7  ;;  %v11190_v5 = vpop.f32.mrb[95].mxu0  ;;  %v8204_v15 = vsel %vm1117_vm6, %v15511_v49, -inf }
0x2cc3   : > { %8205 = vmax.xlane.f32.xlu1 %v8204_v15 }
0x2cc4   : > { %v8207_v43 = vsel %vm1117_vm6, %v15514_v37, -inf }
0x2cc5   : > { %8208 = vmax.xlane.f32.xlu0 %v8207_v43  ;;  %v15564_v43 = vpop.permute.xlu0 %8044 }
0x2cc7   : > { %v8190_v61 = vpop.f32.mrb[96].mxu0 }
0x2cc8   : > { %v15521_v42 = vadd.f32 %v15462_v19, %v8190_v61  ;;  %v11193_v44 = vpop.f32.mrb[97].mxu0 }
0x2cc9   : > { %v8193_v63 = vpop.f32.mrb[98].mxu0  ;;  %v15566_v61 = vpop.permute.xlu0 %8046 }
0x2cca   : > { %v15524_v22 = vadd.f32 %v15468_v50, %v8193_v63  ;;  %v11194_v62 = vpop.f32.mrb[99].mxu0  ;;  %v8210_v23 = vsel %vm1117_vm6, %v15521_v42, -inf }
0x2ccb   : > { %8211 = vmax.xlane.f32.xlu1 %v8210_v23 }
0x2ccc   : > { %v8213_v13 = vsel %vm1117_vm6, %v15524_v22, -inf }
0x2ccd   : > { %8214 = vmax.xlane.f32.xlu0 %v8213_v13 }
0x2ccf   : > { %v8198_v55 = vpop.f32.mrb[100].mxu0 }
0x2cd0   : > { %v15531_v16 = vadd.f32 %v15478_v17, %v8198_v55  ;;  %v11197_v52 = vpop.f32.mrb[101].mxu0 }
0x2cd1   : > { %v8201_v10 = vpop.f32.mrb[102].mxu0 }
0x2cd2   : > { %v11198_v31 = vpop.f32.mrb[103].mxu0  ;;  %v8216_v41 = vsel %vm1117_vm6, %v15531_v16, -inf }
0x2cd3   : > { %8217 = vmax.xlane.f32.xlu1 %v8216_v41 }
0x2cd7   : > { %v8402_v45 = vpop.f32.mrb[104].mxu0 }
0x2cd8   : > { %v15536_v27 = vadd.f32 %v15446_v32, %v8402_v45  ;;  %v11225_v29 = vpop.f32.mrb[105].mxu0 }
0x2cd9   : > { %v8405_v26 = vpop.f32.mrb[106].mxu0 }
0x2cda   : > { %v11226_v34 = vpop.f32.mrb[107].mxu0  ;;  %v8424_v8 = vsel %vm1117_vm6, %v15536_v27, -inf  ;;  %v15545_v32 = vadd.f32 %v15452_v30, %v8405_v26 }
0x2cdb   : > { %8425 = vmax.xlane.f32.xlu0 %v8424_v8 }
0x2cdc   : > { %v8427_v0 = vsel %vm1117_vm6, %v15545_v32, -inf }
0x2cdf   : > { %v8410_v9 = vpop.f32.mrb[108].mxu0 }
0x2ce0   : > { %v11229_v47 = vpop.f32.mrb[109].mxu0  ;;  %v15553_v7 = vadd.f32 %v15462_v19, %v8410_v9  ;;  %v15568_v19 = vpop.permute.xlu1 %8042 }
0x2ce1   : > { %v8413_v2 = vpop.f32.mrb[110].mxu0 }
0x2ce2   : > { %v11230_v28 = vpop.f32.mrb[111].mxu0  ;;  %v15548_v59 = vadd.f32 %v15468_v50, %v8413_v2  ;;  %v8430_v30 = vsel %vm1117_vm6, %v15553_v7, -inf }
0x2ce4   : > { %8264 = vrot.lane.b32.xlu1 %v15336_v14, %s16068_s25  ;;  %v8433_v5 = vsel %vm1117_vm6, %v15548_v59, -inf }
0x2ce7   : > { %v8418_v58 = vpop.f32.mrb[112].mxu0 }
0x2ce8   : > { %v11233_v3 = vpop.f32.mrb[113].mxu0  ;;  %v15558_v15 = vadd.f32 %v15478_v17, %v8418_v58 }
0x2ce9   : > { %v8421_v53 = vpop.f32.mrb[114].mxu0 }
0x2cea   : > { %v11234_v46 = vpop.f32.mrb[115].mxu0  ;;  %v8436_v50 = vsel %vm1117_vm6, %v15558_v15, -inf }
0x2cf1   : > { %8262 = vrot.lane.b32.xlu0 %v15330_v36, %s16068_s25 }
0x2d08   : > { %8428 = vmax.xlane.f32.xlu1 %v8427_v0 }
0x2d0c   : > { %8434 = vmax.xlane.f32.xlu1 %v8433_v5 }
0x2d10   : > { %8431 = vmax.xlane.f32.xlu0 %v8430_v30 }
0x2d14   : > { %8437 = vmax.xlane.f32.xlu0 %v8436_v50 }
0x2d20   : > { %v7763_v44 = vpop.xlane.xlu0 %7762 }
0x2d21   : > { %v7776_v63 = vsub.f32 %v15449_v20, %v7763_v44 }
0x2d22   : > { %v7766_v62 = vpop.xlane.xlu1 %7765 }
0x2d23   : > { %v7781_v17 = vmul.f32 1.442695, %v7776_v63  ;;  %v7777_v23 = vsub.f32 %v15455_v12, %v7766_v62 }
0x2d25   : > { %12077 = vpow2.f32 %v7781_v17  ;;  %v7783_v13 = vmul.f32 1.442695, %v7777_v23 }
0x2d27   : > { %12079 = vpow2.f32 %v7783_v13 }
0x2d28   : > { %v7769_v55 = vpop.xlane.xlu0 %7768 }
0x2d29   : > { %v7778_v52 = vsub.f32 %v15465_v4, %v7769_v55 }
0x2d2b   : > { %v7785_v10 = vmul.f32 1.442695, %v7778_v52 }
0x2d2c   : > { %v7772_v31 = vpop.xlane.xlu0 %7771 }
0x2d2d   : > { %12081 = vpow2.f32 %v7785_v10  ;;  %v7779_v41 = vsub.f32 %v15471_v21, %v7772_v31 }
0x2d2f   : > { %v15574_v45 = vpop.eup %12077  ;;  %v7787_v29 = vmul.f32 1.442695, %v7779_v41 }
0x2d30   : > { %v7775_v26 = vpop.xlane.xlu1 %7774  ;;  %v7791_v20 = vsel %vm1117_vm6, %v15574_v45, 0.0 }
0x2d31   : > { %v15578_v34 = vpop.eup %12079  ;;  %12083 = vpow2.f32 %v7787_v29  ;;  %v7780_v12 = vsub.f32 %v15481_v48, %v7775_v26  ;;  %7792 = vadd.xlane.f32.xlu0 %v7791_v20 }
0x2d32   : > { %v7794_v4 = vsel %vm1117_vm6, %v15578_v34, 0.0 }
0x2d33   : > { %v7789_v8 = vmul.f32 1.442695, %v7780_v12  ;;  %7795 = vadd.xlane.f32.xlu1 %v7794_v4 }
0x2d35   : > { %12085 = vpow2.f32 %v7789_v8 }
0x2d37   : > { %v15583_v21 = vpop.eup %12081 }
0x2d38   : > { %v7986_v9 = vpop.xlane.xlu0 %7985  ;;  %v7797_v47 = vsel %vm1117_vm6, %v15583_v21, 0.0 }
0x2d39   : > { %v7999_v2 = vsub.f32 %v15486_v39, %v7986_v9  ;;  %7798 = vadd.xlane.f32.xlu0 %v7797_v47 }
0x2d3a   : > { %v7989_v28 = vpop.xlane.xlu1 %7988 }
0x2d3b   : > { %v15588_v58 = vpop.eup %12083  ;;  %v8004_v48 = vmul.f32 1.442695, %v7999_v2  ;;  %v8000_v3 = vsub.f32 %v15489_v51, %v7989_v28 }
0x2d3c   : > { %v7800_v53 = vsel %vm1117_vm6, %v15588_v58, 0.0 }
0x2d3d   : > { %12087 = vpow2.f32 %v8004_v48  ;;  %v8006_v46 = vmul.f32 1.442695, %v8000_v3  ;;  %7801 = vadd.xlane.f32.xlu1 %v7800_v53 }
0x2d3f   : > { %v15593_v0 = vpop.eup %12085  ;;  %12089 = vpow2.f32 %v8006_v46 }
0x2d40   : > { %v7992_v5 = vpop.xlane.xlu0 %7991  ;;  %v7803_v39 = vsel %vm1117_vm6, %v15593_v0, 0.0 }
0x2d41   : > { %v8001_v30 = vsub.f32 %v15496_v40, %v7992_v5  ;;  %7804 = vadd.xlane.f32.xlu1 %v7803_v39 }
0x2d42   : > { %v7995_v50 = vpop.xlane.xlu1 %7994 }
0x2d43   : > { %v8008_v44 = vmul.f32 1.442695, %v8001_v30  ;;  %v8002_v51 = vsub.f32 %v15499_v56, %v7995_v50 }
0x2d45   : > { %12091 = vpow2.f32 %v8008_v44  ;;  %v8010_v63 = vmul.f32 1.442695, %v8002_v51 }
0x2d47   : > { %v15599_v62 = vpop.eup %12087  ;;  %12093 = vpow2.f32 %v8010_v63 }
0x2d48   : > { %v7998_v17 = vpop.xlane.xlu0 %7997  ;;  %v8014_v23 = vsel %vm1117_vm6, %v15599_v62, 0.0 }
0x2d49   : > { %v15603_v13 = vpop.eup %12089  ;;  %v8003_v55 = vsub.f32 %v15506_v35, %v7998_v17  ;;  %8015 = vadd.xlane.f32.xlu1 %v8014_v23 }
0x2d4a   : > { %v8017_v40 = vsel %vm1117_vm6, %v15603_v13, 0.0 }
0x2d4b   : > { %v8012_v52 = vmul.f32 1.442695, %v8003_v55  ;;  %8018 = vadd.xlane.f32.xlu0 %v8017_v40 }
0x2d4d   : > { %12095 = vpow2.f32 %v8012_v52 }
0x2d4f   : > { %v15608_v56 = vpop.eup %12091 }
0x2d50   : > { %v8206_v10 = vpop.xlane.xlu1 %8205  ;;  %v8020_v31 = vsel %vm1117_vm6, %v15608_v56, 0.0 }
0x2d51   : > { %v15612_v41 = vpop.eup %12093  ;;  %v8219_v29 = vsub.f32 %v15511_v49, %v8206_v10  ;;  %8021 = vadd.xlane.f32.xlu1 %v8020_v31 }
0x2d52   : > { %v8023_v35 = vsel %vm1117_vm6, %v15612_v41, 0.0  ;;  %v8209_v49 = vpop.xlane.xlu0 %8208 }
0x2d53   : > { %v8224_v26 = vmul.f32 1.442695, %v8219_v29  ;;  %v8220_v9 = vsub.f32 %v15514_v37, %v8209_v49 }
0x2d55   : > { %12097 = vpow2.f32 %v8224_v26  ;;  %8024 = vadd.xlane.f32.xlu1 %v8023_v35  ;;  %v8226_v28 = vmul.f32 1.442695, %v8220_v9 }
0x2d57   : > { %v15617_v20 = vpop.eup %12095  ;;  %12099 = vpow2.f32 %v8226_v28 }
0x2d58   : > { %v8026_v12 = vsel %vm1117_vm6, %v15617_v20, 0.0  ;;  %v8212_v47 = vpop.xlane.xlu1 %8211 }
0x2d59   : > { %8027 = vadd.xlane.f32.xlu1 %v8026_v12  ;;  %v8221_v48 = vsub.f32 %v15521_v42, %v8212_v47 }
0x2d5a   : > { %v8215_v2 = vpop.xlane.xlu0 %8214 }
0x2d5b   : > { %v8222_v53 = vsub.f32 %v15524_v22, %v8215_v2  ;;  %v8228_v46 = vmul.f32 1.442695, %v8221_v48 }
0x2d5d   : > { %12101 = vpow2.f32 %v8228_v46 }
0x2d5f   : > { %v15621_v4 = vpop.eup %12097 }
0x2d60   : > { %v8234_v8 = vsel %vm1117_vm6, %v15621_v4, 0.0  ;;  %v8218_v39 = vpop.xlane.xlu1 %8217 }
0x2d61   : > { %8235 = vadd.xlane.f32.xlu0 %v8234_v8  ;;  %v8223_v30 = vsub.f32 %v15531_v16, %v8218_v39  ;;  %v15634_v44 = vpop.eup %12099 }
0x2d62   : > { %v8237_v42 = vsel %vm1117_vm6, %v15634_v44, 0.0 }
0x2d63   : > { %v8232_v37 = vmul.f32 1.442695, %v8223_v30 }
0x2d67   : > { %v15638_v22 = vpop.eup %12101 }
0x2d68   : > { %v8426_v3 = vpop.xlane.xlu0 %8425  ;;  %v8240_v16 = vsel %vm1117_vm6, %v15638_v22, 0.0 }
0x2d69   : > { %v8439_v5 = vsub.f32 %v15536_v27, %v8426_v3  ;;  %v15642_v27 = vpop.permute.xlu1 %8264 }
0x2d6a   : > { %8482 = vrot.lane.b32.xlu1 %v15330_v36, %s16069_s30  ;;  %v8230_v36 = vmul.f32 1.442695, %v8222_v53 }
0x2d6b   : > { %v8444_v50 = vmul.f32 1.442695, %v8439_v5 }
0x2d6c   : > { %12103 = vpow2.f32 %v8230_v36  ;;  %v15655_v31 = vpop.permute.xlu0 %8262 }
0x2d6d   : > { %12105 = vpow2.f32 %v8444_v50 }
0x2d6e   : > { %12107 = vpow2.f32 %v8232_v37 }
0x2d76   : > { %v15640_v51 = vpop.eup %12103 }
0x2d77   : > { %8266 = vrot.lane.b32.xlu0 %v15340_v60, %s16068_s25  ;;  %v15646_v63 = vpop.eup %12105  ;;  %v8243_v23 = vsel %vm1117_vm6, %v15640_v51, 0.0  ;;  %s16087_s25 = sld [smem:[#allocation15_spill]] }
0x2d78   : > { %v8454_v55 = vsel %vm1117_vm6, %v15646_v63, 0.0  ;;  %v15652_v40 = vpop.eup %12107 }
0x2d79   : > { %v8246_v26 = vsel %vm1117_vm6, %v15652_v40, 0.0 }
0x2d8e   : > { %8238 = vadd.xlane.f32.xlu1 %v8237_v42 }
0x2d92   : > { %8241 = vadd.xlane.f32.xlu1 %v8240_v16 }
0x2d95   : > { %v8429_v17 = vpop.xlane.xlu1 %8428 }
0x2d96   : > { %v8440_v52 = vsub.f32 %v15545_v32, %v8429_v17  ;;  %8244 = vadd.xlane.f32.xlu1 %v8243_v23  ;;  %8455 = vadd.xlane.f32.xlu0 %v8454_v55 }
0x2d98   : > { %v8446_v10 = vmul.f32 1.442695, %v8440_v52 }
0x2d99   : > { %v8435_v29 = vpop.xlane.xlu1 %8434 }
0x2d9a   : > { %12109 = vpow2.f32 %v8446_v10  ;;  %v8442_v35 = vsub.f32 %v15548_v59, %v8435_v29  ;;  %8247 = vadd.xlane.f32.xlu1 %v8246_v26 }
0x2d9c   : > { %v8450_v12 = vmul.f32 1.442695, %v8442_v35 }
0x2d9d   : > { %v8432_v8 = vpop.xlane.xlu0 %8431 }
0x2d9e   : > { %12111 = vpow2.f32 %v8450_v12  ;;  %v8441_v49 = vsub.f32 %v15553_v7, %v8432_v8 }
0x2da0   : > { %v8448_v9 = vmul.f32 1.442695, %v8441_v49 }
0x2da1   : > { %v8438_v7 = vpop.xlane.xlu0 %8437 }
0x2da2   : > { %12113 = vpow2.f32 %v8448_v9  ;;  %v8443_v37 = vsub.f32 %v15558_v15, %v8438_v7 }
0x2da4   : > { %v15661_v32 = vpop.eup %12109 }
0x2da5   : > { %v8457_v47 = vsel %vm1117_vm6, %v15661_v32, 0.0 }
0x2da6   : > { %8458 = vadd.xlane.f32.xlu1 %v8457_v47 }
0x2da8   : > { %v15665_v2 = vpop.eup %12111 }
0x2da9   : > { %v8463_v28 = vsel %vm1117_vm6, %v15665_v2, 0.0 }
0x2daa   : > { %8464 = vadd.xlane.f32.xlu0 %v8463_v28 }
0x2dac   : > { %v15669_v59 = vpop.eup %12113 }
0x2dad   : > { %v8460_v48 = vsel %vm1117_vm6, %v15669_v59, 0.0 }
0x2dae   : > { %8461 = vadd.xlane.f32.xlu1 %v8460_v48 }
0x2dbe   : > { %v7793_v3 = vpop.xlane.xlu0 %7792 }
0x2dbf   : > { %12115 = vrcp.f32 %v7793_v3  ;;  %8484 = vrot.lane.b32.xlu1 %v15336_v14, %s16069_s30  ;;  %v8452_v14 = vmul.f32 1.442695, %v8443_v37 }
0x2dc0   : > { %v7796_v53 = vpop.xlane.xlu1 %7795  ;;  %8486 = vrot.lane.b32.xlu0 %v15340_v60, %s16069_s30 }
0x2dc1   : > { %12117 = vrcp.f32 %v7796_v53 }
0x2dc6   : > { %v7799_v46 = vpop.xlane.xlu0 %7798 }
0x2dc7   : > { %12119 = vrcp.f32 %v7799_v46 }
0x2dc9   : > { %v12116_v5 = vpop.eup %12115 }
0x2dca   : > { %v7802_v39 = vpop.xlane.xlu1 %7801  ;;  %v7811_v30 = vmul.f32 %v12116_v5, %v15574_v45 }
0x2dcb   : > { %v12118_v36 = vpop.eup %12117  ;;  %12121 = vrcp.f32 %v7802_v39 }
0x2dcc   : > { %v7812_v50 = vmul.f32 %v12118_v36, %v15578_v34 }
0x2dce   : > { %v7816_v42 = vpack.c.bf16 %v7812_v50, %v7811_v30  ;;  %v7805_v16 = vpop.xlane.xlu1 %7804 }
0x2dcf   : > { %12123 = vrcp.f32 %v7805_v16 }
0x2dd0   : > { %11134 = vmatmul.mubr.msk.bf16.vlgmr.msra.gmra.mrb[76].mxu1 %vm1117_vm6, %v7816_v42  ;;  %12125 = vpow2.f32 %v8452_v14 }
0x2dd1   : > { %11164 = vmatpush3.bf16.msra.mxu1 %v15568_v19  ;;  %11137 = vmatprep.mubr.msk.bf16.mxu1 %vm12211_vm1, %v12210_v1  ;;  %v12120_v60 = vpop.eup %12119  ;;  %v8060_v19 = vsel %vm1193_vm5, %v15566_v61, 0 }
0x2dd2   : > { %11165 = vmatprep.subr.bf16.mxu1 %v12210_v1  ;;  %v7813_v15 = vmul.f32 %v12120_v60, %v15583_v21 }
0x2dd5   : > { %v12122_v17 = vpop.eup %12121  ;;  %11166 = vmatpush3.bf16.msra.mxu1 %v15564_v43 }
0x2dd6   : > { %v7814_v45 = vmul.f32 %v12122_v17, %v15588_v58  ;;  %v8016_v34 = vpop.xlane.xlu1 %8015  ;;  %11167 = vmatprep.subr.bf16.mxu1 %v12210_v1 }
0x2dd7   : > { %12127 = vrcp.f32 %v8016_v34 }
0x2dd8   : > { %v7817_v23 = vpack.c.bf16 %v7814_v45, %v7813_v15  ;;  %v8019_v55 = vpop.xlane.xlu0 %8018 }
0x2dd9   : > { %v12124_v52 = vpop.eup %12123  ;;  %11168 = vmatpush3.bf16.msra.mxu1 %v8060_v19  ;;  %12129 = vrcp.f32 %v8019_v55 }
0x2dda   : > { %11138 = vmatmul.mubr.msk.bf16.gmra.mrb[80].mxu1 %vm1117_vm6, %v7817_v23  ;;  %11199 = vmatprep.subr.bf16.mxu1 %v12210_v1  ;;  %v7815_v43 = vmul.f32 %v12124_v52, %v15593_v0  ;;  %v15696_v58 = vpop.eup %12125 }
0x2ddb   : > { %11141 = vmatprep.mubr.msk.bf16.mxu1 %vm12211_vm1, %v12210_v1  ;;  %v8466_v26 = vsel %vm1117_vm6, %v15696_v58, 0.0 }
0x2ddc   : > { %v7818_v10 = vpack.c.bf16 %v7815_v43, %v7815_v43 }
0x2dde   : > { %v8022_v21 = vpop.xlane.xlu1 %8021 }
0x2ddf   : > { %12131 = vrcp.f32 %v8022_v21 }
0x2de1   : > { %v12128_v61 = vpop.eup %12127 }
0x2de2   : > { %v8025_v29 = vpop.xlane.xlu1 %8024  ;;  %11142 = vmatmul.mubr.msk.bf16.gmra.mrb[84].mxu1 %vm1117_vm6, %v7818_v10  ;;  %v8034_v12 = vmul.f32 %v12128_v61, %v15599_v62 }
0x2de3   : > { %v12130_v35 = vpop.eup %12129  ;;  %12133 = vrcp.f32 %v8025_v29  ;;  %8467 = vadd.xlane.f32.xlu1 %v8466_v26  ;;  %11169 = vmatprep.mubr.msk.bf16.mxu1 %vm12211_vm1, %v12210_v1 }
0x2de4   : > { %v8035_v0 = vmul.f32 %v12130_v35, %v15603_v13 }
0x2de6   : > { %v8028_v8 = vpop.xlane.xlu1 %8027  ;;  %v8039_v49 = vpack.c.bf16 %v8035_v0, %v8034_v12 }
0x2de7   : > { %12135 = vrcp.f32 %v8028_v8 }
0x2de9   : > { %v12132_v9 = vpop.eup %12131 }
0x2dea   : > { %11170 = vmatmul.mubr.msk.bf16.vlgmr.msra.gmra.mrb[88].mxu1 %vm1117_vm6, %v8039_v49  ;;  %v8036_v28 = vmul.f32 %v12132_v9, %v15608_v56 }
0x2deb   : > { %11200 = vmatpush3.bf16.msra.mxu1 %v15655_v31  ;;  %11173 = vmatprep.mubr.msk.bf16.mxu1 %vm12211_vm1, %v12210_v1 }
0x2dec   : > { %11201 = vmatprep.subr.bf16.mxu1 %v12210_v1 }
0x2ded   : > { %v12134_v47 = vpop.eup %12133 }
0x2dee   : > { %v8037_v13 = vmul.f32 %v12134_v47, %v15612_v41  ;;  %v8236_v48 = vpop.xlane.xlu0 %8235  ;;  %v8483_v41 = vpop.permute.xlu1 %8482 }
0x2def   : > { %11202 = vmatpush3.bf16.msra.mxu1 %v15642_v27  ;;  %12137 = vrcp.f32 %v8236_v48 }
0x2df0   : > { %v8040_v62 = vpack.c.bf16 %v8037_v13, %v8036_v28  ;;  %11203 = vmatprep.subr.bf16.mxu1 %v12210_v1 }
0x2df1   : > { %v12136_v7 = vpop.eup %12135 }
0x2df2   : > { %11174 = vmatmul.mubr.msk.bf16.gmra.mrb[92].mxu1 %vm1117_vm6, %v8040_v62  ;;  %v8267_v31 = vpop.permute.xlu0 %8266  ;;  %v8038_v53 = vmul.f32 %v12136_v7, %v15617_v20 }
0x2df3   : > { %v8280_v3 = vsel %vm1193_vm5, %v8267_v31, 0  ;;  %11177 = vmatprep.mubr.msk.bf16.mxu1 %vm12211_vm1, %v12210_v1 }
0x2df4   : > { %11204 = vmatpush3.bf16.msra.mxu1 %v8280_v3  ;;  %v8041_v56 = vpack.c.bf16 %v8038_v53, %v8038_v53 }
0x2df5   : > { %11235 = vmatprep.subr.bf16.mxu1 %v12210_v1 }
0x2df9   : > { %v12138_v39 = vpop.eup %12137 }
0x2dfa   : > { %11178 = vmatmul.mubr.msk.bf16.gmra.mrb[96].mxu1 %vm1117_vm6, %v8041_v56  ;;  %v8254_v20 = vmul.f32 %v12138_v39, %v15621_v4 }
0x2dfb   : > { %11205 = vmatprep.mubr.msk.bf16.mxu1 %vm12211_vm1, %v12210_v1 }
0x2e1b   : > { %v8239_v27 = vpop.xlane.xlu1 %8238 }
0x2e1c   : > { %12139 = vrcp.f32 %v8239_v27 }
0x2e1f   : > { %v8242_v46 = vpop.xlane.xlu1 %8241 }
0x2e20   : > { %12141 = vrcp.f32 %v8242_v46 }
0x2e23   : > { %v8245_v5 = vpop.xlane.xlu1 %8244 }
0x2e24   : > { %12143 = vrcp.f32 %v8245_v5 }
0x2e26   : > { %v12140_v36 = vpop.eup %12139 }
0x2e27   : > { %v8255_v30 = vmul.f32 %v12140_v36, %v15634_v44  ;;  %v8248_v50 = vpop.xlane.xlu1 %8247  ;;  %v8456_v44 = vpop.xlane.xlu0 %8455 }
0x2e28   : > { %12145 = vrcp.f32 %v8248_v50 }
0x2e29   : > { %v8259_v37 = vpack.c.bf16 %v8255_v30, %v8254_v20 }
0x2e2a   : > { %v12142_v42 = vpop.eup %12141 }
0x2e2b   : > { %11206 = vmatmul.mubr.msk.bf16.vlgmr.msra.gmra.mrb[100].mxu1 %vm1117_vm6, %v8259_v37  ;;  %v8256_v14 = vmul.f32 %v12142_v42, %v15638_v22 }
0x2e2c   : > { %11236 = vmatpush3.bf16.msra.mxu1 %v8483_v41  ;;  %11209 = vmatprep.mubr.msk.bf16.mxu1 %vm12211_vm1, %v12210_v1 }
0x2e2d   : > { %11237 = vmatprep.subr.bf16.mxu1 %v12210_v1 }
0x2e2e   : > { %v12144_v16 = vpop.eup %12143 }
0x2e2f   : > { %v8257_v60 = vmul.f32 %v12144_v16, %v15640_v51 }
0x2e31   : > { %v8260_v4 = vpack.c.bf16 %v8257_v60, %v8256_v14 }
0x2e32   : > { %v12146_v17 = vpop.eup %12145 }
0x2e33   : > { %v8459_v15 = vpop.xlane.xlu1 %8458  ;;  %11210 = vmatmul.mubr.msk.bf16.gmra.mrb[104].mxu1 %vm1117_vm6, %v8260_v4  ;;  %v8258_v45 = vmul.f32 %v12146_v17, %v15652_v40  ;;  %v11577_v4 = vld [vmem:[%s15994_s9 + $0x50] sm:$0xff]  }
0x2e34   : > { %12147 = vrcp.f32 %v8459_v15  ;;  %11213 = vmatprep.mubr.msk.bf16.mxu1 %vm12211_vm1, %v12210_v1  ;;  %11254 = vmatpush3.bf16.msra.mxu0 %v11577_v4 }
0x2e35   : > { %12149 = vrcp.f32 %v8456_v44  ;;  %v8261_v34 = vpack.c.bf16 %v8258_v45, %v8258_v45  ;;  %11255 = vmatprep.subr.bf16.mxu0 %v12210_v1 }
0x2e37   : > { %v8465_v19 = vpop.xlane.xlu0 %8464 }
0x2e3b   : > { %v8462_v23 = vpop.xlane.xlu1 %8461  ;;  %11214 = vmatmul.mubr.msk.bf16.gmra.mrb[108].mxu1 %vm1117_vm6, %v8261_v34  ;;  %v8487_v52 = vpop.permute.xlu0 %8486 }
0x2e3c   : > { %12151 = vrcp.f32 %v8462_v23  ;;  %11241 = vmatprep.mubr.msk.bf16.mxu1 %vm12211_vm1, %v12210_v1  ;;  %v8500_v21 = vsel %vm1193_vm5, %v8487_v52, 0 }
0x2e3d   : > { %12153 = vrcp.f32 %v8465_v19 }
0x2e3e   : > { %v12148_v22 = vpop.eup %12147 }
0x2e3f   : > { %v8485_v51 = vpop.permute.xlu1 %8484  ;;  %v12150_v55 = vpop.eup %12149  ;;  %v8475_v43 = vmul.f32 %v12148_v22, %v15661_v32 }
0x2e40   : > { %11238 = vmatpush3.bf16.msra.mxu1 %v8485_v51  ;;  %v8474_v40 = vmul.f32 %v12150_v55, %v15646_v63 }
0x2e41   : > { %11239 = vmatprep.subr.bf16.mxu1 %v12210_v1 }
0x2e42   : > { %v8479_v10 = vpack.c.bf16 %v8475_v43, %v8474_v40  ;;  %v11578_v43 = vld [vmem:[%s15994_s9 + $0x58] sm:$0xff]  }
0x2e43   : > { %11256 = vmatpush3.bf16.msra.mxu0 %v11578_v43 }
0x2e44   : > { %11240 = vmatpush3.bf16.msra.mxu1 %v8500_v21  ;;  %11269 = vmatprep.subr.bf16.mxu0 %v12210_v1 }
0x2e46   : > { %v12152_v61 = vpop.eup %12151 }
0x2e47   : > { %11242 = vmatmul.mubr.msk.bf16.vlgmr.msra.gmra.mrb[112].mxu1 %vm1117_vm6, %v8479_v10  ;;  %v12154_v29 = vpop.eup %12153  ;;  %v8476_v26 = vmul.f32 %v12152_v61, %v15669_v59 }
0x2e48   : > { %11245 = vmatprep.mubr.msk.bf16.mxu1 %vm12211_vm1, %v12210_v1  ;;  %v8477_v35 = vmul.f32 %v12154_v29, %v15665_v2 }
0x2e4a   : > { %v8480_v32 = vpack.c.bf16 %v8477_v35, %v8476_v26 }
0x2e4f   : > { %11246 = vmatmul.mubr.msk.bf16.gmra.mrb[116].mxu1 %vm1117_vm6, %v8480_v32 }
0x2e50   : > { %11249 = vmatprep.mubr.msk.bf16.mxu1 %vm12211_vm1, %v12210_v1 }
0x2e70   : > { %v8468_v63 = vpop.xlane.xlu1 %8467 }
0x2e71   : > { %12155 = vrcp.f32 %v8468_v63 }
0x2e7b   : > { %v12156_v0 = vpop.eup %12155 }
0x2e7c   : > { %v8478_v12 = vmul.f32 %v12156_v0, %v15696_v58 }
0x2e7e   : > { %v8481_v8 = vpack.c.bf16 %v8478_v12, %v8478_v12 }
0x2e80   : > { %11250 = vmatmul.mubr.msk.bf16.gmra.mrb[120].mxu1 %vm1117_vm6, %v8481_v8 }
0x2e81   : > { %8898 = vmatprep.mubr.bf16.mxu1 %v12212_v6 }
0x2ea3   : > { %v15753_v49 = vpop.f32.mrb[76].mxu1 }
0x2ea4   : > { %v11135_v59 = vpop.f32.mrb[77].mxu1 }
0x2ea5   : > { %v15755_v2 = vpop.f32.mrb[78].mxu1 }
0x2ea6   : > { %v11136_v9 = vpop.f32.mrb[79].mxu1 }
0x2ead   : > { %v15757_v47 = vpop.f32.mrb[80].mxu1 }
0x2eae   : > { %v11139_v28 = vpop.f32.mrb[81].mxu1 }
0x2eaf   : > { %v15759_v13 = vpop.f32.mrb[82].mxu1 }
0x2eb0   : > { %v11140_v48 = vpop.f32.mrb[83].mxu1 }
0x2eb5   : > { %v15761_v62 = vpop.f32.mrb[84].mxu1 }
0x2eb6   : > { %v11143_v58 = vpop.f32.mrb[85].mxu1 }
0x2eb7   : > { %v7892_v7 = vpop.f32.mrb[86].mxu1 }
0x2eb8   : > { %v11144_v31 = vpop.f32.mrb[87].mxu1 }
0x2ebd   : > { %v8096_v3 = vpop.f32.mrb[88].mxu1 }
0x2ebe   : > { %v11171_v53 = vpop.f32.mrb[89].mxu1 }
0x2ebf   : > { %v8099_v56 = vpop.f32.mrb[90].mxu1 }
0x2ec0   : > { %v11499_v41 = vpack.i.bf16 %v8099_v56, %v8096_v3  ;;  %v11172_v27 = vpop.f32.mrb[91].mxu1 }
0x2ec2   : > { %11500 = vrot.lane.b32.xlu0 %v11499_v41, %s16070_s0 }
0x2ec5   : > { %v8104_v46 = vpop.f32.mrb[92].mxu1 }
0x2ec6   : > { %v11175_v5 = vpop.f32.mrb[93].mxu1 }
0x2ec7   : > { %v8107_v39 = vpop.f32.mrb[94].mxu1 }
0x2ec8   : > { %v11514_v36 = vpack.i.bf16 %v8107_v39, %v8104_v46  ;;  %v11176_v20 = vpop.f32.mrb[95].mxu1 }
0x2ecd   : > { %v8112_v30 = vpop.f32.mrb[96].mxu1 }
0x2ece   : > { %v11179_v50 = vpop.f32.mrb[97].mxu1 }
0x2ecf   : > { %v8115_v37 = vpop.f32.mrb[98].mxu1 }
0x2ed0   : > { %v11180_v42 = vpop.f32.mrb[99].mxu1 }
0x2efe   : > { %v8316_v16 = vpop.f32.mrb[100].mxu1 }
0x2eff   : > { %v11207_v14 = vpop.f32.mrb[101].mxu1 }
0x2f00   : > { %v8319_v60 = vpop.f32.mrb[102].mxu1 }
0x2f01   : > { %v11504_v17 = vpack.i.bf16 %v8319_v60, %v8316_v16  ;;  %v11208_v44 = vpop.f32.mrb[103].mxu1 }
0x2f03   : > { %11505 = vrot.lane.b32.xlu0 %v11504_v17, %s16071_s27 }
0x2f06   : > { %v8324_v15 = vpop.f32.mrb[104].mxu1 }
0x2f07   : > { %11515 = vrot.lane.b32.xlu0 %v11514_v36, %s16070_s0  ;;  %v11211_v45 = vpop.f32.mrb[105].mxu1 }
0x2f08   : > { %v8327_v34 = vpop.f32.mrb[106].mxu1 }
0x2f09   : > { %v11519_v19 = vpack.i.bf16 %v8327_v34, %v8324_v15  ;;  %v11212_v23 = vpop.f32.mrb[107].mxu1 }
0x2f0b   : > { %11520 = vrot.lane.b32.xlu0 %v11519_v19, %s16071_s27 }
0x2f0e   : > { %v8332_v22 = vpop.f32.mrb[108].mxu1 }
0x2f0f   : > { %v11215_v51 = vpop.f32.mrb[109].mxu1 }
0x2f10   : > { %v8335_v55 = vpop.f32.mrb[110].mxu1 }
0x2f11   : > { %v11216_v52 = vpop.f32.mrb[111].mxu1 }
0x2f1a   : > { %v8536_v40 = vpop.f32.mrb[112].mxu1 }
0x2f1b   : > { %v11243_v21 = vpop.f32.mrb[113].mxu1 }
0x2f1c   : > { %v8539_v10 = vpop.f32.mrb[114].mxu1 }
0x2f1d   : > { %v11509_v61 = vpack.i.bf16 %v8539_v10, %v8536_v40  ;;  %v11244_v29 = vpop.f32.mrb[115].mxu1  ;;  %v9733_v40 = vld [vmem:[%s16080_s22 + $0x5] ss:$0 sm:$0xff] }
0x2f1f   : > { %11510 = vrot.lane.b32.xlu1 %v11509_v61, %s16072_s28 }
0x2f22   : > { %v8544_v26 = vpop.f32.mrb[116].mxu1 }
0x2f23   : > { %8591 = vrot.lane.b32.xlu1 %v8332_v22, %s16071_s27  ;;  %v11247_v35 = vpop.f32.mrb[117].mxu1 }
0x2f24   : > { %v8547_v32 = vpop.f32.mrb[118].mxu1 }
0x2f25   : > { %v11524_v63 = vpack.i.bf16 %v8547_v32, %v8544_v26  ;;  %v11248_v0 = vpop.f32.mrb[119].mxu1 }
0x2f27   : > { %11525 = vrot.lane.b32.xlu0 %v11524_v63, %s16072_s28 }
0x2f2b   : > { %8571 = vrot.lane.b32.xlu0 %v8112_v30, %s16070_s0 }
0x2f34   : > { %v11501_v28 = vpop.permute.xlu0 %11500 }
0x2f35   : > { %v11503_v58 = vunpack.i.h.bf16 %v11501_v28  ;;  %v11502_v7 = vunpack.i.l.bf16 %v11501_v28 }
0x2f37   : > { %v8619_v41 = vsel %vm1042_vm4, %v15755_v2, %v11503_v58  ;;  %v8618_v27 = vsel %vm1042_vm4, %v15753_v49, %v11502_v7 }
0x2f53   : > { %v8552_v12 = vpop.f32.mrb[120].mxu1 }
0x2f54   : > { %8611 = vrot.lane.b32.xlu0 %v8552_v12, %s16072_s28  ;;  %v11251_v8 = vpop.f32.mrb[121].mxu1 }
0x2f55   : > { %v8555_v59 = vpop.f32.mrb[122].mxu1 }
0x2f56   : > { %v11252_v9 = vpop.f32.mrb[123].mxu1 }
0x2f75   : > { %v11506_v48 = vpop.permute.xlu0 %11505 }
0x2f76   : > { %v11508_v3 = vunpack.i.h.bf16 %v11506_v48  ;;  %v11507_v53 = vunpack.i.l.bf16 %v11506_v48 }
0x2f78   : > { %v8623_v39 = vsel %vm1981_vm7, %v8618_v27, %v11507_v53  ;;  %v8624_v36 = vsel %vm1981_vm7, %v8619_v41, %v11508_v3 }
0x2f79   : > { %v11516_v31 = vpop.permute.xlu0 %11515 }
0x2f7a   : > { %v11518_v42 = vunpack.i.h.bf16 %v11516_v31  ;;  %v11517_v16 = vunpack.i.l.bf16 %v11516_v31 }
0x2f7c   : > { %v8621_v2 = vsel %vm1042_vm4, %v15759_v13, %v11518_v42  ;;  %v8620_v4 = vsel %vm1042_vm4, %v15757_v47, %v11517_v16 }
0x2f7d   : > { %v11521_v20 = vpop.permute.xlu0 %11520 }
0x2f7e   : > { %v11523_v14 = vunpack.i.h.bf16 %v11521_v20  ;;  %v11522_v60 = vunpack.i.l.bf16 %v11521_v20 }
0x2f80   : > { %v8625_v15 = vsel %vm1981_vm7, %v8620_v4, %v11522_v60  ;;  %v8626_v45 = vsel %vm1981_vm7, %v8621_v2, %v11523_v14 }
0x2f91   : > { %v11511_v56 = vpop.permute.xlu1 %11510 }
0x2f92   : > { %v11513_v46 = vunpack.i.h.bf16 %v11511_v56  ;;  %v11512_v5 = vunpack.i.l.bf16 %v11511_v56 }
0x2f94   : > { %v8628_v30 = vsel %vm1987_vm8, %v8623_v39, %v11512_v5  ;;  %v8629_v50 = vsel %vm1987_vm8, %v8624_v36, %v11513_v46 }
0x2f95   : > { %v8633_v37 = vpack.c.bf16 %v8629_v50, %v8628_v30  ;;  %v8592_v22 = vpop.permute.xlu1 %8591 }
0x2f97   : > { %11258 = vmatmul.mubr.msk.bf16.vlgmr.msra.gmra.mrb[116].mxu0 %vm799_vm3, %v8633_v37 }
0x2f98   : > { %11261 = vmatprep.mubr.msk.bf16.mxu0 %vm12211_vm1, %v12210_v1 }
0x2f99   : > { %v11526_v49 = vpop.permute.xlu0 %11525 }
0x2f9a   : > { %v11528_v17 = vunpack.i.h.bf16 %v11526_v49  ;;  %v11527_v44 = vunpack.i.l.bf16 %v11526_v49 }
0x2f9c   : > { %v8630_v34 = vsel %vm1987_vm8, %v8625_v15, %v11527_v44  ;;  %v8631_v19 = vsel %vm1987_vm8, %v8626_v45, %v11528_v17  ;;  %v11581_v45 = vld [vmem:[%s15997_s12 + $0x24] ss:$8 sps:$4 sm:$0xff]  }
0x2f9d   : > { %v8634_v23 = vpack.c.bf16 %v8631_v19, %v8630_v34  ;;  %v8572_v13 = vpop.permute.xlu0 %8571  ;;  %v11579_v34 = vld [vmem:[%s15997_s12 + $0x20] ss:$8 sps:$4 sm:$0xff]   ;;  %8866 = vmatprep.subr.bf16.mxu1 %v11581_v45  ;;  %v11584_v19 = vld [vmem:[%s15997_s12 + $0x34] ss:$8 sps:$4 sm:$0xff]  }
0x2f9e   : > { %v8622_v47 = vsel %vm1042_vm4, %v15761_v62, %v8572_v13  ;;  %8867 = vmatpush1.bf16.msra.mxu1 %v11579_v34  ;;  %v11590_v45 = vld [vmem:[%s15999_s14 + $0x68] sm:$0xff]   ;;  %v11591_v34 = vld [vmem:[%s15999_s14 + $0x70] sm:$0xff]  }
0x2f9f   : > { %11262 = vmatmul.mubr.msk.bf16.gmra.mrb[120].mxu0 %vm799_vm3, %v8634_v23  ;;  %v8627_v51 = vsel %vm1981_vm7, %v8622_v47, %v8592_v22  ;;  %v11582_v23 = vld [vmem:[%s15997_s12 + $0x30] ss:$8 sps:$4 sm:$0xff]   ;;  %8868 = vmatprep.subr.bf16.mxu1 %v11584_v19 }
0x2fa0   : > { %11265 = vmatprep.mubr.msk.bf16.mxu0 %vm12211_vm1, %v12210_v1  ;;  %v11592_v19 = vld [vmem:[%s15999_s14 + $0x78] sm:$0xff]  }
0x2fa2   : > { %8869 = vmatpush1.bf16.msra.mxu1 %v11582_v23  ;;  %v9744_v23 = vld [vmem:[%s15998_s13 + $0x2] sm:$0x3] }
0x2fa3   : > { %11305 = vmatprep.subr.bf16.mxu1 %v12210_v1 }
0x2fc6   : > { %v8612_v55 = vpop.permute.xlu0 %8611 }
0x2fc7   : > { %v8632_v52 = vsel %vm1987_vm8, %v8627_v51, %v8612_v55 }
0x2fc8   : > { %v8635_v43 = vpack.c.bf16 %v8632_v52, %v8632_v52 }
0x2fca   : > { %11266 = vmatmul.mubr.msk.bf16.gmra.mrb[124].mxu0 %vm799_vm3, %v8635_v43 }
0x2fcb   : > { %11285 = vmatprep.mubr.msk.bf16.mxu0 %vm12211_vm1, %v12210_v1 }
0x306a   : > { %v8704_v21 = vpop.f32.mrb[116].mxu0 }
0x306b   : > { %v8705_v10 = vadd.f32 %v9733_v40, %v8704_v21  ;;  %v11259_v61 = vpop.f32.mrb[117].mxu0 }
0x306c   : > { %v8707_v62 = vpop.f32.mrb[118].mxu0 }
0x306d   : > { %v15813_v29 = vadd.f32 %v8705_v10, %v15274_v38  ;;  %v8708_v26 = vadd.f32 %v9733_v40, %v8707_v62  ;;  %v11260_v35 = vpop.f32.mrb[119].mxu0 }
0x306f   : > { %v15816_v32 = vadd.f32 %v8708_v26, %v15277_v54  ;;  %v8733_v63 = vsel %vm799_vm3, %v15813_v29, 0.0 }
0x3070   : > { %8734 = vadd.xlane.f32.xlu1 %v8733_v63  ;;  %v9739_v63 = vld [vmem:[%s16082_s16 + $0x2] sm:$0x3] }
0x3071   : > { %v8736_v0 = vsel %vm799_vm3, %v15816_v32, 0.0 }
0x3072   : > { %8737 = vadd.xlane.f32.xlu0 %v8736_v0  ;;  %v8712_v12 = vpop.f32.mrb[120].mxu0 }
0x3073   : > { %v8713_v8 = vadd.f32 %v9733_v40, %v8712_v12  ;;  %v11263_v59 = vpop.f32.mrb[121].mxu0 }
0x3074   : > { %v8715_v9 = vpop.f32.mrb[122].mxu0  ;;  %v8801_v59 = vrot.slane %v9739_v63, %v12444_v24 }
0x3075   : > { %v15823_v38 = vadd.f32 %v8713_v8, %v15284_v33  ;;  %v8716_v28 = vadd.f32 %v9733_v40, %v8715_v9  ;;  %v11264_v48 = vpop.f32.mrb[123].mxu0 }
0x3077   : > { %v15826_v54 = vadd.f32 %v8716_v28, %v15287_v18  ;;  %v8739_v58 = vsel %vm799_vm3, %v15823_v38, 0.0 }
0x3078   : > { %8740 = vadd.xlane.f32.xlu0 %v8739_v58  ;;  %v8810_v58 = vrot.slane %v9739_v63, %v12427_v57 }
0x3079   : > { %v8742_v7 = vsel %vm799_vm3, %v15826_v54, 0.0 }
0x307a   : > { %8743 = vadd.xlane.f32.xlu1 %v8742_v7 }
0x309d   : > { %v8720_v31 = vpop.f32.mrb[124].mxu0 }
0x309e   : > { %v8721_v3 = vadd.f32 %v9733_v40, %v8720_v31  ;;  %v11267_v53 = vpop.f32.mrb[125].mxu0 }
0x309f   : > { %v8723_v56 = vpop.f32.mrb[126].mxu0 }
0x30a0   : > { %v15833_v33 = vadd.f32 %v8721_v3, %v15294_v25  ;;  %v11268_v41 = vpop.f32.mrb[127].mxu0 }
0x30a2   : > { %v8745_v18 = vsel %vm799_vm3, %v15833_v33, 0.0 }
0x30a3   : > { %8746 = vadd.xlane.f32.xlu0 %v8745_v18 }
0x30fd   : > { %v8735_v27 = vpop.xlane.xlu1 %8734 }
0x30fe   : > { %v8748_v46 = vmul.f32 0.03125, %v8735_v27 }
0x30ff   : > { %v8738_v5 = vpop.xlane.xlu0 %8737 }
0x3100   : > { %v8753_v39 = vsub.f32 %v15813_v29, %v8748_v46  ;;  %v8749_v36 = vmul.f32 0.03125, %v8738_v5 }
0x3102   : > { %v8754_v20 = vsub.f32 %v15816_v32, %v8749_v36  ;;  %v8758_v30 = vmul.f32 %v8753_v39, %v8753_v39 }
0x3104   : > { %v8763_v50 = vsel %vm799_vm3, %v8758_v30, 0.0  ;;  %v8759_v37 = vmul.f32 %v8754_v20, %v8754_v20 }
0x3105   : > { %v8741_v42 = vpop.xlane.xlu0 %8740  ;;  %8764 = vadd.xlane.f32.xlu1 %v8763_v50 }
0x3106   : > { %v8750_v25 = vmul.f32 0.03125, %v8741_v42  ;;  %v8766_v16 = vsel %vm799_vm3, %v8759_v37, 0.0 }
0x3107   : > { %v8744_v14 = vpop.xlane.xlu1 %8743  ;;  %8767 = vadd.xlane.f32.xlu0 %v8766_v16 }
0x3108   : > { %v8755_v60 = vsub.f32 %v15823_v38, %v8750_v25  ;;  %v8751_v49 = vmul.f32 0.03125, %v8744_v14 }
0x310a   : > { %v8756_v2 = vsub.f32 %v15826_v54, %v8751_v49  ;;  %v8760_v4 = vmul.f32 %v8755_v60, %v8755_v60 }
0x310c   : > { %v8769_v17 = vsel %vm799_vm3, %v8760_v4, 0.0  ;;  %v8761_v44 = vmul.f32 %v8756_v2, %v8756_v2  ;;  %v11585_v4 = vld [vmem:[%s15999_s14 + $0x40] sm:$0xff]  }
0x310d   : > { %8770 = vadd.xlane.f32.xlu1 %v8769_v17  ;;  %11270 = vmatpush3.bf16.msra.mxu0 %v11585_v4  ;;  %v11587_v17 = vld [vmem:[%s15999_s14 + $0x50] sm:$0xff]  }
0x310e   : > { %v8772_v15 = vsel %vm799_vm3, %v8761_v44, 0.0  ;;  %11271 = vmatprep.subr.bf16.mxu0 %v12210_v1  ;;  %v11588_v44 = vld [vmem:[%s15999_s14 + $0x58] sm:$0xff]  }
0x310f   : > { %8773 = vadd.xlane.f32.xlu0 %v8772_v15  ;;  %v11589_v15 = vld [vmem:[%s15999_s14 + $0x60] sm:$0xff]  }
0x3130   : > { %v8747_v13 = vpop.xlane.xlu0 %8746 }
0x3131   : > { %v8752_v47 = vmul.f32 0.03125, %v8747_v13  ;;  %v15908_v13 = vrot.slane %v9744_v23, %v12427_v57 }
0x3133   : > { %v8757_v22 = vsub.f32 %v15833_v33, %v8752_v47 }
0x3135   : > { %v8762_v51 = vmul.f32 %v8757_v22, %v8757_v22 }
0x3137   : > { %v8775_v55 = vsel %vm799_vm3, %v8762_v51, 0.0 }
0x3138   : > { %8776 = vadd.xlane.f32.xlu1 %v8775_v55 }
0x3192   : > { %v8765_v52 = vpop.xlane.xlu1 %8764 }
0x3193   : > { %v8778_v43 = vmul.f32 0.03125, %v8765_v52 }
0x3194   : > { %v8768_v40 = vpop.xlane.xlu0 %8767 }
0x3195   : > { %v8783_v21 = vadd.f32 1e-05, %v8778_v43  ;;  %v8779_v10 = vmul.f32 0.03125, %v8768_v40 }
0x3197   : > { %12157 = vrsqrt.f32 %v8783_v21  ;;  %v8784_v61 = vadd.f32 1e-05, %v8779_v10 }
0x3199   : > { %12159 = vrsqrt.f32 %v8784_v61 }
0x319a   : > { %v8771_v62 = vpop.xlane.xlu1 %8770 }
0x319b   : > { %v8780_v26 = vmul.f32 0.03125, %v8771_v62 }
0x319c   : > { %v8774_v35 = vpop.xlane.xlu0 %8773 }
0x319d   : > { %v8785_v0 = vadd.f32 1e-05, %v8780_v26  ;;  %v8781_v12 = vmul.f32 0.03125, %v8774_v35 }
0x319f   : > { %12161 = vrsqrt.f32 %v8785_v0  ;;  %v8786_v8 = vadd.f32 1e-05, %v8781_v12 }
0x31a1   : > { %v12158_v9 = vpop.eup %12157  ;;  %12163 = vrsqrt.f32 %v8786_v8 }
0x31a2   : > { %v8793_v28 = vmul.f32 %v12158_v9, %v8753_v39 }
0x31a3   : > { %v12160_v48 = vpop.eup %12159 }
0x31a4   : > { %v8802_v7 = vmul.f32 %v8801_v59, %v8793_v28  ;;  %v8794_v31 = vmul.f32 %v12160_v48, %v8754_v20 }
0x31a6   : > { %v8803_v3 = vmul.f32 %v8801_v59, %v8794_v31  ;;  %v8811_v53 = vadd.f32 %v8810_v58, %v8802_v7 }
0x31a8   : > { %v8812_v56 = vadd.f32 %v8810_v58, %v8803_v3 }
0x31a9   : > { %v12162_v41 = vpop.eup %12161 }
0x31aa   : > { %v8816_v18 = vpack.c.bf16 %v8812_v56, %v8811_v53  ;;  %v8795_v27 = vmul.f32 %v12162_v41, %v8755_v60 }
0x31ab   : > { %v12164_v46 = vpop.eup %12163 }
0x31ac   : > { %v8804_v5 = vmul.f32 %v8801_v59, %v8795_v27  ;;  %v8796_v36 = vmul.f32 %v12164_v46, %v8756_v2  ;;  %9749 = vmatmul.mubr.msk.bf16.vlgmr.msra.gmra.mrb[124].mxu1 %vm799_vm3, %v8816_v18 }
0x31ad   : > { %8908 = vmatprep.mubr.bf16.mxu1 %v12212_v6 }
0x31ae   : > { %v8805_v30 = vmul.f32 %v8801_v59, %v8796_v36  ;;  %v8813_v39 = vadd.f32 %v8810_v58, %v8804_v5  ;;  %v8830_v36 = vrot.slane %v9744_v23, %v12444_v24 }
0x31b0   : > { %v8814_v50 = vadd.f32 %v8810_v58, %v8805_v30 }
0x31b2   : > { %v8817_v37 = vpack.c.bf16 %v8814_v50, %v8813_v39 }
0x31b4   : > { %9750 = vmatmul.mubr.msk.bf16.gmra.mrb[128].mxu1 %vm799_vm3, %v8817_v37 }
0x31b5   : > { %8918 = vmatprep.mubr.bf16.mxu1 %v12212_v6  ;;  %v11586_v6 = vld [vmem:[%s15999_s14 + $0x48] sm:$0xff]  }
0x31b6   : > { %11272 = vmatpush3.bf16.msra.mxu0 %v11586_v6 }
0x31b7   : > { %11273 = vmatprep.subr.bf16.mxu0 %v12210_v1 }
0x31ba   : > { %11274 = vmatpush3.bf16.msra.mxu0 %v11587_v17  ;;  %v11593_v17 = vld [vmem:[%s16083_s11] sm:$0xff]  }
0x31bb   : > { %11275 = vmatprep.subr.bf16.mxu0 %v12210_v1 }
0x31be   : > { %11276 = vmatpush3.bf16.msra.mxu0 %v11588_v44 }
0x31bf   : > { %11277 = vmatprep.subr.bf16.mxu0 %v12210_v1 }
0x31c2   : > { %11278 = vmatpush3.bf16.msra.mxu0 %v11589_v15 }
0x31c3   : > { %11279 = vmatprep.subr.bf16.mxu0 %v12210_v1 }
0x31c5   : > { %v8777_v20 = vpop.xlane.xlu1 %8776 }
0x31c6   : > { %v8782_v42 = vmul.f32 0.03125, %v8777_v20  ;;  %11280 = vmatpush3.bf16.msra.mxu0 %v11590_v45 }
0x31c7   : > { %11281 = vmatprep.subr.bf16.mxu0 %v12210_v1 }
0x31c8   : > { %v8787_v25 = vadd.f32 1e-05, %v8782_v42 }
0x31ca   : > { %12165 = vrsqrt.f32 %v8787_v25  ;;  %11282 = vmatpush3.bf16.msra.mxu0 %v11591_v34 }
0x31cb   : > { %11283 = vmatprep.subr.bf16.mxu0 %v12210_v1 }
0x31ce   : > { %11284 = vmatpush3.bf16.msra.mxu0 %v11592_v19 }
0x31cf   : > { %11297 = vmatprep.subr.bf16.mxu0 %v12210_v1 }
0x31d4   : > { %v12166_v16 = vpop.eup %12165 }
0x31d5   : > { %v8797_v14 = vmul.f32 %v12166_v16, %v8757_v22 }
0x31d7   : > { %v8806_v60 = vmul.f32 %v8801_v59, %v8797_v14 }
0x31d9   : > { %v8815_v49 = vadd.f32 %v8810_v58, %v8806_v60 }
0x31db   : > { %v8818_v2 = vpack.c.bf16 %v8815_v49, %v8815_v49 }
0x31dd   : > { %9751 = vmatmul.mubr.msk.bf16.gmra.mrb[132].mxu1 %vm799_vm3, %v8818_v2 }
0x31de   : > { %11309 = vmatprep.mubr.msk.bf16.mxu1 %vm12211_vm1, %v12210_v1 }
0x327f   : > { %v8900_v47 = vpop.f32.mrb[124].mxu1 }
0x3280   : > { %v8902_v22 = vpop.f32.mrb[125].mxu1  ;;  %v8901_v20 = vadd.f32 %v8900_v47, %v8830_v36  ;;  %v11594_v47 = vld [vmem:[%s16083_s11 + $0x8] sm:$0xff]  }
0x3281   : > { %v8903_v51 = vadd.f32 %v8902_v22, %v15908_v13  ;;  %v8904_v55 = vpop.f32.mrb[126].mxu1 }
0x3282   : > { %v8906_v52 = vpop.f32.mrb[127].mxu1  ;;  %v8905_v14 = vadd.f32 %v8904_v55, %v8830_v36 }
0x3283   : > { %v8927_v43 = vmul.f32 %v8903_v51, %v8903_v51  ;;  %v8907_v40 = vadd.f32 %v8906_v52, %v15908_v13 }
0x3285   : > { %v8932_v21 = vmul.f32 %v8927_v43, %v8903_v51  ;;  %v8928_v10 = vmul.f32 %v8907_v40, %v8907_v40 }
0x3287   : > { %v8937_v61 = vmul.f32 0.044715, %v8932_v21  ;;  %v8933_v62 = vmul.f32 %v8928_v10, %v8907_v40  ;;  %v8910_v26 = vpop.f32.mrb[128].mxu1 }
0x3288   : > { %v8912_v35 = vpop.f32.mrb[129].mxu1  ;;  %v8911_v34 = vadd.f32 %v8910_v26, %v8830_v36 }
0x3289   : > { %v8942_v63 = vadd.f32 %v8937_v61, %v8903_v51  ;;  %v8938_v0 = vmul.f32 0.044715, %v8933_v62  ;;  %v8913_v57 = vadd.f32 %v8912_v35, %v15908_v13  ;;  %v8914_v12 = vpop.f32.mrb[130].mxu1 }
0x328a   : > { %v8916_v8 = vpop.f32.mrb[131].mxu1 }
0x328b   : > { %v8947_v59 = vmul.f32 0.7978846, %v8942_v63  ;;  %v8943_v9 = vadd.f32 %v8938_v0, %v8907_v40  ;;  %v8929_v28 = vmul.f32 %v8913_v57, %v8913_v57  ;;  %v8917_v48 = vadd.f32 %v8916_v8, %v15908_v13 }
0x328d   : > { %12167 = vtanh.f32 %v8947_v59  ;;  %v8948_v58 = vmul.f32 0.7978846, %v8943_v9  ;;  %v8934_v7 = vmul.f32 %v8929_v28, %v8913_v57  ;;  %v8930_v31 = vmul.f32 %v8917_v48, %v8917_v48 }
0x328f   : > { %12169 = vtanh.f32 %v8948_v58  ;;  %v8939_v3 = vmul.f32 0.044715, %v8934_v7  ;;  %v8935_v53 = vmul.f32 %v8930_v31, %v8917_v48 }
0x3291   : > { %v8944_v56 = vadd.f32 %v8939_v3, %v8913_v57  ;;  %v8940_v41 = vmul.f32 0.044715, %v8935_v53 }
0x3293   : > { %v8949_v18 = vmul.f32 0.7978846, %v8944_v56  ;;  %v8945_v27 = vadd.f32 %v8940_v41, %v8917_v48 }
0x3295   : > { %12171 = vtanh.f32 %v8949_v18  ;;  %v8950_v46 = vmul.f32 0.7978846, %v8945_v27 }
0x3297   : > { %v12168_v5 = vpop.eup %12167  ;;  %12173 = vtanh.f32 %v8950_v46 }
0x3298   : > { %v8957_v30 = vadd.f32 1.0, %v12168_v5 }
0x3299   : > { %v12170_v39 = vpop.eup %12169 }
0x329a   : > { %v8962_v50 = vmul.f32 0.5, %v8957_v30  ;;  %v8958_v37 = vadd.f32 1.0, %v12170_v39 }
0x329c   : > { %v8967_v42 = vmul.f32 %v8962_v50, %v8903_v51  ;;  %v8963_v25 = vmul.f32 0.5, %v8958_v37  ;;  %v8915_v51 = vadd.f32 %v8914_v12, %v8830_v36 }
0x329e   : > { %v8972_v16 = vmul.f32 %v8967_v42, %v8901_v20  ;;  %v8968_v60 = vmul.f32 %v8963_v25, %v8907_v40 }
0x329f   : > { %v12172_v49 = vpop.eup %12171 }
0x32a0   : > { %v8973_v2 = vmul.f32 %v8968_v60, %v8905_v14  ;;  %v8959_v4 = vadd.f32 1.0, %v12172_v49 }
0x32a1   : > { %v12174_v6 = vpop.eup %12173 }
0x32a2   : > { %v8977_v44 = vpack.c.bf16 %v8973_v2, %v8972_v16  ;;  %v8964_v15 = vmul.f32 0.5, %v8959_v4  ;;  %v8960_v45 = vadd.f32 1.0, %v12174_v6 }
0x32a4   : > { %v8969_v19 = vmul.f32 %v8964_v15, %v8913_v57  ;;  %v8965_v23 = vmul.f32 0.5, %v8960_v45  ;;  %11286 = vmatmul.mubr.bf16.vlgmr.msra.gmra.mrb[128].mxu0 %v8977_v44 }
0x32a5   : > { %11289 = vmatprep.mubr.msk.bf16.mxu0 %vm12211_vm1, %v12210_v1  ;;  %11298 = vmatpush3.bf16.msra.mxu0 %v11593_v17 }
0x32a6   : > { %v8974_v22 = vmul.f32 %v8969_v19, %v8911_v34  ;;  %v8970_v55 = vmul.f32 %v8965_v23, %v8917_v48  ;;  %11299 = vmatprep.subr.bf16.mxu0 %v12210_v1 }
0x32a8   : > { %v8975_v52 = vmul.f32 %v8970_v55, %v8915_v51 }
0x32a9   : > { %11300 = vmatpush3.bf16.msra.mxu0 %v11594_v47 }
0x32aa   : > { %v8978_v43 = vpack.c.bf16 %v8975_v52, %v8974_v22 }
0x32ac   : > { %11290 = vmatmul.mubr.bf16.gmra.mrb[132].mxu0 %v8978_v43 }
0x32ad   : > { %11293 = vmatprep.mubr.msk.bf16.mxu0 %vm12211_vm1, %v12210_v1 }
0x32b0   : > { %v8920_v40 = vpop.f32.mrb[132].mxu1 }
0x32b1   : > { %v8922_v21 = vpop.f32.mrb[133].mxu1  ;;  %v8921_v9 = vadd.f32 %v8920_v40, %v8830_v36 }
0x32b2   : > { %v8923_v10 = vadd.f32 %v8922_v21, %v15908_v13  ;;  %v8924_v61 = vpop.f32.mrb[134].mxu1  ;;  %v9769_v13 = vld [vmem:[%s16000_s15 + $0x1] ss:$0 sm:$0xff] }
0x32b3   : > { %v8925_v62 = vpop.f32.mrb[135].mxu1 }
0x32b4   : > { %v8931_v26 = vmul.f32 %v8923_v10, %v8923_v10 }
0x32b6   : > { %v8936_v35 = vmul.f32 %v8931_v26, %v8923_v10 }
0x32b8   : > { %v8941_v63 = vmul.f32 0.044715, %v8936_v35 }
0x32ba   : > { %v8946_v0 = vadd.f32 %v8941_v63, %v8923_v10  ;;  %v9118_v63 = vld [vmem:[%s16084_s24] sm:$0x1] }
0x32bc   : > { %v8951_v57 = vmul.f32 0.7978846, %v8946_v0 }
0x32be   : > { %12175 = vtanh.f32 %v8951_v57 }
0x32c8   : > { %v12176_v12 = vpop.eup %12175 }
0x32c9   : > { %v8961_v8 = vadd.f32 1.0, %v12176_v12 }
0x32cb   : > { %v8966_v59 = vmul.f32 0.5, %v8961_v8  ;;  %v11595_v8 = vld [vmem:[%s16085_s23] sm:$0xff]  }
0x32cc   : > { %11306 = vmatpush3.bf16.msra.mxu1 %v11595_v8 }
0x32cd   : > { %v8971_v28 = vmul.f32 %v8966_v59, %v8923_v10  ;;  %11307 = vmatprep.subr.bf16.mxu1 %v12210_v1  ;;  %v11596_v59 = vld [vmem:[%s16085_s23 + $0x8] sm:$0xff]  }
0x32cf   : > { %v8976_v48 = vmul.f32 %v8971_v28, %v8921_v9 }
0x32d0   : > { %11308 = vmatpush3.bf16.msra.mxu1 %v11596_v59 }
0x32d1   : > { %v8979_v58 = vpack.c.bf16 %v8976_v48, %v8976_v48 }
0x32d3   : > { %11294 = vmatmul.mubr.bf16.gmra.mrb[136].mxu0 %v8979_v58 }
0x32d4   : > { %11301 = vmatprep.mubr.msk.bf16.mxu0 %vm12211_vm1, %v12210_v1 }
0x32db   : > { %11302 = vmatmul.mubr.msk.bf16.vlgmr.msra.gmra.mrb[140].mxu0 %vm799_vm3, %v12373_v11 }
0x3377   : > { %v9087_v7 = vpop.f32.mrb[128].mxu0 }
0x3378   : > { %v9088_v31 = vadd.f32 %v9769_v13, %v9087_v7  ;;  %v11287_v3 = vpop.f32.mrb[129].mxu0 }
0x3379   : > { %v9090_v53 = vpop.f32.mrb[130].mxu0 }
0x337a   : > { %v9109_v56 = vadd.f32 %v9088_v31, %v15813_v29  ;;  %v9091_v41 = vadd.f32 %v9769_v13, %v9090_v53  ;;  %v11288_v18 = vpop.f32.mrb[131].mxu0 }
0x337c   : > { %v9110_v27 = vadd.f32 %v9091_v41, %v15816_v32  ;;  %v9171_v46 = vsel %vm799_vm3, %v9109_v56, 0.0 }
0x337d   : > { %9172 = vadd.xlane.f32.xlu0 %v9171_v46 }
0x337e   : > { %v9174_v5 = vsel %vm799_vm3, %v9110_v27, 0.0 }
0x337f   : > { %9175 = vadd.xlane.f32.xlu1 %v9174_v5  ;;  %v9095_v11 = vpop.f32.mrb[132].mxu0 }
0x3380   : > { %v9096_v36 = vadd.f32 %v9769_v13, %v9095_v11  ;;  %v11291_v30 = vpop.f32.mrb[133].mxu0 }
0x3381   : > { %v9098_v39 = vpop.f32.mrb[134].mxu0 }
0x3382   : > { %v9111_v50 = vadd.f32 %v9096_v36, %v15823_v38  ;;  %v9099_v37 = vadd.f32 %v9769_v13, %v9098_v39  ;;  %v11292_v20 = vpop.f32.mrb[135].mxu0 }
0x3384   : > { %v9112_v29 = vadd.f32 %v9099_v37, %v15826_v54  ;;  %v9177_v42 = vsel %vm799_vm3, %v9111_v50, 0.0 }
0x3385   : > { %9178 = vadd.xlane.f32.xlu0 %v9177_v42 }
0x3386   : > { %v9180_v32 = vsel %vm799_vm3, %v9112_v29, 0.0 }
0x3387   : > { %9181 = vadd.xlane.f32.xlu1 %v9180_v32 }
0x33a6   : > { %v9103_v25 = vpop.f32.mrb[136].mxu0 }
0x33a7   : > { %v9104_v16 = vadd.f32 %v9769_v13, %v9103_v25  ;;  %v11295_v14 = vpop.f32.mrb[137].mxu0 }
0x33a8   : > { %v9106_v60 = vpop.f32.mrb[138].mxu0 }
0x33a9   : > { %v9113_v49 = vadd.f32 %v9104_v16, %v15833_v33  ;;  %v11296_v2 = vpop.f32.mrb[139].mxu0 }
0x33ab   : > { %v9183_v4 = vsel %vm799_vm3, %v9113_v49, 0.0 }
0x33ac   : > { %9184 = vadd.xlane.f32.xlu0 %v9183_v4 }
0x33ae   : > { %v9165_v38 = vpop.f32.mrb[140].mxu0 }
0x33af   : > { %v11303_v6 = vpop.f32.mrb[141].mxu0  ;;  %v9166_v0 = vadd.f32 %v9165_v38, %v9118_v63 }
0x33b0   : > { %v9168_v17 = vpop.f32.mrb[142].mxu0 }
0x33b1   : > { %v11304_v54 = vpop.f32.mrb[143].mxu0  ;;  %v9236_v57 = vadd.f32 1.0, %v9166_v0  ;;  %v9253_v42 = vrot.slane %v9166_v0, %v12444_v24 }
0x33b3   : > { %v9240_v12 = vrot.slane %v9236_v57, %v12444_v24 }
0x340a   : > { %v9173_v44 = vpop.xlane.xlu0 %9172 }
0x340b   : > { %v9186_v15 = vmul.f32 0.03125, %v9173_v44 }
0x340c   : > { %v9176_v45 = vpop.xlane.xlu1 %9175 }
0x340d   : > { %v9191_v34 = vsub.f32 %v9109_v56, %v9186_v15  ;;  %v9187_v19 = vmul.f32 0.03125, %v9176_v45 }
0x340f   : > { %v9192_v23 = vsub.f32 %v9110_v27, %v9187_v19  ;;  %v9196_v47 = vmul.f32 %v9191_v34, %v9191_v34 }
0x3411   : > { %v9201_v22 = vsel %vm799_vm3, %v9196_v47, 0.0  ;;  %v9197_v51 = vmul.f32 %v9192_v23, %v9192_v23 }
0x3412   : > { %v9179_v55 = vpop.xlane.xlu0 %9178  ;;  %9202 = vadd.xlane.f32.xlu1 %v9201_v22 }
0x3413   : > { %v9188_v33 = vmul.f32 0.03125, %v9179_v55  ;;  %v9204_v52 = vsel %vm799_vm3, %v9197_v51, 0.0  ;;  %v9781_v51 = vld [vmem:[%s16087_s25] ss:$0 sm:$0xff] }
0x3414   : > { %v9182_v43 = vpop.xlane.xlu1 %9181  ;;  %9205 = vadd.xlane.f32.xlu0 %v9204_v52 }
0x3415   : > { %v9193_v40 = vsub.f32 %v9111_v50, %v9188_v33  ;;  %v9189_v21 = vmul.f32 0.03125, %v9182_v43 }
0x3417   : > { %v9194_v10 = vsub.f32 %v9112_v29, %v9189_v21  ;;  %v9198_v61 = vmul.f32 %v9193_v40, %v9193_v40 }
0x3419   : > { %v9207_v62 = vsel %vm799_vm3, %v9198_v61, 0.0  ;;  %v9199_v26 = vmul.f32 %v9194_v10, %v9194_v10 }
0x341a   : > { %9208 = vadd.xlane.f32.xlu1 %v9207_v62 }
0x341b   : > { %v9210_v35 = vsel %vm799_vm3, %v9199_v26, 0.0 }
0x341c   : > { %9211 = vadd.xlane.f32.xlu0 %v9210_v35 }
0x3432   : > { %9242 = vrot.lane.b32.xlu0 %v9240_v12, %s16079_s1  ;;  %s16086_s1 = sld [smem:[#allocation3_spill]] }
0x3438   : > { %s16088_s28 = smul.u32 40, %s16086_s1 }
0x3439   : > { %v9185_v9 = vpop.xlane.xlu0 %9184 }
0x343a   : > { %v9190_v28 = vmul.f32 0.03125, %v9185_v9  ;;  %s663_s26 = scalar_lea.vmem %s16089_s3, %s16088_s28 }
0x343c   : > { %v9195_v48 = vsub.f32 %v9113_v49, %v9190_v28 }
0x343e   : > { %v9200_v58 = vmul.f32 %v9195_v48, %v9195_v48 }
0x3440   : > { %v9213_v13 = vsel %vm799_vm3, %v9200_v58, 0.0 }
0x3441   : > { %9214 = vadd.xlane.f32.xlu1 %v9213_v13 }
0x349f   : > { %v9203_v7 = vpop.xlane.xlu1 %9202 }
0x34a0   : > { %v9216_v31 = vmul.f32 0.03125, %v9203_v7 }
0x34a1   : > { %v9206_v3 = vpop.xlane.xlu0 %9205 }
0x34a2   : > { %v9221_v53 = vadd.f32 1e-05, %v9216_v31  ;;  %v9217_v56 = vmul.f32 0.03125, %v9206_v3 }
0x34a4   : > { %12177 = vrsqrt.f32 %v9221_v53  ;;  %v9222_v41 = vadd.f32 1e-05, %v9217_v56 }
0x34a6   : > { %12179 = vrsqrt.f32 %v9222_v41 }
0x34a7   : > { %v9209_v18 = vpop.xlane.xlu1 %9208 }
0x34a8   : > { %v9218_v27 = vmul.f32 0.03125, %v9209_v18 }
0x34a9   : > { %v9212_v46 = vpop.xlane.xlu0 %9211 }
0x34aa   : > { %v9223_v5 = vadd.f32 1e-05, %v9218_v27  ;;  %v9219_v11 = vmul.f32 0.03125, %v9212_v46 }
0x34ac   : > { %12181 = vrsqrt.f32 %v9223_v5  ;;  %v9224_v36 = vadd.f32 1e-05, %v9219_v11 }
0x34ad   : > { %v9243_v39 = vpop.permute.xlu0 %9242 }
0x34ae   : > { %v12178_v30 = vpop.eup %12177  ;;  %12183 = vrsqrt.f32 %v9224_v36 }
0x34af   : > { %v9231_v50 = vmul.f32 %v12178_v30, %v9191_v34 }
0x34b0   : > { %v12180_v37 = vpop.eup %12179 }
0x34b1   : > { %v9232_v20 = vmul.f32 %v12180_v37, %v9192_v23  ;;  %v9245_v29 = vmul.f32 %v9243_v39, %v9231_v50 }
0x34b3   : > { %v9246_v32 = vmul.f32 %v9243_v39, %v9232_v20  ;;  %v9254_v25 = vadd.f32 %v9253_v42, %v9245_v29 }
0x34b5   : > { %v9255_v16 = vadd.f32 %v9253_v42, %v9246_v32 }
0x34b6   : > { %v12182_v14 = vpop.eup %12181 }
0x34b7   : > { %v9233_v60 = vmul.f32 %v12182_v14, %v9193_v40  ;;  %v9259_v49 = vpack.c.bf16 %v9255_v16, %v9254_v25 }
0x34b8   : > { %v12184_v2 = vpop.eup %12183 }
0x34b9   : > { %v9234_v4 = vmul.f32 %v12184_v2, %v9194_v10  ;;  %v9247_v38 = vmul.f32 %v9243_v39, %v9233_v60  ;;  %11310 = vmatmul.mubr.msk.bf16.vlgmr.msra.gmra.mrb[136].mxu1 %vm799_vm3, %v9259_v49 }
0x34ba   : > { %11313 = vmatprep.mubr.msk.bf16.mxu1 %vm12211_vm1, %v12210_v1 }
0x34bb   : > { %v9248_v6 = vmul.f32 %v9243_v39, %v9234_v4  ;;  %v9256_v17 = vadd.f32 %v9253_v42, %v9247_v38 }
0x34bd   : > { %v9257_v54 = vadd.f32 %v9253_v42, %v9248_v6 }
0x34bf   : > { %v9260_v44 = vpack.c.bf16 %v9257_v54, %v9256_v17 }
0x34c1   : > { %11314 = vmatmul.mubr.msk.bf16.gmra.mrb[140].mxu1 %vm799_vm3, %v9260_v44 }
0x34c2   : > { %11317 = vmatprep.mubr.msk.bf16.mxu1 %vm12211_vm1, %v12210_v1 }
0x34ce   : > { %v9215_v24 = vpop.xlane.xlu1 %9214 }
0x34cf   : > { %v9220_v15 = vmul.f32 0.03125, %v9215_v24 }
0x34d1   : > { %v9225_v45 = vadd.f32 1e-05, %v9220_v15 }
0x34d3   : > { %12185 = vrsqrt.f32 %v9225_v45 }
0x34dd   : > { %v12186_v34 = vpop.eup %12185 }
0x34de   : > { %v9235_v19 = vmul.f32 %v12186_v34, %v9195_v48 }
0x34e0   : > { %v9249_v23 = vmul.f32 %v9243_v39, %v9235_v19 }
0x34e2   : > { %v9258_v47 = vadd.f32 %v9253_v42, %v9249_v23 }
0x34e4   : > { %v9261_v22 = vpack.c.bf16 %v9258_v47, %v9258_v47 }
0x34e6   : > { %11318 = vmatmul.mubr.msk.bf16.gmra.mrb[144].mxu1 %vm799_vm3, %v9261_v22 }
0x358c   : > { %v9328_v1 = vpop.f32.mrb[136].mxu1 }
0x358d   : > { %v9329_v55 = vadd.f32 %v9781_v51, %v9328_v1  ;;  %v11311_v33 = vpop.f32.mrb[137].mxu1 }
0x358e   : > { %v9331_v52 = vpop.f32.mrb[138].mxu1 }
0x358f   : > { %9350 = vst.msk [vmem:[%s663_s26] sm:$0xff] %vm681_vm2, %v9329_v55  ;;  %v9332_v43 = vadd.f32 %v9781_v51, %v9331_v52  ;;  %v11312_v40 = vpop.f32.mrb[139].mxu1 }
0x3591   : > { %9351 = vst.msk [vmem:[%s663_s26 + $0x8] sm:$0xff] %vm681_vm2, %v9332_v43 }
0x3594   : > { %v9336_v21 = vpop.f32.mrb[140].mxu1 }
0x3595   : > { %v9337_v10 = vadd.f32 %v9781_v51, %v9336_v21  ;;  %v11315_v61 = vpop.f32.mrb[141].mxu1 }
0x3596   : > { %v9339_v62 = vpop.f32.mrb[142].mxu1 }
0x3597   : > { %9352 = vst.msk [vmem:[%s663_s26 + $0x10] sm:$0xff] %vm681_vm2, %v9337_v10  ;;  %v9340_v26 = vadd.f32 %v9781_v51, %v9339_v62  ;;  %v11316_v35 = vpop.f32.mrb[143].mxu1 }
0x3599   : > { %9353 = vst.msk [vmem:[%s663_s26 + $0x18] sm:$0xff] %vm681_vm2, %v9340_v26 }
0x35b9   : > { %v9344_v63 = vpop.f32.mrb[144].mxu1 }
0x35ba   : > { %v9345_v0 = vadd.f32 %v9781_v51, %v9344_v63  ;;  %v11319_v57 = vpop.f32.mrb[145].mxu1 }
0x35bb   : > { %v9347_v12 = vpop.f32.mrb[146].mxu1 }
0x35bc   : > { %9354 = vst.msk [vmem:[%s663_s26 + $0x20] sm:$0xff] %vm681_vm2, %v9345_v0  ;;  %v11320_v8 = vpop.f32.mrb[147].mxu1 }
0x35bd PF: > { %s16090_s22 = sld [smem:[#allocation2_spill]] }
0x35c3   : > { %s30_s1 = sadd.s32 1, %s16090_s22  }
0x35c4   : > { %p27_p4 = scmp.ge.s32.totalorder %s30_s1, 4  }
0x35c6   :  { %29 = sbr.rel (!%p27_p4) target bundleno = 14 (0xe), region = 160 }

</bundles_post_ra>
